<compile_context>
chip_gen: v5e
topology: v5e:2x2
jax: 0.10.0
libtpu: 0.0.40
codegen_flags: <defaults>
</compile_context>

<pallas_src>
import functools

import jax
import jax.numpy as jnp
from jax import lax
from jax.experimental import pallas as pl
from jax.experimental.pallas import tpu as pltpu


def _hint8(v):
    """Alignment hint (multiple of 8 sublanes) for traced offsets."""
    return v if isinstance(v, int) else pl.multiple_of(v, 8)


def _recon_block_kernel(x_ref, w_ref, b_ref, o_ref, act_ref,
                        *, H, W, Wp, G, C, CH):
    """One (image, layer) grid step.

    x_ref:   (1, H*W, C)     input image, spatially flattened NHWC rows (f32).
    w_ref:   (1, 3, 3*C, C)  this layer's weights, rows ordered (dx, Cin), bf16.
    b_ref:   (1, 1, C)       this layer's bias (f32).
    o_ref:   (1, H*W, C)     output image (written on the last layer only).
    act_ref: (2, rows, C)    VMEM ping-pong activation, padded flat layout, f32.
    """
    layer = pl.program_id(1)
    n_layers = pl.num_programs(1)

    src_slot = layer % 2
    dst_slot = 1 - src_slot
    src = act_ref.at[src_slot]
    dst = act_ref.at[dst_slot]

    n_rows = H * Wp                       # interior (image-row) region
    pad_w = Wp - W                        # pad columns per row (multiple of 8)
    head = G + Wp                         # guard rows + one padding image row
    total_rows = (H + 2) * Wp + 2 * G

    # --- layer 0 of this image: place the image into slot 0 -----------------
    # Guard rows and top/bottom padding rows are zeroed here (never written
    # afterwards).  Interior pad columns are zeroed for the fresh copy below
    # and re-zeroed after every layer's store, so every src slab the conv
    # reads has a zero padding ring.
    @pl.when(layer == 0)
    def _init():
        for slot in range(2):
            act_ref[slot, 0:head, :] = jnp.zeros((head, C), jnp.float32)
            act_ref[slot, total_rows - head:total_rows, :] = (
                jnp.zeros((head, C), jnp.float32))

        def copy_row(y, carry):
            s_off = _hint8(y * W)
            d_off = _hint8(head + y * Wp)
            act_ref[0, pl.ds(d_off, W), :] = x_ref[0, pl.ds(s_off, W), :]
            act_ref[0, pl.ds(_hint8(d_off + W), pad_w), :] = (
                jnp.zeros((pad_w, C), jnp.float32))
            return carry

        lax.fori_loop(0, H, copy_row, 0)

    bias = b_ref[0]                       # (1, C); sublane broadcast is cheap

    # --- 3x3 conv over the padded slab --------------------------------------
    # Per M-chunk (ch rows): 3 matmuls (one per dy tap) of (ch, 3C) x (3C, C);
    # the dx taps are folded into K via a lane concat of three sublane-shifted
    # views of one ALIGNED haloed f32 load, cast to bf16 for the MXU; the
    # accumulate stays f32.
    def conv_chunk(base, ch):
        base = _hint8(base)
        acc = None
        for dy in range(3):
            start = _hint8(G + Wp + base + (dy - 1) * Wp - 8)
            blk = src[pl.ds(start, ch + 16), :]             # aligned haloed load
            op3 = jnp.concatenate(
                [blk[7:7 + ch].astype(jnp.bfloat16),        # dx = -1
                 blk[8:8 + ch].astype(jnp.bfloat16),        # dx =  0
                 blk[9:9 + ch].astype(jnp.bfloat16)],       # dx = +1
                axis=-1)
            part = jnp.dot(op3, w_ref[0, dy],
                           preferred_element_type=jnp.float32)
            acc = part if acc is None else acc + part
        dst[pl.ds(_hint8(head + base), ch), :] = (acc + bias).astype(
            act_ref.dtype)

    n_full = n_rows // CH
    rem = n_rows - n_full * CH
    if n_full > 0:
        def chunk_body(i, carry):
            conv_chunk(i * CH, CH)
            return carry
        lax.fori_loop(0, n_full, chunk_body, 0)
    if rem > 0:
        conv_chunk(n_full * CH, rem)

    # Re-zero the pad columns of dst so the next layer's +/-1 dx taps (and the
    # next image's layer-0 read of this slot) see a zero padding ring.
    def zero_pad_cols(y, carry):
        off = _hint8(head + y * Wp + W)
        dst[pl.ds(off, pad_w), :] = jnp.zeros((pad_w, C), jnp.float32)
        return carry

    lax.fori_loop(0, H, zero_pad_cols, 0)

    # --- last layer: residual add with the block input, emit the output -----
    @pl.when(layer == n_layers - 1)
    def _finalize():
        def out_row(y, carry):
            s_off = _hint8(head + y * Wp)
            d_off = _hint8(y * W)
            row = dst[pl.ds(s_off, W), :]
            o_ref[0, pl.ds(d_off, W), :] = (
                row + x_ref[0, pl.ds(d_off, W), :]).astype(o_ref.dtype)
            return carry

        lax.fori_loop(0, H, out_row, 0)


def recon_block_forward(x_nchw, weights, biases):
    """ReconBlock.forward.

    x_nchw:  (N, C, H, W)  PyTorch layout at the boundary.
    weights: list of (3, 3, C, C) HWIO arrays.
    biases:  list of (C,) arrays.
    """
    x = jnp.transpose(x_nchw, (0, 2, 3, 1)).astype(jnp.float32)   # NHWC
    N, H, W, C = x.shape
    L = len(weights)
    assert L >= 1
    assert C % 128 == 0, "n_filters must be a multiple of 128 (lane width)"
    assert W % 8 == 0, "W must be a multiple of 8 (sublane alignment)"

    Wp = ((W + 2 + 7) // 8) * 8          # padded row pitch (multiple of 8)
    G = 8                                # zero guard rows above/below
    rows = (H + 2) * Wp + 2 * G
    n_rows = H * Wp
    CH = min(256, n_rows)                # M rows per matmul (tunable)

    # Stack parameters once: (L, 3, 3, C, C) -> (L, 3, 3C, C), rows dx-major to
    # match the in-kernel lane concat order.  Weights go to bf16 (MXU operand);
    # bias stays f32.
    w3 = jnp.stack(weights).astype(jnp.bfloat16).reshape(L, 3, 3 * C, C)
    b3 = jnp.stack(biases).astype(jnp.float32).reshape(L, 1, C)

    x_flat = x.reshape(N, H * W, C)

    # Size the scoped VMEM to the buffers we actually use (+ spill headroom).
    scratch_bytes = 2 * rows * C * 4
    io_bytes = 2 * 2 * (H * W * C * 4)               # x & out, double-buffered
    par_bytes = 2 * (3 * 3 * C * C * 2 + C * 4)      # weights (bf16) + bias
    vmem_limit = int(min(scratch_bytes + io_bytes + par_bytes + (8 << 20),
                         64 << 20))

    kernel = functools.partial(_recon_block_kernel,
                               H=H, W=W, Wp=Wp, G=G, C=C, CH=CH)
    out_flat = pl.pallas_call(
        kernel,
        out_shape=jax.ShapeDtypeStruct((N, H * W, C), jnp.float32),
        grid_spec=pltpu.PrefetchScalarGridSpec(
            num_scalar_prefetch=0,
            grid=(N, L),
            in_specs=[
                pl.BlockSpec((1, H * W, C), lambda n, l: (n, 0, 0)),
                pl.BlockSpec((1, 3, 3 * C, C), lambda n, l: (l, 0, 0, 0)),
                pl.BlockSpec((1, 1, C), lambda n, l: (l, 0, 0)),
            ],
            out_specs=pl.BlockSpec((1, H * W, C), lambda n, l: (n, 0, 0)),
            scratch_shapes=[pltpu.VMEM((2, rows, C), jnp.float32)],
        ),
        compiler_params=pltpu.CompilerParams(
            dimension_semantics=("parallel", "arbitrary"),
            vmem_limit_bytes=vmem_limit),
    )(x_flat, w3, b3)

    out = out_flat.reshape(N, H, W, C)
    return jnp.transpose(out, (0, 3, 1, 2)).astype(x_nchw.dtype)


def _make_params(key, n_convs, n_filters):
    """Deterministic synthetic parameters (shapes follow nn.Conv2d(C, C, 3))."""
    weights, biases = [], []
    for _ in range(n_convs):
        kw, kb, key = jax.random.split(key, 3)
        w = jax.random.normal(kw, (3, 3, n_filters, n_filters),
                              dtype=jnp.float32) * 0.02
        b = jax.random.normal(kb, (n_filters,), dtype=jnp.float32) * 0.01
        weights.append(w)
        biases.append(b)
    return weights, biases


def _reference_forward(x_nchw, weights, biases, matmul_dtype=jnp.float32):
    """Pure-JAX reference (lax conv).  matmul_dtype=bfloat16 mirrors the
    kernel's mixed precision (bf16 MXU operands, f32 accumulate/bias/residual)."""
    x = jnp.transpose(x_nchw, (0, 2, 3, 1)).astype(jnp.float32)
    out = x
    for w, b in zip(weights, biases):
        out = lax.conv_general_dilated(
            out.astype(matmul_dtype), w.astype(matmul_dtype),
            window_strides=(1, 1), padding="SAME",
            dimension_numbers=("NHWC", "HWIO", "NHWC"),
            preferred_element_type=jnp.float32) + b
    out = out + x
    return jnp.transpose(out, (0, 3, 1, 2))


if __name__ == "__main__":
    # Small shapes consistent with the module: ReconBlock(n_convs=3, n_filters=128)
    N_CONVS = 3
    N_FILTERS = 128   # channel dim sits on the 128-lane axis
    N, H, W = 2, 16, 16

    key = jax.random.PRNGKey(0)
    kx, kp = jax.random.split(key)
    x = jax.random.normal(kx, (N, N_FILTERS, H, W), dtype=jnp.float32)  # NCHW
    weights, biases = _make_params(kp, N_CONVS, N_FILTERS)

    fwd = jax.jit(recon_block_forward)
    out = jax.block_until_ready(fwd(x, weights, biases))
    assert out.shape == x.shape and out.dtype == x.dtype

    # Tight check against a reference using the same mixed precision
    # (bf16 matmul operands, f32 accumulation / bias / residual).
    ref_bf16 = _reference_forward(x, weights, biases, jnp.bfloat16)
    err_bf16 = float(jnp.max(jnp.abs(out - ref_bf16)))
    assert jnp.allclose(out, ref_bf16, atol=1e-2, rtol=1e-2), (
        "mismatch vs bf16-operand reference, max abs err = %e" % err_bf16)

    # Loose sanity check against full-f32 module semantics (difference is the
    # bf16 rounding of the matmul operands only).
    ref_f32 = _reference_forward(x, weights, biases, jnp.float32)
    err_f32 = float(jnp.max(jnp.abs(out - ref_f32)))
    assert jnp.allclose(out, ref_f32, atol=5e-2, rtol=5e-2), (
        "mismatch vs f32 reference, max abs err = %e" % err_f32)

    print("KERNEL_OK")
</pallas_src>

<mosaic_0001>
module attributes {stable_mosaic.version = 11 : i64} {
  func.func @_recon_block_kernel(%arg0: i32, %arg1: i32, %arg2: memref<1x256x128xf32, #tpu.memory_space<vmem>>, %arg3: memref<1x3x384x128xbf16, #tpu.memory_space<vmem>>, %arg4: memref<1x1x128xf32, #tpu.memory_space<vmem>>, %arg5: memref<1x256x128xf32, #tpu.memory_space<vmem>>, %arg6: memref<2x448x128xf32, #tpu.memory_space<vmem>>) attributes {dimension_semantics = [#tpu.dimension_semantics<parallel>, #tpu.dimension_semantics<arbitrary>], iteration_bounds = array<i64: 2, 3>, scalar_prefetch = 0 : i64, scratch_operands = 1 : i64, tpu.core_type = #tpu.core_type<tc>, window_params = [{transform_indices = @transform_0, window_bounds = array<i64: 1, 256, 128>}, {transform_indices = @transform_1, window_bounds = array<i64: 1, 3, 384, 128>}, {transform_indices = @transform_2, window_bounds = array<i64: 1, 1, 128>}, {transform_indices = @transform_3, window_bounds = array<i64: 1, 256, 128>}]} {
    %c2_i32 = arith.constant 2 : i32
    %c0_i32 = arith.constant 0 : i32
    %0 = arith.cmpi eq, %c2_i32, %c0_i32 : i32
    %c1_i32 = arith.constant 1 : i32
    %1 = arith.select %0, %c1_i32, %c2_i32 : i32
    %2 = arith.remsi %arg1, %1 : i32
    %c0_i32_0 = arith.constant 0 : i32
    %3 = arith.cmpi ne, %2, %c0_i32_0 : i32
    %c0_i32_1 = arith.constant 0 : i32
    %4 = arith.cmpi slt, %2, %c0_i32_1 : i32
    %c0_i32_2 = arith.constant 0 : i32
    %5 = arith.cmpi slt, %1, %c0_i32_2 : i32
    %6 = arith.xori %4, %5 : i1
    %7 = arith.andi %6, %3 : i1
    %8 = arith.addi %2, %1 : i32
    %9 = arith.select %7, %8, %2 : i32
    %c1_i32_3 = arith.constant 1 : i32
    %10 = arith.subi %c1_i32_3, %9 : i32
    %c0_i32_4 = arith.constant 0 : i32
    %11 = arith.cmpi eq, %arg1, %c0_i32_4 : i32
    %12 = arith.extui %11 : i1 to i32
    %c0_i32_5 = arith.constant 0 : i32
    %13 = arith.cmpi ne, %12, %c0_i32_5 : i32
    scf.if %13 {
      %cst_72 = arith.constant 0.000000e+00 : f32
      %132 = vector.broadcast %cst_72 : f32 to vector<32x128xf32>
      %c0_73 = arith.constant 0 : index
      %c0_74 = arith.constant 0 : index
      %c0_75 = arith.constant 0 : index
      %133 = vector.load %arg6[%c0_73, %c0_74, %c0_75] : memref<2x448x128xf32, #tpu.memory_space<vmem>>, vector<1x32x128xf32>
      %134 = vector.shape_cast %133 : vector<1x32x128xf32> to vector<32x128xf32>
      %135 = vector.shape_cast %132 : vector<32x128xf32> to vector<1x32x128xf32>
      tpu.vector_store %arg6[%c0_73, %c0_74, %c0_75], %135 {strides = array<i32>} : memref<2x448x128xf32, #tpu.memory_space<vmem>>, vector<1x32x128xf32>,
      %cst_76 = arith.constant 0.000000e+00 : f32
      %136 = vector.broadcast %cst_76 : f32 to vector<32x128xf32>
      %c0_77 = arith.constant 0 : index
      %c416 = arith.constant 416 : index
      %c0_78 = arith.constant 0 : index
      %137 = vector.load %arg6[%c0_77, %c416, %c0_78] : memref<2x448x128xf32, #tpu.memory_space<vmem>>, vector<1x32x128xf32>
      %138 = vector.shape_cast %137 : vector<1x32x128xf32> to vector<32x128xf32>
      %139 = vector.shape_cast %136 : vector<32x128xf32> to vector<1x32x128xf32>
      tpu.vector_store %arg6[%c0_77, %c416, %c0_78], %139 {strides = array<i32>} : memref<2x448x128xf32, #tpu.memory_space<vmem>>, vector<1x32x128xf32>,
      %cst_79 = arith.constant 0.000000e+00 : f32
      %140 = vector.broadcast %cst_79 : f32 to vector<32x128xf32>
      %c1_80 = arith.constant 1 : index
      %c0_81 = arith.constant 0 : index
      %c0_82 = arith.constant 0 : index
      %141 = vector.load %arg6[%c1_80, %c0_81, %c0_82] : memref<2x448x128xf32, #tpu.memory_space<vmem>>, vector<1x32x128xf32>
      %142 = vector.shape_cast %141 : vector<1x32x128xf32> to vector<32x128xf32>
      %143 = vector.shape_cast %140 : vector<32x128xf32> to vector<1x32x128xf32>
      tpu.vector_store %arg6[%c1_80, %c0_81, %c0_82], %143 {strides = array<i32>} : memref<2x448x128xf32, #tpu.memory_space<vmem>>, vector<1x32x128xf32>,
      %cst_83 = arith.constant 0.000000e+00 : f32
      %144 = vector.broadcast %cst_83 : f32 to vector<32x128xf32>
      %c1_84 = arith.constant 1 : index
      %c416_85 = arith.constant 416 : index
      %c0_86 = arith.constant 0 : index
      %145 = vector.load %arg6[%c1_84, %c416_85, %c0_86] : memref<2x448x128xf32, #tpu.memory_space<vmem>>, vector<1x32x128xf32>
      %146 = vector.shape_cast %145 : vector<1x32x128xf32> to vector<32x128xf32>
      %147 = vector.shape_cast %144 : vector<32x128xf32> to vector<1x32x128xf32>
      tpu.vector_store %arg6[%c1_84, %c416_85, %c0_86], %147 {strides = array<i32>} : memref<2x448x128xf32, #tpu.memory_space<vmem>>, vector<1x32x128xf32>,
      %c0_i32_87 = arith.constant 0 : i32
      %c16_i32_88 = arith.constant 16 : i32
      %148 = arith.addi %c0_i32_87, %c16_i32_88 : i32
      %c1_i32_89 = arith.constant 1 : i32
      scf.for %arg7 = %c0_i32_87 to %148 step %c1_i32_89  : i32 {
        %c16_i32_91 = arith.constant 16 : i32
        %149 = arith.muli %arg7, %c16_i32_91 : i32
        %150 = tpu.assume_multiple %149, 8 : i32
        %c24_i32_92 = arith.constant 24 : i32
        %151 = arith.muli %arg7, %c24_i32_92 : i32
        %c32_i32_93 = arith.constant 32 : i32
        %152 = arith.addi %c32_i32_93, %151 : i32
        %153 = tpu.assume_multiple %152, 8 : i32
        %c0_94 = arith.constant 0 : index
        %154 = arith.index_cast %150 : i32 to index
        %c0_95 = arith.constant 0 : index
        %155 = vector.load %arg2[%c0_94, %154, %c0_95] : memref<1x256x128xf32, #tpu.memory_space<vmem>>, vector<1x16x128xf32>
        %156 = vector.shape_cast %155 : vector<1x16x128xf32> to vector<16x128xf32>
        %c0_96 = arith.constant 0 : index
        %157 = arith.index_cast %153 : i32 to index
        %c0_97 = arith.constant 0 : index
        %158 = vector.load %arg6[%c0_96, %157, %c0_97] : memref<2x448x128xf32, #tpu.memory_space<vmem>>, vector<1x16x128xf32>
        %159 = vector.shape_cast %158 : vector<1x16x128xf32> to vector<16x128xf32>
        %160 = vector.shape_cast %156 : vector<16x128xf32> to vector<1x16x128xf32>
        tpu.vector_store %arg6[%c0_96, %157, %c0_97], %160 {strides = array<i32>} : memref<2x448x128xf32, #tpu.memory_space<vmem>>, vector<1x16x128xf32>,
        %cst_98 = arith.constant 0.000000e+00 : f32
        %161 = vector.broadcast %cst_98 : f32 to vector<8x128xf32>
        %c16_i32_99 = arith.constant 16 : i32
        %162 = arith.addi %153, %c16_i32_99 : i32
        %163 = tpu.assume_multiple %162, 8 : i32
        %c0_100 = arith.constant 0 : index
        %164 = arith.index_cast %163 : i32 to index
        %c0_101 = arith.constant 0 : index
        %165 = vector.load %arg6[%c0_100, %164, %c0_101] : memref<2x448x128xf32, #tpu.memory_space<vmem>>, vector<1x8x128xf32>
        %166 = vector.shape_cast %165 : vector<1x8x128xf32> to vector<8x128xf32>
        %167 = vector.shape_cast %161 : vector<8x128xf32> to vector<1x8x128xf32>
        tpu.vector_store %arg6[%c0_100, %164, %c0_101], %167 {strides = array<i32>} : memref<2x448x128xf32, #tpu.memory_space<vmem>>, vector<1x8x128xf32>,
      }
      %c16_i32_90 = arith.constant 16 : i32
    } else {
    }
    %c0 = arith.constant 0 : index
    %c0_6 = arith.constant 0 : index
    %c0_7 = arith.constant 0 : index
    %14 = vector.load %arg4[%c0, %c0_6, %c0_7] : memref<1x1x128xf32, #tpu.memory_space<vmem>>, vector<1x1x128xf32>
    %15 = vector.shape_cast %14 : vector<1x1x128xf32> to vector<1x128xf32>
    %c0_i32_8 = arith.constant 0 : i32
    %c256_i32 = arith.constant 256 : i32
    %16 = arith.muli %c0_i32_8, %c256_i32 : i32
    %17 = tpu.assume_multiple %16, 8 : i32
    %c32_i32 = arith.constant 32 : i32
    %18 = arith.addi %c32_i32, %17 : i32
    %c-24_i32 = arith.constant -24 : i32
    %19 = arith.addi %18, %c-24_i32 : i32
    %c8_i32 = arith.constant 8 : i32
    %20 = arith.subi %19, %c8_i32 : i32
    %21 = tpu.assume_multiple %20, 8 : i32
    %c0_i32_9 = arith.constant 0 : i32
    %c0_i32_10 = arith.constant 0 : i32
    %22 = tpu.memref_slice %arg6[%9, %c0_i32_9, %c0_i32_10] : memref<2x448x128xf32, #tpu.memory_space<vmem>> -> memref<1x448x128xf32, #tpu.memory_space<vmem>>
    %23 = tpu.memref_squeeze %22 : memref<1x448x128xf32, #tpu.memory_space<vmem>> -> memref<448x128xf32, #tpu.memory_space<vmem>>
    %24 = arith.index_cast %21 : i32 to index
    %c0_11 = arith.constant 0 : index
    %25 = vector.load %23[%24, %c0_11] : memref<448x128xf32, #tpu.memory_space<vmem>>, vector<272x128xf32>
    %26 = vector.extract_strided_slice %25 {offsets = [7, 0], sizes = [256, 128], strides = [1, 1]} : vector<272x128xf32> to vector<256x128xf32>
    %27 = arith.truncf %26 : vector<256x128xf32> to vector<256x128xbf16>
    %28 = vector.extract_strided_slice %25 {offsets = [8, 0], sizes = [256, 128], strides = [1, 1]} : vector<272x128xf32> to vector<256x128xf32>
    %29 = arith.truncf %28 : vector<256x128xf32> to vector<256x128xbf16>
    %30 = vector.extract_strided_slice %25 {offsets = [9, 0], sizes = [256, 128], strides = [1, 1]} : vector<272x128xf32> to vector<256x128xf32>
    %31 = arith.truncf %30 : vector<256x128xf32> to vector<256x128xbf16>
    %32 = tpu.concatenate %27, %29, %31 in 1 : vector<256x128xbf16>, vector<256x128xbf16>, vector<256x128xbf16> -> vector<256x384xbf16>
    %c0_12 = arith.constant 0 : index
    %c0_13 = arith.constant 0 : index
    %c0_14 = arith.constant 0 : index
    %c0_15 = arith.constant 0 : index
    %33 = vector.load %arg3[%c0_12, %c0_13, %c0_14, %c0_15] : memref<1x3x384x128xbf16, #tpu.memory_space<vmem>>, vector<1x1x384x128xbf16>
    %34 = vector.shape_cast %33 : vector<1x1x384x128xbf16> to vector<384x128xbf16>
    %cst = arith.constant dense<0.000000e+00> : vector<256x128xf32>
    %35 = tpu.matmul %32, %34, %cst {dimension_numbers = #tpu.dot_dimension_numbers<[1], [0], [0], [1], [0, 0, 1, 1], [], []>} : vector<256x384xbf16>, vector<384x128xbf16>, vector<256x128xf32> -> vector<256x128xf32>
    %c32_i32_16 = arith.constant 32 : i32
    %36 = arith.addi %c32_i32_16, %17 : i32
    %c0_i32_17 = arith.constant 0 : i32
    %37 = arith.addi %36, %c0_i32_17 : i32
    %c8_i32_18 = arith.constant 8 : i32
    %38 = arith.subi %37, %c8_i32_18 : i32
    %39 = tpu.assume_multiple %38, 8 : i32
    %c0_i32_19 = arith.constant 0 : i32
    %c0_i32_20 = arith.constant 0 : i32
    %40 = tpu.memref_slice %arg6[%9, %c0_i32_19, %c0_i32_20] : memref<2x448x128xf32, #tpu.memory_space<vmem>> -> memref<1x448x128xf32, #tpu.memory_space<vmem>>
    %41 = tpu.memref_squeeze %40 : memref<1x448x128xf32, #tpu.memory_space<vmem>> -> memref<448x128xf32, #tpu.memory_space<vmem>>
    %42 = arith.index_cast %39 : i32 to index
    %c0_21 = arith.constant 0 : index
    %43 = vector.load %41[%42, %c0_21] : memref<448x128xf32, #tpu.memory_space<vmem>>, vector<272x128xf32>
    %44 = vector.extract_strided_slice %43 {offsets = [7, 0], sizes = [256, 128], strides = [1, 1]} : vector<272x128xf32> to vector<256x128xf32>
    %45 = arith.truncf %44 : vector<256x128xf32> to vector<256x128xbf16>
    %46 = vector.extract_strided_slice %43 {offsets = [8, 0], sizes = [256, 128], strides = [1, 1]} : vector<272x128xf32> to vector<256x128xf32>
    %47 = arith.truncf %46 : vector<256x128xf32> to vector<256x128xbf16>
    %48 = vector.extract_strided_slice %43 {offsets = [9, 0], sizes = [256, 128], strides = [1, 1]} : vector<272x128xf32> to vector<256x128xf32>
    %49 = arith.truncf %48 : vector<256x128xf32> to vector<256x128xbf16>
    %50 = tpu.concatenate %45, %47, %49 in 1 : vector<256x128xbf16>, vector<256x128xbf16>, vector<256x128xbf16> -> vector<256x384xbf16>
    %c0_22 = arith.constant 0 : index
    %c1 = arith.constant 1 : index
    %c0_23 = arith.constant 0 : index
    %c0_24 = arith.constant 0 : index
    %51 = vector.load %arg3[%c0_22, %c1, %c0_23, %c0_24] : memref<1x3x384x128xbf16, #tpu.memory_space<vmem>>, vector<1x1x384x128xbf16>
    %52 = vector.shape_cast %51 : vector<1x1x384x128xbf16> to vector<384x128xbf16>
    %cst_25 = arith.constant dense<0.000000e+00> : vector<256x128xf32>
    %53 = tpu.matmul %50, %52, %cst_25 {dimension_numbers = #tpu.dot_dimension_numbers<[1], [0], [0], [1], [0, 0, 1, 1], [], []>} : vector<256x384xbf16>, vector<384x128xbf16>, vector<256x128xf32> -> vector<256x128xf32>
    %54 = arith.addf %35, %53 : vector<256x128xf32>
    %c32_i32_26 = arith.constant 32 : i32
    %55 = arith.addi %c32_i32_26, %17 : i32
    %c24_i32 = arith.constant 24 : i32
    %56 = arith.addi %55, %c24_i32 : i32
    %c8_i32_27 = arith.constant 8 : i32
    %57 = arith.subi %56, %c8_i32_27 : i32
    %58 = tpu.assume_multiple %57, 8 : i32
    %c0_i32_28 = arith.constant 0 : i32
    %c0_i32_29 = arith.constant 0 : i32
    %59 = tpu.memref_slice %arg6[%9, %c0_i32_28, %c0_i32_29] : memref<2x448x128xf32, #tpu.memory_space<vmem>> -> memref<1x448x128xf32, #tpu.memory_space<vmem>>
    %60 = tpu.memref_squeeze %59 : memref<1x448x128xf32, #tpu.memory_space<vmem>> -> memref<448x128xf32, #tpu.memory_space<vmem>>
    %61 = arith.index_cast %58 : i32 to index
    %c0_30 = arith.constant 0 : index
    %62 = vector.load %60[%61, %c0_30] : memref<448x128xf32, #tpu.memory_space<vmem>>, vector<272x128xf32>
    %63 = vector.extract_strided_slice %62 {offsets = [7, 0], sizes = [256, 128], strides = [1, 1]} : vector<272x128xf32> to vector<256x128xf32>
    %64 = arith.truncf %63 : vector<256x128xf32> to vector<256x128xbf16>
    %65 = vector.extract_strided_slice %62 {offsets = [8, 0], sizes = [256, 128], strides = [1, 1]} : vector<272x128xf32> to vector<256x128xf32>
    %66 = arith.truncf %65 : vector<256x128xf32> to vector<256x128xbf16>
    %67 = vector.extract_strided_slice %62 {offsets = [9, 0], sizes = [256, 128], strides = [1, 1]} : vector<272x128xf32> to vector<256x128xf32>
    %68 = arith.truncf %67 : vector<256x128xf32> to vector<256x128xbf16>
    %69 = tpu.concatenate %64, %66, %68 in 1 : vector<256x128xbf16>, vector<256x128xbf16>, vector<256x128xbf16> -> vector<256x384xbf16>
    %c0_31 = arith.constant 0 : index
    %c2 = arith.constant 2 : index
    %c0_32 = arith.constant 0 : index
    %c0_33 = arith.constant 0 : index
    %70 = vector.load %arg3[%c0_31, %c2, %c0_32, %c0_33] : memref<1x3x384x128xbf16, #tpu.memory_space<vmem>>, vector<1x1x384x128xbf16>
    %71 = vector.shape_cast %70 : vector<1x1x384x128xbf16> to vector<384x128xbf16>
    %cst_34 = arith.constant dense<0.000000e+00> : vector<256x128xf32>
    %72 = tpu.matmul %69, %71, %cst_34 {dimension_numbers = #tpu.dot_dimension_numbers<[1], [0], [0], [1], [0, 0, 1, 1], [], []>} : vector<256x384xbf16>, vector<384x128xbf16>, vector<256x128xf32> -> vector<256x128xf32>
    %73 = arith.addf %54, %72 : vector<256x128xf32>
    %74 = vector.broadcast %15 : vector<1x128xf32> to vector<256x128xf32>
    %75 = arith.addf %73, %74 : vector<256x128xf32>
    %c32_i32_35 = arith.constant 32 : i32
    %76 = arith.addi %c32_i32_35, %17 : i32
    %77 = tpu.assume_multiple %76, 8 : i32
    %c0_i32_36 = arith.constant 0 : i32
    %c0_i32_37 = arith.constant 0 : i32
    %78 = tpu.memref_slice %arg6[%10, %c0_i32_36, %c0_i32_37] : memref<2x448x128xf32, #tpu.memory_space<vmem>> -> memref<1x448x128xf32, #tpu.memory_space<vmem>>
    %79 = tpu.memref_squeeze %78 : memref<1x448x128xf32, #tpu.memory_space<vmem>> -> memref<448x128xf32, #tpu.memory_space<vmem>>
    %80 = arith.index_cast %77 : i32 to index
    %c0_38 = arith.constant 0 : index
    %81 = vector.load %79[%80, %c0_38] : memref<448x128xf32, #tpu.memory_space<vmem>>, vector<256x128xf32>
    tpu.vector_store %79[%80, %c0_38], %75 {strides = array<i32>} : memref<448x128xf32, #tpu.memory_space<vmem>>, vector<256x128xf32>,
    %c1_i32_39 = arith.constant 1 : i32
    %c0_i32_40 = arith.constant 0 : i32
    %c0_i32_41 = arith.constant 0 : i32
    %82 = tpu.memref_slice %arg6[%9, %c0_i32_40, %c0_i32_41] : memref<2x448x128xf32, #tpu.memory_space<vmem>> -> memref<1x448x128xf32, #tpu.memory_space<vmem>>
    %83 = tpu.memref_squeeze %82 : memref<1x448x128xf32, #tpu.memory_space<vmem>> -> memref<448x128xf32, #tpu.memory_space<vmem>>
    %c256 = arith.constant 256 : index
    %c0_42 = arith.constant 0 : index
    %84 = vector.load %83[%c256, %c0_42] : memref<448x128xf32, #tpu.memory_space<vmem>>, vector<144x128xf32>
    %85 = vector.extract_strided_slice %84 {offsets = [7, 0], sizes = [128, 128], strides = [1, 1]} : vector<144x128xf32> to vector<128x128xf32>
    %86 = arith.truncf %85 : vector<128x128xf32> to vector<128x128xbf16>
    %87 = vector.extract_strided_slice %84 {offsets = [8, 0], sizes = [128, 128], strides = [1, 1]} : vector<144x128xf32> to vector<128x128xf32>
    %88 = arith.truncf %87 : vector<128x128xf32> to vector<128x128xbf16>
    %89 = vector.extract_strided_slice %84 {offsets = [9, 0], sizes = [128, 128], strides = [1, 1]} : vector<144x128xf32> to vector<128x128xf32>
    %90 = arith.truncf %89 : vector<128x128xf32> to vector<128x128xbf16>
    %91 = tpu.concatenate %86, %88, %90 in 1 : vector<128x128xbf16>, vector<128x128xbf16>, vector<128x128xbf16> -> vector<128x384xbf16>
    %c0_43 = arith.constant 0 : index
    %c0_44 = arith.constant 0 : index
    %c0_45 = arith.constant 0 : index
    %c0_46 = arith.constant 0 : index
    %92 = vector.load %arg3[%c0_43, %c0_44, %c0_45, %c0_46] : memref<1x3x384x128xbf16, #tpu.memory_space<vmem>>, vector<1x1x384x128xbf16>
    %93 = vector.shape_cast %92 : vector<1x1x384x128xbf16> to vector<384x128xbf16>
    %cst_47 = arith.constant dense<0.000000e+00> : vector<128x128xf32>
    %94 = tpu.matmul %91, %93, %cst_47 {dimension_numbers = #tpu.dot_dimension_numbers<[1], [0], [0], [1], [0, 0, 1, 1], [], []>} : vector<128x384xbf16>, vector<384x128xbf16>, vector<128x128xf32> -> vector<128x128xf32>
    %c0_i32_48 = arith.constant 0 : i32
    %c0_i32_49 = arith.constant 0 : i32
    %95 = tpu.memref_slice %arg6[%9, %c0_i32_48, %c0_i32_49] : memref<2x448x128xf32, #tpu.memory_space<vmem>> -> memref<1x448x128xf32, #tpu.memory_space<vmem>>
    %96 = tpu.memref_squeeze %95 : memref<1x448x128xf32, #tpu.memory_space<vmem>> -> memref<448x128xf32, #tpu.memory_space<vmem>>
    %c280 = arith.constant 280 : index
    %c0_50 = arith.constant 0 : index
    %97 = vector.load %96[%c280, %c0_50] : memref<448x128xf32, #tpu.memory_space<vmem>>, vector<144x128xf32>
    %98 = vector.extract_strided_slice %97 {offsets = [7, 0], sizes = [128, 128], strides = [1, 1]} : vector<144x128xf32> to vector<128x128xf32>
    %99 = arith.truncf %98 : vector<128x128xf32> to vector<128x128xbf16>
    %100 = vector.extract_strided_slice %97 {offsets = [8, 0], sizes = [128, 128], strides = [1, 1]} : vector<144x128xf32> to vector<128x128xf32>
    %101 = arith.truncf %100 : vector<128x128xf32> to vector<128x128xbf16>
    %102 = vector.extract_strided_slice %97 {offsets = [9, 0], sizes = [128, 128], strides = [1, 1]} : vector<144x128xf32> to vector<128x128xf32>
    %103 = arith.truncf %102 : vector<128x128xf32> to vector<128x128xbf16>
    %104 = tpu.concatenate %99, %101, %103 in 1 : vector<128x128xbf16>, vector<128x128xbf16>, vector<128x128xbf16> -> vector<128x384xbf16>
    %c0_51 = arith.constant 0 : index
    %c1_52 = arith.constant 1 : index
    %c0_53 = arith.constant 0 : index
    %c0_54 = arith.constant 0 : index
    %105 = vector.load %arg3[%c0_51, %c1_52, %c0_53, %c0_54] : memref<1x3x384x128xbf16, #tpu.memory_space<vmem>>, vector<1x1x384x128xbf16>
    %106 = vector.shape_cast %105 : vector<1x1x384x128xbf16> to vector<384x128xbf16>
    %cst_55 = arith.constant dense<0.000000e+00> : vector<128x128xf32>
    %107 = tpu.matmul %104, %106, %cst_55 {dimension_numbers = #tpu.dot_dimension_numbers<[1], [0], [0], [1], [0, 0, 1, 1], [], []>} : vector<128x384xbf16>, vector<384x128xbf16>, vector<128x128xf32> -> vector<128x128xf32>
    %108 = arith.addf %94, %107 : vector<128x128xf32>
    %c0_i32_56 = arith.constant 0 : i32
    %c0_i32_57 = arith.constant 0 : i32
    %109 = tpu.memref_slice %arg6[%9, %c0_i32_56, %c0_i32_57] : memref<2x448x128xf32, #tpu.memory_space<vmem>> -> memref<1x448x128xf32, #tpu.memory_space<vmem>>
    %110 = tpu.memref_squeeze %109 : memref<1x448x128xf32, #tpu.memory_space<vmem>> -> memref<448x128xf32, #tpu.memory_space<vmem>>
    %c304 = arith.constant 304 : index
    %c0_58 = arith.constant 0 : index
    %111 = vector.load %110[%c304, %c0_58] : memref<448x128xf32, #tpu.memory_space<vmem>>, vector<144x128xf32>
    %112 = vector.extract_strided_slice %111 {offsets = [7, 0], sizes = [128, 128], strides = [1, 1]} : vector<144x128xf32> to vector<128x128xf32>
    %113 = arith.truncf %112 : vector<128x128xf32> to vector<128x128xbf16>
    %114 = vector.extract_strided_slice %111 {offsets = [8, 0], sizes = [128, 128], strides = [1, 1]} : vector<144x128xf32> to vector<128x128xf32>
    %115 = arith.truncf %114 : vector<128x128xf32> to vector<128x128xbf16>
    %116 = vector.extract_strided_slice %111 {offsets = [9, 0], sizes = [128, 128], strides = [1, 1]} : vector<144x128xf32> to vector<128x128xf32>
    %117 = arith.truncf %116 : vector<128x128xf32> to vector<128x128xbf16>
    %118 = tpu.concatenate %113, %115, %117 in 1 : vector<128x128xbf16>, vector<128x128xbf16>, vector<128x128xbf16> -> vector<128x384xbf16>
    %c0_59 = arith.constant 0 : index
    %c2_60 = arith.constant 2 : index
    %c0_61 = arith.constant 0 : index
    %c0_62 = arith.constant 0 : index
    %119 = vector.load %arg3[%c0_59, %c2_60, %c0_61, %c0_62] : memref<1x3x384x128xbf16, #tpu.memory_space<vmem>>, vector<1x1x384x128xbf16>
    %120 = vector.shape_cast %119 : vector<1x1x384x128xbf16> to vector<384x128xbf16>
    %cst_63 = arith.constant dense<0.000000e+00> : vector<128x128xf32>
    %121 = tpu.matmul %118, %120, %cst_63 {dimension_numbers = #tpu.dot_dimension_numbers<[1], [0], [0], [1], [0, 0, 1, 1], [], []>} : vector<128x384xbf16>, vector<384x128xbf16>, vector<128x128xf32> -> vector<128x128xf32>
    %122 = arith.addf %108, %121 : vector<128x128xf32>
    %123 = vector.broadcast %15 : vector<1x128xf32> to vector<128x128xf32>
    %124 = arith.addf %122, %123 : vector<128x128xf32>
    %c0_i32_64 = arith.constant 0 : i32
    %c0_i32_65 = arith.constant 0 : i32
    %125 = tpu.memref_slice %arg6[%10, %c0_i32_64, %c0_i32_65] : memref<2x448x128xf32, #tpu.memory_space<vmem>> -> memref<1x448x128xf32, #tpu.memory_space<vmem>>
    %126 = tpu.memref_squeeze %125 : memref<1x448x128xf32, #tpu.memory_space<vmem>> -> memref<448x128xf32, #tpu.memory_space<vmem>>
    %c288 = arith.constant 288 : index
    %c0_66 = arith.constant 0 : index
    %127 = vector.load %126[%c288, %c0_66] : memref<448x128xf32, #tpu.memory_space<vmem>>, vector<128x128xf32>
    tpu.vector_store %126[%c288, %c0_66], %124 {strides = array<i32>} : memref<448x128xf32, #tpu.memory_space<vmem>>, vector<128x128xf32>,
    %c0_i32_67 = arith.constant 0 : i32
    %c16_i32 = arith.constant 16 : i32
    %128 = arith.addi %c0_i32_67, %c16_i32 : i32
    %c1_i32_68 = arith.constant 1 : i32
    scf.for %arg7 = %c0_i32_67 to %128 step %c1_i32_68  : i32 {
      %c24_i32_72 = arith.constant 24 : i32
      %132 = arith.muli %arg7, %c24_i32_72 : i32
      %c32_i32_73 = arith.constant 32 : i32
      %133 = arith.addi %c32_i32_73, %132 : i32
      %c16_i32_74 = arith.constant 16 : i32
      %134 = arith.addi %133, %c16_i32_74 : i32
      %135 = tpu.assume_multiple %134, 8 : i32
      %cst_75 = arith.constant 0.000000e+00 : f32
      %136 = vector.broadcast %cst_75 : f32 to vector<8x128xf32>
      %c0_i32_76 = arith.constant 0 : i32
      %c0_i32_77 = arith.constant 0 : i32
      %137 = tpu.memref_slice %arg6[%10, %c0_i32_76, %c0_i32_77] : memref<2x448x128xf32, #tpu.memory_space<vmem>> -> memref<1x448x128xf32, #tpu.memory_space<vmem>>
      %138 = tpu.memref_squeeze %137 : memref<1x448x128xf32, #tpu.memory_space<vmem>> -> memref<448x128xf32, #tpu.memory_space<vmem>>
      %139 = arith.index_cast %135 : i32 to index
      %c0_78 = arith.constant 0 : index
      %140 = vector.load %138[%139, %c0_78] : memref<448x128xf32, #tpu.memory_space<vmem>>, vector<8x128xf32>
      tpu.vector_store %138[%139, %c0_78], %136 {strides = array<i32>} : memref<448x128xf32, #tpu.memory_space<vmem>>, vector<8x128xf32>,
    }
    %c16_i32_69 = arith.constant 16 : i32
    %c2_i32_70 = arith.constant 2 : i32
    %129 = arith.cmpi eq, %arg1, %c2_i32_70 : i32
    %130 = arith.extui %129 : i1 to i32
    %c0_i32_71 = arith.constant 0 : i32
    %131 = arith.cmpi ne, %130, %c0_i32_71 : i32
    scf.if %131 {
      %c0_i32_72 = arith.constant 0 : i32
      %c16_i32_73 = arith.constant 16 : i32
      %132 = arith.addi %c0_i32_72, %c16_i32_73 : i32
      %c1_i32_74 = arith.constant 1 : i32
      scf.for %arg7 = %c0_i32_72 to %132 step %c1_i32_74  : i32 {
        %c24_i32_76 = arith.constant 24 : i32
        %133 = arith.muli %arg7, %c24_i32_76 : i32
        %c32_i32_77 = arith.constant 32 : i32
        %134 = arith.addi %c32_i32_77, %133 : i32
        %135 = tpu.assume_multiple %134, 8 : i32
        %c16_i32_78 = arith.constant 16 : i32
        %136 = arith.muli %arg7, %c16_i32_78 : i32
        %137 = tpu.assume_multiple %136, 8 : i32
        %c0_i32_79 = arith.constant 0 : i32
        %c0_i32_80 = arith.constant 0 : i32
        %138 = tpu.memref_slice %arg6[%10, %c0_i32_79, %c0_i32_80] : memref<2x448x128xf32, #tpu.memory_space<vmem>> -> memref<1x448x128xf32, #tpu.memory_space<vmem>>
        %139 = tpu.memref_squeeze %138 : memref<1x448x128xf32, #tpu.memory_space<vmem>> -> memref<448x128xf32, #tpu.memory_space<vmem>>
        %140 = arith.index_cast %135 : i32 to index
        %c0_81 = arith.constant 0 : index
        %141 = vector.load %139[%140, %c0_81] : memref<448x128xf32, #tpu.memory_space<vmem>>, vector<16x128xf32>
        %c0_82 = arith.constant 0 : index
        %142 = arith.index_cast %137 : i32 to index
        %c0_83 = arith.constant 0 : index
        %143 = vector.load %arg2[%c0_82, %142, %c0_83] : memref<1x256x128xf32, #tpu.memory_space<vmem>>, vector<1x16x128xf32>
        %144 = vector.shape_cast %143 : vector<1x16x128xf32> to vector<16x128xf32>
        %145 = arith.addf %141, %144 : vector<16x128xf32>
        %c0_84 = arith.constant 0 : index
        %146 = arith.index_cast %137 : i32 to index
        %c0_85 = arith.constant 0 : index
        %147 = vector.load %arg5[%c0_84, %146, %c0_85] : memref<1x256x128xf32, #tpu.memory_space<vmem>>, vector<1x16x128xf32>
        %148 = vector.shape_cast %147 : vector<1x16x128xf32> to vector<16x128xf32>
        %149 = vector.shape_cast %145 : vector<16x128xf32> to vector<1x16x128xf32>
        tpu.vector_store %arg5[%c0_84, %146, %c0_85], %149 {strides = array<i32>} : memref<1x256x128xf32, #tpu.memory_space<vmem>>, vector<1x16x128xf32>,
      }
      %c16_i32_75 = arith.constant 16 : i32
    } else {
    }
    return
  }
  func.func @transform_0(%arg0: i32, %arg1: i32) -> (i32, i32, i32) {
    %c0_i32 = arith.constant 0 : i32
    %c0_i32_0 = arith.constant 0 : i32
    %c0_i32_1 = arith.constant 0 : i32
    return %arg0, %c0_i32, %c0_i32_0 : i32, i32, i32
  }
  func.func @transform_1(%arg0: i32, %arg1: i32) -> (i32, i32, i32, i32) {
    %c0_i32 = arith.constant 0 : i32
    %c0_i32_0 = arith.constant 0 : i32
    %c0_i32_1 = arith.constant 0 : i32
    %c0_i32_2 = arith.constant 0 : i32
    return %arg1, %c0_i32, %c0_i32_0, %c0_i32_1 : i32, i32, i32, i32
  }
  func.func @transform_2(%arg0: i32, %arg1: i32) -> (i32, i32, i32) {
    %c0_i32 = arith.constant 0 : i32
    %c0_i32_0 = arith.constant 0 : i32
    %c0_i32_1 = arith.constant 0 : i32
    return %arg1, %c0_i32, %c0_i32_0 : i32, i32, i32
  }
  func.func @transform_3(%arg0: i32, %arg1: i32) -> (i32, i32, i32) {
    %c0_i32 = arith.constant 0 : i32
    %c0_i32_0 = arith.constant 0 : i32
    %c0_i32_1 = arith.constant 0 : i32
    return %arg0, %c0_i32, %c0_i32_0 : i32, i32, i32
  }
}

</mosaic_0001>

<bundles_post_ra>
// kernel: recon_block_forward.1
= control target key start
LH: loop header
LB: loop body
LE: loop exit
PB: predicated region body
PF: predicated region fallthrough
CT: control target
= control target key end

     0   :  { %8 = vsyncpa [#allocation4], 0  ;;  %s11032_s0 = inlined_call_operand.vmem [shape: f32[2,256,128], index: 0, kind: input, shape index: {}]   ;;  %s11033_s1 = inlined_call_operand.vmem [shape: bf16[3,3,384,128], index: 1, kind: input, shape index: {}]   ;;  %s11034_s2 = inlined_call_operand.vmem [shape: f32[3,1,128], index: 2, kind: input, shape index: {}]   ;;  %s11035_s3 = inlined_call_operand.hbm [shape: f32[2,256,128], index: 3, kind: output, shape index: {}]  }
   0x1   :  { %10 = vsyncpa [#allocation4 + $0x1], 0  ;;  %s8060_s12 = smov 0   ;;  %s8062_s13 = smov 0  }
   0x2   :  { %s8064_s14 = smov 0   ;;  %s8066_s15 = smov 0  }
   0x3   :  { %s8068_s16 = smov 0   ;;  %s8070_s17 = smov 0  }
   0x4   :  { %s8072_s18 = smov 0   ;;  %s8074_s19 = smov 0  }
   0x5 LB: > { %11067 = sst [smem:[#allocation6_spill]] %s8013_s17  ;;  %s6746_s20 = sadd.s32 4294967295, %s8021_s19   ;;  %s8021_s19 = sphi %s8074_s19, %s16_s19   ;;  %s8017_s18 = sphi %s8072_s18, %s11172_s18   ;;  %s8013_s17 = sphi %s8070_s17, %s11171_s17   ;;  %s8009_s16 = sphi %s8068_s16, %s11170_s16   ;;  %s8005_s15 = sphi %s8066_s15, %s11169_s15   ;;  %s8001_s14 = sphi %s8064_s14, %s11175_s14   ;;  %s7997_s13 = sphi %s8062_s13, %s11174_s13   ;;  %s7993_s12 = sphi %s8060_s12, %s11173_s12  }
   0x6   : > { %11068 = sst [smem:[#allocation7_spill]] %s8017_s18  ;;  %s6747_s21 = sadd.s32 4294967294, %s8021_s19  }
   0x7   : > { %s25_s22 = sadd.s32 1, %s8013_s17  ;;  %s28_s23 = sadd.s32 1, %s8017_s18 }
   0x8   : > { %p26_p0 = scmp.ge.s32.totalorder %s25_s22, 3  ;;  %p123_p1 = scmp.ne.s32.totalorder %s8001_s14, %s7997_s13 }
   0x9   : > { %p124_p2 = scmp.eq.s32.totalorder %s6746_s20, 5  ;;  %p129_p4 = scmp.ne.s32.totalorder %s7997_s13, %s7993_s12 }
   0xa   : > { %s11177_s22 = smov (%p26_p0, %s25_s22), 0  ;;  %s11179_s23 = smov (!%p26_p0, %s28_s23), %s8017_s18 }
   0xb   : > { %11069 = sst [smem:[#allocation8_spill]] %s11177_s22  ;;  %p8109_p3 = por %p124_p2, %p123_p1 }
   0xc   : > { %p30_p5 = scmp.ge.s32.totalorder %s11179_s23, 2  ;;  %p130_p6 = scmp.eq.s32.totalorder %s6747_s21, 5 }
   0xd   : > { %p6750_p7 = scmp.ge.s32.totalorder %s8021_s19, 1  ;;  %p170_p8 = scmp.lt.s32.totalorder %s8021_s19, 7 }
   0xe   : > { %s11181_s23 = smov (%p30_p5, %s11179_s23), 0  ;;  %p8119_p9 = por %p130_p6, %p129_p4 }
   0xf   : > { %11071 = sst [smem:[#allocation9_spill]] %s11181_s23  ;;  %p171_p10 = pnand %p6750_p7, %p170_p8 }
  0x10   : > { %s110_s26 = ssub.s32 %s8017_s18, %s11181_s23  ;;  %s113_s27 = sadd.s32 1, %s8001_s14 }
  0x11   : > { %p111_p11 = scmp.eq.s32.totalorder %s110_s26, 0  ;;  %174 = sbr.rel (%p171_p10) target bundleno = 1529 (0x5f9), region = 32 }
  0x13   : > { %s8127_s28 = scalar_select %p111_p11, %s8001_s14, %s113_s27  }
  0x16   : > { %s11036_s29 = sand.u32 1, %s7997_s13   ;;  %p202_p12 = scmp.lt.s32.totalorder %s8009_s16, 1 }
  0x17   : > { %s8133_s30 = sshll.u32 %s11036_s29, 8  ;;  %p207_p13 = scmp.lt.s32.totalorder %s8005_s15, 2 }
  0x18   : > { %p215_p0 = scmp.lt.s32.totalorder %s8005_s15, 0  ;;  %s216_s7 = ssub.s32 0, %s8005_s15 }
  0x19   : > { %s203_s4 = scalar_select %p202_p12, %s8009_s16, 1 }
  0x1a   : > { %s208_s5 = scalar_select %p207_p13, %s8005_s15, 2 }
  0x1b   : > { %s7641_s6 = sshll.u32 %s203_s4, 8  ;;  %s6755_s27 = smin.u32 %s8005_s15, %s216_s7 }
  0x1c   : > { %s8143_s10 = scalar_lea.vmem %s11032_s0, %s7641_s6  ;;  %s7811_s11 = smul.u32 576, %s208_s5 }
  0x1d   : > { %s8148_s26 = scalar_lea.vmem %s11034_s2, %s208_s5  ;;  %s218_s18 = sand.u32 1, %s6755_s27  }
  0x1e   : > { %s8154_s22 = scalar_lea.vmem %s11033_s1, %s7811_s11  ;;  %s219_s4 = ssub.s32 0, %s218_s18 }
  0x1f   : > { %s11183_s4 = smov (!%p215_p0, %s219_s4), %s218_s18  ;;  %s201_s8 = scalar_lea.vmem [#allocation3], %s8133_s30 }
  0x20   : > { %p6757_p1 = scmp.lt.s32.totalorder %s11183_s4, 0  ;;  %s225_s17 = sadd.s32 2, %s11183_s4 }
  0x21   : > { %p6758_p2 = scmp.ne.s32.totalorder %s8005_s15, 0 }
  0x22   : > { %s11185_s17 = smov (!%p6757_p1, %s225_s17), %s11183_s4  ;;  %s8023_s18 = smov (!%p6758_p2), 0  }
  0x23   : > { %s227_s6 = ssub.s32 1, %s11185_s17  ;;  %231 = sbr.rel (%p6758_p2) target bundleno = 66 (0x42), region = 36 }
  0x28   : > { %v8035_v0 = vmov 0.0  }
  0x29   : > { %232 = vst [vmem:[#allocation2] sm:$0xff] %v8035_v0 }
  0x2a   : > { %233 = vst [vmem:[#allocation2 + $0x8] sm:$0xff] %v8035_v0 }
  0x2b   : > { %234 = vst [vmem:[#allocation2 + $0x10] sm:$0xff] %v8035_v0 }
  0x2c   : > { %235 = vst [vmem:[#allocation2 + $0x18] sm:$0xff] %v8035_v0 }
  0x2d   : > { %236 = vst [vmem:[#allocation2 + $0x1a0] sm:$0xff] %v8035_v0 }
  0x2e   : > { %237 = vst [vmem:[#allocation2 + $0x1a8] sm:$0xff] %v8035_v0 }
  0x2f   : > { %238 = vst [vmem:[#allocation2 + $0x1b0] sm:$0xff] %v8035_v0 }
  0x30   : > { %239 = vst [vmem:[#allocation2 + $0x1b8] sm:$0xff] %v8035_v0 }
  0x31   : > { %241 = vst [vmem:[#allocation2 + $0x1c0] sm:$0xff] %v8035_v0 }
  0x32   : > { %242 = vst [vmem:[#allocation2 + $0x1c8] sm:$0xff] %v8035_v0 }
  0x33   : > { %243 = vst [vmem:[#allocation2 + $0x1d0] sm:$0xff] %v8035_v0 }
  0x34   : > { %244 = vst [vmem:[#allocation2 + $0x1d8] sm:$0xff] %v8035_v0 }
  0x35   : > { %245 = vst [vmem:[#allocation2 + $0x360] sm:$0xff] %v8035_v0 }
  0x36   : > { %246 = vst [vmem:[#allocation2 + $0x368] sm:$0xff] %v8035_v0 }
  0x37   : > { %247 = vst [vmem:[#allocation2 + $0x370] sm:$0xff] %v8035_v0 }
  0x38   : > { %248 = vst [vmem:[#allocation2 + $0x378] sm:$0xff] %v8035_v0 }
  0x39 LB: >> { %s6759_s23 = sshll.u32 %s8025_s18, 4  ;;  %s6656_s29 = smul.u32 24, %s8025_s18  ;;  %v8036_v3 = vmov 0.0   ;;  %s8025_s18 = sphi %s8023_s18, %s254_s18  }
  0x3a   : >> { %s258_s5 = scalar_lea.vmem %s8143_s10, %s6759_s23  ;;  %s254_s18 = sadd.s32 1, %s8025_s18  }
  0x3b   : >> { %v259_v1 = vld [vmem:[%s258_s5] sm:$0xff]  ;;  %v260_v2 = vld [vmem:[%s258_s5 + $0x8] sm:$0xff]  ;;  %s6657_s7 = scalar_lea.vmem [#allocation2], %s6656_s29  ;;  %p251_p4 = scmp.ge.s32.totalorder %s254_s18, 16  }
  0x3c   : >> { %6760 = vst [vmem:[%s6657_s7 + $0x20] sm:$0xff] %v259_v1 }
  0x3d   : >> { %6761 = vst [vmem:[%s6657_s7 + $0x28] sm:$0xff] %v260_v2  ;;  %253 = sbr.rel (!%p251_p4) target bundleno = 57 (0x39), region = 117 }
  0x3e   : >> { %6762 = vst [vmem:[%s6657_s7 + $0x30] sm:$0xff] %v8036_v3 }
  0x42 PF: > { %v7673_v4 = vld [vmem:[%s8154_s22 + $0xf8] sm:$0xff]  ;;  %s268_s9 = smul.u32 448, %s11185_s17  ;;  %v7672_v7 = vld [vmem:[%s8154_s22 + $0xf0] sm:$0xff]  ;;  %v7671_v10 = vld [vmem:[%s8154_s22 + $0xe8] sm:$0xff]  ;;  %vm1063_vm0 = vsmask.f32 4352 }
  0x43   : > { %v8164_v5 = vld [vmem:[%s8154_s22 + $0x138] sm:$0xff]  ;;  %1712 = vmatpush.bf16.msra.mxu0 %v7673_v4  ;;  %7787 = vmatpush.bf16.msra.mxu3 %v7673_v4  ;;  %v8174_v8 = vld [vmem:[%s8154_s22 + $0x130] sm:$0xff]  ;;  %v8183_v11 = vld [vmem:[%s8154_s22 + $0x128] sm:$0xff]  ;;  %vm584_vm1 = vcmask 1042432   ;;  %vm437_vm2 = vsmask.f32 3328 }
  0x44   : > { %v8167_v6 = vld [vmem:[%s8154_s22 + $0x178] sm:$0xff]  ;;  %1801 = vmatpush.bf16.msra.mxu1 %v8164_v5  ;;  %v8177_v9 = vld [vmem:[%s8154_s22 + $0x170] sm:$0xff]  ;;  %v8186_v12 = vld [vmem:[%s8154_s22 + $0x168] sm:$0xff]  ;;  %s8189_s11 = scalar_lea.vmem [#allocation2], %s268_s9  ;;  %s4274_s20 = smul.u32 448, %s227_s6 }
  0x45   : > { %1890 = vmatpush.bf16.msra.mxu2 %v8167_v6  ;;  %v7670_v13 = vld [vmem:[%s8154_s22 + $0xe0] sm:$0xff]  ;;  %v6763_v14 = vld [vmem:[%s8189_s11 + $0x18] sm:$0xff]  ;;  %v6765_v16 = vld [vmem:[%s8189_s11 + $0x28] sm:$0xff] }
  0x46   : > { %v6764_v15 = vld [vmem:[%s8189_s11 + $0x20] sm:$0xff]  ;;  %v6766_v17 = vld [vmem:[%s8189_s11 + $0x30] sm:$0xff]  ;;  %v6767_v18 = vld [vmem:[%s8189_s11 + $0x38] sm:$0xff]  ;;  %v702_v19 = vpack.c.bf16 %v6763_v14, %v6763_v14  ;;  %v704_v21 = vpack.c.bf16 %v6765_v16, %v6765_v16  ;;  %s9813_s17 = scalar_lea.vmem [#allocation2], %s4274_s20 }
  0x47   : > { %1713 = vmatpush.bf16.msra.mxu0 %v7672_v7  ;;  %7788 = vmatpush.bf16.msra.mxu3 %v7672_v7  ;;  %v703_v20 = vpack.c.bf16 %v6764_v15, %v6764_v15  ;;  %v6790_v22 = vld [vmem:[%s8189_s11 + $0xf0] sm:$0xff]  ;;  %v705_v23 = vpack.c.bf16 %v6766_v17, %v6766_v17  ;;  %v706_v24 = vpack.c.bf16 %v6767_v18, %v6767_v18  ;;  %v6791_v25 = vld [vmem:[%s8189_s11 + $0xf8] sm:$0xff]  ;;  %v6792_v26 = vld [vmem:[%s8189_s11 + $0x100] sm:$0xff] }
  0x48   : > { %1802 = vmatpush.bf16.msra.mxu1 %v8174_v8  ;;  %v6793_v27 = vld [vmem:[%s8189_s11 + $0x108] sm:$0xff]  ;;  %v8203_v28 = vld [vmem:[%s8154_s22 + $0x120] sm:$0xff]  ;;  %v8208_v30 = vunpack.c.l.b16 %v702_v19  ;;  %v771_v32 = vunpack.c.l.b16 %v704_v21  ;;  %v6794_v33 = vld [vmem:[%s8189_s11 + $0x110] sm:$0xff]  ;;  %v730_v34 = vpack.c.bf16 %v6791_v25, %v6791_v25  ;;  %v729_v36 = vpack.c.bf16 %v6790_v22, %v6790_v22 }
  0x49   : > { %1891 = vmatpush.bf16.msra.mxu2 %v8177_v9  ;;  %v8206_v29 = vld [vmem:[%s8154_s22 + $0x160] sm:$0xff]  ;;  %v770_v31 = vunpack.c.l.b16 %v703_v20  ;;  %v772_v35 = vunpack.c.l.b16 %v705_v23  ;;  %v731_v37 = vpack.c.bf16 %v6792_v26, %v6792_v26  ;;  %v732_v38 = vpack.c.bf16 %v6793_v27, %v6793_v27  ;;  %v7669_v42 = vld [vmem:[%s8154_s22 + $0xd8] sm:$0xff]  ;;  %v7668_v61 = vld [vmem:[%s8154_s22 + $0xd0] sm:$0xff] }
  0x4a   : > { %v8211_v39 = vunpack.c.l.b16 %v706_v24  ;;  %v733_v41 = vpack.c.bf16 %v6794_v33, %v6794_v33  ;;  %v8215_v45 = vunpack.c.l.b16 %v730_v34  ;;  %v8222_v47 = vld [vmem:[%s8154_s22 + $0x118] sm:$0xff]  ;;  %v8231_v55 = vunpack.c.l.b16 %v729_v36  ;;  %v8244_v2 = vld [vmem:[%s8154_s22 + $0x110] sm:$0xff]  ;;  %v6768_v22 = vld [vmem:[%s8189_s11 + $0x40] sm:$0xff] }
  0x4b   : > { %1714 = vmatpush.bf16.msra.mxu0 %v7671_v10  ;;  %7789 = vmatpush.bf16.msra.mxu3 %v7671_v10  ;;  %v802_v40 = vpack.c.b16 %v770_v31, %v8208_v30  ;;  %v803_v43 = vpack.c.b16 %v772_v35, %v771_v32  ;;  %v819_v44 = vpack.c.b16 %v771_v32, %v770_v31  ;;  %v8217_v46 = vunpack.c.l.b16 %v731_v37  ;;  %v8225_v48 = vld [vmem:[%s8154_s22 + $0x158] sm:$0xff]  ;;  %v8247_v3 = vld [vmem:[%s8154_s22 + $0x150] sm:$0xff]  ;;  %v6769_v23 = vld [vmem:[%s8189_s11 + $0x48] sm:$0xff] }
  0x4c   : > { %1803 = vmatpush.bf16.msra.mxu1 %v8183_v11  ;;  %v8227_v51 = vunpack.c.l.b16 %v732_v38  ;;  %v8229_v52 = vunpack.c.l.b16 %v733_v41  ;;  %v8236_v57 = vpack.c.b16 %v8211_v39, %v772_v35  ;;  %v7667_v24 = vld [vmem:[%s8154_s22 + $0xc8] sm:$0xff]  ;;  %v707_v41 = vpack.c.bf16 %v6768_v22, %v6768_v22 }
  0x4d   : > { %1892 = vmatpush.bf16.msra.mxu2 %v8186_v12  ;;  %v1065_v49 = vshrl.u32 %v802_v40, 16  ;;  %v1068_v50 = vshll.u32 %v802_v40, 16  ;;  %v1073_v53 = vshrl.u32 %v803_v43, 16  ;;  %v1076_v54 = vshll.u32 %v803_v43, 16  ;;  %v8265_v32 = vld [vmem:[%s8154_s22 + $0x108] sm:$0xff] }
  0x4e   : > { %v816_v56 = vpack.c.b16 %v8217_v46, %v8215_v45  ;;  %v817_v60 = vpack.c.b16 %v8229_v52, %v8227_v51  ;;  %v839_v17 = vshll.u32 %v819_v44, 16  ;;  %v844_v21 = vshrl.u32 %v8236_v57, 16  ;;  %v8268_v33 = vld [vmem:[%s8154_s22 + $0x148] sm:$0xff] }
  0x4f   : > { %1715 = vmatpush.bf16.msra.mxu0 %v7670_v13  ;;  %7790 = vmatpush.bf16.msra.mxu3 %v7670_v13  ;;  %v1067_v58 = vrot.slane %v1065_v49, 3  ;;  %v1070_v59 = vrot.slane %v1068_v50, 4  ;;  %v1075_v62 = vrot.slane %v1073_v53, 3  ;;  %v1078_v63 = vrot.slane %v1076_v54, 4 }
  0x50   : > { %1804 = vmatpush.bf16.msra.mxu1 %v8203_v28  ;;  %v1440_v0 = vshrl.u32 %v816_v56, 16  ;;  %v1443_v1 = vshll.u32 %v816_v56, 16  ;;  %v1467_v7 = vshrl.u32 %v817_v60, 16  ;;  %v1470_v10 = vshll.u32 %v817_v60, 16  ;;  %v8285_v60 = vld [vmem:[%s8154_s22 + $0x100] sm:$0xff] }
  0x51   : > { %1893 = vmatpush.bf16.msra.mxu2 %v8206_v29  ;;  %v1071_v4 = vor.u32 %v1070_v59, %v1067_v58  ;;  %v836_v13 = vshrl.u32 %v819_v44, 16  ;;  %v8249_v14 = vor.u32 %v1078_v63, %v1075_v62  ;;  %v841_v27 = vrot.slane %v839_v17, 5  ;;  %v6770_v17 = vld [vmem:[%s8189_s11 + $0x50] sm:$0xff] }
  0x52   : > { %v1442_v15 = vrot.slane %v1440_v0, 3  ;;  %v1445_v16 = vrot.slane %v1443_v1, 4  ;;  %v1469_v18 = vrot.slane %v1467_v7, 3  ;;  %v1472_v19 = vrot.slane %v1470_v10, 4 }
  0x53   : > { %1716 = vmatpush.bf16.msra.mxu0 %v7669_v42  ;;  %7791 = vmatpush.bf16.msra.mxu3 %v7669_v42  ;;  %v838_v20 = vrot.slane %v836_v13, 4  ;;  %v8257_v25 = vsel %vm1063_vm0, %v1071_v4, %v8249_v14  ;;  %v847_v31 = vshll.u32 %v8236_v57, 16  ;;  %v846_v35 = vrot.slane %v844_v21, 4  ;;  %v6795_v4 = vld [vmem:[%s8189_s11 + $0x118] sm:$0xff] }
  0x54   : > { %1805 = vmatpush.bf16.msra.mxu1 %v8222_v47  ;;  %v8259_v26 = vor.u32 %v1445_v16, %v1442_v15  ;;  %v8270_v34 = vor.u32 %v1472_v19, %v1469_v18  ;;  %v981_v36 = vrot.slane %v819_v44, 5  ;;  %v982_v37 = vrot.slane %v8236_v57, 5  ;;  %v7666_v44 = vld [vmem:[%s8154_s22 + $0xc0] sm:$0xff]  ;;  %v7657_v16 = vld [vmem:[%s8154_s22 + $0x78] sm:$0xff] }
  0x55   : > { %1894 = vmatpush.bf16.msra.mxu2 %v8225_v48  ;;  %v842_v38 = vor.u32 %v841_v27, %v838_v20  ;;  %v849_v40 = vrot.slane %v847_v31, 5  ;;  %v708_v42 = vpack.c.bf16 %v6769_v23, %v6769_v23  ;;  %v774_v1 = vunpack.c.l.b16 %v707_v41  ;;  %v6771_v31 = vld [vmem:[%s8189_s11 + $0x58] sm:$0xff] }
  0x56   : > { %v1474_v43 = vsel %vm1063_vm0, %v8259_v26, %v8270_v34  ;;  %v983_v49 = vsel %vm584_vm1, %v981_v36, %v982_v37  ;;  %v1099_v50 = vshrl.u32 %v981_v36, 16  ;;  %v1102_v53 = vshll.u32 %v981_v36, 16 }
  0x57   : > { %1717 = vmatpush.bf16.msra.mxu0 %v7668_v61  ;;  %7792 = vmatpush.bf16.msra.mxu3 %v7668_v61  ;;  %v8280_v54 = vor.u32 %v849_v40, %v846_v35  ;;  %v1082_v56 = vshrl.u32 %v842_v38, 16  ;;  %v1085_v58 = vshll.u32 %v842_v38, 16  ;;  %v1107_v59 = vshrl.u32 %v983_v49, 16  ;;  %v8288_v61 = vld [vmem:[%s8154_s22 + $0x140] sm:$0xff] }
  0x58   : > { %1806 = vmatpush.bf16.msra.mxu1 %v8244_v2  ;;  %v1101_v62 = vrot.slane %v1099_v50, 3  ;;  %v1104_v63 = vrot.slane %v1102_v53, 4  ;;  %v1110_v0 = vshll.u32 %v983_v49, 16  ;;  %v775_v23 = vunpack.c.l.b16 %v708_v42 }
  0x59   : > { %1895 = vmatpush.bf16.msra.mxu2 %v8247_v3  ;;  %v851_v7 = vsel %vm437_vm2, %v842_v38, %v8280_v54  ;;  %v1084_v10 = vrot.slane %v1082_v56, 3  ;;  %v1087_v13 = vrot.slane %v1085_v58, 4  ;;  %v1109_v15 = vrot.slane %v1107_v59, 3 }
  0x5a   : > { %v1090_v18 = vshrl.u32 %v851_v7, 16  ;;  %v1093_v19 = vshll.u32 %v851_v7, 16  ;;  %v1105_v20 = vor.u32 %v1104_v63, %v1101_v62  ;;  %v1112_v21 = vrot.slane %v1110_v0, 4 }
  0x5b   : > { %1718 = vmatpush.bf16.msra.mxu0 %v7667_v24  ;;  %7793 = vmatpush.bf16.msra.mxu3 %v7667_v24  ;;  %v1088_v22 = vor.u32 %v1087_v13, %v1084_v10  ;;  %v804_v24 = vpack.c.b16 %v774_v1, %v8211_v39  ;;  %v734_v27 = vpack.c.bf16 %v6795_v4, %v6795_v4 }
  0x5c   : > { %1807 = vmatpush.bf16.msra.mxu1 %v8265_v32  ;;  %v1092_v35 = vrot.slane %v1090_v18, 3  ;;  %v1095_v36 = vrot.slane %v1093_v19, 4  ;;  %v8299_v38 = vor.u32 %v1112_v21, %v1109_v15  ;;  %v709_v40 = vpack.c.bf16 %v6770_v17, %v6770_v17 }
  0x5d   : > { %1896 = vmatpush.bf16.msra.mxu2 %v8268_v33  ;;  %v8302_v41 = vpack.c.b16 %v775_v23, %v774_v1  ;;  %v1116_v42 = vshrl.u32 %v804_v24, 16  ;;  %v1119_v49 = vshll.u32 %v804_v24, 16  ;;  %v801_v39 = vunpack.c.l.b16 %v734_v27 }
  0x5e   : > { %v8305_v50 = vor.u32 %v1095_v36, %v1092_v35  ;;  %v1114_v53 = vsel %vm1063_vm0, %v1105_v20, %v8299_v38  ;;  %v710_v56 = vpack.c.bf16 %v6771_v31, %v6771_v31  ;;  %v8317_v1 = vpack.c.b16 %v8215_v45, %v8231_v55 }
  0x5f   : > { %1719 = vmatpush.bf16.msra.mxu0 %v7666_v44  ;;  %7794 = vmatpush.bf16.msra.mxu3 %v7666_v44  ;;  %v7656_v44 = vld [vmem:[%s8154_s22 + $0x70] sm:$0xff]  ;;  %v1118_v58 = vrot.slane %v1116_v42, 3  ;;  %v1121_v59 = vrot.slane %v1119_v49, 4  ;;  %v818_v62 = vpack.c.b16 %v801_v39, %v801_v39  ;;  %v853_v0 = vshrl.u32 %v8302_v41, 16 }
  0x60   : > { %1808 = vmatpush.bf16.msra.mxu1 %v8285_v60  ;;  %v1097_v63 = vsel %vm1063_vm0, %v1088_v22, %v8305_v50  ;;  %v8320_v10 = vunpack.c.l.b16 %v710_v56  ;;  %v8334_v22 = vpack.c.b16 %v8227_v51, %v8217_v46  ;;  %v8342_v36 = vpack.c.b16 %v801_v39, %v8229_v52 }
  0x61   : > { %1897 = vmatpush.bf16.msra.mxu2 %v8288_v61  ;;  %v1494_v4 = vshrl.u32 %v818_v62, 16  ;;  %v1497_v7 = vshll.u32 %v818_v62, 16  ;;  %v855_v13 = vrot.slane %v853_v0, 4  ;;  %v8327_v19 = vor.u32 %v1121_v59, %v1118_v58 }
  0x62   : > { %1720 = vmatmul.bf16.vlgmr.msra.gmra.mxu0 %v8257_v25  ;;  %1790 = vmatmul.bf16.vlgmr.msra.gmra.mxu3 %v1474_v43  ;;  %v856_v25 = vshll.u32 %v8302_v41, 16  ;;  %v984_v43 = vrot.slane %v8302_v41, 5  ;;  %v955_v39 = vshll.u32 %v8317_v1, 16  ;;  %v964_v58 = vshll.u32 %v8334_v22, 16 }
  0x63   : > { %2716 = vmatpush.bf16.msrb.mxu0 %v7657_v16  ;;  %7795 = vmatpush.bf16.msrb.mxu3 %v8164_v5  ;;  %v776_v5 = vunpack.c.l.b16 %v709_v40  ;;  %v1496_v17 = vrot.slane %v1494_v4, 3  ;;  %v1499_v18 = vrot.slane %v1497_v7, 4  ;;  %v6773_v7 = vld [vmem:[%s8189_s11 + $0x68] sm:$0xff] }
  0x64   : > { %1898 = vmatmul.bf16.vlgmr.msra.gmra.mxu2 %v1114_v53  ;;  %1809 = vmatmul.bf16.vlgmr.msra.gmra.mxu1 %v1097_v63  ;;  %v858_v15 = vrot.slane %v856_v25, 5  ;;  %v985_v16 = vsel %vm584_vm1, %v982_v37, %v984_v43  ;;  %v952_v37 = vshrl.u32 %v8317_v1, 16  ;;  %v957_v62 = vrot.slane %v955_v39, 5  ;;  %v6772_v63 = vld [vmem:[%s8189_s11 + $0x60] sm:$0xff] }
  0x65   : > { %v1134_v45 = vshrl.u32 %v985_v16, 16  ;;  %v8330_v21 = vpack.c.b16 %v8320_v10, %v776_v5  ;;  %v1500_v24 = vor.u32 %v1499_v18, %v1496_v17  ;;  %v805_v49 = vpack.c.b16 %v776_v5, %v775_v23 }
  0x66   : > { %v859_v20 = vor.u32 %v858_v15, %v855_v13  ;;  %v954_v52 = vrot.slane %v952_v37, 4  ;;  %v970_v5 = vshrl.u32 %v8342_v36, 16  ;;  %v966_v4 = vrot.slane %v964_v58, 5 }
  0x67   : > { %7796 = vmatpush.bf16.msrb.mxu3 %v8174_v8  ;;  %2717 = vmatpush.bf16.msrb.mxu0 %v7656_v44  ;;  %v1137_v8 = vshll.u32 %v985_v16, 16  ;;  %v1136_v57 = vrot.slane %v1134_v45, 3  ;;  %v862_v35 = vshrl.u32 %v8330_v21, 16  ;;  %v865_v53 = vshll.u32 %v8330_v21, 16 }
  0x68   : > { %v860_v27 = vsel %vm437_vm2, %v8280_v54, %v859_v20  ;;  %v1501_v23 = vsel %vm1063_vm0, %v8270_v34, %v1500_v24  ;;  %v973_v34 = vshll.u32 %v8342_v36, 16  ;;  %v1143_v13 = vshrl.u32 %v805_v49, 16 }
  0x69   : > { %v1139_v31 = vrot.slane %v1137_v8, 4  ;;  %v1125_v40 = vshrl.u32 %v860_v27, 16  ;;  %v1128_v42 = vshll.u32 %v860_v27, 16  ;;  %v864_v51 = vrot.slane %v862_v35, 4 }
  0x6a   : > { %v867_v56 = vrot.slane %v865_v53, 5  ;;  %v8368_v15 = vor.u32 %v957_v62, %v954_v52  ;;  %v972_v16 = vrot.slane %v970_v5, 4  ;;  %v986_v17 = vrot.slane %v8330_v21, 5 }
  0x6b   : > { %7797 = vmatpush.bf16.msrb.mxu3 %v8183_v11  ;;  %v1123_v11 = vsel %vm1063_vm0, %v8249_v14, %v8327_v19  ;;  %v8347_v46 = vor.u32 %v1139_v31, %v1136_v57  ;;  %v1127_v54 = vrot.slane %v1125_v40, 3  ;;  %v1130_v44 = vrot.slane %v1128_v42, 4 }
  0x6c   : > { %v961_v14 = vshrl.u32 %v8334_v22, 16  ;;  %v8363_v0 = vor.u32 %v867_v56, %v864_v51  ;;  %v975_v45 = vrot.slane %v973_v34, 5  ;;  %v711_v8 = vpack.c.bf16 %v6772_v63, %v6772_v63 }
  0x6d   : > { %v8356_v59 = vor.u32 %v1130_v44, %v1127_v54  ;;  %v1146_v57 = vshll.u32 %v805_v49, 16  ;;  %v987_v37 = vsel %vm584_vm1, %v984_v43, %v986_v17  ;;  %v712_v24 = vpack.c.bf16 %v6773_v7, %v6773_v7  ;;  %v7655_v49 = vld [vmem:[%s8154_s22 + $0x68] sm:$0xff] }
  0x6e   : > { %v963_v25 = vrot.slane %v961_v14, 4  ;;  %v1161_v31 = vshrl.u32 %v987_v37, 16  ;;  %v1164_v35 = vshll.u32 %v987_v37, 16  ;;  %v1145_v40 = vrot.slane %v1143_v13, 3  ;;  %2718 = vmatpush.bf16.msrb.mxu0 %v7655_v49  ;;  %v6774_v14 = vld [vmem:[%s8189_s11 + $0x70] sm:$0xff] }
  0x6f   : > { %7798 = vmatpush.bf16.msrb.mxu3 %v8203_v28  ;;  %v1141_v28 = vsel %vm1063_vm0, %v8299_v38, %v8347_v46  ;;  %v1132_v38 = vsel %vm1063_vm0, %v8305_v50, %v8356_v59  ;;  %v8383_v50 = vor.u32 %v975_v45, %v972_v16  ;;  %v778_v51 = vunpack.c.l.b16 %v711_v8 }
  0x70   : > { %v967_v18 = vor.u32 %v966_v4, %v963_v25  ;;  %v1148_v53 = vrot.slane %v1146_v57, 4  ;;  %v8389_v56 = vunpack.c.l.b16 %v712_v24  ;;  %v6775_v25 = vld [vmem:[%s8189_s11 + $0x78] sm:$0xff]  ;;  %v713_v7 = vpack.c.bf16 %v6774_v14, %v6774_v14 }
  0x71   : > { %v714_v45 = vpack.c.bf16 %v6775_v25, %v6775_v25 }
  0x72   : > { %1725 = vmatmul.bf16.gmra.mxu0 %v1123_v11  ;;  %1795 = vmatmul.bf16.gmra.mxu3 %v1501_v23  ;;  %v968_v27 = vsel %vm437_vm2, %v8368_v15, %v967_v18  ;;  %v977_v43 = vsel %vm437_vm2, %v967_v18, %v8383_v50  ;;  %v1163_v23 = vrot.slane %v1161_v31, 3  ;;  %v8394_v63 = vpack.c.b16 %v8389_v56, %v778_v51 }
  0x73   : > { %7799 = vmatpush.bf16.msrb.mxu3 %v8222_v47  ;;  %v869_v47 = vsel %vm437_vm2, %v859_v20, %v8363_v0  ;;  %v1449_v42 = vshrl.u32 %v968_v27, 16  ;;  %v1452_v20 = vshll.u32 %v968_v27, 16  ;;  %v1476_v52 = vshrl.u32 %v977_v43, 16 }
  0x74   : > { %1903 = vmatmul.bf16.gmra.mxu2 %v1141_v28  ;;  %1814 = vmatmul.bf16.gmra.mxu1 %v1132_v38  ;;  %v1152_v11 = vshrl.u32 %v869_v47, 16  ;;  %v1155_v41 = vshll.u32 %v869_v47, 16  ;;  %v1479_v39 = vshll.u32 %v977_v43, 16  ;;  %v8397_v4 = vor.u32 %v1148_v53, %v1145_v40 }
  0x75   : > { %v1451_v54 = vrot.slane %v1449_v42, 3  ;;  %v1454_v44 = vrot.slane %v1452_v20, 4  ;;  %v1478_v58 = vrot.slane %v1476_v52, 3  ;;  %v871_v38 = vshrl.u32 %v8394_v63, 16 }
  0x76   : > { %v1154_v28 = vrot.slane %v1152_v11, 3  ;;  %v1157_v62 = vrot.slane %v1155_v41, 4  ;;  %v1481_v5 = vrot.slane %v1479_v39, 4  ;;  %v988_v18 = vrot.slane %v8394_v63, 5 }
  0x77   : > { %7800 = vmatpush.bf16.msrb.mxu3 %v8244_v2  ;;  %v1166_v2 = vrot.slane %v1164_v35, 4  ;;  %v8399_v34 = vor.u32 %v1454_v44, %v1451_v54  ;;  %v873_v57 = vrot.slane %v871_v38, 4  ;;  %v780_v37 = vunpack.c.l.b16 %v713_v7  ;;  %v6776_v44 = vld [vmem:[%s8189_s11 + $0x80] sm:$0xff] }
  0x78   : > { %v8401_v13 = vor.u32 %v1481_v5, %v1478_v58  ;;  %v8409_v8 = vor.u32 %v1157_v62, %v1154_v28  ;;  %v1150_v24 = vsel %vm1063_vm0, %v8327_v19, %v8397_v4  ;;  %v8419_v31 = vunpack.c.l.b16 %v714_v45 }
  0x79   : > { %v8403_v16 = vor.u32 %v1166_v2, %v1163_v23  ;;  %v989_v19 = vsel %vm584_vm1, %v986_v17, %v988_v18  ;;  %v1503_v17 = vshrl.u32 %v8383_v50, 16  ;;  %v1506_v20 = vshll.u32 %v8383_v50, 16  ;;  %v6777_v23 = vld [vmem:[%s8189_s11 + $0x88] sm:$0xff] }
  0x7a   : > { %v1483_v27 = vsel %vm1063_vm0, %v8399_v34, %v8401_v13  ;;  %v1159_v40 = vsel %vm1063_vm0, %v8356_v59, %v8409_v8  ;;  %v1188_v49 = vshrl.u32 %v989_v19, 16  ;;  %v1191_v59 = vshll.u32 %v989_v19, 16 }
  0x7b   : > { %7801 = vmatpush.bf16.msrb.mxu3 %v8265_v32  ;;  %v874_v32 = vshll.u32 %v8394_v63, 16  ;;  %v1168_v35 = vsel %vm1063_vm0, %v8347_v46, %v8403_v16  ;;  %v8438_v46 = vpack.c.b16 %v8419_v31, %v780_v37  ;;  %v1505_v53 = vrot.slane %v1503_v17, 3 }
  0x7c   : > { %v1508_v54 = vrot.slane %v1506_v20, 4  ;;  %v1190_v52 = vrot.slane %v1188_v49, 3  ;;  %v1193_v39 = vrot.slane %v1191_v59, 4  ;;  %v715_v28 = vpack.c.bf16 %v6776_v44, %v6776_v44 }
  0x7d   : > { %v876_v47 = vrot.slane %v874_v32, 5  ;;  %v883_v43 = vshll.u32 %v8438_v46, 16  ;;  %v1008_v7 = vrot.slane %v8334_v22, 5  ;;  %v1010_v38 = vrot.slane %v8342_v36, 5 }
  0x7e   : > { %v1509_v5 = vor.u32 %v1508_v54, %v1505_v53  ;;  %v8452_v25 = vor.u32 %v1193_v39, %v1190_v52  ;;  %v716_v32 = vpack.c.bf16 %v6777_v23, %v6777_v23  ;;  %v807_v45 = vpack.c.b16 %v780_v37, %v8389_v56  ;;  %v7649_v23 = vld [vmem:[%s8154_s22 + $0x38] sm:$0xff] }
  0x7f   : > { %7802 = vmatpush.bf16.msrb.mxu3 %v8285_v60  ;;  %v806_v60 = vpack.c.b16 %v778_v51, %v8320_v10  ;;  %v885_v58 = vrot.slane %v883_v43, 5  ;;  %v1011_v19 = vsel %vm584_vm1, %v1008_v7, %v1010_v38 }
  0x80   : > { %v1195_v56 = vsel %vm1063_vm0, %v8403_v16, %v8452_v25  ;;  %v1488_v17 = vshll.u32 %v1011_v19, 16 }
  0x81   : > { %v1170_v42 = vshrl.u32 %v806_v60, 16  ;;  %v1173_v21 = vshll.u32 %v806_v60, 16  ;;  %v8465_v60 = vunpack.c.l.b16 %v716_v32 }
  0x82   : > { %1730 = vmatmul.bf16.gmra.mxu0 %v1150_v24  ;;  %1879 = vmatmul.bf16.vlgmr.msrb.gmra.mxu3 %v1483_v27  ;;  %v8463_v27 = vunpack.c.l.b16 %v715_v28  ;;  %v1490_v52 = vrot.slane %v1488_v17, 4 }
  0x83   : > { %7803 = vmatpush.bf16.msra.mxu3 %v8167_v6  ;;  %v8424_v6 = vor.u32 %v876_v47, %v873_v57  ;;  %v1175_v51 = vrot.slane %v1173_v21, 4  ;;  %v990_v57 = vrot.slane %v8438_v46, 5  ;;  %v6796_v47 = vld [vmem:[%s8189_s11 + $0x120] sm:$0xff]  ;;  %v1485_v21 = vshrl.u32 %v1011_v19, 16  ;;  %v272_v19 = vld [vmem:[%s8189_s11 + $0x10] sm:$0xff] }
  0x84   : > { %1908 = vmatmul.bf16.gmra.mxu2 %v1168_v35  ;;  %1819 = vmatmul.bf16.gmra.mxu1 %v1159_v40  ;;  %v1510_v35 = vsel %vm1063_vm0, %v8401_v13, %v1509_v5  ;;  %v735_v40 = vpack.c.bf16 %v6796_v47, %v6796_v47 }
  0x85   : > { %v878_v10 = vsel %vm437_vm2, %v8363_v0, %v8424_v6  ;;  %v880_v0 = vshrl.u32 %v8438_v46, 16  ;;  %v1487_v44 = vrot.slane %v1485_v21, 3  ;;  %v306_v21 = vpack.c.bf16 %v272_v19, %v272_v19 }
  0x86   : > { %v1179_v11 = vshrl.u32 %v878_v10, 16  ;;  %v1182_v41 = vshll.u32 %v878_v10, 16  ;;  %v1197_v10 = vshrl.u32 %v807_v45, 16  ;;  %v979_v49 = vunpack.c.l.b16 %v735_v40 }
  0x87   : > { %7804 = vmatpush.bf16.msra.mxu3 %v8177_v9  ;;  %v1172_v9 = vrot.slane %v1170_v42, 3  ;;  %v882_v14 = vrot.slane %v880_v0, 4  ;;  %v8495_v42 = vpack.c.b16 %v8465_v60, %v8463_v27  ;;  %v8510_v47 = vor.u32 %v1490_v52, %v1487_v44 }
  0x88   : > { %v1181_v50 = vrot.slane %v1179_v11, 3  ;;  %v1184_v2 = vrot.slane %v1182_v41, 4  ;;  %v1199_v59 = vrot.slane %v1197_v10, 3 }
  0x89   : > { %v8449_v62 = vor.u32 %v1175_v51, %v1172_v9  ;;  %v889_v43 = vshrl.u32 %v8495_v42, 16  ;;  %v6778_v9 = vld [vmem:[%s8189_s11 + $0x90] sm:$0xff]  ;;  %v6779_v51 = vld [vmem:[%s8189_s11 + $0x98] sm:$0xff]  ;;  %v992_v40 = vrot.slane %v8495_v42, 5 }
  0x8a   : > { %v8459_v24 = vor.u32 %v1184_v2, %v1181_v50  ;;  %v980_v2 = vpack.c.b16 %v979_v49, %v979_v49 }
  0x8b   : > { %7805 = vmatpush.bf16.msra.mxu3 %v8186_v12  ;;  %v1006_v12 = vrot.slane %v8317_v1, 5  ;;  %v1177_v22 = vsel %vm1063_vm0, %v8397_v4, %v8449_v62  ;;  %v1200_v4 = vshll.u32 %v807_v45, 16  ;;  %v287_v1 = vld [vmem:[%s8189_s11 + $0x88] sm:$0xff] }
  0x8c   : > { %v1186_v13 = vsel %vm1063_vm0, %v8409_v8, %v8459_v24 }
  0x8d   : > { %v1009_v37 = vsel %vm584_vm1, %v1006_v12, %v1008_v7  ;;  %v1202_v11 = vrot.slane %v1200_v4, 4  ;;  %v891_v7 = vrot.slane %v889_v43, 4 }
  0x8e   : > { %v1458_v63 = vshrl.u32 %v1009_v37, 16 }
  0x8f   : > { %7806 = vmatpush.bf16.msra.mxu3 %v8206_v29  ;;  %v8461_v29 = vor.u32 %v885_v58, %v882_v14  ;;  %v717_v14 = vpack.c.bf16 %v6778_v9, %v6778_v9  ;;  %v718_v58 = vpack.c.bf16 %v6779_v51, %v6779_v51 }
  0x90   : > { %v1460_v53 = vrot.slane %v1458_v63, 3 }
  0x91   : > { %v887_v16 = vsel %vm437_vm2, %v8424_v6, %v8461_v29  ;;  %v7654_v6 = vld [vmem:[%s8154_s22 + $0x60] sm:$0xff]  ;;  %v784_v10 = vunpack.c.l.b16 %v717_v14  ;;  %v8518_v4 = vunpack.c.l.b16 %v718_v58  ;;  %v7645_v14 = vld [vmem:[%s8154_s22 + $0x18] sm:$0xff] }
  0x92   : > { %1735 = vmatmul.bf16.gmra.mxu0 %v1177_v22  ;;  %1884 = vmatmul.bf16.gmra.mxu3 %v1510_v35  ;;  %v1206_v41 = vshrl.u32 %v887_v16, 16  ;;  %v1209_v0 = vshll.u32 %v887_v16, 16  ;;  %v7648_v35 = vld [vmem:[%s8154_s22 + $0x30] sm:$0xff] }
  0x93   : > { %7807 = vmatpush.bf16.msra.mxu3 %v8225_v48  ;;  %v991_v48 = vsel %vm584_vm1, %v988_v18, %v990_v57  ;;  %v1461_v18 = vshll.u32 %v1009_v37, 16  ;;  %2719 = vmatpush.bf16.msrb.mxu0 %v7654_v6  ;;  %v271_v37 = vld [vmem:[%s8189_s11 + $0x8] sm:$0xff]  ;;  %v7646_v6 = vld [vmem:[%s8154_s22 + $0x20] sm:$0xff] }
  0x94   : > { %1913 = vmatmul.bf16.gmra.mxu2 %v1195_v56  ;;  %v1215_v8 = vshrl.u32 %v991_v48, 16  ;;  %v1218_v20 = vshll.u32 %v991_v48, 16  ;;  %1824 = vmatmul.bf16.gmra.mxu1 %v1186_v13  ;;  %v1208_v28 = vrot.slane %v1206_v41, 3  ;;  %v1211_v5 = vrot.slane %v1209_v0, 4 }
  0x95   : > { %v1463_v54 = vrot.slane %v1461_v18, 4  ;;  %v1012_v56 = vrot.slane %v980_v2, 5  ;;  %v808_v48 = vpack.c.b16 %v8463_v27, %v8419_v31  ;;  %v305_v18 = vpack.c.bf16 %v271_v37, %v271_v37 }
  0x96   : > { %v1217_v39 = vrot.slane %v1215_v8, 3  ;;  %v1220_v50 = vrot.slane %v1218_v20, 4  ;;  %v7647_v8 = vld [vmem:[%s8154_s22 + $0x28] sm:$0xff]  ;;  %v8545_v27 = vpack.c.b16 %v8518_v4, %v784_v10 }
  0x97   : > { %7808 = vmatpush.bf16.msra.mxu3 %v8247_v3  ;;  %v892_v3 = vshll.u32 %v8495_v42, 16  ;;  %v8508_v45 = vor.u32 %v1463_v54, %v1460_v53  ;;  %v1013_v31 = vsel %vm584_vm1, %v1010_v38, %v1012_v56  ;;  %v1224_v20 = vshrl.u32 %v808_v48, 16  ;;  %v7642_v42 = vld [vmem:[%s8154_s22] sm:$0xff] }
  0x98   : > { %v8512_v22 = vor.u32 %v1220_v50, %v1217_v39  ;;  %v1227_v36 = vshll.u32 %v808_v48, 16  ;;  %v1512_v46 = vshrl.u32 %v1013_v31, 16  ;;  %v1515_v49 = vshll.u32 %v1013_v31, 16  ;;  %v6780_v39 = vld [vmem:[%s8189_s11 + $0xa0] sm:$0xff]  ;;  %v6781_v50 = vld [vmem:[%s8189_s11 + $0xa8] sm:$0xff] }
  0x99   : > { %v894_v32 = vrot.slane %v892_v3, 5  ;;  %v1492_v63 = vsel %vm1063_vm0, %v8508_v45, %v8510_v47  ;;  %v898_v3 = vshrl.u32 %v8545_v27, 16  ;;  %v1226_v53 = vrot.slane %v1224_v20, 3 }
  0x9a   : > { %v1222_v17 = vsel %vm1063_vm0, %v8452_v25, %v8512_v22  ;;  %v1229_v54 = vrot.slane %v1227_v36, 4  ;;  %v1514_v44 = vrot.slane %v1512_v46, 3  ;;  %v1517_v52 = vrot.slane %v1515_v49, 4 }
  0x9b   : > { %7809 = vmatpush.bf16.msra.mxu3 %v8268_v33  ;;  %v8506_v33 = vor.u32 %v1202_v11, %v1199_v59  ;;  %v8524_v13 = vor.u32 %v894_v32, %v891_v7  ;;  %v270_v59 = vld [vmem:[%s8189_s11] sm:$0xff]  ;;  %v373_v11 = vunpack.c.l.b16 %v306_v21  ;;  %v720_v56 = vpack.c.bf16 %v6781_v50, %v6781_v50 }
  0x9c   : > { %v304_v51 = vpack.c.bf16 %v270_v59, %v270_v59  ;;  %v8562_v37 = vor.u32 %v1229_v54, %v1226_v53  ;;  %v1518_v19 = vor.u32 %v1517_v52, %v1514_v44  ;;  %v994_v21 = vrot.slane %v8545_v27, 5 }
  0x9d   : > { %v1204_v16 = vsel %vm1063_vm0, %v8449_v62, %v8506_v33  ;;  %v993_v62 = vsel %vm584_vm1, %v990_v57, %v992_v40  ;;  %v896_v38 = vsel %vm437_vm2, %v8461_v29, %v8524_v13  ;;  %v372_v57 = vunpack.c.l.b16 %v305_v18 }
  0x9e   : > { %v1242_v41 = vshrl.u32 %v993_v62, 16  ;;  %v1245_v0 = vshll.u32 %v993_v62, 16  ;;  %v1236_v43 = vshll.u32 %v896_v38, 16  ;;  %v901_v29 = vshll.u32 %v8545_v27, 16 }
  0x9f   : > { %7810 = vmatpush.bf16.msra.mxu3 %v8288_v61  ;;  %v8520_v61 = vor.u32 %v1211_v5, %v1208_v28  ;;  %v8556_v9 = vpack.c.b16 %v373_v11, %v372_v57  ;;  %v900_v5 = vrot.slane %v898_v3, 4  ;;  %v371_v32 = vunpack.c.l.b16 %v304_v51 }
  0xa0   : > { %v1247_v2 = vrot.slane %v1245_v0, 4  ;;  %v1238_v28 = vrot.slane %v1236_v43, 4  ;;  %v903_v7 = vrot.slane %v901_v29, 5  ;;  %v809_v18 = vpack.c.b16 %v784_v10, %v8465_v60  ;;  %v7643_v10 = vld [vmem:[%s8154_s22 + $0x8] sm:$0xff]  ;;  %v7653_v29 = vld [vmem:[%s8154_s22 + $0x58] sm:$0xff] }
  0xa1   : > { %v1213_v25 = vsel %vm1063_vm0, %v8459_v24, %v8520_v61  ;;  %v1233_v24 = vshrl.u32 %v896_v38, 16  ;;  %v8573_v62 = vunpack.c.l.b16 %v720_v56  ;;  %v1519_v20 = vsel %vm1063_vm0, %v8510_v47, %v1518_v19  ;;  %v275_v0 = vld [vmem:[%s8189_s11 + $0x28] sm:$0xff]  ;;  %2720 = vmatpush.bf16.msrb.mxu0 %v7653_v29 }
  0xa2   : > { %1740 = vmatmul.bf16.gmra.mxu0 %v1204_v16  ;;  %1968 = vmatmul.bf16.vlgmr.msra.gmra.mxu3 %v1492_v63  ;;  %v7644_v16 = vld [vmem:[%s8154_s22 + $0x10] sm:$0xff]  ;;  %v405_v36 = vpack.c.b16 %v8208_v30, %v373_v11  ;;  %v1251_v46 = vshrl.u32 %v809_v18, 16  ;;  %v1254_v49 = vshll.u32 %v809_v18, 16 }
  0xa3   : > { %2627 = vmatpush.bf16.msrb.mxu3 %v7649_v23  ;;  %v1244_v23 = vrot.slane %v1242_v41, 3  ;;  %v1235_v58 = vrot.slane %v1233_v24, 3 }
  0xa4   : > { %1918 = vmatmul.bf16.gmra.mxu2 %v1222_v17  ;;  %1829 = vmatmul.bf16.gmra.mxu1 %v1213_v25  ;;  %v8571_v17 = vor.u32 %v903_v7, %v900_v5  ;;  %v1231_v25 = vsel %vm1063_vm0, %v8506_v33, %v8562_v37  ;;  %v995_v33 = vsel %vm584_vm1, %v992_v40, %v994_v21  ;;  %v1991_v11 = vshll.u32 %v405_v36, 16  ;;  %v274_v40 = vld [vmem:[%s8189_s11 + $0x20] sm:$0xff] }
  0xa5   : > { %v8564_v48 = vor.u32 %v1247_v2, %v1244_v23  ;;  %v8567_v63 = vor.u32 %v1238_v28, %v1235_v58  ;;  %v1272_v41 = vshll.u32 %v995_v33, 16  ;;  %v1253_v24 = vrot.slane %v1251_v46, 3  ;;  %v6782_v2 = vld [vmem:[%s8189_s11 + $0xb0] sm:$0xff] }
  0xa6   : > { %v905_v47 = vsel %vm437_vm2, %v8524_v13, %v8571_v17  ;;  %v1256_v13 = vrot.slane %v1254_v49, 4  ;;  %v308_v50 = vpack.c.bf16 %v274_v40, %v274_v40  ;;  %v309_v23 = vpack.c.bf16 %v275_v0, %v275_v0 }
  0xa7   : > { %2628 = vmatpush.bf16.msrb.mxu3 %v7648_v35  ;;  %v719_v35 = vpack.c.bf16 %v6780_v39, %v6780_v39  ;;  %v1249_v60 = vsel %vm1063_vm0, %v8512_v22, %v8564_v48  ;;  %v1240_v38 = vsel %vm1063_vm0, %v8520_v61, %v8567_v63  ;;  %v1260_v43 = vshrl.u32 %v905_v47, 16 }
  0xa8   : > { %v1263_v3 = vshll.u32 %v905_v47, 16  ;;  %v1993_v39 = vrot.slane %v1991_v11, 4  ;;  %v1274_v28 = vrot.slane %v1272_v41, 4  ;;  %v8607_v5 = vor.u32 %v1256_v13, %v1253_v24  ;;  %v277_v13 = vld [vmem:[%s8189_s11 + $0x38] sm:$0xff] }
  0xa9   : > { %v786_v31 = vunpack.c.l.b16 %v719_v35  ;;  %v1262_v7 = vrot.slane %v1260_v43, 3  ;;  %v721_v19 = vpack.c.bf16 %v6782_v2, %v6782_v2 }
  0xab   : > { %2629 = vmatpush.bf16.msrb.mxu3 %v7647_v8  ;;  %v404_v8 = vpack.c.b16 %v372_v57, %v371_v32  ;;  %v8597_v61 = vpack.c.b16 %v8573_v62, %v786_v31  ;;  %v1988_v57 = vshrl.u32 %v405_v36, 16  ;;  %v1265_v32 = vrot.slane %v1263_v3, 4 }
  0xac   : > { %v810_v46 = vpack.c.b16 %v786_v31, %v8518_v4 }
  0xad   : > { %v1980_v22 = vshrl.u32 %v404_v8, 16  ;;  %v1983_v59 = vshll.u32 %v404_v8, 16  ;;  %v907_v54 = vshrl.u32 %v8597_v61, 16  ;;  %v910_v44 = vshll.u32 %v8597_v61, 16 }
  0xae   : > { %v1990_v52 = vrot.slane %v1988_v57, 3 }
  0xaf   : > { %2630 = vmatpush.bf16.msrb.mxu3 %v7646_v6  ;;  %v1269_v6 = vshrl.u32 %v995_v33, 16  ;;  %v1982_v51 = vrot.slane %v1980_v22, 3  ;;  %v1985_v53 = vrot.slane %v1983_v59, 4  ;;  %v909_v35 = vrot.slane %v907_v54, 4 }
  0xb0   : > { %v912_v56 = vrot.slane %v910_v44, 5  ;;  %v8609_v8 = vor.u32 %v1993_v39, %v1990_v52  ;;  %v788_v33 = vunpack.c.l.b16 %v721_v19  ;;  %v1258_v22 = vsel %vm1063_vm0, %v8562_v37, %v8607_v5  ;;  %v6784_v39 = vld [vmem:[%s8189_s11 + $0xc0] sm:$0xff] }
  0xb1   : > { %v1271_v58 = vrot.slane %v1269_v6, 3  ;;  %v1986_v18 = vor.u32 %v1985_v53, %v1982_v51  ;;  %v311_v52 = vpack.c.bf16 %v277_v13, %v277_v13 }
  0xb2   : > { %1745 = vmatmul.bf16.gmra.mxu0 %v1231_v25  ;;  %1973 = vmatmul.bf16.gmra.mxu3 %v1519_v20  ;;  %v8611_v25 = vunpack.c.l.b16 %v308_v50  ;;  %v376_v20 = vunpack.c.l.b16 %v309_v23  ;;  %v8620_v49 = vor.u32 %v912_v56, %v909_v35  ;;  %v6785_v50 = vld [vmem:[%s8189_s11 + $0xc8] sm:$0xff] }
  0xb3   : > { %2631 = vmatpush.bf16.msrb.mxu3 %v7645_v14  ;;  %v6783_v14 = vld [vmem:[%s8189_s11 + $0xb8] sm:$0xff]  ;;  %v8613_v36 = vor.u32 %v1274_v28, %v1271_v58  ;;  %v1995_v59 = vsel %vm1063_vm0, %v1986_v18, %v8609_v8  ;;  %v724_v35 = vpack.c.bf16 %v6785_v50, %v6785_v50 }
  0xb4   : > { %1923 = vmatmul.bf16.gmra.mxu2 %v1249_v60  ;;  %1834 = vmatmul.bf16.gmra.mxu1 %v1240_v38  ;;  %v276_v60 = vld [vmem:[%s8189_s11 + $0x30] sm:$0xff]  ;;  %v996_v38 = vrot.slane %v8597_v61, 5  ;;  %v406_v57 = vpack.c.b16 %v376_v20, %v8611_v25  ;;  %v914_v6 = vsel %vm437_vm2, %v8571_v17, %v8620_v49 }
  0xb5   : > { %v310_v11 = vpack.c.bf16 %v276_v60, %v276_v60  ;;  %v1276_v4 = vsel %vm1063_vm0, %v8564_v48, %v8613_v36  ;;  %v1281_v48 = vshll.u32 %v810_v46, 16  ;;  %v1290_v43 = vshll.u32 %v914_v6, 16 }
  0xb6   : > { %v997_v31 = vsel %vm584_vm1, %v994_v21, %v996_v38  ;;  %v2031_v40 = vshrl.u32 %v406_v57, 16  ;;  %v2034_v27 = vshll.u32 %v406_v57, 16 }
  0xb7   : > { %2632 = vmatpush.bf16.msrb.mxu3 %v7644_v16  ;;  %v722_v16 = vpack.c.bf16 %v6783_v14, %v6783_v14  ;;  %v377_v21 = vunpack.c.l.b16 %v310_v11  ;;  %v1296_v0 = vshrl.u32 %v997_v31, 16  ;;  %v1299_v24 = vshll.u32 %v997_v31, 16 }
  0xb8   : > { %v1283_v53 = vrot.slane %v1281_v48, 4  ;;  %v2033_v54 = vrot.slane %v2031_v40, 3  ;;  %v2036_v44 = vrot.slane %v2034_v27, 4  ;;  %v1292_v58 = vrot.slane %v1290_v43, 4 }
  0xb9   : > { %v8622_v47 = vunpack.c.l.b16 %v722_v16  ;;  %v8648_v3 = vpack.c.b16 %v377_v21, %v376_v20  ;;  %v1298_v23 = vrot.slane %v1296_v0, 3  ;;  %v1301_v2 = vrot.slane %v1299_v24, 4  ;;  %v278_v20 = vld [vmem:[%s8189_s11 + $0x40] sm:$0xff] }
  0xba   : > { %v8656_v19 = vor.u32 %v2036_v44, %v2033_v54  ;;  %v378_v16 = vunpack.c.l.b16 %v311_v52  ;;  %v8669_v11 = vunpack.c.l.b16 %v724_v35  ;;  %v6786_v44 = vld [vmem:[%s8189_s11 + $0xd0] sm:$0xff]  ;;  %v6787_v52 = vld [vmem:[%s8189_s11 + $0xd8] sm:$0xff] }
  0xbb   : > { %2633 = vmatpush.bf16.msrb.mxu3 %v7643_v10  ;;  %v8616_v10 = vor.u32 %v1265_v32, %v1262_v7  ;;  %v8645_v41 = vpack.c.b16 %v8622_v47, %v788_v33  ;;  %v723_v32 = vpack.c.bf16 %v6784_v39, %v6784_v39  ;;  %v8658_v18 = vor.u32 %v1301_v2, %v1298_v23 }
  0xbc   : > { %v2038_v31 = vsel %vm1063_vm0, %v8609_v8, %v8656_v19 }
  0xbd   : > { %v1267_v37 = vsel %vm1063_vm0, %v8567_v63, %v8616_v10  ;;  %v1287_v63 = vshrl.u32 %v914_v6, 16  ;;  %v916_v17 = vshrl.u32 %v8645_v41, 16  ;;  %v919_v51 = vshll.u32 %v8645_v41, 16 }
  0xbe   : > { %v8667_v57 = vunpack.c.l.b16 %v723_v32  ;;  %v312_v6 = vpack.c.bf16 %v278_v20, %v278_v20 }
  0xbf   : > { %2634 = vmatpush.bf16.msrb.mxu3 %v7642_v42  ;;  %v1278_v42 = vshrl.u32 %v810_v46, 16  ;;  %v1289_v14 = vrot.slane %v1287_v63, 3  ;;  %v918_v28 = vrot.slane %v916_v17, 4  ;;  %v921_v7 = vrot.slane %v919_v51, 5 }
  0xc0   : > { %v998_v46 = vrot.slane %v8645_v41, 5  ;;  %v379_v27 = vunpack.c.l.b16 %v312_v6 }
  0xc1   : > { %v1280_v29 = vrot.slane %v1278_v42, 3  ;;  %v8661_v60 = vor.u32 %v1292_v58, %v1289_v14  ;;  %v7652_v42 = vld [vmem:[%s8154_s22 + $0x50] sm:$0xff] }
  0xc2   : > { %1750 = vmatmul.bf16.gmra.mxu0 %v1258_v22  ;;  %2635 = vmatmul.bf16.vlgmr.msrb.gmra.mxu3 %v1995_v59  ;;  %v811_v22 = vpack.c.b16 %v788_v33, %v8573_v62  ;;  %v8665_v59 = vor.u32 %v921_v7, %v918_v28  ;;  %v1303_v62 = vsel %vm1063_vm0, %v8613_v36, %v8658_v18 }
  0xc3   : > { %v8654_v56 = vor.u32 %v1283_v53, %v1280_v29  ;;  %v999_v33 = vsel %vm584_vm1, %v996_v38, %v998_v46  ;;  %2721 = vmatpush.bf16.msrb.mxu0 %v7652_v42  ;;  %v8694_v36 = vpack.c.b16 %v8669_v11, %v8667_v57  ;;  %v8697_v63 = vpack.c.b16 %v379_v27, %v378_v16 }
  0xc4   : > { %1928 = vmatmul.bf16.gmra.mxu2 %v1276_v4  ;;  %1839 = vmatmul.bf16.gmra.mxu1 %v1267_v37  ;;  %v407_v37 = vpack.c.b16 %v378_v16, %v377_v21  ;;  %v1305_v8 = vshrl.u32 %v811_v22, 16  ;;  %v923_v48 = vsel %vm437_vm2, %v8620_v49, %v8665_v59  ;;  %v1308_v61 = vshll.u32 %v811_v22, 16 }
  0xc5   : > { %v1285_v4 = vsel %vm1063_vm0, %v8607_v5, %v8654_v56  ;;  %v1294_v5 = vsel %vm1063_vm0, %v8616_v10, %v8661_v60  ;;  %v1323_v21 = vshrl.u32 %v999_v33, 16  ;;  %v1326_v0 = vshll.u32 %v999_v33, 16  ;;  %v279_v10 = vld [vmem:[%s8189_s11 + $0x48] sm:$0xff] }
  0xc6   : > { %v2058_v40 = vshrl.u32 %v407_v37, 16  ;;  %v2061_v38 = vshll.u32 %v407_v37, 16  ;;  %v1314_v24 = vshrl.u32 %v923_v48, 16  ;;  %v1317_v13 = vshll.u32 %v923_v48, 16 }
  0xc7   : > { %v1307_v49 = vrot.slane %v1305_v8, 3  ;;  %v11049_v43 = vshrl.u32 %v8694_v36, 16  ;;  %v11047_v29 = vshll.u32 %v8694_v36, 16  ;;  %v1310_v17 = vrot.slane %v1308_v61, 4 }
  0xc8   : > { %v2060_v51 = vrot.slane %v2058_v40, 3  ;;  %v2063_v53 = vrot.slane %v2061_v38, 4  ;;  %v313_v54 = vpack.c.bf16 %v279_v10, %v279_v10  ;;  %v1325_v39 = vrot.slane %v1323_v21, 3 }
  0xc9   : > { %v1328_v50 = vrot.slane %v1326_v0, 4  ;;  %v1316_v23 = vrot.slane %v1314_v24, 3  ;;  %v1319_v2 = vrot.slane %v1317_v13, 4  ;;  %v927_v14 = vrot.slane %v11049_v43, 4  ;;  %v7705_v43 = vld [vmem:[%s8154_s22 + $0x1f8] sm:$0xff] }
  0xca   : > { %v930_v58 = vrot.slane %v11047_v29, 5  ;;  %v725_v28 = vpack.c.bf16 %v6786_v44, %v6786_v44  ;;  %v726_v7 = vpack.c.bf16 %v6787_v52, %v6787_v52  ;;  %v8707_v32 = vor.u32 %v1310_v17, %v1307_v49  ;;  %v281_v17 = vld [vmem:[%s8189_s11 + $0x58] sm:$0xff]  ;;  %4028 = vmatpush.bf16.msra.mxu3 %v7705_v43 }
  0xcb   : > { %v8709_v35 = vor.u32 %v2063_v53, %v2060_v51  ;;  %v380_v16 = vunpack.c.l.b16 %v313_v54  ;;  %v8711_v20 = vor.u32 %v1328_v50, %v1325_v39  ;;  %v812_v22 = vpack.c.b16 %v8667_v57, %v8622_v47 }
  0xcc   : > { %v8717_v37 = vor.u32 %v1319_v2, %v1316_v23  ;;  %v8719_v42 = vor.u32 %v930_v58, %v927_v14  ;;  %v792_v6 = vunpack.c.l.b16 %v725_v28  ;;  %v315_v58 = vpack.c.bf16 %v281_v17, %v281_v17  ;;  %v6788_v28 = vld [vmem:[%s8189_s11 + $0xe0] sm:$0xff] }
  0xcd   : > { %v2065_v8 = vsel %vm1063_vm0, %v8656_v19, %v8709_v35  ;;  %v408_v47 = vpack.c.b16 %v380_v16, %v379_v27  ;;  %v1330_v61 = vsel %vm1063_vm0, %v8658_v18, %v8711_v20  ;;  %v1332_v40 = vshrl.u32 %v812_v22, 16 }
  0xce   : > { %v1335_v38 = vshll.u32 %v812_v22, 16  ;;  %v1321_v19 = vsel %vm1063_vm0, %v8661_v60, %v8717_v37  ;;  %v932_v18 = vsel %vm437_vm2, %v8665_v59, %v8719_v42 }
  0xcf   : > { %v2085_v41 = vshrl.u32 %v408_v47, 16  ;;  %v2088_v10 = vshll.u32 %v408_v47, 16  ;;  %v1341_v53 = vshrl.u32 %v932_v18, 16  ;;  %v1344_v59 = vshll.u32 %v932_v18, 16 }
  0xd0   : > { %v1337_v51 = vrot.slane %v1335_v38, 4 }
  0xd1   : > { %v2087_v2 = vrot.slane %v2085_v41, 3  ;;  %v2090_v14 = vrot.slane %v2088_v10, 4 }
  0xd2   : > { %1755 = vmatmul.bf16.gmra.mxu0 %v1285_v4  ;;  %2640 = vmatmul.bf16.gmra.mxu3 %v2038_v31  ;;  %v280_v4 = vld [vmem:[%s8189_s11 + $0x50] sm:$0xff]  ;;  %v1000_v31 = vrot.slane %v8694_v36, 5 }
  0xd3   : > { %v314_v48 = vpack.c.bf16 %v280_v4, %v280_v4 }
  0xd4   : > { %1933 = vmatmul.bf16.gmra.mxu2 %v1303_v62  ;;  %1844 = vmatmul.bf16.gmra.mxu1 %v1294_v5  ;;  %v8721_v62 = vunpack.c.l.b16 %v726_v7  ;;  %v1312_v5 = vsel %vm1063_vm0, %v8654_v56, %v8707_v32  ;;  %v1001_v21 = vsel %vm584_vm1, %v998_v46, %v1000_v31  ;;  %v1334_v46 = vrot.slane %v1332_v40, 3  ;;  %v6789_v7 = vld [vmem:[%s8189_s11 + $0xe8] sm:$0xff] }
  0xd5   : > { %v381_v24 = vunpack.c.l.b16 %v314_v48  ;;  %v1350_v13 = vshrl.u32 %v1001_v21, 16  ;;  %v1353_v49 = vshll.u32 %v1001_v21, 16  ;;  %v728_v40 = vpack.c.bf16 %v6789_v7, %v6789_v7 }
  0xd6   : > { %v8744_v27 = vpack.c.b16 %v8721_v62, %v792_v6  ;;  %v8763_v21 = vor.u32 %v2090_v14, %v2087_v2 }
  0xd7   : > { %v8749_v54 = vpack.c.b16 %v381_v24, %v380_v16  ;;  %v1352_v22 = vrot.slane %v1350_v13, 3  ;;  %v1355_v4 = vrot.slane %v1353_v49, 4  ;;  %v1343_v16 = vrot.slane %v1341_v53, 3 }
  0xd8   : > { %v11046_v52 = vshrl.u32 %v8744_v27, 16  ;;  %v11042_v39 = vshll.u32 %v8744_v27, 16  ;;  %v1002_v13 = vrot.slane %v8744_v27, 5 }
  0xd9   : > { %v8766_v18 = vor.u32 %v1355_v4, %v1352_v22 }
  0xda   : > { %v936_v47 = vrot.slane %v11046_v52, 4  ;;  %v939_v48 = vrot.slane %v11042_v39, 5  ;;  %v7664_v52 = vld [vmem:[%s8154_s22 + $0xb0] sm:$0xff] }
  0xdb   : > { %v1357_v2 = vsel %vm1063_vm0, %v8711_v20, %v8766_v18 }
  0xdf   : > { %v1721_v33 = vpop.f32.mrf.mxu0 }
  0xe1   : > { %v1810_v56 = vpop.f32.mrf.mxu1 }
  0xe2   : > { %1760 = vmatmul.bf16.gmra.mxu0 %v1312_v5  ;;  %2645 = vmatmul.bf16.gmra.mxu3 %v2065_v8  ;;  %v1811_v0 = vadd.f32 %v1810_v56, %v1721_v33  ;;  %v8757_v33 = vor.u32 %v1337_v51, %v1334_v46  ;;  %v1346_v5 = vrot.slane %v1344_v59, 4  ;;  %v382_v56 = vunpack.c.l.b16 %v315_v58 }
  0xe3   : > { %v8775_v46 = vpack.c.b16 %v792_v6, %v8669_v11  ;;  %v8780_v51 = vor.u32 %v939_v48, %v936_v47  ;;  %v8782_v59 = vunpack.c.l.b16 %v728_v40  ;;  %v283_v47 = vld [vmem:[%s8189_s11 + $0x68] sm:$0xff] }
  0xe4   : > { %1938 = vmatmul.bf16.gmra.mxu2 %v1330_v61  ;;  %1849 = vmatmul.bf16.gmra.mxu1 %v1321_v19  ;;  %v727_v61 = vpack.c.bf16 %v6788_v28, %v6788_v28  ;;  %v7651_v19 = vld [vmem:[%s8154_s22 + $0x48] sm:$0xff]  ;;  %v1339_v10 = vsel %vm1063_vm0, %v8707_v32, %v8757_v33  ;;  %v8778_v17 = vor.u32 %v1346_v5, %v1343_v16 }
  0xe5   : > { %v8747_v60 = vpop.f32.mrf.mxu3  ;;  %11073 = vst [vmem:[#allocation10_spill] sm:$0xff] %v8775_v46  ;;  %2722 = vmatpush.bf16.msrb.mxu0 %v7651_v19  ;;  %v2092_v32 = vsel %vm1063_vm0, %v8709_v35, %v8763_v21  ;;  %v409_v11 = vpack.c.b16 %v382_v56, %v381_v24  ;;  %v11041_v14 = vshrl.u32 %v8775_v46, 16  ;;  %v11040_v58 = vshll.u32 %v8775_v46, 16 }
  0xe6   : > { %v794_v53 = vunpack.c.l.b16 %v727_v61  ;;  %11074 = vst [vmem:[#allocation11_spill] sm:$0xff] %v8782_v59  ;;  %v1003_v28 = vsel %vm584_vm1, %v1000_v31, %v1002_v13  ;;  %v1348_v35 = vsel %vm1063_vm0, %v8717_v37, %v8778_v17  ;;  %v941_v20 = vsel %vm437_vm2, %v8719_v42, %v8780_v51 }
  0xe7   : > { %v1899_v44 = vpop.f32.mrf.mxu2  ;;  %v1723_v23 = vpop.f32.mrf.mxu0  ;;  %v2112_v4 = vshrl.u32 %v409_v11, 16  ;;  %v2115_v16 = vshll.u32 %v409_v11, 16  ;;  %v1377_v31 = vshrl.u32 %v1003_v28, 16  ;;  %v1361_v37 = vrot.slane %v11041_v14, 3 }
  0xe8   : > { %v8753_v50 = vadd.f32 %v1899_v44, %v1811_v0  ;;  %v282_v0 = vld [vmem:[%s8189_s11 + $0x60] sm:$0xff]  ;;  %v8806_v24 = vpack.c.b16 %v8782_v59, %v794_v53  ;;  %v1364_v42 = vrot.slane %v11040_v58, 4  ;;  %v1371_v19 = vshll.u32 %v941_v20, 16 }
  0xe9   : > { %v1812_v8 = vpop.f32.mrf.mxu1  ;;  %v316_v6 = vpack.c.bf16 %v282_v0, %v282_v0  ;;  %v2117_v11 = vrot.slane %v2115_v16, 4  ;;  %v284_v16 = vld [vmem:[%s8189_s11 + $0x70] sm:$0xff] }
  0xea   : > { %v1813_v38 = vadd.f32 %v1812_v8, %v1723_v23  ;;  %v1380_v8 = vshll.u32 %v1003_v28, 16  ;;  %v11045_v0 = vshrl.u32 %v8806_v24, 16  ;;  %v1373_v58 = vrot.slane %v1371_v19, 4 }
  0xeb   : > { %v383_v5 = vunpack.c.l.b16 %v316_v6  ;;  %v317_v6 = vpack.c.bf16 %v283_v47, %v283_v47  ;;  %v1004_v47 = vrot.slane %v8806_v24, 5 }
  0xec   : > { %v1382_v28 = vrot.slane %v1380_v8, 4  ;;  %v8835_v8 = vpack.c.b16 %v794_v53, %v8721_v62  ;;  %v318_v53 = vpack.c.bf16 %v284_v16, %v284_v16 }
  0xed   : > { %v8769_v41 = vpop.f32.mrf.mxu3  ;;  %v8815_v61 = vpack.c.b16 %v383_v5, %v382_v56  ;;  %v384_v39 = vunpack.c.l.b16 %v317_v6 }
  0xee   : > { %11075 = vst [vmem:[#allocation12_spill] sm:$0xff] %v8835_v8 }
  0xef   : > { %v1901_v49 = vpop.f32.mrf.mxu2  ;;  %v1726_v23 = vpop.f32.mrf.mxu0  ;;  %v410_v62 = vpack.c.b16 %v384_v39, %v383_v5 }
  0xf0   : > { %v8784_v44 = vadd.f32 %v1901_v49, %v1813_v38  ;;  %v1368_v38 = vshrl.u32 %v941_v20, 16  ;;  %v945_v20 = vrot.slane %v11045_v0, 4 }
  0xf1   : > { %v1815_v7 = vpop.f32.mrf.mxu1 }
  0xf2   : > { %1765 = vmatmul.bf16.gmra.mxu0 %v1339_v10  ;;  %2650 = vmatmul.bf16.gmra.mxu3 %v2092_v32  ;;  %v1816_v22 = vadd.f32 %v1815_v7, %v1726_v23  ;;  %v11043_v10 = vshll.u32 %v8806_v24, 16  ;;  %v2114_v32 = vrot.slane %v2112_v4, 3  ;;  %v8821_v7 = vor.u32 %v1364_v42, %v1361_v37 }
  0xf4   : > { %1943 = vmatmul.bf16.gmra.mxu2 %v1357_v2  ;;  %1854 = vmatmul.bf16.gmra.mxu1 %v1348_v35  ;;  %v1379_v2 = vrot.slane %v1377_v31, 3  ;;  %v1370_v35 = vrot.slane %v1368_v38, 3  ;;  %v948_v14 = vrot.slane %v11043_v10, 5  ;;  %v1366_v42 = vsel %vm1063_vm0, %v8757_v33, %v8821_v7 }
  0xf5   : > { %v8809_v48 = vpop.f32.mrf.mxu3  ;;  %v1005_v33 = vsel %vm584_vm1, %v1002_v13, %v1004_v47 }
  0xf6   : > { %v8829_v4 = vor.u32 %v1382_v28, %v1379_v2  ;;  %v8841_v38 = vor.u32 %v1373_v58, %v1370_v35  ;;  %v949_v19 = vor.u32 %v948_v14, %v945_v20  ;;  %v11044_v2 = vshrl.u32 %v8835_v8, 16  ;;  %v285_v35 = vld [vmem:[%s8189_s11 + $0x78] sm:$0xff] }
  0xf7   : > { %v1904_v40 = vpop.f32.mrf.mxu2  ;;  %v1728_v23 = vpop.f32.mrf.mxu0  ;;  %v11048_v58 = vshll.u32 %v8835_v8, 16  ;;  %v2139_v28 = vshrl.u32 %v410_v62, 16  ;;  %v385_v20 = vunpack.c.l.b16 %v318_v53  ;;  %v1404_v13 = vshrl.u32 %v1005_v33, 16 }
  0xf8   : > { %v8819_v49 = vadd.f32 %v1904_v40, %v1816_v22  ;;  %v8827_v40 = vor.u32 %v2117_v11, %v2114_v32  ;;  %v1384_v6 = vsel %vm1063_vm0, %v8766_v18, %v8829_v4  ;;  %v950_v18 = vsel %vm437_vm2, %v8780_v51, %v949_v19 }
  0xf9   : > { %v1817_v56 = vpop.f32.mrf.mxu1 }
  0xfa   : > { %v1818_v22 = vadd.f32 %v1817_v56, %v1728_v23  ;;  %v2119_v11 = vsel %vm1063_vm0, %v8763_v21, %v8827_v40  ;;  %v1375_v21 = vsel %vm1063_vm0, %v8778_v17, %v8841_v38  ;;  %v2142_v56 = vshll.u32 %v410_v62, 16  ;;  %v7665_v62 = vld [vmem:[%s8154_s22 + $0xb8] sm:$0xff] }
  0xfb   : > { %v1388_v17 = vrot.slane %v11044_v2, 3  ;;  %v7650_v2 = vld [vmem:[%s8154_s22 + $0x40] sm:$0xff]  ;;  %2805 = vmatpush.bf16.msrb.mxu1 %v7665_v62 }
  0xfc   : > { %v2144_v10 = vrot.slane %v2142_v56, 4  ;;  %2723 = vmatpush.bf16.msrb.mxu0 %v7650_v2  ;;  %v815_v56 = vpack.c.b16 %v8231_v55, %v8782_v59 }
  0xfd   : > { %v8832_v31 = vpop.f32.mrf.mxu3 }
  0xff   : > { %v1906_v37 = vpop.f32.mrf.mxu2  ;;  %v1731_v32 = vpop.f32.mrf.mxu0  ;;  %2806 = vmatpush.bf16.msrb.mxu1 %v7664_v52 }
 0x100   : > { %v8843_v23 = vadd.f32 %v1906_v37, %v1818_v22  ;;  %v1407_v22 = vshll.u32 %v1005_v33, 16  ;;  %v8866_v37 = vpack.c.b16 %v385_v20, %v384_v39  ;;  %v1406_v39 = vrot.slane %v1404_v13, 3  ;;  %v286_v13 = vld [vmem:[%s8189_s11 + $0x80] sm:$0xff] }
 0x101   : > { %v1820_v14 = vpop.f32.mrf.mxu1  ;;  %v320_v62 = vpack.c.bf16 %v286_v13, %v286_v13  ;;  %v321_v13 = vpack.c.bf16 %v287_v1, %v287_v1 }
 0x102   : > { %1770 = vmatmul.bf16.gmra.mxu0 %v1366_v42  ;;  %2655 = vmatmul.bf16.gmra.mxu3 %v2119_v11  ;;  %v1821_v5 = vadd.f32 %v1820_v14, %v1731_v32  ;;  %v1395_v32 = vshrl.u32 %v950_v18, 16  ;;  %v1398_v11 = vshll.u32 %v950_v18, 16  ;;  %v1391_v14 = vrot.slane %v11048_v58, 4 }
 0x103   : > { %v1409_v0 = vrot.slane %v1407_v22, 4 }
 0x104   : > { %1948 = vmatmul.bf16.gmra.mxu2 %v1384_v6  ;;  %1859 = vmatmul.bf16.gmra.mxu1 %v1375_v21  ;;  %v319_v6 = vpack.c.bf16 %v285_v35, %v285_v35  ;;  %v2141_v21 = vrot.slane %v2139_v28, 3  ;;  %v1400_v18 = vrot.slane %v1398_v11, 4 }
 0x105   : > { %v1880_v16 = vpop.f32.mrf.mxu3  ;;  %v8884_v28 = vor.u32 %v1409_v0, %v1406_v39  ;;  %v7663_v0 = vld [vmem:[%s8154_s22 + $0xa8] sm:$0xff] }
 0x106   : > { %v8869_v42 = vadd.f32 %v1880_v16, %v8747_v60  ;;  %v1397_v16 = vrot.slane %v1395_v32, 3  ;;  %v386_v35 = vunpack.c.l.b16 %v319_v6  ;;  %v8882_v29 = vor.u32 %v2144_v10, %v2141_v21  ;;  %2807 = vmatpush.bf16.msrb.mxu1 %v7663_v0  ;;  %v7662_v21 = vld [vmem:[%s8154_s22 + $0xa0] sm:$0xff] }
 0x107   : > { %v1909_v51 = vpop.f32.mrf.mxu2  ;;  %v1733_v33 = vpop.f32.mrf.mxu0  ;;  %v959_v10 = vsel %vm437_vm2, %v949_v19, %v8368_v15  ;;  %v8912_v15 = vpack.c.b16 %v8611_v25, %v8208_v30  ;;  %v1413_v19 = vshrl.u32 %v815_v56, 16 }
 0x108   : > { %v8872_v53 = vadd.f32 %v1909_v51, %v1821_v5  ;;  %v8880_v51 = vor.u32 %v1391_v14, %v1388_v17  ;;  %v8894_v11 = vor.u32 %v1400_v18, %v1397_v16  ;;  %v411_v17 = vpack.c.b16 %v386_v35, %v385_v20 }
 0x109   : > { %v1822_v60 = vpop.f32.mrf.mxu1  ;;  %v2146_v52 = vsel %vm1063_vm0, %v8827_v40, %v8882_v29  ;;  %v1416_v20 = vshll.u32 %v815_v56, 16  ;;  %v1422_v40 = vshrl.u32 %v959_v10, 16  ;;  %v447_v16 = vshrl.u32 %v8912_v15, 16 }
 0x10a   : > { %v8878_v5 = vadd.f32 %v1822_v60, %v1733_v33  ;;  %v1393_v55 = vsel %vm1063_vm0, %v8821_v7, %v8880_v51  ;;  %v1411_v7 = vsel %vm1063_vm0, %v8829_v4, %v8884_v28  ;;  %v1425_v33 = vshll.u32 %v959_v10, 16  ;;  %2808 = vmatpush.bf16.msrb.mxu1 %v7662_v21 }
 0x10b   : > { %v2166_v25 = vshrl.u32 %v411_v17, 16  ;;  %v2169_v4 = vshll.u32 %v411_v17, 16  ;;  %v387_v60 = vunpack.c.l.b16 %v320_v62  ;;  %v1415_v18 = vrot.slane %v1413_v19, 3 }
 0x10c   : > { %v1418_v56 = vrot.slane %v1416_v20, 4  ;;  %v1424_v10 = vrot.slane %v1422_v40, 3  ;;  %v1427_v0 = vrot.slane %v1425_v33, 4  ;;  %v442_v40 = vshll.u32 %v8556_v9, 16 }
 0x10d   : > { %v1882_v2 = vpop.f32.mrf.mxu3  ;;  %v2168_v62 = vrot.slane %v2166_v25, 3  ;;  %v2171_v1 = vrot.slane %v2169_v4, 4  ;;  %v388_v33 = vunpack.c.l.b16 %v321_v13  ;;  %v7660_v4 = vld [vmem:[%s8154_s22 + $0x90] sm:$0xff] }
 0x10e   : > { %v8890_v22 = vadd.f32 %v1882_v2, %v8769_v41  ;;  %v1007_v41 = vsel %vm584_vm1, %v1004_v47, %v1006_v12  ;;  %v1402_v12 = vsel %vm1063_vm0, %v8841_v38, %v8894_v11  ;;  %v450_v2 = vshll.u32 %v8912_v15, 16 }
 0x10f   : > { %v8892_v32 = vpop.f32.mrf.mxu2  ;;  %v1736_v6 = vpop.f32.mrf.mxu0  ;;  %v1431_v47 = vshrl.u32 %v1007_v41, 16  ;;  %v1434_v30 = vshll.u32 %v1007_v41, 16  ;;  %v8944_v58 = vor.u32 %v2171_v1, %v2168_v62  ;;  %v412_v13 = vpack.c.b16 %v388_v33, %v387_v60 }
 0x110   : > { %v452_v25 = vrot.slane %v450_v2, 5 }
 0x111   : > { %v1825_v14 = vpop.f32.mrf.mxu1  ;;  %v1436_v41 = vrot.slane %v1434_v30, 4  ;;  %v449_v30 = vrot.slane %v447_v16, 4 }
 0x112   : > { %1775 = vmatmul.bf16.gmra.mxu0 %v1393_v55  ;;  %2660 = vmatmul.bf16.gmra.mxu3 %v2146_v52  ;;  %v1826_v39 = vadd.f32 %v1825_v14, %v1736_v6  ;;  %v8924_v55 = vpack.c.b16 %v387_v60, %v386_v35  ;;  %v1433_v52 = vrot.slane %v1431_v47, 3  ;;  %v439_v14 = vshrl.u32 %v8556_v9, 16 }
 0x113   : > { %v8934_v35 = vor.u32 %v1418_v56, %v1415_v18  ;;  %v444_v47 = vrot.slane %v442_v40, 5  ;;  %v8947_v56 = vor.u32 %v452_v25, %v449_v30 }
 0x114   : > { %1953 = vmatmul.bf16.gmra.mxu2 %v1411_v7  ;;  %1864 = vmatmul.bf16.gmra.mxu1 %v1402_v12  ;;  %v7661_v7 = vld [vmem:[%s8154_s22 + $0x98] sm:$0xff]  ;;  %v441_v12 = vrot.slane %v439_v14, 4 }
 0x115   : > { %v1885_v38 = vpop.f32.mrf.mxu3  ;;  %2809 = vmatpush.bf16.msrb.mxu1 %v7661_v7  ;;  %v1420_v2 = vsel %vm1063_vm0, %v8880_v51, %v8934_v35  ;;  %v7659_v51 = vld [vmem:[%s8154_s22 + $0x88] sm:$0xff] }
 0x116   : > { %v8927_v6 = vadd.f32 %v1885_v38, %v8809_v48  ;;  %v288_v48 = vld [vmem:[%s8189_s11 + $0x90] sm:$0xff]  ;;  %v8939_v38 = vor.u32 %v1436_v41, %v1433_v52  ;;  %v445_v18 = vor.u32 %v444_v47, %v441_v12  ;;  %v11053_v52 = vrot.slane %v8912_v15, 5 }
 0x117   : > { %v1914_v17 = vpop.f32.mrf.mxu2  ;;  %v1738_v20 = vpop.f32.mrf.mxu0  ;;  %v322_v7 = vpack.c.bf16 %v288_v48, %v288_v48  ;;  %v2193_v48 = vshrl.u32 %v412_v13, 16 }
 0x118   : > { %v8930_v19 = vadd.f32 %v1914_v17, %v1826_v39  ;;  %v8937_v39 = vor.u32 %v1427_v0, %v1424_v10  ;;  %v454_v10 = vsel %vm437_vm2, %v445_v18, %v8947_v56  ;;  %v585_v0 = vrot.slane %v8556_v9, 5 }
 0x119   : > { %v1827_v21 = vpop.f32.mrf.mxu1  ;;  %2810 = vmatpush.bf16.msrb.mxu1 %v7660_v4  ;;  %v1438_v43 = vsel %vm1063_vm0, %v8884_v28, %v8939_v38  ;;  %v2173_v9 = vsel %vm1063_vm0, %v8882_v29, %v8944_v58  ;;  %v2000_v14 = vshll.u32 %v445_v18, 16  ;;  %v2008_v40 = vshll.u32 %v454_v10, 16 }
 0x11a   : > { %v8942_v17 = vadd.f32 %v1827_v21, %v1738_v20  ;;  %v1429_v60 = vsel %vm1063_vm0, %v8894_v11, %v8937_v39  ;;  %v1997_v20 = vshrl.u32 %v445_v18, 16  ;;  %v389_v12 = vunpack.c.l.b16 %v322_v7  ;;  %v7658_v18 = vld [vmem:[%s8154_s22 + $0x80] sm:$0xff] }
 0x11b   : > { %v587_v28 = vsel %vm584_vm1, %v585_v0, %v11053_v52  ;;  %v2002_v11 = vrot.slane %v2000_v14, 4  ;;  %v2010_v25 = vrot.slane %v2008_v40, 4  ;;  %v2014_v21 = vshrl.u32 %v585_v0, 16  ;;  %v7713_v14 = vld [vmem:[%s8154_s22 + $0x238] sm:$0xff] }
 0x11c   : > { %v1999_v47 = vrot.slane %v1997_v20, 3  ;;  %v2196_v29 = vshll.u32 %v412_v13, 16  ;;  %v289_v20 = vld [vmem:[%s8189_s11 + $0x98] sm:$0xff]  ;;  %v8976_v59 = vpack.c.b16 %v389_v12, %v388_v33  ;;  %v2195_v13 = vrot.slane %v2193_v48, 3  ;;  %4117 = vmatpush.bf16.msra.mxu0 %v7713_v14 }
 0x11d   : > { %v1887_v16 = vpop.f32.mrf.mxu3  ;;  %2811 = vmatpush.bf16.msrb.mxu1 %v7659_v51  ;;  %v2025_v51 = vshll.u32 %v587_v28, 16  ;;  %v456_v48 = vshrl.u32 %v8648_v3, 16  ;;  %v588_v14 = vrot.slane %v8648_v3, 5 }
 0x11e   : > { %v8957_v41 = vadd.f32 %v1887_v16, %v8832_v31  ;;  %v2005_v31 = vshrl.u32 %v454_v10, 16  ;;  %v2017_v16 = vshll.u32 %v585_v0, 16  ;;  %v2022_v10 = vshrl.u32 %v587_v28, 16 }
 0x11f   : > { %v8959_v62 = vpop.f32.mrf.mxu2  ;;  %v1741_v1 = vpop.f32.mrf.mxu0  ;;  %v2003_v8 = vor.u32 %v2002_v11, %v1999_v47  ;;  %v323_v47 = vpack.c.bf16 %v289_v20, %v289_v20 }
 0x120   : > { %v2007_v30 = vrot.slane %v2005_v31, 3  ;;  %v2016_v31 = vrot.slane %v2014_v21, 3  ;;  %v2019_v40 = vrot.slane %v2017_v16, 4  ;;  %v2024_v46 = vrot.slane %v2022_v10, 3 }
 0x121   : > { %v1830_v4 = vpop.f32.mrf.mxu1  ;;  %2812 = vmatpush.bf16.msrb.mxu1 %v7658_v18  ;;  %v458_v21 = vrot.slane %v456_v48, 4  ;;  %v390_v16 = vunpack.c.l.b16 %v323_v47 }
 0x122   : > { %1780 = vmatmul.bf16.gmra.mxu0 %v1420_v2  ;;  %2665 = vmatmul.bf16.gmra.mxu3 %v2173_v9  ;;  %v1831_v7 = vadd.f32 %v1830_v4, %v1741_v1  ;;  %v8978_v52 = vor.u32 %v2010_v25, %v2007_v30  ;;  %v2198_v9 = vrot.slane %v2196_v29, 4  ;;  %v2020_v28 = vor.u32 %v2019_v40, %v2016_v31 }
 0x123   : > { %v459_v25 = vshll.u32 %v8648_v3, 16 }
 0x124   : > { %1958 = vmatmul.bf16.gmra.mxu2 %v1438_v43  ;;  %1869 = vmatmul.bf16.gmra.mxu1 %v1429_v60  ;;  %v8983_v0 = vsel %vm1063_vm0, %v2003_v8, %v8978_v52  ;;  %v2027_v43 = vrot.slane %v2025_v51, 4  ;;  %v8998_v29 = vor.u32 %v2198_v9, %v2195_v13  ;;  %v1447_v13 = vsel %vm1063_vm0, %v8934_v35, %v8259_v26 }
 0x125   : > { %v1969_v2 = vpop.f32.mrf.mxu3  ;;  %v461_v4 = vrot.slane %v459_v25, 5 }
 0x126   : > { %v8986_v1 = vadd.f32 %v1969_v2, %v8869_v42  ;;  %v2028_v60 = vor.u32 %v2027_v43, %v2024_v46  ;;  %v290_v42 = vld [vmem:[%s8189_s11 + $0xa0] sm:$0xff]  ;;  %v413_v2 = vpack.c.b16 %v390_v16, %v389_v12  ;;  %v2200_v9 = vsel %vm1063_vm0, %v8944_v58, %v8998_v29 }
 0x127   : > { %v1919_v33 = vpop.f32.mrf.mxu2  ;;  %v1743_v30 = vpop.f32.mrf.mxu0  ;;  %v462_v51 = vor.u32 %v461_v4, %v458_v21  ;;  %v324_v20 = vpack.c.bf16 %v290_v42, %v290_v42  ;;  %v1456_v58 = vsel %vm1063_vm0, %v8937_v39, %v8399_v34  ;;  %v291_v42 = vld [vmem:[%s8189_s11 + $0xa8] sm:$0xff] }
 0x128   : > { %v8988_v11 = vadd.f32 %v1919_v33, %v1831_v7  ;;  %v8993_v8 = vsel %vm1063_vm0, %v2020_v28, %v2028_v60  ;;  %v2223_v21 = vshll.u32 %v413_v2, 16 }
 0x129   : > { %v1832_v18 = vpop.f32.mrf.mxu1  ;;  %v463_v46 = vsel %vm437_vm2, %v8947_v56, %v462_v51  ;;  %v11077_v56 = vrot.slane %v8912_v15, 5  ;;  %v391_v48 = vunpack.c.l.b16 %v324_v20  ;;  %v2220_v15 = vshrl.u32 %v413_v2, 16 }
 0x12a   : > { %v8996_v10 = vadd.f32 %v1832_v18, %v1743_v30  ;;  %v2040_v43 = vshrl.u32 %v463_v46, 16  ;;  %v2043_v47 = vshll.u32 %v463_v46, 16 }
 0x12b   : > { %v589_v28 = vsel %vm584_vm1, %v11077_v56, %v588_v14  ;;  %v2222_v2 = vrot.slane %v2220_v15, 3  ;;  %v468_v56 = vshll.u32 %v8697_v63, 16 }
 0x12c   : > { %v2042_v12 = vrot.slane %v2040_v43, 3  ;;  %v2049_v30 = vshrl.u32 %v589_v28, 16  ;;  %v2045_v26 = vrot.slane %v2043_v47, 4  ;;  %v2052_v35 = vshll.u32 %v589_v28, 16 }
 0x12d   : > { %v1971_v7 = vpop.f32.mrf.mxu3 }
 0x12e   : > { %v9006_v40 = vadd.f32 %v1971_v7, %v8890_v22  ;;  %v1465_v22 = vsel %vm1063_vm0, %v8939_v38, %v8508_v45  ;;  %v2051_v4 = vrot.slane %v2049_v30, 3  ;;  %v9026_v7 = vpack.c.b16 %v391_v48, %v390_v16  ;;  %v292_v30 = vld [vmem:[%s8189_s11 + $0xb0] sm:$0xff] }
 0x12f   : > { %v9003_v31 = vpop.f32.mrf.mxu2  ;;  %v1746_v33 = vpop.f32.mrf.mxu0  ;;  %v2046_v45 = vor.u32 %v2045_v26, %v2042_v12  ;;  %v2054_v38 = vrot.slane %v2052_v35, 4  ;;  %v2225_v16 = vrot.slane %v2223_v21, 4 }
 0x130   : > { %11076 = vst [vmem:[#allocation13_spill] sm:$0xff] %v9006_v40 }
 0x131   : > { %v1835_v25 = vpop.f32.mrf.mxu1  ;;  %v9030_v46 = vsel %vm1063_vm0, %v8978_v52, %v2046_v45  ;;  %v9032_v43 = vor.u32 %v2054_v38, %v2051_v4  ;;  %v465_v52 = vshrl.u32 %v8697_v63, 16  ;;  %v9048_v35 = vor.u32 %v2225_v16, %v2222_v2 }
 0x132   : > { %1785 = vmatmul.bf16.gmra.mxu0 %v1447_v13  ;;  %2670 = vmatmul.bf16.gmra.mxu3 %v2200_v9  ;;  %v1836_v18 = vadd.f32 %v1835_v25, %v1746_v33  ;;  %v325_v33 = vpack.c.bf16 %v291_v42, %v291_v42  ;;  %v7697_v25 = vld [vmem:[%s8154_s22 + $0x1b8] sm:$0xff] }
 0x133   : > { %v9041_v47 = vsel %vm1063_vm0, %v2028_v60, %v9032_v43  ;;  %v467_v28 = vrot.slane %v465_v52, 4  ;;  %3939 = vmatpush.bf16.msrb.mxu2 %v7697_v25  ;;  %v326_v60 = vpack.c.bf16 %v292_v30, %v292_v30  ;;  %v2227_v16 = vsel %vm1063_vm0, %v8998_v29, %v9048_v35  ;;  %v293_v29 = vld [vmem:[%s8189_s11 + $0xb8] sm:$0xff] }
 0x134   : > { %1963 = vmatmul.bf16.gmra.mxu2 %v1465_v22  ;;  %1874 = vmatmul.bf16.gmra.mxu1 %v1456_v58  ;;  %v470_v22 = vrot.slane %v468_v56, 5  ;;  %v392_v12 = vunpack.c.l.b16 %v325_v33  ;;  %v7704_v58 = vld [vmem:[%s8154_s22 + $0x1f0] sm:$0xff] }
 0x135   : > { %v1974_v20 = vpop.f32.mrf.mxu3  ;;  %4029 = vmatpush.bf16.msra.mxu3 %v7704_v58  ;;  %v393_v52 = vunpack.c.l.b16 %v326_v60  ;;  %v7712_v58 = vld [vmem:[%s8154_s22 + $0x230] sm:$0xff] }
 0x136   : > { %v9035_v39 = vadd.f32 %v1974_v20, %v8927_v6  ;;  %v471_v15 = vor.u32 %v470_v22, %v467_v28  ;;  %v414_v20 = vpack.c.b16 %v392_v12, %v391_v48  ;;  %4118 = vmatpush.bf16.msra.mxu0 %v7712_v58 }
 0x137   : > { %v1924_v34 = vpop.f32.mrf.mxu2  ;;  %v1748_v9 = vpop.f32.mrf.mxu0  ;;  %v9067_v25 = vpack.c.b16 %v393_v52, %v392_v12 }
 0x138   : > { %v9037_v13 = vadd.f32 %v1924_v34, %v1836_v18  ;;  %v472_v4 = vsel %vm437_vm2, %v462_v51, %v471_v15  ;;  %v590_v18 = vrot.slane %v8697_v63, 5  ;;  %v2247_v48 = vshrl.u32 %v414_v20, 16 }
 0x139   : > { %v1837_v6 = vpop.f32.mrf.mxu1  ;;  %v2067_v34 = vshrl.u32 %v472_v4, 16  ;;  %v2070_v33 = vshll.u32 %v472_v4, 16  ;;  %v2250_v22 = vshll.u32 %v414_v20, 16 }
 0x13a   : > { %v9046_v26 = vadd.f32 %v1837_v6, %v1748_v9  ;;  %v591_v51 = vsel %vm584_vm1, %v588_v14, %v590_v18  ;;  %v2249_v20 = vrot.slane %v2247_v48, 3 }
 0x13b   : > { %v2069_v63 = vrot.slane %v2067_v34, 3  ;;  %v2076_v9 = vshrl.u32 %v591_v51, 16  ;;  %v2072_v56 = vrot.slane %v2070_v33, 4 }
 0x13d   : > { %v1976_v21 = vpop.f32.mrf.mxu3  ;;  %v2078_v6 = vrot.slane %v2076_v9, 3  ;;  %v2073_v3 = vor.u32 %v2072_v56, %v2069_v63 }
 0x13e   : > { %v9057_v38 = vadd.f32 %v1976_v21, %v8957_v41  ;;  %v2079_v41 = vshll.u32 %v591_v51, 16 }
 0x13f   : > { %v9054_v42 = vpop.f32.mrf.mxu2  ;;  %v1751_v2 = vpop.f32.mrf.mxu0  ;;  %v9072_v60 = vsel %vm1063_vm0, %v2046_v45, %v2073_v3  ;;  %v477_v45 = vshll.u32 %v8749_v54, 16 }
 0x140   : > { %11078 = vst [vmem:[#allocation14_spill] sm:$0xff] %v9057_v38  ;;  %v2081_v14 = vrot.slane %v2079_v41, 4 }
 0x141   : > { %v1840_v28 = vpop.f32.mrf.mxu1  ;;  %v479_v9 = vrot.slane %v477_v45, 5 }
 0x142   : > { %2675 = vmatmul.bf16.gmra.mxu3 %v2227_v16  ;;  %2724 = vmatmul.bf16.vlgmr.msrb.gmra.mxu0 %v8983_v0  ;;  %v1841_v30 = vadd.f32 %v1840_v28, %v1751_v2  ;;  %v2082_v4 = vor.u32 %v2081_v14, %v2078_v6  ;;  %v2252_v2 = vrot.slane %v2250_v22, 4  ;;  %v327_v16 = vpack.c.bf16 %v293_v29, %v293_v29 }
 0x144   : > { %2813 = vmatmul.bf16.vlgmr.msrb.gmra.mxu1 %v8993_v8  ;;  %v9081_v51 = vsel %vm1063_vm0, %v9032_v43, %v2082_v4  ;;  %v474_v8 = vshrl.u32 %v8749_v54, 16  ;;  %v9085_v41 = vunpack.c.l.b16 %v327_v16  ;;  %v2253_v28 = vor.u32 %v2252_v2, %v2249_v20 }
 0x145   : > { %v2636_v21 = vpop.f32.mrf.mxu3 }
 0x146   : > { %v9075_v0 = vadd.f32 %v2636_v21, %v8753_v50  ;;  %v476_v63 = vrot.slane %v474_v8, 4  ;;  %v415_v58 = vpack.c.b16 %v9085_v41, %v393_v52  ;;  %v2254_v16 = vsel %vm1063_vm0, %v9048_v35, %v2253_v28 }
 0x147   : > { %v1929_v34 = vpop.f32.mrf.mxu2  ;;  %v1753_v33 = vpop.f32.mrf.mxu0 }
 0x148   : > { %v9077_v12 = vadd.f32 %v1929_v34, %v1841_v30  ;;  %v480_v48 = vor.u32 %v479_v9, %v476_v63  ;;  %v592_v30 = vrot.slane %v8749_v54, 5  ;;  %v2277_v45 = vshll.u32 %v415_v58, 16 }
 0x149   : > { %v1842_v56 = vpop.f32.mrf.mxu1 }
 0x14a   : > { %v9087_v50 = vadd.f32 %v1842_v56, %v1753_v33  ;;  %v481_v6 = vsel %vm437_vm2, %v471_v15, %v480_v48  ;;  %v593_v20 = vsel %vm584_vm1, %v590_v18, %v592_v30 }
 0x14b   : > { %v2094_v14 = vshrl.u32 %v481_v6, 16  ;;  %v2097_v21 = vshll.u32 %v481_v6, 16  ;;  %v2103_v15 = vshrl.u32 %v593_v20, 16  ;;  %v2106_v8 = vshll.u32 %v593_v20, 16  ;;  %v7696_v20 = vld [vmem:[%s8154_s22 + $0x1b0] sm:$0xff] }
 0x14c   : > { %3940 = vmatpush.bf16.msrb.mxu2 %v7696_v20 }
 0x14d   : > { %v2638_v22 = vpop.f32.mrf.mxu3  ;;  %v2096_v2 = vrot.slane %v2094_v14, 3  ;;  %v2099_v33 = vrot.slane %v2097_v21, 4  ;;  %v2105_v9 = vrot.slane %v2103_v15, 3  ;;  %v2108_v56 = vrot.slane %v2106_v8, 4 }
 0x14e   : > { %v9094_v29 = vadd.f32 %v2638_v22, %v8784_v44  ;;  %v2274_v44 = vshrl.u32 %v415_v58, 16  ;;  %v2279_v21 = vrot.slane %v2277_v45, 4 }
 0x14f   : > { %v9091_v43 = vpop.f32.mrf.mxu2  ;;  %v1756_v34 = vpop.f32.mrf.mxu0  ;;  %v2100_v52 = vor.u32 %v2099_v33, %v2096_v2  ;;  %v2109_v18 = vor.u32 %v2108_v56, %v2105_v9 }
 0x151   : > { %v1845_v54 = vpop.f32.mrf.mxu1  ;;  %v9102_v22 = vsel %vm1063_vm0, %v2073_v3, %v2100_v52  ;;  %v483_v3 = vshrl.u32 %v8815_v61, 16 }
 0x152   : > { %2680 = vmatmul.bf16.gmra.mxu3 %v2254_v16  ;;  %2729 = vmatmul.bf16.gmra.mxu0 %v9030_v46  ;;  %v1846_v63 = vadd.f32 %v1845_v54, %v1756_v34  ;;  %v2276_v46 = vrot.slane %v2274_v44, 3  ;;  %v9111_v34 = vsel %vm1063_vm0, %v2082_v4, %v2109_v18  ;;  %v7703_v54 = vld [vmem:[%s8154_s22 + $0x1e8] sm:$0xff]  ;;  %v594_v4 = vrot.slane %v8815_v61, 5 }
 0x153   : > { %v485_v2 = vrot.slane %v483_v3, 4  ;;  %4030 = vmatpush.bf16.msra.mxu3 %v7703_v54 }
 0x154   : > { %2818 = vmatmul.bf16.gmra.mxu1 %v9041_v47  ;;  %v486_v47 = vshll.u32 %v8815_v61, 16 }
 0x155   : > { %v2641_v35 = vpop.f32.mrf.mxu3 }
 0x156   : > { %v9106_v14 = vadd.f32 %v2641_v35, %v8819_v49  ;;  %v488_v33 = vrot.slane %v486_v47, 5  ;;  %v2280_v49 = vor.u32 %v2279_v21, %v2276_v46  ;;  %v595_v46 = vsel %vm584_vm1, %v592_v30, %v594_v4 }
 0x157   : > { %v1934_v6 = vpop.f32.mrf.mxu2  ;;  %v1758_v16 = vpop.f32.mrf.mxu0  ;;  %v2130_v47 = vshrl.u32 %v595_v46, 16 }
 0x158   : > { %v9108_v58 = vadd.f32 %v1934_v6, %v1846_v63  ;;  %v489_v44 = vor.u32 %v488_v33, %v485_v2  ;;  %v2133_v2 = vshll.u32 %v595_v46, 16 }
 0x159   : > { %v1847_v15 = vpop.f32.mrf.mxu1 }
 0x15a   : > { %v9116_v8 = vadd.f32 %v1847_v15, %v1758_v16  ;;  %v490_v63 = vsel %vm437_vm2, %v480_v48, %v489_v44  ;;  %v2281_v16 = vsel %vm1063_vm0, %v2253_v28, %v2280_v49  ;;  %v7711_v15 = vld [vmem:[%s8154_s22 + $0x228] sm:$0xff]  ;;  %v2135_v54 = vrot.slane %v2133_v2, 4 }
 0x15b   : > { %v2121_v35 = vshrl.u32 %v490_v63, 16  ;;  %v2124_v6 = vshll.u32 %v490_v63, 16  ;;  %4119 = vmatpush.bf16.msra.mxu0 %v7711_v15 }
 0x15d   : > { %v2643_v45 = vpop.f32.mrf.mxu3  ;;  %v2123_v21 = vrot.slane %v2121_v35, 3  ;;  %v2126_v3 = vrot.slane %v2124_v6, 4  ;;  %v11079_v6 = vshrl.u32 %v8694_v36, 16 }
 0x15e   : > { %v9124_v56 = vadd.f32 %v2643_v45, %v8843_v23  ;;  %v2132_v23 = vrot.slane %v2130_v47, 3 }
 0x15f   : > { %v9121_v9 = vpop.f32.mrf.mxu2  ;;  %v1761_v20 = vpop.f32.mrf.mxu0  ;;  %v2127_v61 = vor.u32 %v2126_v3, %v2123_v21  ;;  %v495_v3 = vshll.u32 %v8866_v37, 16 }
 0x160   : > { %v2136_v30 = vor.u32 %v2135_v54, %v2132_v23 }
 0x161   : > { %v1850_v48 = vpop.f32.mrf.mxu1  ;;  %v9131_v45 = vsel %vm1063_vm0, %v2100_v52, %v2127_v61  ;;  %v497_v2 = vrot.slane %v495_v3, 5 }
 0x162   : > { %2685 = vmatmul.bf16.gmra.mxu3 %v2281_v16  ;;  %2734 = vmatmul.bf16.gmra.mxu0 %v9072_v60  ;;  %v1851_v33 = vadd.f32 %v1850_v48, %v1761_v20  ;;  %v2303_v60 = vrot.slane %v11079_v6, 3  ;;  %v11080_v20 = vshll.u32 %v8694_v36, 16  ;;  %v9144_v52 = vsel %vm1063_vm0, %v2109_v18, %v2136_v30 }
 0x163   : > { %v1912_v36 = vadd.f32 %v8892_v32, %v8878_v5  ;;  %v596_v18 = vrot.slane %v8866_v37, 5 }
 0x164   : > { %2823 = vmatmul.bf16.gmra.mxu1 %v9081_v51  ;;  %v2306_v16 = vrot.slane %v11080_v20, 4  ;;  %v492_v51 = vshrl.u32 %v8866_v37, 16 }
 0x165   : > { %v2646_v28 = vpop.f32.mrf.mxu3 }
 0x166   : > { %v9135_v35 = vadd.f32 %v2646_v28, %v8872_v53  ;;  %v494_v47 = vrot.slane %v492_v51, 4  ;;  %v2307_v15 = vor.u32 %v2306_v16, %v2303_v60  ;;  %v597_v60 = vsel %vm584_vm1, %v594_v4, %v596_v18 }
 0x167   : > { %v1939_v63 = vpop.f32.mrf.mxu2  ;;  %v1763_v21 = vpop.f32.mrf.mxu0  ;;  %v2157_v5 = vshrl.u32 %v597_v60, 16  ;;  %v2160_v32 = vshll.u32 %v597_v60, 16 }
 0x168   : > { %v9141_v46 = vadd.f32 %v1939_v63, %v1851_v33  ;;  %v498_v23 = vor.u32 %v497_v2, %v494_v47  ;;  %v7695_v2 = vld [vmem:[%s8154_s22 + $0x1a8] sm:$0xff] }
 0x169   : > { %v1852_v53 = vpop.f32.mrf.mxu1  ;;  %3941 = vmatpush.bf16.msrb.mxu2 %v7695_v2 }
 0x16a   : > { %v9148_v48 = vadd.f32 %v1852_v53, %v1763_v21  ;;  %v499_v54 = vsel %vm437_vm2, %v489_v44, %v498_v23  ;;  %v2308_v21 = vsel %vm1063_vm0, %v2280_v49, %v2307_v15  ;;  %v2159_v53 = vrot.slane %v2157_v5, 3 }
 0x16b   : > { %v2148_v6 = vshrl.u32 %v499_v54, 16  ;;  %v2151_v20 = vshll.u32 %v499_v54, 16 }
 0x16d   : > { %v2648_v33 = vpop.f32.mrf.mxu3  ;;  %v2150_v16 = vrot.slane %v2148_v6, 3  ;;  %v2153_v3 = vrot.slane %v2151_v20, 4 }
 0x16e   : > { %v9156_v63 = vadd.f32 %v2648_v33, %v1912_v36  ;;  %v2162_v36 = vrot.slane %v2160_v32, 4 }
 0x16f   : > { %v9154_v28 = vpop.f32.mrf.mxu2  ;;  %v1766_v51 = vpop.f32.mrf.mxu0  ;;  %v2154_v37 = vor.u32 %v2153_v3, %v2150_v16  ;;  %v504_v3 = vshll.u32 %v8924_v55, 16 }
 0x170   : > { %11081 = vst [vmem:[#allocation15_spill] sm:$0xff] %v9154_v28  ;;  %v2163_v4 = vor.u32 %v2162_v36, %v2159_v53  ;;  %v7702_v53 = vld [vmem:[%s8154_s22 + $0x1e0] sm:$0xff] }
 0x171   : > { %v1855_v47 = vpop.f32.mrf.mxu1  ;;  %v9163_v33 = vsel %vm1063_vm0, %v2127_v61, %v2154_v37  ;;  %v506_v32 = vrot.slane %v504_v3, 5  ;;  %4031 = vmatpush.bf16.msra.mxu3 %v7702_v53  ;;  %v301_v53 = vld [vmem:[%s8189_s11 + $0xf8] sm:$0xff] }
 0x172   : > { %2690 = vmatmul.bf16.gmra.mxu3 %v2308_v21  ;;  %2739 = vmatmul.bf16.gmra.mxu0 %v9102_v22  ;;  %v1856_v44 = vadd.f32 %v1855_v47, %v1766_v51  ;;  %v11082_v22 = vshrl.u32 %v8744_v27, 16  ;;  %v11083_v51 = vshll.u32 %v8744_v27, 16  ;;  %v9176_v16 = vsel %vm1063_vm0, %v2136_v30, %v2163_v4 }
 0x174   : > { %2828 = vmatmul.bf16.gmra.mxu1 %v9111_v34  ;;  %v2330_v20 = vrot.slane %v11082_v22, 3  ;;  %v2333_v21 = vrot.slane %v11083_v51, 4  ;;  %v501_v34 = vshrl.u32 %v8924_v55, 16 }
 0x175   : > { %v2651_v49 = vpop.f32.mrf.mxu3 }
 0x176   : > { %v9167_v6 = vadd.f32 %v2651_v49, %v8930_v19  ;;  %v503_v5 = vrot.slane %v501_v34, 4  ;;  %v9182_v2 = vor.u32 %v2333_v21, %v2330_v20  ;;  %v598_v49 = vrot.slane %v8924_v55, 5 }
 0x177   : > { %v1944_v54 = vpop.f32.mrf.mxu2  ;;  %v1768_v61 = vpop.f32.mrf.mxu0 }
 0x178   : > { %v9173_v60 = vadd.f32 %v1944_v54, %v1856_v44  ;;  %v507_v27 = vor.u32 %v506_v32, %v503_v5  ;;  %v1917_v44 = vadd.f32 %v8959_v62, %v8942_v17  ;;  %v2335_v21 = vsel %vm1063_vm0, %v2307_v15, %v9182_v2 }
 0x179   : > { %v1857_v19 = vpop.f32.mrf.mxu1  ;;  %v599_v17 = vsel %vm584_vm1, %v596_v18, %v598_v49  ;;  %v11086_v18 = vshrl.u32 %v8806_v24, 16 }
 0x17a   : > { %v9180_v47 = vadd.f32 %v1857_v19, %v1768_v61  ;;  %v508_v30 = vsel %vm437_vm2, %v498_v23, %v507_v27  ;;  %v2184_v34 = vshrl.u32 %v599_v17, 16  ;;  %v2187_v3 = vshll.u32 %v599_v17, 16  ;;  %v300_v19 = vld [vmem:[%s8189_s11 + $0xf0] sm:$0xff] }
 0x17b   : > { %v2175_v51 = vshrl.u32 %v508_v30, 16  ;;  %v2178_v61 = vshll.u32 %v508_v30, 16  ;;  %v2357_v30 = vrot.slane %v11086_v18, 3 }
 0x17c   : > { %11084 = vst [vmem:[#allocation16_spill] sm:$0xff] %v9180_v47  ;;  %v2186_v5 = vrot.slane %v2184_v34, 3  ;;  %v2189_v38 = vrot.slane %v2187_v3, 4  ;;  %v335_v34 = vpack.c.bf16 %v301_v53, %v301_v53 }
 0x17d   : > { %v2653_v36 = vpop.f32.mrf.mxu3  ;;  %v2177_v62 = vrot.slane %v2175_v51, 3  ;;  %v2180_v23 = vrot.slane %v2178_v61, 4  ;;  %v11087_v61 = vshll.u32 %v8806_v24, 16 }
 0x17e   : > { %v9191_v22 = vadd.f32 %v2653_v36, %v1917_v44  ;;  %v7710_v36 = vld [vmem:[%s8154_s22 + $0x220] sm:$0xff]  ;;  %v402_v24 = vunpack.c.l.b16 %v335_v34 }
 0x17f   : > { %v9189_v54 = vpop.f32.mrf.mxu2  ;;  %v1771_v20 = vpop.f32.mrf.mxu0  ;;  %v2181_v44 = vor.u32 %v2180_v23, %v2177_v62  ;;  %4120 = vmatpush.bf16.msra.mxu0 %v7710_v36  ;;  %v2360_v17 = vrot.slane %v11087_v61, 4  ;;  %v334_v62 = vpack.c.bf16 %v300_v19, %v300_v19  ;;  %v600_v61 = vrot.slane %v8976_v59, 5 }
 0x180   : > { %11085 = vst [vmem:[#allocation17_spill] sm:$0xff] %v9189_v54 }
 0x181   : > { %v1860_v55 = vpop.f32.mrf.mxu1  ;;  %v9204_v51 = vsel %vm1063_vm0, %v2154_v37, %v2181_v44  ;;  %v510_v37 = vshrl.u32 %v8976_v59, 16 }
 0x182   : > { %2695 = vmatmul.bf16.gmra.mxu3 %v2335_v21  ;;  %2744 = vmatmul.bf16.gmra.mxu0 %v9131_v45  ;;  %v1861_v32 = vadd.f32 %v1860_v55, %v1771_v20  ;;  %v2190_v21 = vor.u32 %v2189_v38, %v2186_v5  ;;  %v513_v38 = vshll.u32 %v8976_v59, 16 }
 0x183   : > { %v512_v55 = vrot.slane %v510_v37, 4 }
 0x184   : > { %2833 = vmatmul.bf16.gmra.mxu1 %v9144_v52  ;;  %v9214_v3 = vsel %vm1063_vm0, %v2163_v4, %v2190_v21  ;;  %v515_v5 = vrot.slane %v513_v38, 5 }
 0x185   : > { %v2656_v15 = vpop.f32.mrf.mxu3 }
 0x186   : > { %v9207_v20 = vadd.f32 %v2656_v15, %v8988_v11  ;;  %v9218_v11 = vunpack.c.l.b16 %v334_v62  ;;  %v302_v15 = vld [vmem:[%s8189_s11 + $0x100] sm:$0xff]  ;;  %v516_v53 = vor.u32 %v515_v5, %v512_v55 }
 0x187   : > { %v1949_v45 = vpop.f32.mrf.mxu2  ;;  %v1773_v23 = vpop.f32.mrf.mxu0  ;;  %v336_v4 = vpack.c.bf16 %v302_v15, %v302_v15 }
 0x188   : > { %v9211_v52 = vadd.f32 %v1949_v45, %v1861_v32  ;;  %v2361_v32 = vor.u32 %v2360_v17, %v2357_v30  ;;  %v517_v45 = vsel %vm437_vm2, %v507_v27, %v516_v53  ;;  %v419_v37 = vpack.c.b16 %v402_v24, %v9218_v11 }
 0x189   : > { %v1862_v36 = vpop.f32.mrf.mxu1  ;;  %v2202_v38 = vshrl.u32 %v517_v45, 16  ;;  %v601_v30 = vsel %vm584_vm1, %v598_v49, %v600_v61  ;;  %v403_v5 = vunpack.c.l.b16 %v336_v4 }
 0x18a   : > { %v9221_v19 = vadd.f32 %v1862_v36, %v1773_v23  ;;  %v2362_v34 = vsel %vm1063_vm0, %v9182_v2, %v2361_v32  ;;  %v7694_v23 = vld [vmem:[%s8154_s22 + $0x1a0] sm:$0xff]  ;;  %v2205_v36 = vshll.u32 %v517_v45, 16  ;;  %v2211_v55 = vshrl.u32 %v601_v30, 16 }
 0x18b   : > { %v2204_v17 = vrot.slane %v2202_v38, 3  ;;  %3942 = vmatpush.bf16.msrb.mxu2 %v7694_v23  ;;  %v2214_v15 = vshll.u32 %v601_v30, 16  ;;  %v9235_v28 = vpack.c.b16 %v403_v5, %v402_v24  ;;  %v522_v30 = vshll.u32 %v9026_v7, 16 }
 0x18c   : > { %11088 = vst [vmem:[#allocation18_spill] sm:$0xff] %v9221_v19  ;;  %v2207_v27 = vrot.slane %v2205_v36, 4  ;;  %v2385_v19 = vshll.u32 %v419_v37, 16  ;;  %v2213_v54 = vrot.slane %v2211_v55, 3 }
 0x18d   : > { %v9223_v18 = vpop.f32.mrf.mxu3  ;;  %v2216_v45 = vrot.slane %v2214_v15, 4 }
 0x18e   : > { %v2208_v2 = vor.u32 %v2207_v27, %v2204_v17  ;;  %v524_v17 = vrot.slane %v522_v30, 5 }
 0x18f   : > { %v9227_v40 = vpop.f32.mrf.mxu2  ;;  %v1776_v62 = vpop.f32.mrf.mxu0  ;;  %v2217_v4 = vor.u32 %v2216_v45, %v2213_v54 }
 0x190   : > { %11089 = vst [vmem:[#allocation19_spill] sm:$0xff] %v9227_v40  ;;  %v2382_v40 = vshrl.u32 %v419_v37, 16  ;;  %v9239_v38 = vsel %vm1063_vm0, %v2181_v44, %v2208_v2  ;;  %v2387_v37 = vrot.slane %v2385_v19, 4 }
 0x191   : > { %v1865_v59 = vpop.f32.mrf.mxu1 }
 0x192   : > { %2700 = vmatmul.bf16.gmra.mxu3 %v2362_v34  ;;  %2749 = vmatmul.bf16.gmra.mxu0 %v9163_v33  ;;  %v1866_v47 = vadd.f32 %v1865_v59, %v1776_v62  ;;  %v2384_v33 = vrot.slane %v2382_v40, 3  ;;  %v9247_v62 = vsel %vm1063_vm0, %v2190_v21, %v2217_v4  ;;  %v602_v21 = vrot.slane %v9026_v7, 5 }
 0x193   : > { %v420_v59 = vpack.c.b16 %v403_v5, %v403_v5 }
 0x194   : > { %2838 = vmatmul.bf16.gmra.mxu1 %v9176_v16  ;;  %v519_v16 = vshrl.u32 %v9026_v7, 16  ;;  %v2388_v27 = vor.u32 %v2387_v37, %v2384_v33  ;;  %v603_v33 = vsel %vm584_vm1, %v600_v61, %v602_v21 }
 0x195   : > { %v2661_v49 = vpop.f32.mrf.mxu3  ;;  %v2238_v30 = vshrl.u32 %v603_v33, 16  ;;  %v2409_v7 = vshrl.u32 %v420_v59, 16 }
 0x196   : > { %v9242_v34 = vadd.f32 %v2661_v49, %v9037_v13  ;;  %v521_v44 = vrot.slane %v519_v16, 4  ;;  %v7701_v13 = vld [vmem:[%s8154_s22 + $0x1d8] sm:$0xff] }
 0x197   : > { %v1954_v23 = vpop.f32.mrf.mxu2  ;;  %v1778_v24 = vpop.f32.mrf.mxu0  ;;  %4032 = vmatpush.bf16.msra.mxu3 %v7701_v13 }
 0x198   : > { %v9244_v36 = vadd.f32 %v1954_v23, %v1866_v47  ;;  %v525_v15 = vor.u32 %v524_v17, %v521_v44  ;;  %v2241_v44 = vshll.u32 %v603_v33, 16 }
 0x199   : > { %v1867_v55 = vpop.f32.mrf.mxu1 }
 0x19a   : > { %v9251_v54 = vadd.f32 %v1867_v55, %v1778_v24  ;;  %v526_v47 = vsel %vm437_vm2, %v516_v53, %v525_v15  ;;  %v2389_v24 = vsel %vm1063_vm0, %v2361_v32, %v2388_v27  ;;  %v2240_v55 = vrot.slane %v2238_v30, 3 }
 0x19b   : > { %v2229_v45 = vshrl.u32 %v526_v47, 16  ;;  %v2232_v49 = vshll.u32 %v526_v47, 16  ;;  %v2243_v5 = vrot.slane %v2241_v44, 4  ;;  %v2412_v47 = vshll.u32 %v420_v59, 16 }
 0x19c   : > { %11090 = vst [vmem:[#allocation20_spill] sm:$0xff] %v9251_v54 }
 0x19d   : > { %v9254_v40 = vpop.f32.mrf.mxu3  ;;  %v2231_v37 = vrot.slane %v2229_v45, 3  ;;  %v2234_v16 = vrot.slane %v2232_v49, 4  ;;  %v2244_v32 = vor.u32 %v2243_v5, %v2240_v55  ;;  %v2414_v33 = vrot.slane %v2412_v47, 4 }
 0x19e   : > { %v604_v55 = vrot.slane %v9067_v25, 5 }
 0x19f   : > { %v9258_v19 = vpop.f32.mrf.mxu2  ;;  %v1781_v23 = vpop.f32.mrf.mxu0  ;;  %v2235_v53 = vor.u32 %v2234_v16, %v2231_v37  ;;  %v531_v37 = vshll.u32 %v9067_v25, 16 }
 0x1a0   : > { %11091 = vst [vmem:[#allocation21_spill] sm:$0xff] %v9258_v19  ;;  %v7709_v19 = vld [vmem:[%s8154_s22 + $0x218] sm:$0xff] }
 0x1a1   : > { %v1870_v17 = vpop.f32.mrf.mxu1  ;;  %v9265_v54 = vsel %vm1063_vm0, %v2208_v2, %v2235_v53  ;;  %4121 = vmatpush.bf16.msra.mxu0 %v7709_v19  ;;  %v528_v2 = vshrl.u32 %v9067_v25, 16  ;;  %v533_v16 = vrot.slane %v531_v37, 5 }
 0x1a2   : > { %2705 = vmatmul.bf16.gmra.mxu3 %v2389_v24  ;;  %2754 = vmatmul.bf16.gmra.mxu0 %v9204_v51  ;;  %v1871_v13 = vadd.f32 %v1870_v17, %v1781_v23  ;;  %v2411_v51 = vrot.slane %v2409_v7, 3  ;;  %v9272_v24 = vsel %vm1063_vm0, %v2217_v4, %v2244_v32 }
 0x1a4   : > { %2843 = vmatmul.bf16.gmra.mxu1 %v9214_v3  ;;  %v530_v3 = vrot.slane %v528_v2, 4  ;;  %v2415_v44 = vor.u32 %v2414_v33, %v2411_v51 }
 0x1a5   : > { %v2666_v61 = vpop.f32.mrf.mxu3 }
 0x1a6   : > { %v9269_v49 = vadd.f32 %v2666_v61, %v9077_v12  ;;  %v7693_v12 = vld [vmem:[%s8154_s22 + $0x198] sm:$0xff]  ;;  %v534_v17 = vor.u32 %v533_v16, %v530_v3 }
 0x1a7   : > { %v1959_v45 = vpop.f32.mrf.mxu2  ;;  %v1783_v59 = vpop.f32.mrf.mxu0  ;;  %3943 = vmatpush.bf16.msrb.mxu2 %v7693_v12 }
 0x1a8   : > { %v9274_v23 = vadd.f32 %v1959_v45, %v1871_v13  ;;  %v535_v4 = vsel %vm437_vm2, %v525_v15, %v534_v17  ;;  %v2416_v45 = vsel %vm1063_vm0, %v2388_v27, %v2415_v44 }
 0x1a9   : > { %v1872_v30 = vpop.f32.mrf.mxu1  ;;  %v2256_v13 = vshrl.u32 %v535_v4, 16  ;;  %v2259_v47 = vshll.u32 %v535_v4, 16 }
 0x1aa   : > { %v9278_v19 = vadd.f32 %v1872_v30, %v1783_v59  ;;  %v605_v59 = vsel %vm584_vm1, %v602_v21, %v604_v55  ;;  %v9292_v30 = vpack.c.b16 %v8667_v57, %v9085_v41 }
 0x1ab   : > { %v2258_v2 = vrot.slane %v2256_v13, 3  ;;  %v2261_v51 = vrot.slane %v2259_v47, 4  ;;  %v2265_v33 = vshrl.u32 %v605_v59, 16  ;;  %v2268_v37 = vshll.u32 %v605_v59, 16 }
 0x1ac   : > { %v537_v41 = vshrl.u32 %v9292_v30, 16 }
 0x1ad   : > { %v9281_v7 = vpop.f32.mrf.mxu3  ;;  %v2262_v15 = vor.u32 %v2261_v51, %v2258_v2  ;;  %v2267_v16 = vrot.slane %v2265_v33, 3  ;;  %v2270_v25 = vrot.slane %v2268_v37, 4 }
 0x1af   : > { %v9285_v5 = vpop.f32.mrf.mxu2  ;;  %v1786_v61 = vpop.f32.mrf.mxu0  ;;  %v9295_v27 = vsel %vm1063_vm0, %v2235_v53, %v2262_v15  ;;  %v2271_v21 = vor.u32 %v2270_v25, %v2267_v16  ;;  %v539_v53 = vrot.slane %v537_v41, 4 }
 0x1b0   : > { %11092 = vst [vmem:[#allocation22_spill] sm:$0xff] %v9285_v5 }
 0x1b1   : > { %v1875_v3 = vpop.f32.mrf.mxu1 }
 0x1b2   : > { %2710 = vmatmul.bf16.gmra.mxu3 %v2416_v45  ;;  %2759 = vmatmul.bf16.gmra.mxu0 %v9239_v38  ;;  %v1876_v12 = vadd.f32 %v1875_v3, %v1786_v61  ;;  %v9302_v38 = vsel %vm1063_vm0, %v2244_v32, %v2271_v21  ;;  %v540_v61 = vshll.u32 %v9292_v30, 16  ;;  %v606_v32 = vrot.slane %v9292_v30, 5  ;;  %v7708_v30 = vld [vmem:[%s8154_s22 + $0x210] sm:$0xff] }
 0x1b3   : > { %4122 = vmatpush.bf16.msra.mxu0 %v7708_v30 }
 0x1b4   : > { %2848 = vmatmul.bf16.gmra.mxu1 %v9247_v62  ;;  %v542_v45 = vrot.slane %v540_v61, 5  ;;  %v7700_v62 = vld [vmem:[%s8154_s22 + $0x1d0] sm:$0xff]  ;;  %v607_v25 = vsel %vm584_vm1, %v604_v55, %v606_v32 }
 0x1b5   : > { %v2671_v44 = vpop.f32.mrf.mxu3  ;;  %4033 = vmatpush.bf16.msra.mxu3 %v7700_v62  ;;  %v2295_v41 = vshll.u32 %v607_v25, 16 }
 0x1b6   : > { %v9299_v13 = vadd.f32 %v2671_v44, %v9108_v58  ;;  %v543_v51 = vor.u32 %v542_v45, %v539_v53 }
 0x1b7   : > { %v1964_v4 = vpop.f32.mrf.mxu2  ;;  %v1788_v57 = vpop.f32.mrf.mxu0 }
 0x1b8   : > { %v9304_v47 = vadd.f32 %v1964_v4, %v1876_v12  ;;  %v544_v58 = vsel %vm437_vm2, %v534_v17, %v543_v51 }
 0x1b9   : > { %v1877_v59 = vpop.f32.mrf.mxu1  ;;  %v2283_v37 = vshrl.u32 %v544_v58, 16  ;;  %v2286_v3 = vshll.u32 %v544_v58, 16 }
 0x1ba   : > { %v9308_v2 = vadd.f32 %v1877_v59, %v1788_v57  ;;  %v2292_v57 = vshrl.u32 %v607_v25, 16  ;;  %v2297_v59 = vrot.slane %v2295_v41, 4  ;;  %v11095_v25 = vld [vmem:[#allocation10_spill] sm:$0xff] }
 0x1bb   : > { %v2285_v44 = vrot.slane %v2283_v37, 3  ;;  %v2288_v4 = vrot.slane %v2286_v3, 4  ;;  %v7692_v37 = vld [vmem:[%s8154_s22 + $0x190] sm:$0xff] }
 0x1bc   : > { %11093 = vst [vmem:[#allocation23_spill] sm:$0xff] %v9308_v2  ;;  %v2294_v17 = vrot.slane %v2292_v57, 3  ;;  %3944 = vmatpush.bf16.msrb.mxu2 %v7692_v37 }
 0x1bd   : > { %v9311_v33 = vpop.f32.mrf.mxu3  ;;  %v2289_v53 = vor.u32 %v2288_v4, %v2285_v44 }
 0x1bf   : > { %v2725_v16 = vpop.f32.mrf.mxu0  ;;  %v2290_v62 = vsel %vm1063_vm0, %v2262_v15, %v2289_v53  ;;  %v11097_v15 = vshll.u32 %v11095_v25, 16 }
 0x1c0   : > { %v2726_v12 = vadd.f32 %v2725_v16, %v9075_v0  ;;  %v2298_v0 = vor.u32 %v2297_v59, %v2294_v17  ;;  %v608_v17 = vrot.slane %v11095_v25, 5 }
 0x1c1   : > { %v2814_v61 = vpop.f32.mrf.mxu1  ;;  %v551_v4 = vrot.slane %v11097_v15, 5 }
 0x1c2   : > { %2764 = vmatmul.bf16.gmra.mxu0 %v9265_v54  ;;  %v9318_v45 = vadd.f32 %v2814_v61, %v2726_v12  ;;  %v2299_v54 = vsel %vm1063_vm0, %v2271_v21, %v2298_v0  ;;  %v11096_v12 = vshrl.u32 %v11095_v25, 16  ;;  %v609_v59 = vsel %vm584_vm1, %v606_v32, %v608_v17 }
 0x1c3   : > { %v2322_v15 = vshll.u32 %v609_v59, 16 }
 0x1c4   : > { %11094 = vst [vmem:[#allocation24_spill] sm:$0xff] %v9318_v45  ;;  %2853 = vmatmul.bf16.gmra.mxu1 %v9272_v24  ;;  %v548_v44 = vrot.slane %v11096_v12, 4  ;;  %v2319_v12 = vshrl.u32 %v609_v59, 16 }
 0x1c5   : > { %v2676_v55 = vpop.f32.mrf.mxu3  ;;  %v2324_v25 = vrot.slane %v2322_v15, 4  ;;  %v7707_v15 = vld [vmem:[%s8154_s22 + $0x208] sm:$0xff] }
 0x1c6   : > { %v9324_v58 = vadd.f32 %v2676_v55, %v9141_v46  ;;  %v552_v41 = vor.u32 %v551_v4, %v548_v44  ;;  %4123 = vmatpush.bf16.msra.mxu0 %v7707_v15 }
 0x1c7   : > { %v2727_v3 = vpop.f32.mrf.mxu0 }
 0x1c8   : > { %v2728_v16 = vadd.f32 %v2727_v3, %v9094_v29  ;;  %v553_v46 = vsel %vm437_vm2, %v543_v51, %v552_v41  ;;  %v2321_v51 = vrot.slane %v2319_v12, 3  ;;  %v7691_v12 = vld [vmem:[%s8154_s22 + $0x188] sm:$0xff] }
 0x1c9   : > { %v2816_v24 = vpop.f32.mrf.mxu1  ;;  %v2310_v21 = vshrl.u32 %v553_v46, 16  ;;  %v2313_v30 = vshll.u32 %v553_v46, 16  ;;  %3945 = vmatpush.bf16.msrb.mxu2 %v7691_v12 }
 0x1ca   : > { %v9333_v57 = vadd.f32 %v2816_v24, %v2728_v16  ;;  %v9349_v32 = vor.u32 %v2324_v25, %v2321_v51 }
 0x1cb   : > { %v2312_v37 = vrot.slane %v2310_v21, 3  ;;  %v2315_v3 = vrot.slane %v2313_v30, 4 }
 0x1cc   : > { %11098 = vst [vmem:[#allocation10_spill] sm:$0xff] %v9333_v57  ;;  %v2326_v21 = vsel %vm1063_vm0, %v2298_v0, %v9349_v32 }
 0x1cd   : > { %v9335_v61 = vpop.f32.mrf.mxu3  ;;  %v9342_v44 = vor.u32 %v2315_v3, %v2312_v37 }
 0x1cf   : > { %v2730_v29 = vpop.f32.mrf.mxu0  ;;  %v2317_v24 = vsel %vm1063_vm0, %v2289_v53, %v9342_v44  ;;  %v7699_v53 = vld [vmem:[%s8154_s22 + $0x1c8] sm:$0xff] }
 0x1d0   : > { %v2731_v55 = vadd.f32 %v2730_v29, %v9106_v14  ;;  %4034 = vmatpush.bf16.msra.mxu3 %v7699_v53 }
 0x1d1   : > { %v2819_v16 = vpop.f32.mrf.mxu1 }
 0x1d2   : > { %2769 = vmatmul.bf16.gmra.mxu0 %v9295_v27  ;;  %v9344_v4 = vadd.f32 %v2819_v16, %v2731_v55  ;;  %v11102_v16 = vld [vmem:[#allocation12_spill] sm:$0xff] }
 0x1d3   : > { %v11103_v51 = vshrl.u32 %v11102_v16, 16 }
 0x1d4   : > { %11099 = vst [vmem:[#allocation25_spill] sm:$0xff] %v9344_v4  ;;  %2858 = vmatmul.bf16.gmra.mxu1 %v9302_v38 }
 0x1d5   : > { %v2681_v14 = vpop.f32.mrf.mxu3  ;;  %v557_v25 = vrot.slane %v11103_v51, 4 }
 0x1d6   : > { %v9352_v46 = vadd.f32 %v2681_v14, %v9173_v60  ;;  %v11104_v14 = vshll.u32 %v11102_v16, 16 }
 0x1d7   : > { %v2732_v27 = vpop.f32.mrf.mxu0 }
 0x1d8   : > { %v2733_v30 = vadd.f32 %v2732_v27, %v9124_v56  ;;  %v560_v27 = vrot.slane %v11104_v14, 5 }
 0x1d9   : > { %v2821_v29 = vpop.f32.mrf.mxu1 }
 0x1da   : > { %v9357_v59 = vadd.f32 %v2821_v29, %v2733_v30  ;;  %v561_v53 = vor.u32 %v560_v27, %v557_v25 }
 0x1dc   : > { %11100 = vst [vmem:[#allocation26_spill] sm:$0xff] %v9357_v59  ;;  %v562_v15 = vsel %vm437_vm2, %v552_v41, %v561_v53 }
 0x1dd   : > { %v9360_v55 = vpop.f32.mrf.mxu3  ;;  %v2337_v25 = vshrl.u32 %v562_v15, 16  ;;  %v2340_v27 = vshll.u32 %v562_v15, 16  ;;  %v573_v15 = vshrl.u32 %v9235_v28, 16 }
 0x1df   : > { %v2735_v38 = vpop.f32.mrf.mxu0  ;;  %v2342_v59 = vrot.slane %v2340_v27, 4 }
 0x1e0   : > { %v2736_v37 = vadd.f32 %v2735_v38, %v9135_v35  ;;  %v11105_v35 = vld [vmem:[#allocation11_spill] sm:$0xff] }
 0x1e1   : > { %v2824_v3 = vpop.f32.mrf.mxu1 }
 0x1e2   : > { %2774 = vmatmul.bf16.gmra.mxu0 %v2290_v62  ;;  %v9363_v60 = vadd.f32 %v2824_v3, %v2736_v37  ;;  %v9376_v62 = vpack.c.b16 %v9218_v11, %v11105_v35 }
 0x1e4   : > { %11101 = vst [vmem:[#allocation27_spill] sm:$0xff] %v9363_v60  ;;  %2863 = vmatmul.bf16.gmra.mxu1 %v2299_v54  ;;  %v564_v37 = vshrl.u32 %v9376_v62, 16  ;;  %v567_v3 = vshll.u32 %v9376_v62, 16  ;;  %v2339_v60 = vrot.slane %v2337_v25, 3 }
 0x1e5   : > { %v2686_v0 = vpop.f32.mrf.mxu3 }
 0x1e6   : > { %v9368_v56 = vadd.f32 %v2686_v0, %v9211_v52  ;;  %v610_v52 = vrot.slane %v11102_v16, 5  ;;  %v566_v51 = vrot.slane %v564_v37, 4  ;;  %v569_v14 = vrot.slane %v567_v3, 5 }
 0x1e7   : > { %v2737_v30 = vpop.f32.mrf.mxu0 }
 0x1e8   : > { %v2738_v29 = vadd.f32 %v2737_v30, %v9156_v63  ;;  %v611_v11 = vsel %vm584_vm1, %v608_v17, %v610_v52 }
 0x1e9   : > { %v2826_v54 = vpop.f32.mrf.mxu1  ;;  %v2346_v16 = vshrl.u32 %v611_v11, 16  ;;  %v2349_v30 = vshll.u32 %v611_v11, 16 }
 0x1ea   : > { %v9379_v38 = vadd.f32 %v2826_v54, %v2738_v29  ;;  %v570_v54 = vor.u32 %v569_v14, %v566_v51  ;;  %v575_v51 = vrot.slane %v573_v15, 4 }
 0x1eb   : > { %v2348_v37 = vrot.slane %v2346_v16, 3 }
 0x1ec   : > { %11106 = vst [vmem:[#allocation12_spill] sm:$0xff] %v9379_v38  ;;  %v612_v38 = vrot.slane %v9376_v62, 5  ;;  %v9400_v62 = vor.u32 %v2342_v59, %v2339_v60 }
 0x1ed   : > { %v9384_v12 = vpop.f32.mrf.mxu3 }
 0x1ee   : > { %v2344_v59 = vsel %vm1063_vm0, %v9342_v44, %v9400_v62 }
 0x1ef   : > { %v2740_v0 = vpop.f32.mrf.mxu0 }
 0x1f0   : > { %v2741_v63 = vadd.f32 %v2740_v0, %v9167_v6  ;;  %v2351_v6 = vrot.slane %v2349_v30, 4  ;;  %v576_v0 = vshll.u32 %v9235_v28, 16  ;;  %v7698_v30 = vld [vmem:[%s8154_s22 + $0x1c0] sm:$0xff] }
 0x1f1   : > { %v2829_v35 = vpop.f32.mrf.mxu1  ;;  %4035 = vmatpush.bf16.msra.mxu3 %v7698_v30  ;;  %v7039_v30 = vld [vmem:[%s8189_s11 + $0x40] sm:$0xff] }
 0x1f2   : > { %2779 = vmatmul.bf16.gmra.mxu0 %v2317_v24  ;;  %v9389_v29 = vadd.f32 %v2829_v35, %v2741_v63  ;;  %v571_v24 = vsel %vm437_vm2, %v561_v53, %v570_v54  ;;  %v578_v14 = vrot.slane %v576_v0, 5  ;;  %v9402_v63 = vor.u32 %v2351_v6, %v2348_v37 }
 0x1f3   : > { %v2364_v25 = vshrl.u32 %v571_v24, 16  ;;  %v2367_v27 = vshll.u32 %v571_v24, 16 }
 0x1f4   : > { %11107 = vst [vmem:[#allocation11_spill] sm:$0xff] %v9389_v29  ;;  %2868 = vmatmul.bf16.gmra.mxu1 %v2326_v21  ;;  %v613_v21 = vsel %vm584_vm1, %v610_v52, %v612_v38  ;;  %v11056_v52 = vrot.slane %v9235_v28, 5  ;;  %v2353_v44 = vsel %vm1063_vm0, %v9349_v32, %v9402_v63  ;;  %v7041_v29 = vld [vmem:[%s8189_s11 + $0x50] sm:$0xff] }
 0x1f5   : > { %v2691_v41 = vpop.f32.mrf.mxu3  ;;  %v2373_v53 = vshrl.u32 %v613_v21, 16  ;;  %v2376_v16 = vshll.u32 %v613_v21, 16  ;;  %v2366_v37 = vrot.slane %v2364_v25, 3  ;;  %v2369_v6 = vrot.slane %v2367_v27, 4  ;;  %v7038_v27 = vld [vmem:[%s8189_s11 + $0x38] sm:$0xff] }
 0x1f6   : > { %v9393_v17 = vadd.f32 %v2691_v41, %v9244_v36  ;;  %v9407_v41 = vor.u32 %v578_v14, %v575_v51  ;;  %v2931_v32 = vpack.c.bf16 %v7038_v27, %v7038_v27 }
 0x1f7   : > { %v2742_v3 = vpop.f32.mrf.mxu0  ;;  %v2378_v21 = vrot.slane %v2376_v16, 4  ;;  %v2370_v4 = vor.u32 %v2369_v6, %v2366_v37 }
 0x1f8   : > { %v2743_v11 = vadd.f32 %v2742_v3, %v9191_v22  ;;  %v580_v60 = vsel %vm437_vm2, %v570_v54, %v9407_v41  ;;  %v7690_v3 = vld [vmem:[%s8154_s22 + $0x180] sm:$0xff]  ;;  %v615_v54 = vsel %vm584_vm1, %v612_v38, %v11056_v52  ;;  %v1922_v52 = vadd.f32 %v9003_v31, %v8996_v10 }
 0x1f9   : > { %v2831_v36 = vpop.f32.mrf.mxu1  ;;  %v2391_v24 = vshrl.u32 %v580_v60, 16  ;;  %v2394_v15 = vshll.u32 %v580_v60, 16  ;;  %3946 = vmatpush.bf16.msrb.mxu2 %v7690_v3  ;;  %v2400_v25 = vshrl.u32 %v615_v54, 16  ;;  %v7040_v60 = vld [vmem:[%s8189_s11 + $0x48] sm:$0xff] }
 0x1fa   : > { %v9404_v35 = vadd.f32 %v2831_v36, %v2743_v11  ;;  %v2375_v11 = vrot.slane %v2373_v53, 3  ;;  %v2932_v53 = vpack.c.bf16 %v7039_v30, %v7039_v30  ;;  %v2933_v16 = vpack.c.bf16 %v7040_v60, %v7040_v60 }
 0x1fb   : > { %v2393_v14 = vrot.slane %v2391_v24, 3  ;;  %v2396_v36 = vrot.slane %v2394_v15, 4  ;;  %v2402_v38 = vrot.slane %v2400_v25, 3  ;;  %v2998_v24 = vunpack.c.l.b16 %v2931_v32 }
 0x1fc   : > { %11108 = vst [vmem:[#allocation28_spill] sm:$0xff] %v9404_v35  ;;  %v2403_v35 = vshll.u32 %v615_v54, 16  ;;  %v2999_v15 = vunpack.c.l.b16 %v2932_v53  ;;  %v3000_v27 = vunpack.c.l.b16 %v2933_v16  ;;  %v2379_v6 = vor.u32 %v2378_v21, %v2375_v11  ;;  %v7037_v11 = vld [vmem:[%s8189_s11 + $0x30] sm:$0xff] }
 0x1fd   : > { %v9409_v22 = vpop.f32.mrf.mxu3  ;;  %v9431_v57 = vor.u32 %v2396_v36, %v2393_v14  ;;  %v2659_v14 = vadd.f32 %v9223_v18, %v1922_v52  ;;  %v303_v36 = vld [vmem:[%s8189_s11 + $0x108] sm:$0xff]  ;;  %v2930_v18 = vpack.c.bf16 %v7037_v11, %v7037_v11 }
 0x1fe   : > { %v2405_v3 = vrot.slane %v2403_v35, 4  ;;  %v9444_v35 = vpack.c.b16 %v2999_v15, %v2998_v24  ;;  %v337_v60 = vpack.c.bf16 %v303_v36, %v303_v36  ;;  %v3031_v2 = vpack.c.b16 %v3000_v27, %v2999_v15 }
 0x1ff   : > { %v2745_v0 = vpop.f32.mrf.mxu0  ;;  %v9438_v54 = vsel %vm1063_vm0, %v2370_v4, %v9431_v57  ;;  %v2380_v11 = vsel %vm1063_vm0, %v9402_v63, %v2379_v6 }
 0x200   : > { %v9425_v51 = vadd.f32 %v2745_v0, %v9207_v20  ;;  %v2934_v20 = vpack.c.bf16 %v7041_v29, %v7041_v29  ;;  %v7706_v0 = vld [vmem:[%s8154_s22 + $0x200] sm:$0xff]  ;;  %v9442_v29 = vor.u32 %v2405_v3, %v2402_v38  ;;  %v3064_v21 = vshrl.u32 %v9444_v35, 16 }
 0x201   : > { %4124 = vmatpush.bf16.msra.mxu0 %v7706_v0  ;;  %v3067_v30 = vshll.u32 %v9444_v35, 16  ;;  %v582_v38 = vunpack.c.l.b16 %v337_v60 }
 0x202   : > { %11109 = vst [vmem:[#allocation29_spill] sm:$0xff] %v9425_v51  ;;  %2784 = vmatmul.bf16.gmra.mxu0 %v2344_v59  ;;  %v9440_v59 = vunpack.c.l.b16 %v2934_v20  ;;  %v3066_v53 = vrot.slane %v3064_v21, 4  ;;  %v2997_v20 = vunpack.c.l.b16 %v2930_v18  ;;  %v2418_v21 = vshrl.u32 %v9407_v41, 16 }
 0x203   : > { %v3069_v16 = vrot.slane %v3067_v30, 5  ;;  %v583_v51 = vpack.c.b16 %v582_v38, %v582_v38  ;;  %v2421_v30 = vshll.u32 %v9407_v41, 16  ;;  %v3300_v18 = vshrl.u32 %v3031_v2, 16 }
 0x204   : > { %2873 = vmatmul.bf16.gmra.mxu1 %v2353_v44  ;;  %v9451_v31 = vpack.c.b16 %v9440_v59, %v3000_v27  ;;  %v9456_v44 = vsel %vm1063_vm0, %v2379_v6, %v9442_v29  ;;  %v3030_v45 = vpack.c.b16 %v2998_v24, %v2997_v20  ;;  %v7043_v20 = vld [vmem:[%s8189_s11 + $0x60] sm:$0xff] }
 0x205   : > { %v2696_v37 = vpop.f32.mrf.mxu3  ;;  %v616_v24 = vrot.slane %v583_v51, 5 }
 0x206   : > { %v9448_v10 = vadd.f32 %v2696_v37, %v9274_v23  ;;  %v3072_v23 = vshrl.u32 %v9451_v31, 16  ;;  %v3075_v52 = vshll.u32 %v9451_v31, 16  ;;  %v3070_v37 = vor.u32 %v3069_v16, %v3066_v53 }
 0x207   : > { %v2747_v25 = vpop.f32.mrf.mxu0  ;;  %v3292_v60 = vshrl.u32 %v3030_v45, 16  ;;  %v3295_v27 = vshll.u32 %v3030_v45, 16 }
 0x208   : > { %v9461_v32 = vadd.f32 %v2747_v25, %v2659_v14  ;;  %v3074_v0 = vrot.slane %v3072_v23, 4  ;;  %v3077_v3 = vrot.slane %v3075_v52, 5  ;;  %v1927_v14 = vadd.f32 %v9054_v42, %v9046_v26 }
 0x209   : > { %v2371_v25 = vsel %vm1063_vm0, %v9400_v62, %v2370_v4  ;;  %v3303_v23 = vshll.u32 %v3031_v2, 16  ;;  %v2420_v4 = vrot.slane %v2418_v21, 3  ;;  %v2423_v62 = vrot.slane %v2421_v30, 4  ;;  %v7042_v2 = vld [vmem:[%s8189_s11 + $0x58] sm:$0xff] }
 0x20a   : > { %11110 = vst [vmem:[#allocation30_spill] sm:$0xff] %v9461_v32  ;;  %v9465_v5 = vor.u32 %v3077_v3, %v3074_v0  ;;  %v3294_v63 = vrot.slane %v3292_v60, 3  ;;  %v3297_v6 = vrot.slane %v3295_v27, 4  ;;  %v3302_v52 = vrot.slane %v3300_v18, 3 }
 0x20b   : > { %v3305_v41 = vrot.slane %v3303_v23, 4  ;;  %v3309_v53 = vshrl.u32 %v3070_v37, 16  ;;  %v2424_v51 = vor.u32 %v2423_v62, %v2420_v4  ;;  %v3312_v45 = vshll.u32 %v3070_v37, 16 }
 0x20c   : > { %v3079_v26 = vsel %vm437_vm2, %v3070_v37, %v9465_v5  ;;  %v2664_v0 = vadd.f32 %v9254_v40, %v1927_v14  ;;  %v3298_v3 = vor.u32 %v3297_v6, %v3294_v63  ;;  %v11111_v27 = vrot.slane %v9235_v28, 5 }
 0x20d   : > { %v9469_v36 = vpop.f32.mrf.mxu3  ;;  %v3317_v16 = vshrl.u32 %v3079_v26, 16  ;;  %v3320_v38 = vshll.u32 %v3079_v26, 16  ;;  %v3306_v32 = vor.u32 %v3305_v41, %v3302_v52  ;;  %v9487_v21 = vsel %vm1063_vm0, %v9431_v57, %v2424_v51 }
 0x20e   : > { %v3314_v30 = vrot.slane %v3312_v45, 4  ;;  %v617_v18 = vsel %vm584_vm1, %v11111_v27, %v616_v24  ;;  %v2935_v23 = vpack.c.bf16 %v7042_v2, %v7042_v2  ;;  %v2936_v40 = vpack.c.bf16 %v7043_v20, %v7043_v20  ;;  %v7044_v27 = vld [vmem:[%s8189_s11 + $0x68] sm:$0xff] }
 0x20f   : > { %v2750_v15 = vpop.f32.mrf.mxu0  ;;  %v3319_v60 = vrot.slane %v3317_v16, 3  ;;  %v3307_v37 = vsel %vm1063_vm0, %v3298_v3, %v3306_v32  ;;  %v2427_v4 = vshrl.u32 %v617_v18, 16  ;;  %v2430_v63 = vshll.u32 %v617_v18, 16  ;;  %v7045_v18 = vld [vmem:[%s8189_s11 + $0x70] sm:$0xff] }
 0x210   : > { %v9480_v42 = vadd.f32 %v2750_v15, %v9242_v34  ;;  %v3311_v34 = vrot.slane %v3309_v53, 3  ;;  %v3322_v15 = vrot.slane %v3320_v38, 4  ;;  %3947 = vmatmul.bf16.vlgmr.msrb.gmra.mxu2 %v3307_v37  ;;  %v3002_v6 = vunpack.c.l.b16 %v2935_v23 }
 0x211   : > { %v2429_v28 = vrot.slane %v2427_v4, 3  ;;  %v2432_v24 = vrot.slane %v2430_v63, 4  ;;  %v2938_v4 = vpack.c.bf16 %v7045_v18, %v7045_v18 }
 0x212   : > { %2789 = vmatmul.bf16.gmra.mxu0 %v2371_v25  ;;  %v3315_v26 = vor.u32 %v3314_v30, %v3311_v34  ;;  %v3323_v57 = vor.u32 %v3322_v15, %v3319_v60  ;;  %v3032_v16 = vpack.c.b16 %v3002_v6, %v9440_v59 }
 0x214   : > { %2878 = vmatmul.bf16.gmra.mxu1 %v2380_v11  ;;  %v3003_v11 = vunpack.c.l.b16 %v2936_v40  ;;  %v3324_v41 = vsel %vm1063_vm0, %v3315_v26, %v3323_v57  ;;  %v3343_v3 = vshrl.u32 %v3032_v16, 16  ;;  %v3346_v34 = vshll.u32 %v3032_v16, 16 }
 0x215   : > { %v2701_v25 = vpop.f32.mrf.mxu3  ;;  %4036 = vmatmul.bf16.vlgmr.msra.gmra.mxu3 %v3324_v41  ;;  %v2937_v26 = vpack.c.bf16 %v7044_v27, %v7044_v27 }
 0x216   : > { %v9494_v14 = vadd.f32 %v2701_v25, %v9304_v47  ;;  %v9499_v53 = vpack.c.b16 %v3003_v11, %v3002_v6  ;;  %v2433_v47 = vor.u32 %v2432_v24, %v2429_v28  ;;  %v3345_v25 = vrot.slane %v3343_v3, 3 }
 0x217   : > { %v2752_v62 = vpop.f32.mrf.mxu0  ;;  %v3348_v37 = vrot.slane %v3346_v34, 4  ;;  %v3004_v28 = vunpack.c.l.b16 %v2937_v26  ;;  %v9522_v24 = vunpack.c.l.b16 %v2938_v4 }
 0x218   : > { %v9496_v52 = vadd.f32 %v2752_v62, %v2664_v0  ;;  %v3081_v51 = vshrl.u32 %v9499_v53, 16  ;;  %v3084_v45 = vshll.u32 %v9499_v53, 16  ;;  %v9508_v2 = vsel %vm1063_vm0, %v9442_v29, %v2433_v47 }
 0x219   : > { %v3349_v29 = vor.u32 %v3348_v37, %v3345_v25  ;;  %v1932_v62 = vadd.f32 %v9091_v43, %v9087_v50  ;;  %v9529_v50 = vpack.c.b16 %v9522_v24, %v3004_v28 }
 0x21a   : > { %v3083_v20 = vrot.slane %v3081_v51, 4  ;;  %v3086_v0 = vrot.slane %v3084_v45, 5 }
 0x21b   : > { %v3093_v45 = vshll.u32 %v9529_v50, 16 }
 0x21c   : > { %v3087_v60 = vor.u32 %v3086_v0, %v3083_v20  ;;  %v3033_v0 = vpack.c.b16 %v3004_v28, %v3003_v11  ;;  %v7047_v11 = vld [vmem:[%s8189_s11 + $0x80] sm:$0xff] }
 0x21d   : > { %v9504_v38 = vpop.f32.mrf.mxu3  ;;  %v3095_v20 = vrot.slane %v3093_v45, 5 }
 0x21e   : > { %v3088_v59 = vsel %vm437_vm2, %v9465_v5, %v3087_v60  ;;  %v2669_v5 = vadd.f32 %v9281_v7, %v1932_v62  ;;  %v3209_v7 = vrot.slane %v9444_v35, 5  ;;  %v3373_v25 = vshll.u32 %v3033_v0, 16 }
 0x21f   : > { %v2755_v30 = vpop.f32.mrf.mxu0  ;;  %v3352_v23 = vshrl.u32 %v3088_v59, 16  ;;  %v3355_v40 = vshll.u32 %v3088_v59, 16 }
 0x220   : > { %v9511_v15 = vadd.f32 %v2755_v30, %v9269_v49  ;;  %v3350_v49 = vsel %vm1063_vm0, %v3306_v32, %v3349_v29  ;;  %v3370_v30 = vshrl.u32 %v3033_v0, 16  ;;  %v3375_v59 = vrot.slane %v3373_v25, 4 }
 0x221   : > { %v3354_v63 = vrot.slane %v3352_v23, 3  ;;  %v3357_v6 = vrot.slane %v3355_v40, 4  ;;  %3952 = vmatmul.bf16.gmra.mxu2 %v3350_v49  ;;  %v7046_v40 = vld [vmem:[%s8189_s11 + $0x78] sm:$0xff]  ;;  %v3326_v26 = vshrl.u32 %v3209_v7, 16  ;;  %v3329_v49 = vshll.u32 %v3209_v7, 16 }
 0x222   : > { %2794 = vmatmul.bf16.gmra.mxu0 %v9438_v54  ;;  %v3372_v18 = vrot.slane %v3370_v30, 3  ;;  %v2939_v62 = vpack.c.bf16 %v7046_v40, %v7046_v40 }
 0x223   : > { %v3358_v47 = vor.u32 %v3357_v6, %v3354_v63 }
 0x224   : > { %2883 = vmatmul.bf16.gmra.mxu1 %v9456_v44  ;;  %v3090_v44 = vshrl.u32 %v9529_v50, 16  ;;  %v3376_v63 = vor.u32 %v3375_v59, %v3372_v18  ;;  %v3212_v59 = vrot.slane %v9499_v53, 5 }
 0x225   : > { %v2706_v41 = vpop.f32.mrf.mxu3  ;;  %v3359_v32 = vsel %vm1063_vm0, %v3323_v57, %v3358_v47 }
 0x226   : > { %v9526_v54 = vadd.f32 %v2706_v41, %v8986_v1  ;;  %4041 = vmatmul.bf16.gmra.mxu3 %v3359_v32  ;;  %v3210_v1 = vrot.slane %v9451_v31, 5  ;;  %v3092_v16 = vrot.slane %v3090_v44, 4  ;;  %v2940_v41 = vpack.c.bf16 %v7047_v11, %v7047_v11 }
 0x227   : > { %v2757_v51 = vpop.f32.mrf.mxu0  ;;  %v3377_v32 = vsel %vm1063_vm0, %v3349_v29, %v3376_v63 }
 0x228   : > { %v9531_v43 = vadd.f32 %v2757_v51, %v2669_v5  ;;  %v3096_v34 = vor.u32 %v3095_v20, %v3092_v16  ;;  %v3211_v37 = vsel %vm584_vm1, %v3209_v7, %v3210_v1  ;;  %v3006_v51 = vunpack.c.l.b16 %v2939_v62 }
 0x229   : > { %v3334_v28 = vshrl.u32 %v3211_v37, 16  ;;  %v3337_v5 = vshll.u32 %v3211_v37, 16  ;;  %v9553_v44 = vunpack.c.l.b16 %v2940_v41  ;;  %v3328_v20 = vrot.slane %v3326_v26, 3 }
 0x22a   : > { %v3097_v27 = vsel %vm437_vm2, %v3087_v60, %v3096_v34 }
 0x22b   : > { %v3379_v23 = vshrl.u32 %v3097_v27, 16  ;;  %v3382_v4 = vshll.u32 %v3097_v27, 16  ;;  %v9561_v0 = vpack.c.b16 %v9553_v44, %v3006_v51  ;;  %v3339_v29 = vrot.slane %v3337_v5, 4 }
 0x22d   : > { %v9538_v3 = vpop.f32.mrf.mxu3  ;;  %v3381_v6 = vrot.slane %v3379_v23, 3  ;;  %v3384_v60 = vrot.slane %v3382_v4, 4  ;;  %v3034_v23 = vpack.c.b16 %v3006_v51, %v9522_v24  ;;  %v7048_v24 = vld [vmem:[%s8189_s11 + $0x88] sm:$0xff] }
 0x22f   : > { %v2760_v57 = vpop.f32.mrf.mxu0  ;;  %v3385_v16 = vor.u32 %v3384_v60, %v3381_v6  ;;  %v3397_v11 = vshrl.u32 %v3034_v23, 16  ;;  %v7049_v60 = vld [vmem:[%s8189_s11 + $0x90] sm:$0xff] }
 0x230   : > { %v9545_v35 = vadd.f32 %v2760_v57, %v9299_v13  ;;  %v1937_v13 = vadd.f32 %v9121_v9, %v9116_v8  ;;  %v3331_v8 = vrot.slane %v3329_v49, 4  ;;  %v3336_v9 = vrot.slane %v3334_v28, 3 }
 0x231   : > { %3957 = vmatmul.bf16.gmra.mxu2 %v3377_v32  ;;  %v3386_v25 = vsel %vm1063_vm0, %v3358_v47, %v3385_v16  ;;  %v3400_v47 = vshll.u32 %v3034_v23, 16  ;;  %v3213_v28 = vsel %vm584_vm1, %v3210_v1, %v3212_v59  ;;  %v3399_v53 = vrot.slane %v3397_v11, 3 }
 0x232   : > { %2799 = vmatmul.bf16.gmra.mxu0 %v9487_v21  ;;  %v2674_v21 = vadd.f32 %v9311_v33, %v1937_v13  ;;  %v3102_v33 = vshll.u32 %v9561_v0, 16  ;;  %v3332_v27 = vor.u32 %v3331_v8, %v3328_v20  ;;  %v3340_v18 = vor.u32 %v3339_v29, %v3336_v9 }
 0x233   : > { %v3402_v5 = vrot.slane %v3400_v47, 4  ;;  %v2941_v32 = vpack.c.bf16 %v7048_v24, %v7048_v24  ;;  %v3364_v20 = vshll.u32 %v3213_v28, 16 }
 0x234   : > { %2888 = vmatmul.bf16.gmra.mxu1 %v9508_v2  ;;  %v3099_v2 = vshrl.u32 %v9561_v0, 16  ;;  %v3104_v37 = vrot.slane %v3102_v33, 5  ;;  %v3341_v62 = vsel %vm1063_vm0, %v3332_v27, %v3340_v18 }
 0x235   : > { %v2711_v45 = vpop.f32.mrf.mxu3  ;;  %v3008_v9 = vunpack.c.l.b16 %v2941_v32  ;;  %v7051_v32 = vld [vmem:[%s8189_s11 + $0xa0] sm:$0xff] }
 0x236   : > { %v9558_v7 = vadd.f32 %v2711_v45, %v9035_v39  ;;  %4046 = vmatmul.bf16.gmra.mxu3 %v3386_v25  ;;  %v3101_v39 = vrot.slane %v3099_v2, 4  ;;  %v2942_v45 = vpack.c.bf16 %v7049_v60, %v7049_v60 }
 0x237   : > { %v2762_v30 = vpop.f32.mrf.mxu0 }
 0x238   : > { %v9564_v57 = vadd.f32 %v2762_v30, %v2674_v21  ;;  %v3105_v40 = vor.u32 %v3104_v37, %v3101_v39  ;;  %v3361_v21 = vshrl.u32 %v3213_v28, 16  ;;  %v3009_v1 = vunpack.c.l.b16 %v2942_v45 }
 0x239   : > { %v3366_v37 = vrot.slane %v3364_v20, 4 }
 0x23a   : > { %v3106_v26 = vsel %vm437_vm2, %v3096_v34, %v3105_v40  ;;  %v3403_v34 = vor.u32 %v3402_v5, %v3399_v53  ;;  %v9585_v2 = vpack.c.b16 %v3009_v1, %v3008_v9  ;;  %v3363_v39 = vrot.slane %v3361_v21, 3 }
 0x23b   : > { %v3406_v49 = vshrl.u32 %v3106_v26, 16  ;;  %v3409_v6 = vshll.u32 %v3106_v26, 16 }
 0x23c   : > { %v3404_v31 = vsel %vm1063_vm0, %v3376_v63, %v3403_v34  ;;  %v3108_v23 = vshrl.u32 %v9585_v2, 16  ;;  %v3367_v47 = vor.u32 %v3366_v37, %v3363_v39 }
 0x23d   : > { %v3408_v51 = vrot.slane %v3406_v49, 3  ;;  %v3411_v13 = vrot.slane %v3409_v6, 4 }
 0x23e   : > { %v3110_v63 = vrot.slane %v3108_v23, 4  ;;  %v3368_v28 = vsel %vm1063_vm0, %v3340_v18, %v3367_v47 }
 0x23f   : > { %v2765_v4 = vpop.f32.mrf.mxu0  ;;  %v3412_v30 = vor.u32 %v3411_v13, %v3408_v51 }
 0x240   : > { %v9573_v41 = vadd.f32 %v2765_v4, %v9324_v58  ;;  %v11112_v58 = vld [vmem:[#allocation15_spill] sm:$0xff] }
 0x241   : > { %v1942_v8 = vadd.f32 %v11112_v58, %v9148_v48  ;;  %3962 = vmatmul.bf16.gmra.mxu2 %v3404_v31  ;;  %v3413_v25 = vsel %vm1063_vm0, %v3385_v16, %v3412_v30  ;;  %v3111_v48 = vshll.u32 %v9585_v2, 16  ;;  %v3035_v16 = vpack.c.b16 %v3008_v9, %v9553_v44  ;;  %v11113_v9 = vld [vmem:[#allocation16_spill] sm:$0xff] }
 0x242   : > { %4125 = vmatmul.bf16.vlgmr.msra.gmra.mxu0 %v3341_v62 }
 0x243   : > { %v2679_v29 = vadd.f32 %v9335_v61, %v1942_v8  ;;  %v3113_v11 = vrot.slane %v3111_v48, 5  ;;  %v3214_v61 = vrot.slane %v9529_v50, 5  ;;  %v3424_v4 = vshrl.u32 %v3035_v16, 16  ;;  %v7050_v50 = vld [vmem:[%s8189_s11 + $0x98] sm:$0xff] }
 0x244   : > { %v3427_v62 = vshll.u32 %v3035_v16, 16  ;;  %v2943_v21 = vpack.c.bf16 %v7050_v50, %v7050_v50 }
 0x245   : > { %v3114_v26 = vor.u32 %v3113_v11, %v3110_v63  ;;  %v3215_v60 = vsel %vm584_vm1, %v3212_v59, %v3214_v61  ;;  %v3426_v51 = vrot.slane %v3424_v4, 3 }
 0x246   : > { %4051 = vmatmul.bf16.gmra.mxu3 %v3413_v25  ;;  %v3429_v13 = vrot.slane %v3427_v62, 4  ;;  %v3388_v58 = vshrl.u32 %v3215_v60, 16  ;;  %v3391_v8 = vshll.u32 %v3215_v60, 16  ;;  %v3010_v31 = vunpack.c.l.b16 %v2943_v21 }
 0x247   : > { %v2767_v33 = vpop.f32.mrf.mxu0  ;;  %v3115_v49 = vsel %vm437_vm2, %v3105_v40, %v3114_v26  ;;  %v2944_v40 = vpack.c.bf16 %v7051_v32, %v7051_v32 }
 0x248   : > { %v9587_v27 = vadd.f32 %v2767_v33, %v2679_v29  ;;  %v3433_v53 = vshrl.u32 %v3115_v49, 16  ;;  %v3436_v5 = vshll.u32 %v3115_v49, 16  ;;  %v3430_v20 = vor.u32 %v3429_v13, %v3426_v51  ;;  %v11114_v29 = vld [vmem:[#allocation17_spill] sm:$0xff] }
 0x249   : > { %v3011_v59 = vunpack.c.l.b16 %v2944_v40  ;;  %v3390_v48 = vrot.slane %v3388_v58, 3  ;;  %v3393_v63 = vrot.slane %v3391_v8, 4  ;;  %v7052_v40 = vld [vmem:[%s8189_s11 + $0xa8] sm:$0xff] }
 0x24a   : > { %v3435_v44 = vrot.slane %v3433_v53, 3  ;;  %v3438_v45 = vrot.slane %v3436_v5, 4  ;;  %v3431_v25 = vsel %vm1063_vm0, %v3403_v34, %v3430_v20  ;;  %v2945_v8 = vpack.c.bf16 %v7052_v40, %v7052_v40 }
 0x24b   : > { %v9606_v37 = vpack.c.b16 %v3011_v59, %v3010_v31  ;;  %v3394_v49 = vor.u32 %v3393_v63, %v3390_v48 }
 0x24c   : > { %v3439_v18 = vor.u32 %v3438_v45, %v3435_v44 }
 0x24d   : > { %v3117_v16 = vshrl.u32 %v9606_v37, 16  ;;  %v3120_v4 = vshll.u32 %v9606_v37, 16  ;;  %v3395_v51 = vsel %vm1063_vm0, %v3367_v47, %v3394_v49 }
 0x24e   : > { %v3440_v39 = vsel %vm1063_vm0, %v3412_v30, %v3439_v18  ;;  %v3036_v30 = vpack.c.b16 %v3010_v31, %v3009_v1 }
 0x24f   : > { %v2770_v6 = vpop.f32.mrf.mxu0  ;;  %v3119_v62 = vrot.slane %v3117_v16, 4  ;;  %v3122_v34 = vrot.slane %v3120_v4, 5 }
 0x250   : > { %v9596_v24 = vadd.f32 %v2770_v6, %v9352_v46  ;;  %v1947_v46 = vadd.f32 %v11114_v29, %v11113_v9  ;;  %v3454_v53 = vshll.u32 %v3036_v30, 16 }
 0x251   : > { %3967 = vmatmul.bf16.gmra.mxu2 %v3431_v25  ;;  %v3123_v6 = vor.u32 %v3122_v34, %v3119_v62  ;;  %v11115_v25 = vld [vmem:[#allocation18_spill] sm:$0xff] }
 0x252   : > { %4130 = vmatmul.bf16.gmra.mxu0 %v3368_v28  ;;  %v2684_v33 = vadd.f32 %v9360_v55, %v1947_v46  ;;  %v3216_v55 = vrot.slane %v9561_v0, 5  ;;  %v3451_v28 = vshrl.u32 %v3036_v30, 16  ;;  %v3456_v21 = vrot.slane %v3454_v53, 4  ;;  %v7053_v0 = vld [vmem:[%s8189_s11 + $0xb0] sm:$0xff] }
 0x253   : > { %v3124_v5 = vsel %vm437_vm2, %v3114_v26, %v3123_v6  ;;  %v2946_v26 = vpack.c.bf16 %v7053_v0, %v7053_v0  ;;  %v3012_v46 = vunpack.c.l.b16 %v2945_v8 }
 0x254   : > { %v3460_v13 = vshrl.u32 %v3124_v5, 16  ;;  %v3463_v50 = vshll.u32 %v3124_v5, 16  ;;  %v3217_v44 = vsel %vm584_vm1, %v3214_v61, %v3216_v55  ;;  %v3453_v45 = vrot.slane %v3451_v28, 3 }
 0x255   : > { %v3415_v9 = vshrl.u32 %v3217_v44, 16  ;;  %v3418_v29 = vshll.u32 %v3217_v44, 16  ;;  %v3013_v61 = vunpack.c.l.b16 %v2946_v26  ;;  %v7054_v26 = vld [vmem:[%s8189_s11 + $0xb8] sm:$0xff] }
 0x256   : > { %4056 = vmatmul.bf16.gmra.mxu3 %v3440_v39  ;;  %v3462_v1 = vrot.slane %v3460_v13, 3  ;;  %v3465_v58 = vrot.slane %v3463_v50, 4  ;;  %v3457_v31 = vor.u32 %v3456_v21, %v3453_v45 }
 0x257   : > { %v2772_v23 = vpop.f32.mrf.mxu0  ;;  %v9626_v63 = vpack.c.b16 %v3013_v61, %v3012_v46  ;;  %v3417_v4 = vrot.slane %v3415_v9, 3  ;;  %v3420_v62 = vrot.slane %v3418_v29, 4  ;;  %v2947_v29 = vpack.c.bf16 %v7054_v26, %v7054_v26 }
 0x258   : > { %v9608_v11 = vadd.f32 %v2772_v23, %v2684_v33  ;;  %v3466_v47 = vor.u32 %v3465_v58, %v3462_v1  ;;  %v11116_v33 = vld [vmem:[#allocation19_spill] sm:$0xff]  ;;  %v3458_v39 = vsel %vm1063_vm0, %v3430_v20, %v3457_v31 }
 0x259   : > { %v3126_v30 = vshrl.u32 %v9626_v63, 16  ;;  %v3129_v28 = vshll.u32 %v9626_v63, 16  ;;  %v3421_v5 = vor.u32 %v3420_v62, %v3417_v4 }
 0x25a   : > { %v3467_v48 = vsel %vm1063_vm0, %v3439_v18, %v3466_v47  ;;  %v3037_v18 = vpack.c.b16 %v3012_v46, %v3011_v59 }
 0x25b   : > { %v3128_v53 = vrot.slane %v3126_v30, 4  ;;  %v3131_v20 = vrot.slane %v3129_v28, 5  ;;  %v3422_v45 = vsel %vm1063_vm0, %v3394_v49, %v3421_v5 }
 0x25c   : > { %v3481_v13 = vshll.u32 %v3037_v18, 16 }
 0x25e   : > { %v3483_v8 = vrot.slane %v3481_v13, 4 }
 0x25f   : > { %v2775_v60 = vpop.f32.mrf.mxu0 }
 0x260   : > { %v9616_v32 = vadd.f32 %v2775_v60, %v9368_v56  ;;  %v1952_v56 = vadd.f32 %v11116_v33, %v11115_v25  ;;  %v3132_v60 = vor.u32 %v3131_v20, %v3128_v53 }
 0x261   : > { %3972 = vmatmul.bf16.gmra.mxu2 %v3458_v39  ;;  %v11117_v39 = vld [vmem:[#allocation20_spill] sm:$0xff] }
 0x262   : > { %4135 = vmatmul.bf16.gmra.mxu0 %v3395_v51  ;;  %v2689_v23 = vadd.f32 %v9384_v12, %v1952_v56  ;;  %v3218_v12 = vrot.slane %v9585_v2, 5  ;;  %v3478_v51 = vshrl.u32 %v3037_v18, 16  ;;  %v3133_v50 = vsel %vm437_vm2, %v3123_v6, %v3132_v60  ;;  %v7055_v2 = vld [vmem:[%s8189_s11 + $0xc0] sm:$0xff] }
 0x263   : > { %v3487_v21 = vshrl.u32 %v3133_v50, 16  ;;  %v3490_v40 = vshll.u32 %v3133_v50, 16  ;;  %v2948_v6 = vpack.c.bf16 %v7055_v2, %v7055_v2  ;;  %v3014_v56 = vunpack.c.l.b16 %v2947_v29 }
 0x264   : > { %v3219_v1 = vsel %vm584_vm1, %v3216_v55, %v3218_v12  ;;  %v3480_v58 = vrot.slane %v3478_v51, 3 }
 0x265   : > { %v3489_v59 = vrot.slane %v3487_v21, 3  ;;  %v3492_v9 = vrot.slane %v3490_v40, 4  ;;  %v3442_v25 = vshrl.u32 %v3219_v1, 16  ;;  %v3445_v33 = vshll.u32 %v3219_v1, 16 }
 0x266   : > { %4061 = vmatmul.bf16.gmra.mxu3 %v3467_v48  ;;  %v3484_v46 = vor.u32 %v3483_v8, %v3480_v58  ;;  %v3015_v55 = vunpack.c.l.b16 %v2948_v6  ;;  %v7056_v6 = vld [vmem:[%s8189_s11 + $0xc8] sm:$0xff] }
 0x267   : > { %v2777_v16 = vpop.f32.mrf.mxu0  ;;  %v3493_v49 = vor.u32 %v3492_v9, %v3489_v59  ;;  %v3444_v28 = vrot.slane %v3442_v25, 3  ;;  %v3447_v53 = vrot.slane %v3445_v33, 4  ;;  %v2949_v33 = vpack.c.bf16 %v7056_v6, %v7056_v6 }
 0x268   : > { %v9628_v34 = vadd.f32 %v2777_v16, %v2689_v23  ;;  %v11118_v23 = vld [vmem:[#allocation21_spill] sm:$0xff]  ;;  %v3485_v48 = vsel %vm1063_vm0, %v3457_v31, %v3484_v46  ;;  %v9646_v62 = vpack.c.b16 %v3015_v55, %v3014_v56 }
 0x269   : > { %v3494_v4 = vsel %vm1063_vm0, %v3466_v47, %v3493_v49  ;;  %v3448_v50 = vor.u32 %v3447_v53, %v3444_v28  ;;  %v3038_v47 = vpack.c.b16 %v3014_v56, %v3013_v61 }
 0x26a   : > { %v3135_v18 = vshrl.u32 %v9646_v62, 16  ;;  %v3138_v51 = vshll.u32 %v9646_v62, 16 }
 0x26b   : > { %v3508_v21 = vshll.u32 %v3038_v47, 16  ;;  %v3449_v58 = vsel %vm1063_vm0, %v3421_v5, %v3448_v50 }
 0x26c   : > { %v3137_v13 = vrot.slane %v3135_v18, 4  ;;  %v3140_v31 = vrot.slane %v3138_v51, 5 }
 0x26d   : > { %v3510_v29 = vrot.slane %v3508_v21, 4 }
 0x26f   : > { %v2780_v44 = vpop.f32.mrf.mxu0 }
 0x270   : > { %v9636_v0 = vadd.f32 %v2780_v44, %v9393_v17  ;;  %v1957_v17 = vadd.f32 %v11118_v23, %v11117_v39  ;;  %v3141_v44 = vor.u32 %v3140_v31, %v3137_v13 }
 0x271   : > { %3977 = vmatmul.bf16.gmra.mxu2 %v3485_v48  ;;  %v11119_v48 = vld [vmem:[#allocation22_spill] sm:$0xff] }
 0x272   : > { %4140 = vmatmul.bf16.gmra.mxu0 %v3422_v45  ;;  %v2694_v16 = vadd.f32 %v9409_v22, %v1957_v17  ;;  %v3220_v22 = vrot.slane %v9606_v37, 5  ;;  %v3505_v45 = vshrl.u32 %v3038_v47, 16  ;;  %v3142_v40 = vsel %vm437_vm2, %v3132_v60, %v3141_v44  ;;  %v7057_v37 = vld [vmem:[%s8189_s11 + $0xd0] sm:$0xff] }
 0x273   : > { %v3514_v8 = vshrl.u32 %v3142_v40, 16  ;;  %v3517_v26 = vshll.u32 %v3142_v40, 16  ;;  %v2950_v60 = vpack.c.bf16 %v7057_v37, %v7057_v37  ;;  %v3016_v17 = vunpack.c.l.b16 %v2949_v33 }
 0x274   : > { %v3221_v59 = vsel %vm584_vm1, %v3218_v12, %v3220_v22  ;;  %v3507_v9 = vrot.slane %v3505_v45, 3 }
 0x275   : > { %v3516_v61 = vrot.slane %v3514_v8, 3  ;;  %v3519_v25 = vrot.slane %v3517_v26, 4  ;;  %v3469_v39 = vshrl.u32 %v3221_v59, 16  ;;  %v3472_v23 = vshll.u32 %v3221_v59, 16 }
 0x276   : > { %4066 = vmatmul.bf16.gmra.mxu3 %v3494_v4  ;;  %v3511_v56 = vor.u32 %v3510_v29, %v3507_v9  ;;  %v9664_v12 = vunpack.c.l.b16 %v2950_v60  ;;  %v3039_v45 = vpack.c.b16 %v3016_v17, %v3015_v55  ;;  %v1966_v55 = vpop.f32.mrf.mxu2 }
 0x277   : > { %v2782_v30 = vpop.f32.mrf.mxu0  ;;  %v3520_v5 = vor.u32 %v3519_v25, %v3516_v61  ;;  %v3471_v18 = vrot.slane %v3469_v39, 3  ;;  %v3474_v51 = vrot.slane %v3472_v23, 4  ;;  %v7058_v25 = vld [vmem:[%s8189_s11 + $0xd8] sm:$0xff] }
 0x278   : > { %v9648_v20 = vadd.f32 %v2782_v30, %v2694_v16  ;;  %v3512_v16 = vsel %vm1063_vm0, %v3484_v46, %v3511_v56  ;;  %v9669_v28 = vpack.c.b16 %v9664_v12, %v3016_v17  ;;  %v3532_v40 = vshrl.u32 %v3039_v45, 16 }
 0x279   : > { %v3521_v30 = vsel %vm1063_vm0, %v3493_v49, %v3520_v5  ;;  %v3222_v49 = vrot.slane %v9626_v63, 5  ;;  %v7059_v63 = vld [vmem:[%s8189_s11 + $0xe0] sm:$0xff]  ;;  %v2951_v39 = vpack.c.bf16 %v7058_v25, %v7058_v25 }
 0x27a   : > { %v3144_v31 = vshrl.u32 %v9669_v28, 16  ;;  %v3534_v37 = vrot.slane %v3532_v40, 3  ;;  %v2952_v23 = vpack.c.bf16 %v7059_v63, %v7059_v63 }
 0x27b   : > { %v3223_v6 = vsel %vm584_vm1, %v3220_v22, %v3222_v49 }
 0x27c   : > { %v3146_v46 = vrot.slane %v3144_v31, 4  ;;  %v3496_v17 = vshrl.u32 %v3223_v6, 16 }
 0x27f   : > { %v2785_v1 = vpop.f32.mrf.mxu0 }
 0x280   : > { %v9656_v2 = vadd.f32 %v2785_v1, %v9448_v10  ;;  %v1962_v10 = vadd.f32 %v11119_v48, %v9278_v19  ;;  %v3147_v19 = vshll.u32 %v9669_v28, 16  ;;  %v3535_v1 = vshll.u32 %v3039_v45, 16 }
 0x281   : > { %3982 = vmatmul.bf16.gmra.mxu2 %v3512_v16  ;;  %v11120_v16 = vld [vmem:[#allocation23_spill] sm:$0xff] }
 0x282   : > { %4145 = vmatmul.bf16.gmra.mxu0 %v3449_v58  ;;  %v2699_v4 = vadd.f32 %v9469_v36, %v1962_v10  ;;  %v3149_v47 = vrot.slane %v3147_v19, 5  ;;  %v3475_v36 = vor.u32 %v3474_v51, %v3471_v18  ;;  %v3537_v61 = vrot.slane %v3535_v1, 4 }
 0x283   : > { %v3018_v10 = vunpack.c.l.b16 %v2951_v39  ;;  %v3498_v19 = vrot.slane %v3496_v17, 3  ;;  %v7061_v17 = vld [vmem:[%s8189_s11 + $0xf0] sm:$0xff] }
 0x284   : > { %v3150_v21 = vor.u32 %v3149_v47, %v3146_v46  ;;  %v3476_v26 = vsel %vm1063_vm0, %v3448_v50, %v3475_v36  ;;  %v3499_v50 = vshll.u32 %v3223_v6, 16 }
 0x286   : > { %4071 = vmatmul.bf16.gmra.mxu3 %v3521_v30  ;;  %v3151_v58 = vsel %vm437_vm2, %v3141_v44, %v3150_v21  ;;  %v3538_v44 = vor.u32 %v3537_v61, %v3534_v37  ;;  %v9688_v30 = vunpack.c.l.b16 %v2952_v23  ;;  %v3501_v46 = vrot.slane %v3499_v50, 4  ;;  %v7060_v23 = vld [vmem:[%s8189_s11 + $0xe8] sm:$0xff] }
 0x287   : > { %v2787_v53 = vpop.f32.mrf.mxu0  ;;  %v3541_v59 = vshrl.u32 %v3151_v58, 16  ;;  %v3544_v9 = vshll.u32 %v3151_v58, 16 }
 0x288   : > { %v9671_v13 = vadd.f32 %v2787_v53, %v2699_v4  ;;  %v9685_v4 = vpop.f32.mrf.mxu3  ;;  %v3539_v22 = vsel %vm1063_vm0, %v3511_v56, %v3538_v44  ;;  %v9693_v51 = vpack.c.b16 %v9688_v30, %v3018_v10  ;;  %v3502_v58 = vor.u32 %v3501_v46, %v3498_v19  ;;  %v11121_v19 = vld [vmem:[#allocation13_spill] sm:$0xff] }
 0x289   : > { %v3543_v33 = vrot.slane %v3541_v59, 3  ;;  %v3546_v60 = vrot.slane %v3544_v9, 4  ;;  %v2709_v46 = vadd.f32 %v9538_v3, %v11121_v19 }
 0x28a   : > { %v3153_v45 = vshrl.u32 %v9693_v51, 16  ;;  %v3156_v40 = vshll.u32 %v9693_v51, 16  ;;  %v3503_v25 = vsel %vm1063_vm0, %v3475_v36, %v3502_v58 }
 0x28b   : > { %v3547_v48 = vor.u32 %v3546_v60, %v3543_v33 }
 0x28c   : > { %v3155_v1 = vrot.slane %v3153_v45, 4 }
 0x28d   : > { %v3548_v18 = vsel %vm1063_vm0, %v3520_v5, %v3547_v48  ;;  %v3224_v5 = vrot.slane %v9646_v62, 5 }
 0x28f   : > { %v2790_v8 = vpop.f32.mrf.mxu0  ;;  %v3225_v62 = vsel %vm584_vm1, %v3222_v49, %v3224_v5 }
 0x290   : > { %v9679_v29 = vadd.f32 %v2790_v8, %v9494_v14  ;;  %v1967_v14 = vadd.f32 %v1966_v55, %v11120_v16  ;;  %v2953_v16 = vpack.c.bf16 %v7060_v23, %v7060_v23  ;;  %v3523_v36 = vshrl.u32 %v3225_v62, 16 }
 0x291   : > { %3987 = vmatmul.bf16.gmra.mxu2 %v3539_v22  ;;  %v3526_v22 = vshll.u32 %v3225_v62, 16 }
 0x292   : > { %4150 = vmatmul.bf16.gmra.mxu0 %v3476_v26  ;;  %v2704_v53 = vadd.f32 %v9504_v38, %v1967_v14  ;;  %v3158_v38 = vrot.slane %v3156_v40, 5  ;;  %v3040_v26 = vpack.c.b16 %v3018_v10, %v9664_v12  ;;  %v2954_v14 = vpack.c.bf16 %v7061_v17, %v7061_v17 }
 0x293   : > { %v9699_v56 = vpop.f32.mrf.mxu2 }
 0x294   : > { %v3159_v59 = vor.u32 %v3158_v38, %v3155_v1  ;;  %v3559_v9 = vshrl.u32 %v3040_v26, 16  ;;  %v3562_v6 = vshll.u32 %v3040_v26, 16  ;;  %v3525_v38 = vrot.slane %v3523_v36, 3 }
 0x295   : > { %v3528_v26 = vrot.slane %v3526_v22, 4 }
 0x296   : > { %4076 = vmatmul.bf16.gmra.mxu3 %v3548_v18  ;;  %v3160_v37 = vsel %vm437_vm2, %v3150_v21, %v3159_v59  ;;  %v3561_v60 = vrot.slane %v3559_v9, 3  ;;  %v3564_v39 = vrot.slane %v3562_v6, 4  ;;  %v3020_v18 = vunpack.c.l.b16 %v2953_v16 }
 0x297   : > { %v2792_v31 = vpop.f32.mrf.mxu0  ;;  %v3568_v63 = vshrl.u32 %v3160_v37, 16  ;;  %v3571_v55 = vshll.u32 %v3160_v37, 16 }
 0x298   : > { %v9695_v47 = vadd.f32 %v2792_v31, %v2704_v53  ;;  %v9702_v8 = vpop.f32.mrf.mxu3  ;;  %v3565_v21 = vor.u32 %v3564_v39, %v3561_v60  ;;  %v9718_v31 = vunpack.c.l.b16 %v2954_v14 }
 0x299   : > { %v3570_v50 = vrot.slane %v3568_v63, 3  ;;  %v3573_v10 = vrot.slane %v3571_v55, 4  ;;  %v3041_v55 = vpack.c.b16 %v3020_v18, %v9688_v30  ;;  %v7062_v30 = vld [vmem:[%s8189_s11 + $0xf8] sm:$0xff] }
 0x29a   : > { %v3566_v49 = vsel %vm1063_vm0, %v3538_v44, %v3565_v21  ;;  %v9724_v40 = vpack.c.b16 %v9718_v31, %v3020_v18  ;;  %v7063_v18 = vld [vmem:[%s8189_s11 + $0x100] sm:$0xff] }
 0x29b   : > { %v9713_v12 = vpop.f32.mrf.mxu2  ;;  %v3574_v53 = vor.u32 %v3573_v10, %v3570_v50  ;;  %v3586_v60 = vshrl.u32 %v3041_v55, 16  ;;  %v3589_v39 = vshll.u32 %v3041_v55, 16 }
 0x29c   : > { %v3162_v6 = vshrl.u32 %v9724_v40, 16  ;;  %v3165_v44 = vshll.u32 %v9724_v40, 16 }
 0x29d   : > { %v3575_v45 = vsel %vm1063_vm0, %v3547_v48, %v3574_v53  ;;  %v3226_v48 = vrot.slane %v9669_v28, 5  ;;  %v3588_v22 = vrot.slane %v3586_v60, 3  ;;  %v7753_v60 = vld [vmem:[%s8154_s22 + $0x138] sm:$0xff] }
 0x29e   : > { %v3167_v3 = vrot.slane %v3165_v44, 5  ;;  %5110 = vmatpush.bf16.msra.mxu2 %v7753_v60 }
 0x29f   : > { %v2795_v61 = vpop.f32.mrf.mxu0  ;;  %v3227_v36 = vsel %vm584_vm1, %v3224_v5, %v3226_v48 }
 0x2a0   : > { %v9708_v33 = vadd.f32 %v2795_v61, %v9526_v54  ;;  %v9715_v54 = vpop.f32.mrf.mxu3  ;;  %v3164_v61 = vrot.slane %v3162_v6, 4 }
 0x2a1   : > { %3992 = vmatmul.bf16.gmra.mxu2 %v3566_v49  ;;  %v3591_v49 = vrot.slane %v3589_v39, 4 }
 0x2a2   : > { %4155 = vmatmul.bf16.gmra.mxu0 %v3503_v25  ;;  %v3529_v25 = vor.u32 %v3528_v26, %v3525_v38  ;;  %v3168_v62 = vor.u32 %v3167_v3, %v3164_v61  ;;  %v3553_v38 = vshll.u32 %v3227_v36, 16  ;;  %v11123_v3 = vld [vmem:[#allocation14_spill] sm:$0xff] }
 0x2a3   : > { %v2714_v55 = vadd.f32 %v9685_v4, %v11123_v3 }
 0x2a4   : > { %v9730_v37 = vpop.f32.mrf.mxu2  ;;  %v3169_v23 = vsel %vm437_vm2, %v3159_v59, %v3168_v62  ;;  %v3530_v50 = vsel %vm1063_vm0, %v3502_v58, %v3529_v25  ;;  %v2955_v58 = vpack.c.bf16 %v7062_v30, %v7062_v30 }
 0x2a5   : > { %v3595_v10 = vshrl.u32 %v3169_v23, 16  ;;  %v3598_v16 = vshll.u32 %v3169_v23, 16  ;;  %v7745_v23 = vld [vmem:[%s8154_s22 + $0xf8] sm:$0xff] }
 0x2a6   : > { %4081 = vmatmul.bf16.gmra.mxu3 %v3575_v45  ;;  %v9748_v45 = vor.u32 %v3591_v49, %v3588_v22  ;;  %v3022_v5 = vunpack.c.l.b16 %v2955_v58  ;;  %5061 = vmatpush.bf16.msra.mxu1 %v7745_v23 }
 0x2a7   : > { %v2797_v1 = vpop.f32.mrf.mxu0  ;;  %v3597_v59 = vrot.slane %v3595_v10, 3 }
 0x2a8   : > { %v9726_v9 = vadd.f32 %v2797_v1, %v2709_v46  ;;  %v3600_v46 = vrot.slane %v3598_v16, 4  ;;  %v3550_v1 = vshrl.u32 %v3227_v36, 16  ;;  %v3593_v44 = vsel %vm1063_vm0, %v3565_v21, %v9748_v45 }
 0x2a9   : > { %v9733_v63 = vpop.f32.mrf.mxu3  ;;  %v3555_v16 = vrot.slane %v3553_v38, 4  ;;  %v3042_v58 = vpack.c.b16 %v3022_v5, %v9718_v31 }
 0x2aa   : > { %v9750_v26 = vor.u32 %v3600_v46, %v3597_v59  ;;  %v3552_v10 = vrot.slane %v3550_v1, 3  ;;  %v3228_v59 = vrot.slane %v9693_v51, 5 }
 0x2ab   : > { %v3613_v1 = vshrl.u32 %v3042_v58, 16  ;;  %v3616_v38 = vshll.u32 %v3042_v58, 16 }
 0x2ac   : > { %v9746_v19 = vpop.f32.mrf.mxu2  ;;  %v3602_v39 = vsel %vm1063_vm0, %v3574_v53, %v9750_v26  ;;  %v9773_v30 = vor.u32 %v3555_v16, %v3552_v10  ;;  %v3229_v31 = vsel %vm584_vm1, %v3226_v48, %v3228_v59 }
 0x2ad   : > { %v3618_v23 = vrot.slane %v3616_v38, 4  ;;  %v3577_v58 = vshrl.u32 %v3229_v31, 16 }
 0x2af   : > { %v2800_v17 = vpop.f32.mrf.mxu0 }
 0x2b0   : > { %v9739_v14 = vadd.f32 %v2800_v17, %v9558_v7  ;;  %v2956_v7 = vpack.c.bf16 %v7063_v18, %v7063_v18  ;;  %v4038_v18 = vadd.f32 %v9702_v8, %v9699_v56 }
 0x2b1   : > { %v9752_v6 = vpop.f32.mrf.mxu3  ;;  %3997 = vmatmul.bf16.gmra.mxu2 %v3593_v44 }
 0x2b2   : > { %11122 = vst [vmem:[#allocation15_spill] sm:$0xff] %v9739_v14  ;;  %4160 = vmatmul.bf16.gmra.mxu0 %v3530_v50  ;;  %v9756_v61 = vunpack.c.l.b16 %v2956_v7 }
 0x2b4   : > { %v9765_v17 = vpack.c.b16 %v9756_v61, %v3022_v5  ;;  %v9771_v22 = vpop.f32.mrf.mxu2  ;;  %v3615_v5 = vrot.slane %v3613_v1, 3 }
 0x2b6   : > { %v3171_v21 = vshrl.u32 %v9765_v17, 16  ;;  %v3174_v4 = vshll.u32 %v9765_v17, 16  ;;  %4086 = vmatmul.bf16.gmra.mxu3 %v3602_v39  ;;  %v9787_v39 = vld [vmem:[%s8148_s26] ss:$0 sm:$0xff] }
 0x2b7   : > { %v2802_v50 = vpop.f32.mrf.mxu0 }
 0x2b8   : > { %v9767_v36 = vadd.f32 %v2802_v50, %v2714_v55  ;;  %v3173_v53 = vrot.slane %v3171_v21, 4  ;;  %v3176_v49 = vrot.slane %v3174_v4, 5  ;;  %v3557_v55 = vsel %vm1063_vm0, %v3529_v25, %v9773_v30  ;;  %v7065_v50 = vld [vmem:[%s8189_s11 + $0x110] sm:$0xff] }
 0x2b9   : > { %v9778_v46 = vpop.f32.mrf.mxu3  ;;  %v11125_v4 = vld [vmem:[#allocation24_spill] sm:$0xff] }
 0x2ba   : > { %11124 = vst [vmem:[#allocation16_spill] sm:$0xff] %v9767_v36  ;;  %v3177_v7 = vor.u32 %v3176_v49, %v3173_v53  ;;  %v9799_v49 = vor.u32 %v3618_v23, %v3615_v5  ;;  %v3579_v5 = vrot.slane %v3577_v58, 3 }
 0x2bc   : > { %v3178_v44 = vsel %vm437_vm2, %v3168_v62, %v3177_v7  ;;  %v7064_v62 = vld [vmem:[%s8189_s11 + $0x108] sm:$0xff]  ;;  %v9796_v10 = vpop.f32.mrf.mxu2 }
 0x2bd   : > { %v3622_v56 = vshrl.u32 %v3178_v44, 16  ;;  %v3625_v8 = vshll.u32 %v3178_v44, 16  ;;  %v2957_v25 = vpack.c.bf16 %v7064_v62, %v7064_v62  ;;  %v3580_v44 = vshll.u32 %v3229_v31, 16 }
 0x2bf   : > { %v4126_v3 = vpop.f32.mrf.mxu0  ;;  %v3624_v16 = vrot.slane %v3622_v56, 3  ;;  %v3627_v21 = vrot.slane %v3625_v8, 4  ;;  %v3024_v48 = vunpack.c.l.b16 %v2957_v25 }
 0x2c0   : > { %v4127_v60 = vadd.f32 %v4126_v3, %v4038_v18  ;;  %v2958_v18 = vpack.c.bf16 %v7065_v50, %v7065_v50  ;;  %v3620_v3 = vsel %vm1063_vm0, %v9748_v45, %v9799_v49  ;;  %v3582_v45 = vrot.slane %v3580_v44, 4  ;;  %v11126_v50 = vld [vmem:[#allocation10_spill] sm:$0xff] }
 0x2c1   : > { %v9801_v28 = vor.u32 %v3627_v21, %v3624_v16  ;;  %v9804_v38 = vpop.f32.mrf.mxu3  ;;  %4002 = vmatmul.bf16.gmra.mxu2 %v3620_v3  ;;  %v3043_v44 = vpack.c.b16 %v3024_v48, %v9756_v61 }
 0x2c2   : > { %v4206_v53 = vadd.f32 %v4127_v60, %v11125_v4  ;;  %4165 = vmatmul.bf16.gmra.mxu0 %v3557_v55  ;;  %v9809_v56 = vunpack.c.l.b16 %v2958_v18  ;;  %v4040_v55 = vadd.f32 %v9715_v54, %v9713_v12  ;;  %v9829_v4 = vor.u32 %v3582_v45, %v3579_v5 }
 0x2c3   : > { %v3629_v8 = vsel %vm1063_vm0, %v9750_v26, %v9801_v28  ;;  %v4043_v26 = vadd.f32 %v9733_v63, %v9730_v37  ;;  %v3230_v18 = vrot.slane %v9724_v40, 5  ;;  %v3640_v3 = vshrl.u32 %v3043_v44, 16  ;;  %v9841_v63 = vpop.f32.mrf.mxu1 }
 0x2c4   : > { %v4241_v1 = vadd.f32 %v9787_v39, %v4206_v53  ;;  %v9820_v60 = vpack.c.b16 %v9809_v56, %v3024_v48  ;;  %v9824_v54 = vpop.f32.mrf.mxu2 }
 0x2c5   : > { %v3231_v61 = vsel %vm584_vm1, %v3228_v59, %v3230_v18  ;;  %v3642_v48 = vrot.slane %v3640_v3, 3 }
 0x2c6   : > { %7215 = vst [vmem:[%s9813_s17 + $0x20] sm:$0xff] %v4241_v1  ;;  %v3180_v62 = vshrl.u32 %v9820_v60, 16  ;;  %v3183_v12 = vshll.u32 %v9820_v60, 16  ;;  %4091 = vmatmul.bf16.gmra.mxu3 %v3629_v8  ;;  %v3607_v59 = vshll.u32 %v3231_v61, 16 }
 0x2c7   : > { %v4128_v31 = vpop.f32.mrf.mxu0 }
 0x2c8   : > { %v4129_v23 = vadd.f32 %v4128_v31, %v4040_v55  ;;  %v3182_v21 = vrot.slane %v3180_v62, 4  ;;  %v3185_v25 = vrot.slane %v3183_v12, 5  ;;  %v3643_v55 = vshll.u32 %v3043_v44, 16 }
 0x2c9   : > { %v9833_v58 = vpop.f32.mrf.mxu3  ;;  %v3584_v31 = vsel %vm1063_vm0, %v9773_v30, %v9829_v4  ;;  %v3604_v44 = vshrl.u32 %v3231_v61, 16 }
 0x2ca   : > { %v4207_v16 = vadd.f32 %v4129_v23, %v11126_v50  ;;  %v9836_v1 = vor.u32 %v3185_v25, %v3182_v21  ;;  %v3645_v62 = vrot.slane %v3643_v55, 4  ;;  %v11127_v25 = vld [vmem:[#allocation25_spill] sm:$0xff] }
 0x2cc   : > { %v4242_v53 = vadd.f32 %v9787_v39, %v4207_v16  ;;  %v3187_v37 = vsel %vm437_vm2, %v3177_v7, %v9836_v1  ;;  %v9853_v50 = vpop.f32.mrf.mxu2 }
 0x2cd   : > { %v3649_v5 = vshrl.u32 %v3187_v37, 16  ;;  %v3652_v45 = vshll.u32 %v3187_v37, 16 }
 0x2ce   : > { %7216 = vst [vmem:[%s9813_s17 + $0x28] sm:$0xff] %v4242_v53 }
 0x2cf   : > { %v4131_v8 = vpop.f32.mrf.mxu0  ;;  %v3651_v16 = vrot.slane %v3649_v5, 3  ;;  %v3654_v21 = vrot.slane %v3652_v45, 4 }
 0x2d0   : > { %v4132_v23 = vadd.f32 %v4131_v8, %v4043_v26  ;;  %v9856_v26 = vor.u32 %v3645_v62, %v3642_v48  ;;  %v7744_v48 = vld [vmem:[%s8154_s22 + $0xf0] sm:$0xff] }
 0x2d1   : > { %v9858_v3 = vor.u32 %v3654_v21, %v3651_v16  ;;  %v9861_v8 = vpop.f32.mrf.mxu3  ;;  %v3609_v16 = vrot.slane %v3607_v59, 4  ;;  %5062 = vmatpush.bf16.msra.mxu1 %v7744_v48  ;;  %v9881_v21 = vpop.f32.mrf.mxu1 }
 0x2d2   : > { %v4208_v53 = vadd.f32 %v4132_v23, %v11127_v25  ;;  %4170 = vmatmul.bf16.gmra.mxu0 %v3584_v31  ;;  %v3647_v5 = vsel %vm1063_vm0, %v9799_v49, %v9856_v26  ;;  %v4045_v31 = vadd.f32 %v9752_v6, %v9746_v19  ;;  %v7752_v23 = vld [vmem:[%s8154_s22 + $0x130] sm:$0xff] }
 0x2d3   : > { %4007 = vmatmul.bf16.gmra.mxu2 %v3647_v5  ;;  %v3656_v61 = vsel %vm1063_vm0, %v9801_v28, %v9858_v3  ;;  %v11129_v28 = vld [vmem:[#allocation26_spill] sm:$0xff]  ;;  %v11057_v5 = vrot.slane %v9765_v17, 5 }
 0x2d4   : > { %v4243_v37 = vadd.f32 %v9787_v39, %v4208_v53  ;;  %5111 = vmatpush.bf16.msra.mxu2 %v7752_v23 }
 0x2d5   : > { %v7066_v12 = vld [vmem:[%s8189_s11 + $0x118] sm:$0xff]  ;;  %v7067_v7 = vld [vmem:[%s8189_s11 + $0x120] sm:$0xff] }
 0x2d6   : > { %v2959_v30 = vpack.c.bf16 %v7066_v12, %v7066_v12  ;;  %v2960_v51 = vpack.c.bf16 %v7067_v7, %v7067_v7  ;;  %7217 = vst [vmem:[%s9813_s17 + $0x30] sm:$0xff] %v4243_v37  ;;  %v3606_v7 = vrot.slane %v3604_v44, 3  ;;  %4096 = vmatmul.bf16.gmra.mxu3 %v3656_v61  ;;  %v4048_v44 = vadd.f32 %v9778_v46, %v9771_v22 }
 0x2d7   : > { %v4133_v12 = vpop.f32.mrf.mxu0 }
 0x2d8   : > { %v3026_v55 = vunpack.c.l.b16 %v2959_v30  ;;  %v9866_v45 = vunpack.c.l.b16 %v2960_v51  ;;  %v4134_v49 = vadd.f32 %v4133_v12, %v4045_v31  ;;  %v9883_v30 = vpop.f32.mrf.mxu2  ;;  %v9888_v59 = vor.u32 %v3609_v16, %v3606_v7 }
 0x2d9   : > { %v9892_v31 = vpop.f32.mrf.mxu3 }
 0x2da   : > { %11128 = vst [vmem:[#allocation17_spill] sm:$0xff] %v9866_v45  ;;  %v9877_v62 = vpack.c.b16 %v9866_v45, %v3026_v55  ;;  %v4209_v25 = vadd.f32 %v4134_v49, %v11129_v28  ;;  %v3044_v23 = vpack.c.b16 %v3026_v55, %v9809_v56  ;;  %v3611_v46 = vsel %vm1063_vm0, %v9829_v4, %v9888_v59  ;;  %v11130_v4 = vld [vmem:[#allocation27_spill] sm:$0xff] }
 0x2db   : > { %v3233_v56 = vsel %vm584_vm1, %v3230_v18, %v11057_v5 }
 0x2dc   : > { %v3189_v19 = vshrl.u32 %v9877_v62, 16  ;;  %v3192_v6 = vshll.u32 %v9877_v62, 16  ;;  %v4244_v37 = vadd.f32 %v9787_v39, %v4209_v25  ;;  %v3667_v48 = vshrl.u32 %v3044_v23, 16 }
 0x2dd   : > { %v3670_v12 = vshll.u32 %v3044_v23, 16  ;;  %v3631_v40 = vshrl.u32 %v3233_v56, 16  ;;  %v3634_v36 = vshll.u32 %v3233_v56, 16 }
 0x2de   : > { %v3191_v53 = vrot.slane %v3189_v19, 4  ;;  %v3194_v51 = vrot.slane %v3192_v6, 5  ;;  %7218 = vst [vmem:[%s9813_s17 + $0x38] sm:$0xff] %v4244_v37  ;;  %v3669_v55 = vrot.slane %v3667_v48, 3 }
 0x2df   : > { %v4136_v22 = vpop.f32.mrf.mxu0  ;;  %v3672_v6 = vrot.slane %v3670_v12, 4 }
 0x2e0   : > { %v3195_v61 = vor.u32 %v3194_v51, %v3191_v53  ;;  %v4137_v19 = vadd.f32 %v4136_v22, %v4048_v44  ;;  %v9908_v53 = vpop.f32.mrf.mxu2  ;;  %v9911_v22 = vpop.f32.mrf.mxu1 }
 0x2e1   : > { %v3673_v44 = vor.u32 %v3672_v6, %v3669_v55  ;;  %v9914_v5 = vpop.f32.mrf.mxu3  ;;  %v3633_v6 = vrot.slane %v3631_v40, 3 }
 0x2e2   : > { %v3196_v49 = vsel %vm437_vm2, %v9836_v1, %v3195_v61  ;;  %v4210_v23 = vadd.f32 %v4137_v19, %v11130_v4  ;;  %4175 = vmatmul.bf16.gmra.mxu0 %v3611_v46  ;;  %v4050_v46 = vadd.f32 %v9804_v38, %v9796_v10  ;;  %v11131_v10 = vld [vmem:[#allocation12_spill] sm:$0xff] }
 0x2e3   : > { %v3676_v7 = vshrl.u32 %v3196_v49, 16  ;;  %v3679_v16 = vshll.u32 %v3196_v49, 16 }
 0x2e4   : > { %v4245_v12 = vadd.f32 %v9787_v39, %v4210_v23 }
 0x2e5   : > { %v7068_v28 = vld [vmem:[%s8189_s11 + $0x128] sm:$0xff]  ;;  %v7069_v25 = vld [vmem:[%s8189_s11 + $0x130] sm:$0xff]  ;;  %v3678_v1 = vrot.slane %v3676_v7, 3  ;;  %v3681_v51 = vrot.slane %v3679_v16, 4  ;;  %v3674_v7 = vsel %vm1063_vm0, %v9856_v26, %v3673_v44 }
 0x2e6   : > { %v2961_v37 = vpack.c.bf16 %v7068_v28, %v7068_v28  ;;  %v2962_v49 = vpack.c.bf16 %v7069_v25, %v7069_v25  ;;  %7219 = vst [vmem:[%s9813_s17 + $0x40] sm:$0xff] %v4245_v12  ;;  %4012 = vmatmul.bf16.gmra.mxu2 %v3674_v7  ;;  %v3636_v28 = vrot.slane %v3634_v36, 4  ;;  %v4053_v36 = vadd.f32 %v9833_v58, %v9824_v54 }
 0x2e7   : > { %v3682_v18 = vor.u32 %v3681_v51, %v3678_v1  ;;  %v4138_v55 = vpop.f32.mrf.mxu0 }
 0x2e8   : > { %v3028_v48 = vunpack.c.l.b16 %v2961_v37  ;;  %v9918_v16 = vunpack.c.l.b16 %v2962_v49  ;;  %v4139_v25 = vadd.f32 %v4138_v55, %v4050_v46  ;;  %v9930_v51 = vpop.f32.mrf.mxu2  ;;  %v3637_v4 = vor.u32 %v3636_v28, %v3633_v6  ;;  %v9948_v46 = vpop.f32.mrf.mxu1 }
 0x2e9   : > { %v3683_v19 = vsel %vm1063_vm0, %v9858_v3, %v3682_v18  ;;  %v3234_v49 = vrot.slane %v9820_v60, 5  ;;  %v9941_v40 = vpop.f32.mrf.mxu3 }
 0x2ea   : > { %v9926_v56 = vpack.c.b16 %v9918_v16, %v3028_v48  ;;  %4101 = vmatmul.bf16.gmra.mxu3 %v3683_v19  ;;  %v4211_v38 = vadd.f32 %v4139_v25, %v11131_v10  ;;  %v9944_v12 = vpack.c.b16 %v3028_v48, %v9866_v45  ;;  %v3638_v60 = vsel %vm1063_vm0, %v9888_v59, %v3637_v4 }
 0x2eb   : > { %v11133_v25 = vrot.slane %v9765_v17, 5 }
 0x2ec   : > { %v11059_v26 = vshrl.u32 %v9926_v56, 16  ;;  %v11058_v1 = vshll.u32 %v9926_v56, 16  ;;  %v4246_v23 = vadd.f32 %v9787_v39, %v4211_v38  ;;  %v11061_v19 = vshrl.u32 %v9944_v12, 16 }
 0x2ed   : > { %v11060_v55 = vshll.u32 %v9944_v12, 16  ;;  %v3235_v10 = vsel %vm584_vm1, %v11133_v25, %v3234_v49 }
 0x2ee   : > { %v3200_v3 = vrot.slane %v11059_v26, 4  ;;  %v3203_v37 = vrot.slane %v11058_v1, 5  ;;  %7220 = vst [vmem:[%s9813_s17 + $0x48] sm:$0xff] %v4246_v23  ;;  %v3696_v38 = vrot.slane %v11061_v19, 3  ;;  %v11134_v23 = vld [vmem:[#allocation11_spill] sm:$0xff]  ;;  %v3658_v17 = vshrl.u32 %v3235_v10, 16 }
 0x2ef   : > { %v4141_v58 = vpop.f32.mrf.mxu0 }
 0x2f0   : > { %v9946_v7 = vor.u32 %v3203_v37, %v3200_v3  ;;  %v4142_v48 = vadd.f32 %v4141_v58, %v4053_v36  ;;  %v3699_v3 = vrot.slane %v11060_v55, 4  ;;  %v3661_v58 = vshll.u32 %v3235_v10, 16 }
 0x2f1   : > { %v9970_v26 = vpop.f32.mrf.mxu3 }
 0x2f2   : > { %11132 = vst [vmem:[#allocation18_spill] sm:$0xff] %v9946_v7  ;;  %v3205_v54 = vsel %vm437_vm2, %v3195_v61, %v9946_v7  ;;  %v9964_v61 = vpop.f32.mrf.mxu2  ;;  %4180 = vmatmul.bf16.gmra.mxu0 %v3638_v60  ;;  %v9967_v36 = vor.u32 %v3699_v3, %v3696_v38  ;;  %v9980_v38 = vpop.f32.mrf.mxu1  ;;  %v3660_v3 = vrot.slane %v3658_v17, 3  ;;  %v3046_v17 = vpack.c.b16 %v9918_v16, %v9918_v16 }
 0x2f3   : > { %v3703_v6 = vshrl.u32 %v3205_v54, 16  ;;  %v3706_v28 = vshll.u32 %v3205_v54, 16  ;;  %v4212_v54 = vadd.f32 %v4142_v48, %v11134_v23  ;;  %v7743_v48 = vld [vmem:[%s8154_s22 + $0xe8] sm:$0xff]  ;;  %v11135_v23 = vld [vmem:[#allocation28_spill] sm:$0xff] }
 0x2f4   : > { %v3701_v55 = vsel %vm1063_vm0, %v3673_v44, %v9967_v36  ;;  %5063 = vmatpush.bf16.msra.mxu1 %v7743_v48  ;;  %v11136_v48 = vld [vmem:[#allocation29_spill] sm:$0xff] }
 0x2f5   : > { %v3705_v37 = vrot.slane %v3703_v6, 3  ;;  %v3708_v59 = vrot.slane %v3706_v28, 4  ;;  %v4247_v1 = vadd.f32 %v9787_v39, %v4212_v54  ;;  %v4055_v6 = vadd.f32 %v9861_v8, %v9853_v50  ;;  %v7751_v28 = vld [vmem:[%s8154_s22 + $0x128] sm:$0xff] }
 0x2f6   : > { %4017 = vmatmul.bf16.gmra.mxu2 %v3701_v55 }
 0x2f7   : > { %v3709_v25 = vor.u32 %v3708_v59, %v3705_v37  ;;  %7221 = vst [vmem:[%s9813_s17 + $0x50] sm:$0xff] %v4247_v1  ;;  %v4143_v10 = vpop.f32.mrf.mxu0  ;;  %v3663_v37 = vrot.slane %v3661_v58, 4  ;;  %5112 = vmatpush.bf16.msra.mxu2 %v7751_v28  ;;  %v3236_v1 = vrot.slane %v9877_v62, 5  ;;  %v3721_v58 = vshrl.u32 %v3046_v17, 16 }
 0x2f8   : > { %v4144_v59 = vadd.f32 %v4143_v10, %v4055_v6  ;;  %v3724_v6 = vshll.u32 %v3046_v17, 16  ;;  %v3730_v28 = vshrl.u32 %v9946_v7, 16  ;;  %v2835_v62 = vadd.f32 %v9841_v63, %v11136_v48 }
 0x2f9   : > { %v3710_v60 = vsel %vm1063_vm0, %v3682_v18, %v3709_v25  ;;  %v3664_v8 = vor.u32 %v3663_v37, %v3660_v3  ;;  %v4058_v18 = vadd.f32 %v9892_v31, %v9883_v30  ;;  %v9989_v54 = vpop.f32.mrf.mxu3  ;;  %v3237_v31 = vsel %vm584_vm1, %v3234_v49, %v3236_v1 }
 0x2fa   : > { %4106 = vmatmul.bf16.gmra.mxu3 %v3710_v60  ;;  %v9982_v44 = vpop.f32.mrf.mxu2  ;;  %v4213_v50 = vadd.f32 %v4144_v59, %v11135_v23  ;;  %v3733_v60 = vshll.u32 %v9946_v7, 16  ;;  %v3723_v37 = vrot.slane %v3721_v58, 3  ;;  %v3726_v59 = vrot.slane %v3724_v6, 4 }
 0x2fb   : > { %v3665_v30 = vsel %vm1063_vm0, %v3637_v4, %v3664_v8  ;;  %v3732_v23 = vrot.slane %v3730_v28, 3  ;;  %v3685_v45 = vshrl.u32 %v3237_v31, 16  ;;  %v3688_v63 = vshll.u32 %v3237_v31, 16 }
 0x2fc   : > { %v4248_v55 = vadd.f32 %v9787_v39, %v4213_v50  ;;  %v10000_v50 = vpop.f32.mrf.mxu1  ;;  %v3735_v17 = vrot.slane %v3733_v60, 4  ;;  %v3727_v7 = vor.u32 %v3726_v59, %v3723_v37 }
 0x2fd   : > { %v3687_v28 = vrot.slane %v3685_v45, 3  ;;  %v3690_v60 = vrot.slane %v3688_v63, 4 }
 0x2fe   : > { %7222 = vst [vmem:[%s9813_s17 + $0x58] sm:$0xff] %v4248_v55  ;;  %v3736_v48 = vor.u32 %v3735_v17, %v3732_v23  ;;  %v3728_v49 = vsel %vm1063_vm0, %v9967_v36, %v3727_v7  ;;  %v2840_v17 = vadd.f32 %v9911_v22, %v9480_v42  ;;  %v4065_v42 = vadd.f32 %v9970_v26, %v9964_v61  ;;  %v7750_v22 = vld [vmem:[%s8154_s22 + $0x120] sm:$0xff] }
 0x2ff   : > { %v4146_v10 = vpop.f32.mrf.mxu0  ;;  %5113 = vmatpush.bf16.msra.mxu2 %v7750_v22  ;;  %v7758_v22 = vld [vmem:[%s8154_s22 + $0x160] sm:$0xff] }
 0x300   : > { %v4147_v3 = vadd.f32 %v4146_v10, %v4058_v18  ;;  %v4060_v18 = vadd.f32 %v9914_v5, %v9908_v53  ;;  %v3737_v58 = vsel %vm1063_vm0, %v3709_v25, %v3736_v48  ;;  %v3691_v5 = vor.u32 %v3690_v60, %v3687_v28 }
 0x301   : > { %v10005_v14 = vpop.f32.mrf.mxu3  ;;  %v4063_v53 = vadd.f32 %v9941_v40, %v9930_v51 }
 0x302   : > { %v10002_v55 = vpop.f32.mrf.mxu2  ;;  %v4214_v19 = vadd.f32 %v4147_v3, %v2835_v62  ;;  %4185 = vmatmul.bf16.gmra.mxu0 %v3665_v30  ;;  %v11137_v62 = vld [vmem:[#allocation30_spill] sm:$0xff]  ;;  %v10023_v3 = vrot.slane %v9926_v56, 5  ;;  %v3692_v59 = vsel %vm1063_vm0, %v3664_v8, %v3691_v5 }
 0x304   : > { %v4249_v4 = vadd.f32 %v9787_v39, %v4214_v19  ;;  %v2837_v19 = vadd.f32 %v9881_v21, %v11137_v62  ;;  %v10017_v31 = vpop.f32.mrf.mxu1  ;;  %v3239_v40 = vsel %vm584_vm1, %v3236_v1, %v10023_v3  ;;  %v7742_v1 = vld [vmem:[%s8154_s22 + $0xe0] sm:$0xff] }
 0x305   : > { %5064 = vmatpush.bf16.msra.mxu1 %v7742_v1 }
 0x306   : > { %7223 = vst [vmem:[%s9813_s17 + $0x60] sm:$0xff] %v4249_v4  ;;  %4022 = vmatmul.bf16.gmra.mxu2 %v3728_v49  ;;  %v3712_v4 = vshrl.u32 %v3239_v40, 16  ;;  %v3715_v49 = vshll.u32 %v3239_v40, 16 }
 0x307   : > { %v4148_v6 = vpop.f32.mrf.mxu0 }
 0x308   : > { %v4149_v10 = vadd.f32 %v4148_v6, %v4060_v18  ;;  %v3714_v60 = vrot.slane %v3712_v4, 3  ;;  %v3717_v62 = vrot.slane %v3715_v49, 4 }
 0x309   : > { %v10025_v45 = vpop.f32.mrf.mxu3 }
 0x30a   : > { %4111 = vmatmul.bf16.gmra.mxu3 %v3737_v58  ;;  %v10015_v30 = vpop.f32.mrf.mxu2  ;;  %v4215_v7 = vadd.f32 %v4149_v10, %v2837_v19  ;;  %v2842_v10 = vadd.f32 %v9948_v46, %v9496_v52  ;;  %v3718_v26 = vor.u32 %v3717_v62, %v3714_v60  ;;  %v2847_v62 = vadd.f32 %v10000_v50, %v9531_v43 }
 0x30c   : > { %v4250_v25 = vadd.f32 %v9787_v39, %v4215_v7  ;;  %v10041_v6 = vpop.f32.mrf.mxu1 }
 0x30d   : > { %v7070_v37 = vld [vmem:[%s8189_s11 + $0x138] sm:$0xff] }
 0x30e   : > { %7224 = vst [vmem:[%s9813_s17 + $0x68] sm:$0xff] %v4250_v25  ;;  %v2963_v23 = vpack.c.bf16 %v7070_v37, %v7070_v37  ;;  %v4068_v37 = vadd.f32 %v9989_v54, %v9982_v44  ;;  %v2845_v44 = vadd.f32 %v9980_v38, %v9511_v15 }
 0x30f   : > { %v4151_v21 = vpop.f32.mrf.mxu0 }
 0x310   : > { %v4152_v51 = vadd.f32 %v4151_v21, %v4063_v53  ;;  %v10036_v18 = vunpack.c.l.b16 %v2963_v23  ;;  %v7761_v53 = vld [vmem:[%s8154_s22 + $0x178] sm:$0xff]  ;;  %v7760_v23 = vld [vmem:[%s8154_s22 + $0x170] sm:$0xff] }
 0x311   : > { %v10039_v58 = vpop.f32.mrf.mxu3  ;;  %5159 = vmatpush.bf16.msrb.mxu3 %v7761_v53  ;;  %v4073_v53 = vadd.f32 %v10025_v45, %v10015_v30 }
 0x312   : > { %v4216_v63 = vadd.f32 %v4152_v51, %v2840_v17  ;;  %4190 = vmatmul.bf16.gmra.mxu0 %v3692_v59  ;;  %v10034_v48 = vpop.f32.mrf.mxu2  ;;  %v3208_v19 = vpack.c.b16 %v10036_v18, %v10036_v18  ;;  %v3719_v51 = vsel %vm1063_vm0, %v3691_v5, %v3718_v26  ;;  %v4070_v5 = vadd.f32 %v10005_v14, %v10002_v55 }
 0x314   : > { %v4251_v8 = vadd.f32 %v9787_v39, %v4216_v63  ;;  %v3240_v61 = vrot.slane %v3208_v19, 5  ;;  %v10062_v52 = vpop.f32.mrf.mxu1  ;;  %v7759_v63 = vld [vmem:[%s8154_s22 + $0x168] sm:$0xff] }
 0x315   : > { %5160 = vmatpush.bf16.msrb.mxu3 %v7760_v23  ;;  %v4623_v23 = vrot.slane %v9944_v12, 5 }
 0x316   : > { %7225 = vst [vmem:[%s9813_s17 + $0x70] sm:$0xff] %v4251_v8  ;;  %v3241_v40 = vsel %vm584_vm1, %v10023_v3, %v3240_v61  ;;  %v7749_v61 = vld [vmem:[%s8154_s22 + $0x118] sm:$0xff] }
 0x317   : > { %v4153_v28 = vpop.f32.mrf.mxu0  ;;  %v3739_v49 = vshrl.u32 %v3241_v40, 16  ;;  %v3742_v8 = vshll.u32 %v3241_v40, 16  ;;  %5114 = vmatpush.bf16.msra.mxu2 %v7749_v61 }
 0x318   : > { %v4154_v7 = vadd.f32 %v4153_v28, %v4065_v42 }
 0x319   : > { %v10059_v17 = vpop.f32.mrf.mxu3  ;;  %5161 = vmatpush.bf16.msrb.mxu3 %v7759_v63  ;;  %v3741_v1 = vrot.slane %v3739_v49, 3  ;;  %v3744_v28 = vrot.slane %v3742_v8, 4  ;;  %v11139_v8 = vshll.u32 %v9944_v12, 16 }
 0x31a   : > { %v4217_v25 = vadd.f32 %v4154_v7, %v2842_v10  ;;  %v10056_v59 = vpop.f32.mrf.mxu2  ;;  %v7757_v10 = vld [vmem:[%s8154_s22 + $0x158] sm:$0xff] }
 0x31b   : > { %v3745_v55 = vor.u32 %v3744_v28, %v3741_v1 }
 0x31c   : > { %v4252_v21 = vadd.f32 %v9787_v39, %v4217_v25  ;;  %v10082_v7 = vpop.f32.mrf.mxu1 }
 0x31d   : > { %5162 = vmatpush.bf16.msrb.mxu3 %v7758_v22  ;;  %v3746_v43 = vsel %vm1063_vm0, %v3718_v26, %v3745_v55  ;;  %v4713_v22 = vshrl.u32 %v4623_v23, 16 }
 0x31e   : > { %7226 = vst [vmem:[%s9813_s17 + $0x78] sm:$0xff] %v4252_v21  ;;  %v10091_v21 = vpack.c.b16 %v10036_v18, %v9918_v16 }
 0x31f   : > { %v4156_v46 = vpop.f32.mrf.mxu0  ;;  %v4715_v55 = vrot.slane %v4713_v22, 3 }
 0x320   : > { %v4157_v54 = vadd.f32 %v4156_v46, %v4068_v37  ;;  %v7756_v37 = vld [vmem:[%s8154_s22 + $0x150] sm:$0xff]  ;;  %v4624_v30 = vrot.slane %v10091_v21, 5  ;;  %v4558_v45 = vshrl.u32 %v10091_v21, 16  ;;  %v4561_v46 = vshll.u32 %v10091_v21, 16 }
 0x321   : > { %v10077_v60 = vpop.f32.mrf.mxu3  ;;  %5163 = vmatpush.bf16.msrb.mxu3 %v7757_v10  ;;  %v7747_v10 = vld [vmem:[%s8154_s22 + $0x108] sm:$0xff] }
 0x322   : > { %v4218_v4 = vadd.f32 %v4157_v54, %v2845_v44  ;;  %4195 = vmatmul.bf16.gmra.mxu0 %v3719_v51  ;;  %v10075_v15 = vpop.f32.mrf.mxu2  ;;  %v2850_v51 = vadd.f32 %v10017_v31, %v9545_v35  ;;  %v7748_v44 = vld [vmem:[%s8154_s22 + $0x110] sm:$0xff]  ;;  %v7755_v54 = vld [vmem:[%s8154_s22 + $0x148] sm:$0xff]  ;;  %v4625_v63 = vsel %vm584_vm1, %v4623_v23, %v4624_v30  ;;  %v4560_v35 = vrot.slane %v4558_v45, 4 }
 0x323   : > { %5115 = vmatpush.bf16.msra.mxu2 %v7748_v44  ;;  %v4721_v1 = vshrl.u32 %v4625_v63, 16  ;;  %v2852_v44 = vadd.f32 %v10041_v6, %v9564_v57 }
 0x324   : > { %v4253_v42 = vadd.f32 %v9787_v39, %v4218_v4  ;;  %v11138_v4 = vshrl.u32 %v9944_v12, 16  ;;  %v10116_v28 = vpop.f32.mrf.mxu1  ;;  %v4563_v12 = vrot.slane %v4561_v46, 5 }
 0x325   : > { %5164 = vmatpush.bf16.msrb.mxu3 %v7756_v37 }
 0x326   : > { %7227 = vst [vmem:[%s9813_s17 + $0x80] sm:$0xff] %v4253_v42  ;;  %v4552_v49 = vrot.slane %v11138_v4, 4  ;;  %v4555_v42 = vrot.slane %v11139_v8, 5  ;;  %v4564_v37 = vor.u32 %v4563_v12, %v4560_v35  ;;  %v7746_v8 = vld [vmem:[%s8154_s22 + $0x100] sm:$0xff] }
 0x327   : > { %v4158_v38 = vpop.f32.mrf.mxu0  ;;  %5116 = vmatpush.bf16.msra.mxu2 %v7747_v10 }
 0x328   : > { %v4159_v19 = vadd.f32 %v4158_v38, %v4070_v5  ;;  %v4716_v5 = vshll.u32 %v4623_v23, 16  ;;  %v4724_v38 = vshll.u32 %v4625_v63, 16 }
 0x329   : > { %v10105_v26 = vpop.f32.mrf.mxu3  ;;  %5165 = vmatpush.bf16.msrb.mxu3 %v7755_v54 }
 0x32a   : > { %v4219_v14 = vadd.f32 %v4159_v19, %v2847_v62  ;;  %v10101_v16 = vpop.f32.mrf.mxu2  ;;  %v4556_v62 = vor.u32 %v4555_v42, %v4552_v49  ;;  %v4726_v61 = vrot.slane %v4724_v38, 4 }
 0x32b   : > { %5117 = vmatpush.bf16.msra.mxu2 %v7746_v8 }
 0x32c   : > { %v4254_v25 = vadd.f32 %v9787_v39, %v4219_v14  ;;  %v7754_v14 = vld [vmem:[%s8154_s22 + $0x140] sm:$0xff]  ;;  %v4565_v4 = vsel %vm437_vm2, %v4556_v62, %v4564_v37 }
 0x32d   : > { %5166 = vmatpush.bf16.msrb.mxu3 %v7754_v14  ;;  %v4704_v42 = vshrl.u32 %v4565_v4, 16 }
 0x32e   : > { %7228 = vst [vmem:[%s9813_s17 + $0x88] sm:$0xff] %v4254_v25  ;;  %v4723_v25 = vrot.slane %v4721_v1, 3 }
 0x32f   : > { %v4161_v50 = vpop.f32.mrf.mxu0 }
 0x330   : > { %v4162_v40 = vadd.f32 %v4161_v50, %v4073_v53  ;;  %v4718_v53 = vrot.slane %v4716_v5, 4  ;;  %v7741_v50 = vld [vmem:[%s8154_s22 + $0xd8] sm:$0xff]  ;;  %v4727_v63 = vor.u32 %v4726_v61, %v4723_v25  ;;  %v4707_v5 = vshll.u32 %v4565_v4, 16  ;;  %v10145_v61 = vpop.f32.mrf.mxu1 }
 0x331   : > { %5065 = vmatpush.bf16.msra.mxu1 %v7741_v50  ;;  %v10136_v12 = vpop.f32.mrf.mxu3 }
 0x332   : > { %v4220_v31 = vadd.f32 %v4162_v40, %v2850_v51  ;;  %4200 = vmatmul.bf16.gmra.mxu0 %v3746_v43  ;;  %v4075_v43 = vadd.f32 %v10039_v58, %v10034_v48  ;;  %v4719_v23 = vor.u32 %v4718_v53, %v4715_v55  ;;  %v4696_v51 = vshrl.u32 %v4556_v62, 16  ;;  %v10134_v6 = vpop.f32.mrf.mxu2 }
 0x333   : > { %v4699_v40 = vshll.u32 %v4556_v62, 16  ;;  %v4706_v62 = vrot.slane %v4704_v42, 3  ;;  %v4709_v10 = vrot.slane %v4707_v5, 4  ;;  %v4078_v53 = vadd.f32 %v10059_v17, %v10056_v59 }
 0x334   : > { %v4255_v19 = vadd.f32 %v9787_v39, %v4220_v31  ;;  %v4698_v48 = vrot.slane %v4696_v51, 3  ;;  %v4728_v22 = vsel %vm1063_vm0, %v4719_v23, %v4727_v63  ;;  %v2855_v59 = vadd.f32 %v10062_v52, %v9573_v41 }
 0x335   : > { %v4701_v58 = vrot.slane %v4699_v40, 4  ;;  %5167 = vmatmul.bf16.vlgmr.msrb.gmra.mxu3 %v4728_v22 }
 0x336   : > { %7229 = vst [vmem:[%s9813_s17 + $0x90] sm:$0xff] %v4255_v19 }
 0x337   : > { %v4163_v54 = vpop.f32.mrf.mxu0  ;;  %v4702_v19 = vor.u32 %v4701_v58, %v4698_v48 }
 0x338   : > { %v4164_v49 = vadd.f32 %v4163_v54, %v4075_v43  ;;  %v4710_v43 = vor.u32 %v4709_v10, %v4706_v62  ;;  %v10176_v10 = vpop.f32.mrf.mxu1 }
 0x339   : > { %v10168_v5 = vpop.f32.mrf.mxu3 }
 0x33a   : > { %v4221_v57 = vadd.f32 %v4164_v49, %v2852_v44  ;;  %v4711_v51 = vsel %vm1063_vm0, %v4702_v19, %v4710_v43  ;;  %v10166_v41 = vpop.f32.mrf.mxu2  ;;  %v2857_v19 = vadd.f32 %v10082_v7, %v9587_v27  ;;  %v4083_v27 = vadd.f32 %v10105_v26, %v10101_v16 }
 0x33b   : > { %5118 = vmatmul.bf16.vlgmr.msra.gmra.mxu2 %v4711_v51  ;;  %v2860_v26 = vadd.f32 %v10116_v28, %v9596_v24 }
 0x33c   : > { %v4256_v25 = vadd.f32 %v9787_v39, %v4221_v57 }
 0x33d   : > { %v4317_v35 = vld [vmem:[%s8189_s11 + $0x140] sm:$0xff]  ;;  %v4318_v31 = vld [vmem:[%s8189_s11 + $0x148] sm:$0xff] }
 0x33e   : > { %v4335_v1 = vpack.c.bf16 %v4317_v35, %v4317_v35  ;;  %v4336_v38 = vpack.c.bf16 %v4318_v31, %v4318_v31  ;;  %7230 = vst [vmem:[%s9813_s17 + $0x98] sm:$0xff] %v4256_v25 }
 0x33f   : > { %v4166_v23 = vpop.f32.mrf.mxu0 }
 0x340   : > { %v10138_v14 = vunpack.c.l.b16 %v4335_v1  ;;  %v10140_v55 = vunpack.c.l.b16 %v4336_v38  ;;  %v4167_v17 = vadd.f32 %v4166_v23, %v4078_v53  ;;  %v4080_v1 = vadd.f32 %v10077_v60, %v10075_v15 }
 0x342   : > { %v10149_v50 = vpack.c.b16 %v10140_v55, %v10138_v14  ;;  %v4222_v48 = vadd.f32 %v4167_v17, %v2855_v59 }
 0x344   : > { %v4626_v40 = vrot.slane %v10149_v50, 5  ;;  %v4567_v44 = vshrl.u32 %v10149_v50, 16  ;;  %v4570_v54 = vshll.u32 %v10149_v50, 16  ;;  %v4257_v31 = vadd.f32 %v9787_v39, %v4222_v48 }
 0x346   : > { %v4627_v4 = vsel %vm584_vm1, %v4624_v30, %v4626_v40  ;;  %v4569_v49 = vrot.slane %v4567_v44, 4  ;;  %v4572_v8 = vrot.slane %v4570_v54, 5  ;;  %7231 = vst [vmem:[%s9813_s17 + $0xa0] sm:$0xff] %v4257_v31 }
 0x347   : > { %v4743_v58 = vshrl.u32 %v4627_v4, 16  ;;  %v4746_v42 = vshll.u32 %v4627_v4, 16  ;;  %v4168_v53 = vpop.f32.mrf.mxu0 }
 0x348   : > { %v4573_v35 = vor.u32 %v4572_v8, %v4569_v49  ;;  %v4169_v25 = vadd.f32 %v4168_v53, %v4080_v1  ;;  %v10203_v1 = vpop.f32.mrf.mxu1 }
 0x349   : > { %v4745_v52 = vrot.slane %v4743_v58, 3  ;;  %v4748_v22 = vrot.slane %v4746_v42, 4  ;;  %v10194_v42 = vpop.f32.mrf.mxu2 }
 0x34a   : > { %v4574_v30 = vsel %vm437_vm2, %v4564_v37, %v4573_v35  ;;  %v4223_v60 = vadd.f32 %v4169_v25, %v2857_v19 }
 0x34b   : > { %v4749_v38 = vor.u32 %v4748_v22, %v4745_v52  ;;  %v4734_v57 = vshrl.u32 %v4574_v30, 16  ;;  %v4737_v62 = vshll.u32 %v4574_v30, 16  ;;  %v10196_v52 = vpop.f32.mrf.mxu3 }
 0x34c   : > { %v4258_v7 = vadd.f32 %v9787_v39, %v4223_v60 }
 0x34d   : > { %v4750_v23 = vsel %vm1063_vm0, %v4727_v63, %v4749_v38  ;;  %v4736_v51 = vrot.slane %v4734_v57, 3  ;;  %v4739_v59 = vrot.slane %v4737_v62, 4  ;;  %v4319_v37 = vld [vmem:[%s8189_s11 + $0x150] sm:$0xff]  ;;  %v4320_v17 = vld [vmem:[%s8189_s11 + $0x158] sm:$0xff] }
 0x34e   : > { %v4337_v4 = vpack.c.bf16 %v4319_v37, %v4319_v37  ;;  %v4338_v15 = vpack.c.bf16 %v4320_v17, %v4320_v17  ;;  %5172 = vmatmul.bf16.gmra.mxu3 %v4750_v23  ;;  %7232 = vst [vmem:[%s9813_s17 + $0xa8] sm:$0xff] %v4258_v7  ;;  %v7740_v17 = vld [vmem:[%s8154_s22 + $0xd0] sm:$0xff] }
 0x34f   : > { %v4740_v49 = vor.u32 %v4739_v59, %v4736_v51  ;;  %v4171_v31 = vpop.f32.mrf.mxu0  ;;  %5066 = vmatpush.bf16.msra.mxu1 %v7740_v17 }
 0x350   : > { %v10181_v8 = vunpack.c.l.b16 %v4337_v4  ;;  %v10183_v48 = vunpack.c.l.b16 %v4338_v15 }
 0x351   : > { %v4741_v63 = vsel %vm1063_vm0, %v4710_v43, %v4740_v49  ;;  %v4172_v43 = vadd.f32 %v4171_v31, %v4083_v27  ;;  %v2862_v27 = vadd.f32 %v10145_v61, %v9608_v11  ;;  %v10218_v31 = vpop.f32.mrf.mxu2 }
 0x352   : > { %v10191_v58 = vpack.c.b16 %v10183_v48, %v10181_v8  ;;  %5123 = vmatmul.bf16.gmra.mxu2 %v4741_v63 }
 0x353   : > { %v4224_v53 = vadd.f32 %v4172_v43, %v2860_v26 }
 0x354   : > { %v4628_v22 = vrot.slane %v10191_v58, 5  ;;  %v4576_v30 = vshrl.u32 %v10191_v58, 16  ;;  %v4579_v16 = vshll.u32 %v10191_v58, 16 }
 0x355   : > { %v4259_v24 = vadd.f32 %v9787_v39, %v4224_v53 }
 0x356   : > { %v4629_v57 = vsel %vm584_vm1, %v4626_v40, %v4628_v22  ;;  %v4578_v62 = vrot.slane %v4576_v30, 4  ;;  %v4581_v19 = vrot.slane %v4579_v16, 5  ;;  %v4085_v40 = vadd.f32 %v10136_v12, %v10134_v6  ;;  %v4092_v12 = vpop.f32.mrf.mxu3 }
 0x357   : > { %v4765_v25 = vshrl.u32 %v4629_v57, 16  ;;  %v4768_v23 = vshll.u32 %v4629_v57, 16  ;;  %7233 = vst [vmem:[%s9813_s17 + $0xb0] sm:$0xff] %v4259_v24  ;;  %v4173_v7 = vpop.f32.mrf.mxu0  ;;  %v4088_v24 = vadd.f32 %v10168_v5, %v10166_v41  ;;  %v2865_v41 = vadd.f32 %v10176_v10, %v9616_v32 }
 0x358   : > { %v4582_v51 = vor.u32 %v4581_v19, %v4578_v62  ;;  %v4174_v63 = vadd.f32 %v4173_v7, %v4085_v40 }
 0x359   : > { %v4767_v28 = vrot.slane %v4765_v25, 3  ;;  %v4770_v59 = vrot.slane %v4768_v23, 4  ;;  %v2869_v23 = vpop.f32.mrf.mxu1  ;;  %v4005_v7 = vpop.f32.mrf.mxu2 }
 0x35a   : > { %v4583_v37 = vsel %vm437_vm2, %v4573_v35, %v4582_v51  ;;  %v4225_v53 = vadd.f32 %v4174_v63, %v2862_v27 }
 0x35b   : > { %v4771_v4 = vor.u32 %v4770_v59, %v4767_v28  ;;  %v4756_v15 = vshrl.u32 %v4583_v37, 16  ;;  %v4759_v60 = vshll.u32 %v4583_v37, 16 }
 0x35d   : > { %v4772_v26 = vsel %vm1063_vm0, %v4749_v38, %v4771_v4  ;;  %v4758_v35 = vrot.slane %v4756_v15, 3  ;;  %v4761_v43 = vrot.slane %v4759_v60, 4  ;;  %v4260_v38 = vadd.f32 %v9787_v39, %v4225_v53 }
 0x35e   : > { %v4321_v57 = vld [vmem:[%s8189_s11 + $0x160] sm:$0xff]  ;;  %v4322_v6 = vld [vmem:[%s8189_s11 + $0x168] sm:$0xff]  ;;  %5177 = vmatmul.bf16.gmra.mxu3 %v4772_v26 }
 0x35f   : > { %v4339_v62 = vpack.c.bf16 %v4321_v57, %v4321_v57  ;;  %v4340_v19 = vpack.c.bf16 %v4322_v6, %v4322_v6  ;;  %v4762_v25 = vor.u32 %v4761_v43, %v4758_v35  ;;  %7234 = vst [vmem:[%s9813_s17 + $0xb8] sm:$0xff] %v4260_v38  ;;  %v4176_v37 = vpop.f32.mrf.mxu0  ;;  %v4094_v35 = vpop.f32.mrf.mxu3  ;;  %v10247_v57 = vld [vmem:[%s8148_s26] ss:$0 sm:$0xff] }
 0x360   : > { %v4177_v5 = vadd.f32 %v4176_v37, %v4088_v24 }
 0x361   : > { %v10223_v11 = vunpack.c.l.b16 %v4339_v62  ;;  %v10225_v61 = vunpack.c.l.b16 %v4340_v19  ;;  %v4763_v28 = vsel %vm1063_vm0, %v4740_v49, %v4762_v25  ;;  %v2871_v6 = vpop.f32.mrf.mxu1  ;;  %v4090_v19 = vadd.f32 %v10196_v52, %v10194_v42 }
 0x362   : > { %5128 = vmatmul.bf16.gmra.mxu2 %v4763_v28  ;;  %v4226_v27 = vadd.f32 %v4177_v5, %v2865_v41  ;;  %v2867_v28 = vadd.f32 %v10203_v1, %v9628_v34  ;;  %v4093_v34 = vadd.f32 %v4092_v12, %v10218_v31  ;;  %v2870_v31 = vadd.f32 %v2869_v23, %v9636_v0 }
 0x363   : > { %v10233_v59 = vpack.c.b16 %v10225_v61, %v10223_v11  ;;  %v4095_v23 = vadd.f32 %v4094_v35, %v4005_v7 }
 0x364   : > { %v4261_v32 = vadd.f32 %v10247_v57, %v4226_v27 }
 0x365   : > { %v4630_v40 = vrot.slane %v10233_v59, 5  ;;  %v4585_v17 = vshrl.u32 %v10233_v59, 16  ;;  %v4588_v15 = vshll.u32 %v10233_v59, 16 }
 0x366   : > { %7235 = vst [vmem:[%s9813_s17 + $0xc0] sm:$0xff] %v4261_v32 }
 0x367   : > { %v4631_v39 = vsel %vm584_vm1, %v4628_v22, %v4630_v40  ;;  %v4587_v49 = vrot.slane %v4585_v17, 4  ;;  %v4590_v60 = vrot.slane %v4588_v15, 5  ;;  %v4178_v37 = vpop.f32.mrf.mxu0 }
 0x368   : > { %v4787_v63 = vshrl.u32 %v4631_v39, 16  ;;  %v4790_v26 = vshll.u32 %v4631_v39, 16  ;;  %v4179_v41 = vadd.f32 %v4178_v37, %v4090_v19 }
 0x369   : > { %v4591_v43 = vor.u32 %v4590_v60, %v4587_v49  ;;  %v2874_v19 = vpop.f32.mrf.mxu1 }
 0x36a   : > { %v4789_v10 = vrot.slane %v4787_v63, 3  ;;  %v4792_v22 = vrot.slane %v4790_v26, 4  ;;  %v4227_v26 = vadd.f32 %v4179_v41, %v2867_v28 }
 0x36b   : > { %v4592_v62 = vsel %vm437_vm2, %v4582_v51, %v4591_v43 }
 0x36c   : > { %v4793_v53 = vor.u32 %v4792_v22, %v4789_v10  ;;  %v4778_v24 = vshrl.u32 %v4592_v62, 16  ;;  %v4781_v38 = vshll.u32 %v4592_v62, 16  ;;  %v4262_v1 = vadd.f32 %v10247_v57, %v4227_v26  ;;  %v4008_v10 = vpop.f32.mrf.mxu2 }
 0x36d   : > { %v4323_v60 = vld [vmem:[%s8189_s11 + $0x170] sm:$0xff]  ;;  %v4324_v27 = vld [vmem:[%s8189_s11 + $0x178] sm:$0xff] }
 0x36e   : > { %v4794_v5 = vsel %vm1063_vm0, %v4771_v4, %v4793_v53  ;;  %v4780_v39 = vrot.slane %v4778_v24, 3  ;;  %v4783_v49 = vrot.slane %v4781_v38, 4  ;;  %v4341_v51 = vpack.c.bf16 %v4323_v60, %v4323_v60  ;;  %v4097_v4 = vpop.f32.mrf.mxu3  ;;  %7236 = vst [vmem:[%s9813_s17 + $0xc8] sm:$0xff] %v4262_v1 }
 0x36f   : > { %v4342_v63 = vpack.c.bf16 %v4324_v27, %v4324_v27  ;;  %5182 = vmatmul.bf16.gmra.mxu3 %v4794_v5  ;;  %v4181_v24 = vpop.f32.mrf.mxu0 }
 0x370   : > { %v4784_v42 = vor.u32 %v4783_v49, %v4780_v39  ;;  %v10259_v52 = vunpack.c.l.b16 %v4341_v51  ;;  %v4182_v12 = vadd.f32 %v4181_v24, %v4093_v34  ;;  %v7739_v34 = vld [vmem:[%s8154_s22 + $0xc8] sm:$0xff] }
 0x371   : > { %v10261_v32 = vunpack.c.l.b16 %v4342_v63  ;;  %5067 = vmatpush.bf16.msra.mxu1 %v7739_v34  ;;  %v2876_v35 = vpop.f32.mrf.mxu1 }
 0x372   : > { %v4785_v22 = vsel %vm1063_vm0, %v4762_v25, %v4784_v42  ;;  %v4228_v39 = vadd.f32 %v4182_v12, %v2870_v31  ;;  %v2872_v31 = vadd.f32 %v2871_v6, %v9648_v20  ;;  %v4098_v6 = vadd.f32 %v4097_v4, %v4008_v10 }
 0x373   : > { %v10268_v62 = vpack.c.b16 %v10261_v32, %v10259_v52  ;;  %5133 = vmatmul.bf16.gmra.mxu2 %v4785_v22 }
 0x374   : > { %v4263_v51 = vadd.f32 %v10247_v57, %v4228_v39 }
 0x375   : > { %v4632_v38 = vrot.slane %v10268_v62, 5  ;;  %v4594_v28 = vshrl.u32 %v10268_v62, 16  ;;  %v11065_v37 = vshll.u32 %v10268_v62, 16 }
 0x376   : > { %7237 = vst [vmem:[%s9813_s17 + $0xd0] sm:$0xff] %v4263_v51 }
 0x377   : > { %v4633_v25 = vsel %vm584_vm1, %v4630_v40, %v4632_v38  ;;  %v4596_v41 = vrot.slane %v4594_v28, 4  ;;  %v4599_v5 = vrot.slane %v11065_v37, 5  ;;  %v4010_v40 = vpop.f32.mrf.mxu2  ;;  %v4183_v12 = vpop.f32.mrf.mxu0 }
 0x378   : > { %v4809_v49 = vshrl.u32 %v4633_v25, 16  ;;  %v4812_v60 = vshll.u32 %v4633_v25, 16  ;;  %v4099_v25 = vpop.f32.mrf.mxu3 }
 0x379   : > { %v4600_v27 = vor.u32 %v4599_v5, %v4596_v41  ;;  %v4184_v41 = vadd.f32 %v4183_v12, %v4095_v23 }
 0x37a   : > { %v4811_v63 = vrot.slane %v4809_v49, 3  ;;  %v4814_v26 = vrot.slane %v4812_v60, 4 }
 0x37b   : > { %v4601_v0 = vsel %vm437_vm2, %v4591_v43, %v4600_v27  ;;  %v4229_v37 = vadd.f32 %v4184_v41, %v2872_v31  ;;  %v2875_v31 = vadd.f32 %v2874_v19, %v9656_v2 }
 0x37c   : > { %v4815_v1 = vor.u32 %v4814_v26, %v4811_v63  ;;  %v4800_v22 = vshrl.u32 %v4601_v0, 16  ;;  %v4803_v24 = vshll.u32 %v4601_v0, 16 }
 0x37d   : > { %v4325_v49 = vld [vmem:[%s8189_s11 + $0x180] sm:$0xff]  ;;  %v4326_v7 = vld [vmem:[%s8189_s11 + $0x188] sm:$0xff]  ;;  %v4264_v0 = vadd.f32 %v10247_v57, %v4229_v37 }
 0x37e   : > { %v4816_v5 = vsel %vm1063_vm0, %v4793_v53, %v4815_v1  ;;  %v4802_v39 = vrot.slane %v4800_v22, 3  ;;  %v4805_v43 = vrot.slane %v4803_v24, 4  ;;  %v4343_v60 = vpack.c.bf16 %v4325_v49, %v4325_v49 }
 0x37f   : > { %v4344_v51 = vpack.c.bf16 %v4326_v7, %v4326_v7  ;;  %5187 = vmatmul.bf16.gmra.mxu3 %v4816_v5  ;;  %7238 = vst [vmem:[%s9813_s17 + $0xd8] sm:$0xff] %v4264_v0  ;;  %v4186_v34 = vpop.f32.mrf.mxu0  ;;  %v4013_v5 = vpop.f32.mrf.mxu2 }
 0x380   : > { %v4806_v63 = vor.u32 %v4805_v43, %v4802_v39  ;;  %v10288_v26 = vunpack.c.l.b16 %v4343_v60  ;;  %v4187_v41 = vadd.f32 %v4186_v34, %v4098_v6  ;;  %v4102_v39 = vpop.f32.mrf.mxu3  ;;  %v2879_v7 = vpop.f32.mrf.mxu1  ;;  %v4100_v6 = vadd.f32 %v4099_v25, %v4010_v40 }
 0x381   : > { %v10290_v20 = vunpack.c.l.b16 %v4344_v51  ;;  %v2877_v34 = vadd.f32 %v2876_v35, %v9671_v13  ;;  %v4103_v13 = vadd.f32 %v4102_v39, %v4013_v5 }
 0x382   : > { %v4807_v53 = vsel %vm1063_vm0, %v4784_v42, %v4806_v63  ;;  %v4230_v42 = vadd.f32 %v4187_v41, %v2875_v31 }
 0x383   : > { %v4547_v23 = vpack.c.b16 %v10290_v20, %v10288_v26  ;;  %5138 = vmatmul.bf16.gmra.mxu2 %v4807_v53 }
 0x384   : > { %v4265_v51 = vadd.f32 %v10247_v57, %v4230_v42 }
 0x385   : > { %v4634_v22 = vrot.slane %v4547_v23, 5  ;;  %v4603_v24 = vshrl.u32 %v4547_v23, 16  ;;  %v4606_v12 = vshll.u32 %v4547_v23, 16 }
 0x386   : > { %7239 = vst [vmem:[%s9813_s17 + $0xe0] sm:$0xff] %v4265_v51 }
 0x387   : > { %v4635_v10 = vsel %vm584_vm1, %v4632_v38, %v4634_v22  ;;  %v4605_v4 = vrot.slane %v4603_v24, 4  ;;  %v4608_v37 = vrot.slane %v4606_v12, 5  ;;  %v4188_v24 = vpop.f32.mrf.mxu0 }
 0x388   : > { %v4831_v43 = vshrl.u32 %v4635_v10, 16  ;;  %v4834_v49 = vshll.u32 %v4635_v10, 16  ;;  %v4189_v12 = vadd.f32 %v4188_v24, %v4100_v6  ;;  %v4104_v25 = vpop.f32.mrf.mxu3  ;;  %v2880_v24 = vadd.f32 %v2879_v7, %v9679_v29 }
 0x389   : > { %v4609_v60 = vor.u32 %v4608_v37, %v4605_v4 }
 0x38a   : > { %v4833_v0 = vrot.slane %v4831_v43, 3  ;;  %v4836_v2 = vrot.slane %v4834_v49, 4  ;;  %v4231_v49 = vadd.f32 %v4189_v12, %v2877_v34 }
 0x38b   : > { %v4610_v19 = vsel %vm437_vm2, %v4600_v27, %v4609_v60  ;;  %v4015_v27 = vpop.f32.mrf.mxu2 }
 0x38c   : > { %v4837_v53 = vor.u32 %v4836_v2, %v4833_v0  ;;  %v4822_v23 = vshrl.u32 %v4610_v19, 16  ;;  %v4825_v38 = vshll.u32 %v4610_v19, 16  ;;  %v4266_v35 = vadd.f32 %v10247_v57, %v4231_v49 }
 0x38d   : > { %v4535_v4 = vld [vmem:[%s8189_s11 + $0x190] sm:$0xff]  ;;  %v4536_v37 = vld [vmem:[%s8189_s11 + $0x198] sm:$0xff]  ;;  %v4105_v7 = vadd.f32 %v4104_v25, %v4015_v27 }
 0x38e   : > { %v4838_v31 = vsel %vm1063_vm0, %v4815_v1, %v4837_v53  ;;  %v4824_v41 = vrot.slane %v4822_v23, 3  ;;  %v4827_v10 = vrot.slane %v4825_v38, 4  ;;  %v4538_v42 = vpack.c.bf16 %v4535_v4, %v4535_v4  ;;  %v2881_v1 = vpop.f32.mrf.mxu1  ;;  %7240 = vst [vmem:[%s9813_s17 + $0xe8] sm:$0xff] %v4266_v35 }
 0x38f   : > { %v4539_v43 = vpack.c.bf16 %v4536_v37, %v4536_v37  ;;  %5192 = vmatmul.bf16.gmra.mxu3 %v4838_v31  ;;  %v4191_v6 = vpop.f32.mrf.mxu0 }
 0x390   : > { %v4828_v40 = vor.u32 %v4827_v10, %v4824_v41  ;;  %v10306_v51 = vunpack.c.l.b16 %v4538_v42  ;;  %v4192_v5 = vadd.f32 %v4191_v6, %v4103_v13  ;;  %v4107_v35 = vpop.f32.mrf.mxu3  ;;  %v7738_v13 = vld [vmem:[%s8154_s22 + $0xc0] sm:$0xff]  ;;  %v2882_v6 = vadd.f32 %v2881_v1, %v9695_v47 }
 0x391   : > { %v10308_v0 = vunpack.c.l.b16 %v4539_v43  ;;  %5068 = vmatpush.bf16.msra.mxu1 %v7738_v13 }
 0x392   : > { %v4829_v2 = vsel %vm1063_vm0, %v4806_v63, %v4828_v40  ;;  %v4232_v31 = vadd.f32 %v4192_v5, %v2880_v24 }
 0x393   : > { %v10314_v19 = vpack.c.b16 %v10308_v0, %v10306_v51  ;;  %5143 = vmatmul.bf16.gmra.mxu2 %v4829_v2  ;;  %v4018_v42 = vpop.f32.mrf.mxu2 }
 0x394   : > { %v4267_v37 = vadd.f32 %v10247_v57, %v4232_v31  ;;  %v4108_v1 = vadd.f32 %v4107_v35, %v4018_v42 }
 0x395   : > { %v4636_v23 = vrot.slane %v10314_v19, 5  ;;  %v4612_v38 = vshrl.u32 %v10314_v19, 16  ;;  %v4615_v34 = vshll.u32 %v10314_v19, 16 }
 0x396   : > { %7241 = vst [vmem:[%s9813_s17 + $0xf0] sm:$0xff] %v4267_v37  ;;  %v7736_v37 = vld [vmem:[%s8154_s22 + $0xb0] sm:$0xff] }
 0x397   : > { %v4637_v63 = vsel %vm584_vm1, %v4634_v22, %v4636_v23  ;;  %v4614_v39 = vrot.slane %v4612_v38, 4  ;;  %v4617_v12 = vrot.slane %v4615_v34, 5  ;;  %v2884_v38 = vpop.f32.mrf.mxu1  ;;  %v4193_v34 = vpop.f32.mrf.mxu0 }
 0x398   : > { %v4858_v41 = vshrl.u32 %v4637_v63, 16  ;;  %v4861_v10 = vshll.u32 %v4637_v63, 16  ;;  %v4194_v24 = vadd.f32 %v4193_v34, %v4105_v7  ;;  %v4109_v7 = vpop.f32.mrf.mxu3  ;;  %v2885_v42 = vadd.f32 %v2884_v38, %v9708_v33 }
 0x399   : > { %v4618_v4 = vor.u32 %v4617_v12, %v4614_v39 }
 0x39a   : > { %v4860_v43 = vrot.slane %v4858_v41, 3  ;;  %v4863_v49 = vrot.slane %v4861_v10, 4  ;;  %v4233_v12 = vadd.f32 %v4194_v24, %v2882_v6  ;;  %v7729_v10 = vld [vmem:[%s8154_s22 + $0x78] sm:$0xff] }
 0x39b   : > { %v4619_v29 = vsel %vm437_vm2, %v4609_v60, %v4618_v4  ;;  %v7737_v60 = vld [vmem:[%s8154_s22 + $0xb8] sm:$0xff]  ;;  %5635 = vmatpush.bf16.msrb.mxu2 %v7729_v10  ;;  %v4879_v24 = vshll.u32 %v4618_v4, 16 }
 0x39c   : > { %v10326_v22 = vor.u32 %v4863_v49, %v4860_v43  ;;  %v4849_v2 = vshrl.u32 %v4619_v29, 16  ;;  %v4852_v19 = vshll.u32 %v4619_v29, 16  ;;  %5684 = vmatpush.bf16.msra.mxu3 %v7737_v60  ;;  %v4268_v41 = vadd.f32 %v10247_v57, %v4233_v12  ;;  %v4020_v49 = vpop.f32.mrf.mxu2  ;;  %v7728_v29 = vld [vmem:[%s8154_s22 + $0x70] sm:$0xff]  ;;  %v7727_v60 = vld [vmem:[%s8154_s22 + $0x68] sm:$0xff]  ;;  %v7733_v10 = vld [vmem:[%s8154_s22 + $0x98] sm:$0xff] }
 0x39d   : > { %v4537_v63 = vld [vmem:[%s8189_s11 + $0x1a0] sm:$0xff] }
 0x39e   : > { %v4865_v5 = vsel %vm1063_vm0, %v4837_v53, %v10326_v22  ;;  %v4851_v27 = vrot.slane %v4849_v2, 3  ;;  %v4854_v25 = vrot.slane %v4852_v19, 4  ;;  %v4540_v39 = vpack.c.bf16 %v4537_v63, %v4537_v63  ;;  %7242 = vst [vmem:[%s9813_s17 + $0xf8] sm:$0xff] %v4268_v41  ;;  %v7735_v2 = vld [vmem:[%s8154_s22 + $0xa8] sm:$0xff]  ;;  %v7734_v63 = vld [vmem:[%s8154_s22 + $0xa0] sm:$0xff] }
 0x39f   : > { %5197 = vmatmul.bf16.gmra.mxu3 %v4865_v5  ;;  %v4196_v13 = vpop.f32.mrf.mxu0  ;;  %v2886_v6 = vpop.f32.mrf.mxu1  ;;  %5636 = vmatpush.bf16.msrb.mxu2 %v7728_v29 }
 0x3a0   : > { %v4855_v31 = vor.u32 %v4854_v25, %v4851_v27  ;;  %v4621_v47 = vunpack.c.l.b16 %v4540_v39  ;;  %5685 = vmatpush.bf16.msra.mxu3 %v7736_v37  ;;  %v4197_v35 = vadd.f32 %v4196_v13, %v4108_v1  ;;  %v4110_v1 = vadd.f32 %v4109_v7, %v4020_v49  ;;  %v4112_v13 = vpop.f32.mrf.mxu3 }
 0x3a1   : > { %v2887_v37 = vadd.f32 %v2886_v6, %v9726_v9 }
 0x3a2   : > { %v4856_v53 = vsel %vm1063_vm0, %v4828_v40, %v4855_v31  ;;  %v4622_v43 = vpack.c.b16 %v4621_v47, %v4621_v47  ;;  %v4876_v40 = vshrl.u32 %v4618_v4, 16  ;;  %v4234_v5 = vadd.f32 %v4197_v35, %v2885_v42  ;;  %v7726_v4 = vld [vmem:[%s8154_s22 + $0x60] sm:$0xff]  ;;  %v7732_v42 = vld [vmem:[%s8154_s22 + $0x90] sm:$0xff] }
 0x3a3   : > { %5148 = vmatmul.bf16.gmra.mxu2 %v4856_v53  ;;  %v4881_v47 = vrot.slane %v4879_v24, 4  ;;  %v11140_v24 = vld [vmem:[#allocation15_spill] sm:$0xff] }
 0x3a4   : > { %v4638_v19 = vrot.slane %v4622_v43, 5  ;;  %5686 = vmatpush.bf16.msra.mxu3 %v7735_v2  ;;  %v4269_v39 = vadd.f32 %v10247_v57, %v4234_v5  ;;  %v4878_v12 = vrot.slane %v4876_v40, 3  ;;  %5637 = vmatpush.bf16.msrb.mxu2 %v7727_v60  ;;  %v4023_v29 = vpop.f32.mrf.mxu2  ;;  %v7725_v2 = vld [vmem:[%s8154_s22 + $0x58] sm:$0xff]  ;;  %v7731_v40 = vld [vmem:[%s8154_s22 + $0x88] sm:$0xff] }
 0x3a5   : > { %v4113_v35 = vadd.f32 %v4112_v13, %v4023_v29 }
 0x3a6   : > { %v4639_v34 = vsel %vm584_vm1, %v4636_v23, %v4638_v19  ;;  %7243 = vst [vmem:[%s9813_s17 + $0x100] sm:$0xff] %v4269_v39  ;;  %v4882_v49 = vor.u32 %v4881_v47, %v4878_v12  ;;  %v7723_v39 = vld [vmem:[%s8154_s22 + $0x48] sm:$0xff]  ;;  %v7769_v12 = vld [vmem:[%s8154_s22 + $0x1b8] sm:$0xff] }
 0x3a7   : > { %v4885_v27 = vshrl.u32 %v4639_v34, 16  ;;  %v4888_v25 = vshll.u32 %v4639_v34, 16  ;;  %v4198_v41 = vpop.f32.mrf.mxu0  ;;  %v2889_v19 = vpop.f32.mrf.mxu1  ;;  %6367 = vmatpush.bf16.msrb.mxu0 %v7769_v12 }
 0x3a8   : > { %5687 = vmatpush.bf16.msra.mxu3 %v7734_v63  ;;  %v4199_v53 = vadd.f32 %v4198_v41, %v4110_v1  ;;  %5638 = vmatpush.bf16.msrb.mxu2 %v7726_v4  ;;  %v4883_v6 = vsel %vm1063_vm0, %v4855_v31, %v4882_v49  ;;  %v2890_v5 = vadd.f32 %v2889_v19, %v11140_v24  ;;  %v4114_v63 = vpop.f32.mrf.mxu3  ;;  %v7721_v31 = vld [vmem:[%s8154_s22 + $0x38] sm:$0xff]  ;;  %v7722_v4 = vld [vmem:[%s8154_s22 + $0x40] sm:$0xff]  ;;  %v11141_v41 = vld [vmem:[#allocation16_spill] sm:$0xff] }
 0x3a9   : > { %v4887_v33 = vrot.slane %v4885_v27, 3  ;;  %v4890_v38 = vrot.slane %v4888_v25, 4  ;;  %5586 = vmatpush.bf16.msrb.mxu1 %v7721_v31  ;;  %v11143_v31 = vshll.u32 %v9926_v56, 16 }
 0x3aa   : > { %v4235_v7 = vadd.f32 %v4199_v53, %v2887_v37 }
 0x3ab   : > { %v4891_v23 = vor.u32 %v4890_v38, %v4887_v33  ;;  %v7730_v33 = vld [vmem:[%s8154_s22 + $0x80] sm:$0xff] }
 0x3ac   : > { %5688 = vmatpush.bf16.msra.mxu3 %v7733_v10  ;;  %v4270_v9 = vadd.f32 %v10247_v57, %v4235_v7  ;;  %5639 = vmatpush.bf16.msrb.mxu2 %v7725_v2  ;;  %v4025_v25 = vpop.f32.mrf.mxu2 }
 0x3ad   : > { %v4892_v43 = vsel %vm1063_vm0, %v10326_v22, %v4891_v23  ;;  %v7724_v22 = vld [vmem:[%s8154_s22 + $0x50] sm:$0xff]  ;;  %v4115_v1 = vadd.f32 %v4114_v63, %v4025_v25 }
 0x3ae   : > { %7244 = vst [vmem:[%s9813_s17 + $0x108] sm:$0xff] %v4270_v9 }
 0x3af   : > { %5202 = vmatmul.bf16.gmra.mxu3 %v4892_v43  ;;  %v4201_v34 = vpop.f32.mrf.mxu0  ;;  %v2891_v47 = vpop.f32.mrf.mxu1 }
 0x3b0   : > { %5689 = vmatpush.bf16.msra.mxu3 %v7732_v42  ;;  %v4202_v60 = vadd.f32 %v4201_v34, %v4113_v35  ;;  %5640 = vmatpush.bf16.msrb.mxu2 %v7724_v22  ;;  %v2892_v10 = vadd.f32 %v2891_v47, %v11141_v41  ;;  %v7720_v35 = vld [vmem:[%s8154_s22 + $0x30] sm:$0xff] }
 0x3b1   : > { %5587 = vmatpush.bf16.msrb.mxu1 %v7720_v35 }
 0x3b2   : > { %v4236_v27 = vadd.f32 %v4202_v60, %v2890_v5 }
 0x3b3   : > { %5153 = vmatmul.bf16.gmra.mxu2 %v4883_v6 }
 0x3b4   : > { %5690 = vmatpush.bf16.msra.mxu3 %v7731_v40  ;;  %v4271_v38 = vadd.f32 %v10247_v57, %v4236_v27  ;;  %5641 = vmatpush.bf16.msrb.mxu2 %v7723_v39  ;;  %v4692_v39 = vrot.slane %v11143_v31, 4 }
 0x3b6   : > { %7245 = vst [vmem:[%s9813_s17 + $0x110] sm:$0xff] %v4271_v38  ;;  %v11144_v38 = vld [vmem:[#allocation17_spill] sm:$0xff] }
 0x3b7   : > { %v4203_v23 = vpop.f32.mrf.mxu0 }
 0x3b8   : > { %5691 = vmatpush.bf16.msra.mxu3 %v7730_v33  ;;  %v4204_v37 = vadd.f32 %v4203_v23, %v4115_v1  ;;  %5642 = vmatpush.bf16.msrb.mxu2 %v7722_v4  ;;  %v10381_v4 = vpack.c.b16 %v10138_v14, %v10036_v18 }
 0x3ba   : > { %v4237_v43 = vadd.f32 %v4204_v37, %v2892_v10 }
 0x3bc   : > { %v4272_v29 = vadd.f32 %v10247_v57, %v4237_v43  ;;  %v11142_v57 = vshrl.u32 %v9926_v56, 16 }
 0x3bd   : > { %v4310_v53 = vld [vmem:[%s8189_s11 + $0x108] sm:$0xff]  ;;  %v4311_v49 = vld [vmem:[%s8189_s11 + $0x110] sm:$0xff] }
 0x3be   : > { %v4328_v13 = vpack.c.bf16 %v4310_v53, %v4310_v53  ;;  %7246 = vst [vmem:[%s9813_s17 + $0x118] sm:$0xff] %v4272_v29  ;;  %v4329_v7 = vpack.c.bf16 %v4311_v49, %v4311_v49  ;;  %v4691_v63 = vrot.slane %v11142_v57, 3 }
 0x3c0   : > { %v4363_v2 = vunpack.c.l.b16 %v4328_v13  ;;  %v4364_v19 = vunpack.c.l.b16 %v4329_v7  ;;  %v10383_v43 = vor.u32 %v4692_v39, %v4691_v63 }
 0x3c2   : > { %v4388_v42 = vpack.c.b16 %v4364_v19, %v4363_v2 }
 0x3c4   : > { %v4397_v9 = vshrl.u32 %v4388_v42, 16  ;;  %v4400_v6 = vshll.u32 %v4388_v42, 16  ;;  %v4470_v40 = vrot.slane %v4388_v42, 5 }
 0x3c5   : > { %v4309_v22 = vld [vmem:[%s8189_s11 + $0x100] sm:$0xff]  ;;  %v4312_v34 = vld [vmem:[%s8189_s11 + $0x118] sm:$0xff] }
 0x3c6   : > { %v4330_v24 = vpack.c.bf16 %v4312_v34, %v4312_v34  ;;  %v4399_v5 = vrot.slane %v4397_v9, 4  ;;  %v4402_v60 = vrot.slane %v4400_v6, 5  ;;  %v4327_v27 = vpack.c.bf16 %v4309_v22, %v4309_v22 }
 0x3c7   : > { %v5243_v33 = vshrl.u32 %v4470_v40, 16  ;;  %v5246_v1 = vshll.u32 %v4470_v40, 16 }
 0x3c8   : > { %v4365_v25 = vunpack.c.l.b16 %v4330_v24  ;;  %v4403_v23 = vor.u32 %v4402_v60, %v4399_v5  ;;  %v4362_v41 = vunpack.c.l.b16 %v4327_v27 }
 0x3c9   : > { %v5245_v29 = vrot.slane %v5243_v33, 3  ;;  %v5248_v35 = vrot.slane %v5246_v1, 4  ;;  %v7719_v33 = vld [vmem:[%s8154_s22 + $0x28] sm:$0xff] }
 0x3ca   : > { %v4389_v12 = vpack.c.b16 %v11144_v38, %v4365_v25  ;;  %v4380_v47 = vpack.c.b16 %v4365_v25, %v4364_v19  ;;  %v4379_v13 = vpack.c.b16 %v4363_v2, %v4362_v41  ;;  %v5226_v9 = vshrl.u32 %v4403_v23, 16  ;;  %v7768_v38 = vld [vmem:[%s8154_s22 + $0x1b0] sm:$0xff]  ;;  %5588 = vmatpush.bf16.msrb.mxu1 %v7719_v33 }
 0x3cb   : > { %v5229_v6 = vshll.u32 %v4403_v23, 16  ;;  %v4423_v41 = vshrl.u32 %v10381_v4, 16  ;;  %6368 = vmatpush.bf16.msrb.mxu0 %v7768_v38 }
 0x3cc   : > { %v4405_v10 = vshrl.u32 %v4389_v12, 16  ;;  %v4408_v37 = vshll.u32 %v4389_v12, 16  ;;  %v4471_v53 = vrot.slane %v4389_v12, 5  ;;  %v5209_v24 = vshrl.u32 %v4379_v13, 16 }
 0x3cd   : > { %v5212_v5 = vshll.u32 %v4379_v13, 16  ;;  %v5217_v60 = vshrl.u32 %v4380_v47, 16  ;;  %v5231_v63 = vrot.slane %v5229_v6, 4  ;;  %v5249_v12 = vor.u32 %v5248_v35, %v5245_v29 }
 0x3ce   : > { %v4407_v56 = vrot.slane %v4405_v10, 4  ;;  %v4410_v49 = vrot.slane %v4408_v37, 5  ;;  %v4688_v7 = vrot.slane %v4405_v10, 3  ;;  %v4689_v42 = vrot.slane %v4408_v37, 4 }
 0x3cf   : > { %v4472_v19 = vsel %vm584_vm1, %v4470_v40, %v4471_v53  ;;  %v5228_v40 = vrot.slane %v5226_v9, 3  ;;  %v4426_v13 = vshll.u32 %v10381_v4, 16  ;;  %v4474_v29 = vsel %vm584_vm1, %v4471_v53, %v10023_v3 }
 0x3d0   : > { %v4690_v22 = vor.u32 %v4689_v42, %v4688_v7  ;;  %v5251_v18 = vshrl.u32 %v4472_v19, 16  ;;  %v5254_v14 = vshll.u32 %v4472_v19, 16  ;;  %v4411_v34 = vor.u32 %v4410_v49, %v4407_v56 }
 0x3d1   : > { %v5219_v49 = vrot.slane %v5217_v60, 3  ;;  %v5220_v7 = vshll.u32 %v4380_v47, 16  ;;  %v5232_v42 = vor.u32 %v5231_v63, %v5228_v40  ;;  %v5214_v35 = vrot.slane %v5212_v5, 4 }
 0x3d2   : > { %v4694_v2 = vsel %vm1063_vm0, %v4690_v22, %v10383_v43  ;;  %v5253_v27 = vrot.slane %v5251_v18, 3  ;;  %v5256_v25 = vrot.slane %v5254_v14, 4  ;;  %v4412_v57 = vsel %vm437_vm2, %v4403_v23, %v4411_v34 }
 0x3d3   : > { %5069 = vmatmul.bf16.vlgmr.msra.gmra.mxu1 %v4694_v2  ;;  %v5234_v31 = vshrl.u32 %v4412_v57, 16  ;;  %v5237_v39 = vshll.u32 %v4412_v57, 16  ;;  %v5211_v23 = vrot.slane %v5209_v24, 3  ;;  %v4729_v9 = vrot.slane %v4423_v41, 3 }
 0x3d4   : > { %v5257_v1 = vor.u32 %v5256_v25, %v5253_v27  ;;  %v4730_v6 = vrot.slane %v4426_v13, 4  ;;  %v5222_v22 = vrot.slane %v5220_v7, 4  ;;  %v5273_v14 = vshrl.u32 %v4474_v29, 16  ;;  %v11145_v27 = vld [vmem:[#allocation18_spill] sm:$0xff] }
 0x3d5   : > { %v5236_v10 = vrot.slane %v5234_v31, 3  ;;  %v5239_v37 = vrot.slane %v5237_v39, 4  ;;  %v5276_v2 = vshll.u32 %v4474_v29, 16  ;;  %v4421_v24 = vsel %vm437_vm2, %v4411_v34, %v11145_v27 }
 0x3d6   : > { %v5258_v56 = vsel %vm1063_vm0, %v5249_v12, %v5257_v1  ;;  %v10399_v60 = vor.u32 %v5222_v22, %v5219_v49  ;;  %v5215_v47 = vor.u32 %v5214_v35, %v5211_v23  ;;  %v4731_v25 = vor.u32 %v4730_v6, %v4729_v9 }
 0x3d7   : > { %5692 = vmatmul.bf16.vlgmr.msra.gmra.mxu3 %v5258_v56  ;;  %v5240_v19 = vor.u32 %v5239_v37, %v5236_v10  ;;  %v5264_v57 = vshrl.u32 %v4421_v24, 16  ;;  %v5267_v40 = vshll.u32 %v4421_v24, 16  ;;  %v5275_v5 = vrot.slane %v5273_v14, 3  ;;  %v7718_v56 = vld [vmem:[%s8154_s22 + $0x20] sm:$0xff] }
 0x3d8   : > { %v10403_v53 = vsel %vm1063_vm0, %v5215_v47, %v10399_v60  ;;  %v5278_v63 = vrot.slane %v5276_v2, 4  ;;  %v4732_v31 = vsel %vm1063_vm0, %v10383_v43, %v4731_v25  ;;  %v10409_v39 = vpack.c.b16 %v10181_v8, %v10140_v55  ;;  %5589 = vmatpush.bf16.msrb.mxu1 %v7718_v56 }
 0x3d9   : > { %v5241_v18 = vsel %vm1063_vm0, %v5232_v42, %v5240_v19  ;;  %v5266_v34 = vrot.slane %v5264_v57, 3  ;;  %v5269_v33 = vrot.slane %v5267_v40, 4  ;;  %v4425_v38 = vrot.slane %v4423_v41, 4  ;;  %v7717_v57 = vld [vmem:[%s8154_s22 + $0x18] sm:$0xff]  ;;  %v7767_v40 = vld [vmem:[%s8154_s22 + $0x1a8] sm:$0xff] }
 0x3da   : > { %5643 = vmatmul.bf16.vlgmr.msrb.gmra.mxu2 %v5241_v18  ;;  %v4428_v12 = vrot.slane %v4426_v13, 5  ;;  %v5279_v10 = vor.u32 %v5278_v63, %v5275_v5  ;;  %v4475_v37 = vrot.slane %v10381_v4, 5  ;;  %v4432_v23 = vshrl.u32 %v10409_v39, 16  ;;  %6369 = vmatpush.bf16.msrb.mxu0 %v7767_v40 }
 0x3db   : > { %v4435_v49 = vshll.u32 %v10409_v39, 16  ;;  %v5270_v7 = vor.u32 %v5269_v33, %v5266_v34  ;;  %v10433_v2 = vpack.c.b16 %v10223_v11, %v10183_v48  ;;  %v5282_v4 = vrot.slane %v4561_v46, 4 }
 0x3dc   : > { %v5280_v43 = vsel %vm1063_vm0, %v5257_v1, %v5279_v10  ;;  %v10416_v42 = vor.u32 %v4428_v12, %v4425_v38  ;;  %v4476_v55 = vsel %vm584_vm1, %v10023_v3, %v4475_v37  ;;  %v4751_v8 = vrot.slane %v4432_v23, 3  ;;  %5590 = vmatpush.bf16.msrb.mxu1 %v7717_v57  ;;  %v7716_v12 = vld [vmem:[%s8154_s22 + $0x10] sm:$0xff] }
 0x3dd   : > { %v4752_v41 = vrot.slane %v4435_v49, 4  ;;  %v5271_v13 = vsel %vm1063_vm0, %v5240_v19, %v5270_v7  ;;  %v5295_v1 = vshrl.u32 %v4476_v55, 16  ;;  %v5298_v29 = vshll.u32 %v4476_v55, 16 }
 0x3de   : > { %v4430_v35 = vsel %vm437_vm2, %v11145_v27, %v10416_v42  ;;  %v4441_v27 = vshrl.u32 %v10433_v2, 16  ;;  %v4444_v5 = vshll.u32 %v10433_v2, 16  ;;  %v10454_v38 = vpack.c.b16 %v10259_v52, %v10225_v61 }
 0x3df   : > { %v4753_v9 = vor.u32 %v4752_v41, %v4751_v8  ;;  %v5286_v6 = vshrl.u32 %v4430_v35, 16  ;;  %v5289_v3 = vshll.u32 %v4430_v35, 16  ;;  %v5297_v22 = vrot.slane %v5295_v1, 3  ;;  %v7766_v1 = vld [vmem:[%s8154_s22 + $0x1a0] sm:$0xff] }
 0x3e0   : > { %v5300_v18 = vrot.slane %v5298_v29, 4  ;;  %v4773_v11 = vrot.slane %v4441_v27, 3  ;;  %v4453_v56 = vshll.u32 %v10454_v38, 16  ;;  %5591 = vmatpush.bf16.msrb.mxu1 %v7716_v12  ;;  %v10468_v61 = vpack.c.b16 %v10288_v26, %v10261_v32  ;;  %6370 = vmatpush.bf16.msrb.mxu0 %v7766_v1  ;;  %v7777_v12 = vld [vmem:[%s8154_s22 + $0x1f8] sm:$0xff] }
 0x3e1   : > { %v4754_v14 = vsel %vm1063_vm0, %v4731_v25, %v4753_v9  ;;  %v5288_v19 = vrot.slane %v5286_v6, 3  ;;  %v5291_v24 = vrot.slane %v5289_v3, 4  ;;  %v4774_v25 = vrot.slane %v4444_v5, 4 }
 0x3e2   : > { %v10435_v47 = vor.u32 %v5300_v18, %v5297_v22  ;;  %v4796_v55 = vrot.slane %v4453_v56, 4  ;;  %v4459_v29 = vshrl.u32 %v10468_v61, 16  ;;  %v4462_v35 = vshll.u32 %v10468_v61, 16 }
 0x3e3   : > { %5074 = vmatmul.bf16.gmra.mxu1 %v4732_v31  ;;  %v10441_v63 = vor.u32 %v5291_v24, %v5288_v19  ;;  %v4775_v34 = vor.u32 %v4774_v25, %v4773_v11  ;;  %v4545_v18 = vpack.c.b16 %v10306_v51, %v10290_v20  ;;  %v7785_v19 = vld [vmem:[%s8154_s22 + $0x238] sm:$0xff]  ;;  %v4546_v51 = vpack.c.b16 %v10308_v0, %v10308_v0 }
 0x3e4   : > { %v5302_v48 = vsel %vm1063_vm0, %v5279_v10, %v10435_v47  ;;  %v4450_v10 = vshrl.u32 %v10454_v38, 16  ;;  %v4818_v32 = vrot.slane %v4462_v35, 4  ;;  %6465 = vmatpush.bf16.msra.mxu2 %v7785_v19  ;;  %v4434_v19 = vrot.slane %v4432_v23, 4 }
 0x3e5   : > { %v5293_v31 = vsel %vm1063_vm0, %v5270_v7, %v10441_v63  ;;  %v4776_v33 = vsel %vm1063_vm0, %v4753_v9, %v4775_v34  ;;  %v4817_v9 = vrot.slane %v4459_v29, 3  ;;  %v4840_v24 = vshrl.u32 %v4545_v18, 16 }
 0x3e6   : > { %v4795_v7 = vrot.slane %v4450_v10, 3  ;;  %v4843_v57 = vshll.u32 %v4545_v18, 16  ;;  %v4452_v46 = vrot.slane %v4450_v10, 4  ;;  %v4464_v50 = vrot.slane %v4462_v35, 5 }
 0x3e7   : > { %5697 = vmatmul.bf16.gmra.mxu3 %v5280_v43  ;;  %v10459_v43 = vpop.f32.mrf.mxu2  ;;  %v4819_v3 = vor.u32 %v4818_v32, %v4817_v9  ;;  %v7784_v9 = vld [vmem:[%s8154_s22 + $0x230] sm:$0xff] }
 0x3e8   : > { %v4797_v8 = vor.u32 %v4796_v55, %v4795_v7  ;;  %v4845_v11 = vrot.slane %v4843_v57, 4  ;;  %v4867_v7 = vshrl.u32 %v4546_v51, 16  ;;  %v4870_v55 = vshll.u32 %v4546_v51, 16  ;;  %6466 = vmatpush.bf16.msra.mxu2 %v7784_v9  ;;  %v7776_v32 = vld [vmem:[%s8154_s22 + $0x1f0] sm:$0xff] }
 0x3e9   : > { %v7764_v57 = vld [vmem:[%s8154_s22 + $0x190] sm:$0xff]  ;;  %v5262_v9 = vsel %vm1063_vm0, %v10399_v60, %v9967_v36 }
 0x3ea   : > { %5648 = vmatmul.bf16.gmra.mxu2 %v5271_v13  ;;  %v4798_v41 = vsel %vm1063_vm0, %v4775_v34, %v4797_v8  ;;  %v7715_v13 = vld [vmem:[%s8154_s22 + $0x8] sm:$0xff]  ;;  %v4820_v22 = vsel %vm1063_vm0, %v4797_v8, %v4819_v3  ;;  %v4869_v8 = vrot.slane %v4867_v7, 3 }
 0x3eb   : > { %5592 = vmatpush.bf16.msrb.mxu1 %v7715_v13 }
 0x3ef   : > { %v10470_v52 = vpop.f32.mrf.mxu2 }
 0x3f3   : > { %5079 = vmatmul.bf16.gmra.mxu1 %v4754_v14  ;;  %v7714_v14 = vld [vmem:[%s8154_s22] sm:$0xff] }
 0x3f4   : > { %5593 = vmatpush.bf16.msrb.mxu1 %v7714_v14 }
 0x3f7   : > { %5702 = vmatmul.bf16.gmra.mxu3 %v5302_v48  ;;  %v10480_v6 = vpop.f32.mrf.mxu2  ;;  %v4842_v48 = vrot.slane %v4840_v24, 3  ;;  %v4437_v24 = vrot.slane %v4435_v49, 5 }
 0x3f8   : > { %6416 = vmatpush.bf16.msra.mxu1 %v7777_v12 }
 0x3f9   : > { %v4846_v25 = vor.u32 %v4845_v11, %v4842_v48  ;;  %v7775_v48 = vld [vmem:[%s8154_s22 + $0x1e8] sm:$0xff]  ;;  %v4438_v11 = vor.u32 %v4437_v24, %v4434_v19 }
 0x3fa   : > { %5653 = vmatmul.bf16.gmra.mxu2 %v5293_v31 }
 0x3fb   : > { %v4847_v34 = vsel %vm1063_vm0, %v4819_v3, %v4846_v25 }
 0x3fc   : > { %6417 = vmatpush.bf16.msra.mxu1 %v7776_v32 }
 0x3ff   : > { %v10487_v40 = vpop.f32.mrf.mxu2 }
 0x400   : > { %6418 = vmatpush.bf16.msra.mxu1 %v7775_v48 }
 0x403   : > { %5084 = vmatmul.bf16.gmra.mxu1 %v4776_v33  ;;  %v7765_v33 = vld [vmem:[%s8154_s22 + $0x198] sm:$0xff] }
 0x404   : > { %6371 = vmatpush.bf16.msrb.mxu0 %v7765_v33 }
 0x407   : > { %v10489_v31 = vpop.f32.mrf.mxu2 }
 0x408   : > { %6372 = vmatpush.bf16.msrb.mxu0 %v7764_v57 }
 0x40f   : > { %v10496_v13 = vpop.f32.mrf.mxu2 }
 0x413   : > { %5089 = vmatmul.bf16.gmra.mxu1 %v4798_v41  ;;  %v4872_v41 = vrot.slane %v4870_v55, 4  ;;  %v7782_v55 = vld [vmem:[%s8154_s22 + $0x220] sm:$0xff] }
 0x415   : > { %v4873_v1 = vor.u32 %v4872_v41, %v4869_v8  ;;  %v4446_v41 = vrot.slane %v4444_v5, 5  ;;  %v10540_v5 = vpop.f32.mrf.mxu3 }
 0x417   : > { %v4874_v0 = vsel %vm1063_vm0, %v4846_v25, %v4873_v1  ;;  %v10501_v3 = vpop.f32.mrf.mxu2  ;;  %v4439_v25 = vsel %vm437_vm2, %v10416_v42, %v4438_v11  ;;  %v4443_v42 = vrot.slane %v4441_v27, 4 }
 0x418   : > { %v5308_v33 = vshrl.u32 %v4439_v25, 16  ;;  %v5311_v23 = vshll.u32 %v4439_v25, 16 }
 0x419   : > { %v4447_v19 = vor.u32 %v4446_v41, %v4443_v42  ;;  %v4455_v42 = vrot.slane %v4453_v56, 5 }
 0x41a   : > { %v5310_v12 = vrot.slane %v5308_v33, 3  ;;  %v5313_v7 = vrot.slane %v5311_v23, 4  ;;  %v7781_v23 = vld [vmem:[%s8154_s22 + $0x218] sm:$0xff] }
 0x41b   : > { %v4448_v48 = vsel %vm437_vm2, %v4438_v11, %v4447_v19 }
 0x41c   : > { %v5314_v49 = vor.u32 %v5313_v7, %v5310_v12  ;;  %v5330_v25 = vshrl.u32 %v4448_v48, 16 }
 0x41d   : > { %v10559_v41 = vpop.f32.mrf.mxu3 }
 0x41e   : > { %v5332_v12 = vrot.slane %v5330_v25, 3  ;;  %v5304_v25 = vrot.slane %v4570_v54, 4 }
 0x41f   : > { %v10504_v18 = vpop.f32.mrf.mxu2 }
 0x423   : > { %5094 = vmatmul.bf16.gmra.mxu1 %v4820_v22  ;;  %v7783_v22 = vld [vmem:[%s8154_s22 + $0x228] sm:$0xff] }
 0x424   : > { %6467 = vmatpush.bf16.msra.mxu2 %v7783_v22 }
 0x428   : > { %6468 = vmatpush.bf16.msra.mxu2 %v7782_v55 }
 0x42c   : > { %6469 = vmatpush.bf16.msra.mxu2 %v7781_v23 }
 0x433   : > { %5099 = vmatmul.bf16.gmra.mxu1 %v4847_v34  ;;  %v10517_v34 = vpop.f32.mrf.mxu2 }
 0x43b   : > { %v10530_v1 = vpop.f32.mrf.mxu2 }
 0x443   : > { %5104 = vmatmul.bf16.gmra.mxu1 %v4874_v0  ;;  %v4477_v0 = vrot.slane %v10409_v39, 5  ;;  %v5281_v39 = vrot.slane %v4558_v45, 3  ;;  %v10552_v11 = vpop.f32.mrf.mxu2 }
 0x445   : > { %v4478_v32 = vsel %vm584_vm1, %v4475_v37, %v4477_v0  ;;  %v5333_v37 = vshll.u32 %v4448_v48, 16 }
 0x446   : > { %v5317_v22 = vshrl.u32 %v4478_v32, 16  ;;  %v5320_v27 = vshll.u32 %v4478_v32, 16 }
 0x447   : > { %v5335_v7 = vrot.slane %v5333_v37, 4 }
 0x448   : > { %v5319_v24 = vrot.slane %v5317_v22, 3  ;;  %v5322_v57 = vrot.slane %v5320_v27, 4  ;;  %v7773_v22 = vld [vmem:[%s8154_s22 + $0x1d8] sm:$0xff]  ;;  %v4456_v27 = vor.u32 %v4455_v42, %v4452_v46  ;;  %v4461_v42 = vrot.slane %v4459_v29, 4 }
 0x449   : > { %v5336_v45 = vor.u32 %v5335_v7, %v5332_v12  ;;  %v7780_v7 = vld [vmem:[%s8154_s22 + $0x210] sm:$0xff] }
 0x44a   : > { %v5323_v33 = vor.u32 %v5322_v57, %v5319_v24  ;;  %v4457_v56 = vsel %vm437_vm2, %v4447_v19, %v4456_v27  ;;  %6470 = vmatpush.bf16.msra.mxu2 %v7780_v7 }
 0x44b   : > { %v5337_v21 = vsel %vm1063_vm0, %v5314_v49, %v5336_v45  ;;  %v10570_v57 = vpop.f32.mrf.mxu2 }
 0x44c   : > { %v5324_v55 = vsel %vm1063_vm0, %v10435_v47, %v5323_v33 }
 0x44d   : > { %5707 = vmatmul.bf16.gmra.mxu3 %v5324_v55  ;;  %v10579_v55 = vpop.f32.mrf.mxu3 }
 0x450   : > { %v10506_v14 = vpop.f32.mrf.mxu1 }
 0x453   : > { %5594 = vmatmul.bf16.vlgmr.msrb.gmra.mxu1 %v10403_v53  ;;  %v5315_v53 = vsel %vm1063_vm0, %v10441_v63, %v5314_v49  ;;  %v7774_v63 = vld [vmem:[%s8154_s22 + $0x1e0] sm:$0xff]  ;;  %v7763_v49 = vld [vmem:[%s8154_s22 + $0x188] sm:$0xff]  ;;  %v10587_v54 = vpop.f32.mrf.mxu2 }
 0x454   : > { %5658 = vmatmul.bf16.gmra.mxu2 %v5315_v53  ;;  %6419 = vmatpush.bf16.msra.mxu1 %v7774_v63  ;;  %v5283_v53 = vor.u32 %v5282_v4, %v5281_v39  ;;  %v4479_v63 = vrot.slane %v10433_v2, 5  ;;  %v5355_v4 = vshll.u32 %v4457_v56, 16  ;;  %v5303_v2 = vrot.slane %v4567_v44, 3 }
 0x455   : > { %6373 = vmatpush.bf16.msrb.mxu0 %v7763_v49 }
 0x456   : > { %v4480_v32 = vsel %vm584_vm1, %v4477_v0, %v4479_v63  ;;  %v5357_v12 = vrot.slane %v5355_v4, 4  ;;  %v5305_v46 = vor.u32 %v5304_v25, %v5303_v2 }
 0x457   : > { %v5339_v10 = vshrl.u32 %v4480_v32, 16  ;;  %v5342_v24 = vshll.u32 %v4480_v32, 16 }
 0x458   : > { %v10519_v51 = vpop.f32.mrf.mxu1  ;;  %6420 = vmatpush.bf16.msra.mxu1 %v7773_v22  ;;  %v5306_v32 = vsel %vm1063_vm0, %v5283_v53, %v5305_v46  ;;  %v7772_v22 = vld [vmem:[%s8154_s22 + $0x1d0] sm:$0xff] }
 0x459   : > { %v5341_v48 = vrot.slane %v5339_v10, 3  ;;  %v5344_v39 = vrot.slane %v5342_v24, 4  ;;  %v10595_v10 = vpop.f32.mrf.mxu3 }
 0x45b   : > { %v5345_v37 = vor.u32 %v5344_v39, %v5341_v48 }
 0x45c   : > { %6421 = vmatpush.bf16.msra.mxu1 %v7772_v22 }
 0x45d   : > { %v5346_v19 = vsel %vm1063_vm0, %v5323_v33, %v5345_v37  ;;  %v4481_v33 = vrot.slane %v10454_v38, 5  ;;  %v5325_v38 = vrot.slane %v4576_v30, 3 }
 0x45e   : > { %5712 = vmatmul.bf16.gmra.mxu3 %v5346_v19 }
 0x45f   : > { %v4482_v49 = vsel %vm584_vm1, %v4479_v63, %v4481_v33  ;;  %v5326_v63 = vrot.slane %v4579_v16, 4 }
 0x460   : > { %v10524_v8 = vpop.f32.mrf.mxu1  ;;  %v5361_v29 = vshrl.u32 %v4482_v49, 16  ;;  %v5364_v24 = vshll.u32 %v4482_v49, 16 }
 0x461   : > { %v5327_v19 = vor.u32 %v5326_v63, %v5325_v38 }
 0x462   : > { %v5366_v48 = vrot.slane %v5364_v24, 4 }
 0x463   : > { %5599 = vmatmul.bf16.gmra.mxu1 %v5262_v9  ;;  %v5284_v9 = vsel %vm1063_vm0, %v9967_v36, %v5283_v53  ;;  %v5352_v36 = vshrl.u32 %v4457_v56, 16  ;;  %v5363_v56 = vrot.slane %v5361_v29, 3  ;;  %v5328_v16 = vsel %vm1063_vm0, %v5305_v46, %v5327_v19 }
 0x464   : > { %5663 = vmatmul.bf16.gmra.mxu2 %v5337_v21 }
 0x465   : > { %v5354_v23 = vrot.slane %v5352_v36, 3  ;;  %v5367_v4 = vor.u32 %v5366_v48, %v5363_v56 }
 0x467   : > { %v5358_v21 = vor.u32 %v5357_v12, %v5354_v23  ;;  %v7779_v23 = vld [vmem:[%s8154_s22 + $0x208] sm:$0xff]  ;;  %v10605_v12 = vpop.f32.mrf.mxu2 }
 0x468   : > { %v10543_v60 = vpop.f32.mrf.mxu1  ;;  %11146 = vst [vmem:[#allocation19_spill] sm:$0xff] %v10605_v12  ;;  %6471 = vmatpush.bf16.msra.mxu2 %v7779_v23 }
 0x469   : > { %v5359_v44 = vsel %vm1063_vm0, %v5336_v45, %v5358_v21  ;;  %v4465_v45 = vor.u32 %v4464_v50, %v4461_v42  ;;  %v4483_v42 = vrot.slane %v10468_v61, 5 }
 0x46b   : > { %v4466_v35 = vsel %vm437_vm2, %v4456_v27, %v4465_v45  ;;  %v5368_v27 = vsel %vm1063_vm0, %v5345_v37, %v5367_v4  ;;  %v4484_v50 = vsel %vm584_vm1, %v4481_v33, %v4483_v42  ;;  %v7771_v37 = vld [vmem:[%s8154_s22 + $0x1c8] sm:$0xff]  ;;  %v5401_v49 = vshrl.u32 %v4465_v45, 16 }
 0x46c   : > { %v5374_v39 = vshrl.u32 %v4466_v35, 16  ;;  %v5377_v36 = vshll.u32 %v4466_v35, 16  ;;  %v5404_v22 = vshll.u32 %v4465_v45, 16  ;;  %v5386_v24 = vshll.u32 %v4484_v50, 16  ;;  %6422 = vmatpush.bf16.msra.mxu1 %v7771_v37 }
 0x46d   : > { %v5403_v35 = vrot.slane %v5401_v49, 3  ;;  %v5347_v45 = vrot.slane %v4585_v17, 3 }
 0x46e   : > { %v5376_v2 = vrot.slane %v5374_v39, 3  ;;  %v5379_v25 = vrot.slane %v5377_v36, 4  ;;  %5717 = vmatmul.bf16.gmra.mxu3 %v5368_v27  ;;  %v5406_v56 = vrot.slane %v5404_v22, 4  ;;  %v5388_v46 = vrot.slane %v5386_v24, 4 }
 0x46f   : > { %v10618_v29 = vpop.f32.mrf.mxu2  ;;  %v5348_v36 = vrot.slane %v4588_v15, 4  ;;  %v4469_v15 = vpack.c.b16 %v10290_v20, %v10290_v20 }
 0x470   : > { %v10561_v47 = vpop.f32.mrf.mxu1  ;;  %v5380_v7 = vor.u32 %v5379_v25, %v5376_v2  ;;  %11147 = vst [vmem:[#allocation20_spill] sm:$0xff] %v10618_v29  ;;  %v5407_v39 = vor.u32 %v5406_v56, %v5403_v35  ;;  %v7778_v2 = vld [vmem:[%s8154_s22 + $0x200] sm:$0xff] }
 0x471   : > { %6472 = vmatpush.bf16.msra.mxu2 %v7778_v2  ;;  %v10631_v23 = vor.u32 %v5348_v36, %v5347_v45  ;;  %v5369_v36 = vrot.slane %v4594_v28, 3 }
 0x472   : > { %v5381_v30 = vsel %vm1063_vm0, %v5358_v21, %v5380_v7  ;;  %v5383_v21 = vshrl.u32 %v4484_v50, 16  ;;  %v5408_v63 = vsel %vm1063_vm0, %v5380_v7, %v5407_v39  ;;  %v5734_v7 = vld [vmem:[%s8189_s11 + $0x138] sm:$0xff]  ;;  %v4485_v50 = vrot.slane %v4469_v15, 5 }
 0x473   : > { %5604 = vmatmul.bf16.gmra.mxu1 %v5284_v9  ;;  %v5350_v59 = vsel %vm1063_vm0, %v5327_v19, %v10631_v23  ;;  %v5752_v37 = vpack.c.bf16 %v5734_v7, %v5734_v7 }
 0x474   : > { %5668 = vmatmul.bf16.gmra.mxu2 %v5359_v44  ;;  %v10609_v44 = vpop.f32.mrf.mxu3  ;;  %v5385_v48 = vrot.slane %v5383_v21, 3  ;;  %v7770_v21 = vld [vmem:[%s8154_s22 + $0x1c0] sm:$0xff]  ;;  %v4486_v35 = vsel %vm584_vm1, %v4483_v42, %v4485_v50 }
 0x475   : > { %v5787_v56 = vunpack.c.l.b16 %v5752_v37  ;;  %v5410_v20 = vshrl.u32 %v4486_v35, 16  ;;  %6423 = vmatpush.bf16.msra.mxu1 %v7770_v21 }
 0x476   : > { %v5389_v38 = vor.u32 %v5388_v46, %v5385_v48  ;;  %v5413_v46 = vshll.u32 %v4486_v35, 16 }
 0x477   : > { %v10633_v27 = vpop.f32.mrf.mxu2 }
 0x478   : > { %v10574_v0 = vpop.f32.mrf.mxu1  ;;  %v5390_v25 = vsel %vm1063_vm0, %v5367_v4, %v5389_v38  ;;  %11148 = vst [vmem:[#allocation21_spill] sm:$0xff] %v10633_v27 }
 0x47c   : > { %v10620_v61 = vpop.f32.mrf.mxu3 }
 0x47e   : > { %5722 = vmatmul.bf16.gmra.mxu3 %v5390_v25  ;;  %v5412_v25 = vrot.slane %v5410_v20, 3 }
 0x47f   : > { %v10657_v42 = vpop.f32.mrf.mxu2 }
 0x480   : > { %v10589_v9 = vpop.f32.mrf.mxu1  ;;  %11150 = vst [vmem:[#allocation22_spill] sm:$0xff] %v10657_v42 }
 0x483   : > { %5609 = vmatmul.bf16.gmra.mxu1 %v5306_v32  ;;  %v7762_v32 = vld [vmem:[%s8154_s22 + $0x180] sm:$0xff]  ;;  %s8027_s22 = smov 0  }
 0x484   : > { %5673 = vmatmul.bf16.gmra.mxu2 %v5381_v30  ;;  %6374 = vmatpush.bf16.msrb.mxu0 %v7762_v32  ;;  %v5735_v30 = vld [vmem:[%s8189_s11 + $0x140] sm:$0xff]  ;;  %v10644_v4 = vpop.f32.mrf.mxu3  ;;  %v5737_v32 = vld [vmem:[%s8189_s11 + $0x150] sm:$0xff] }
 0x485   : > { %v5753_v49 = vpack.c.bf16 %v5735_v30, %v5735_v30  ;;  %v5755_v24 = vpack.c.bf16 %v5737_v32, %v5737_v32 }
 0x487   : > { %v5788_v19 = vunpack.c.l.b16 %v5753_v49  ;;  %v10649_v39 = vunpack.c.l.b16 %v5755_v24 }
 0x488   : > { %v10600_v53 = vpop.f32.mrf.mxu1 }
 0x489   : > { %v10651_v45 = vpack.c.b16 %v5788_v19, %v5787_v56 }
 0x48b   : > { %v5894_v30 = vrot.slane %v10651_v45, 5 }
 0x48c   : > { %v10670_v35 = vpop.f32.mrf.mxu3 }
 0x48d   : > { %v5994_v28 = vshrl.u32 %v5894_v30, 16  ;;  %v5997_v49 = vshll.u32 %v5894_v30, 16 }
 0x490   : > { %v10611_v58 = vpop.f32.mrf.mxu1 }
 0x493   : > { %5614 = vmatmul.bf16.gmra.mxu1 %v5328_v16  ;;  %v5736_v16 = vld [vmem:[%s8189_s11 + $0x148] sm:$0xff] }
 0x494   : > { %5678 = vmatmul.bf16.gmra.mxu2 %v5408_v63  ;;  %v5754_v22 = vpack.c.bf16 %v5736_v16, %v5736_v16  ;;  %v11149_v63 = vshll.u32 %v10268_v62, 16  ;;  %v5733_v16 = vld [vmem:[%s8189_s11 + $0x130] sm:$0xff] }
 0x495   : > { %v5751_v32 = vpack.c.bf16 %v5733_v16, %v5733_v16 }
 0x496   : > { %v5789_v48 = vunpack.c.l.b16 %v5754_v22  ;;  %v5370_v2 = vrot.slane %v11149_v63, 4  ;;  %v5999_v63 = vrot.slane %v5997_v49, 4 }
 0x497   : > { %v5786_v24 = vunpack.c.l.b16 %v5751_v32 }
 0x498   : > { %v10622_v33 = vpop.f32.mrf.mxu1  ;;  %v10662_v7 = vpack.c.b16 %v10649_v39, %v5789_v48  ;;  %v5804_v62 = vpack.c.b16 %v5789_v48, %v5788_v19  ;;  %v10667_v22 = vor.u32 %v5370_v2, %v5369_v36 }
 0x499   : > { %v5803_v42 = vpack.c.b16 %v5787_v56, %v5786_v24 }
 0x49a   : > { %v11066_v37 = vrot.slane %v10662_v7, 5  ;;  %v5971_v19 = vshll.u32 %v5804_v62, 16 }
 0x49b   : > { %v5960_v32 = vshrl.u32 %v5803_v42, 16 }
 0x49c   : > { %v5896_v20 = vsel %vm584_vm1, %v5894_v30, %v11066_v37  ;;  %v5372_v30 = vsel %vm1063_vm0, %v10631_v23, %v10667_v22  ;;  %v10684_v37 = vpop.f32.mrf.mxu2  ;;  %v5824_v23 = vshll.u32 %v10651_v45, 16 }
 0x49d   : > { %v6005_v16 = vshll.u32 %v5896_v20, 16  ;;  %v5962_v56 = vrot.slane %v5960_v32, 3  ;;  %11151 = vst [vmem:[#allocation23_spill] sm:$0xff] %v10684_v37 }
 0x4a0   : > { %v10635_v17 = vpop.f32.mrf.mxu1 }
 0x4a3   : > { %5619 = vmatmul.bf16.gmra.mxu1 %v5350_v59  ;;  %v5415_v59 = vrot.slane %v5413_v46, 4  ;;  %v5996_v46 = vrot.slane %v5994_v28, 3  ;;  %v5973_v28 = vrot.slane %v5971_v19, 4  ;;  %v5829_v19 = vshrl.u32 %v10662_v7, 16 }
 0x4a4   : > { %v10697_v37 = vpop.f32.mrf.mxu2 }
 0x4a5   : > { %v5416_v50 = vor.u32 %v5415_v59, %v5412_v25  ;;  %v5968_v25 = vshrl.u32 %v5804_v62, 16  ;;  %v6002_v59 = vshrl.u32 %v5896_v20, 16  ;;  %v6000_v48 = vor.u32 %v5999_v63, %v5996_v46  ;;  %v5738_v62 = vld [vmem:[%s8189_s11 + $0x158] sm:$0xff]  ;;  %v5739_v20 = vld [vmem:[%s8189_s11 + $0x160] sm:$0xff]  ;;  %11153 = vst [vmem:[#allocation14_spill] sm:$0xff] %v10697_v37 }
 0x4a7   : > { %v5417_v21 = vsel %vm1063_vm0, %v5389_v38, %v5416_v50  ;;  %v4387_v38 = vpack.c.b16 %v10288_v26, %v10288_v26  ;;  %v5970_v36 = vrot.slane %v5968_v25, 3  ;;  %v6004_v2 = vrot.slane %v6002_v59, 3 }
 0x4a8   : > { %v10659_v15 = vpop.f32.mrf.mxu1  ;;  %5727 = vmatmul.bf16.gmra.mxu3 %v5417_v21  ;;  %v6007_v50 = vrot.slane %v6005_v16, 4  ;;  %v5963_v21 = vshll.u32 %v5803_v42, 16  ;;  %v5821_v59 = vshrl.u32 %v10651_v45, 16  ;;  %v5756_v16 = vpack.c.bf16 %v5738_v62, %v5738_v62 }
 0x4a9   : > { %v5392_v26 = vshrl.u32 %v4387_v38, 16  ;;  %v5395_v46 = vshll.u32 %v4387_v38, 16  ;;  %v5974_v63 = vor.u32 %v5973_v28, %v5970_v36 }
 0x4aa   : > { %v6008_v49 = vor.u32 %v6007_v50, %v6004_v2  ;;  %v5965_v24 = vrot.slane %v5963_v21, 4  ;;  %v5832_v2 = vshll.u32 %v10662_v7, 16  ;;  %v5757_v50 = vpack.c.bf16 %v5739_v20, %v5739_v20 }
 0x4ab   : > { %v5791_v21 = vunpack.c.l.b16 %v5756_v16  ;;  %v5394_v36 = vrot.slane %v5392_v26, 3  ;;  %v11154_v16 = vrot.slane %v10662_v7, 5 }
 0x4ac   : > { %v6009_v42 = vsel %vm1063_vm0, %v6000_v48, %v6008_v49  ;;  %v5966_v25 = vor.u32 %v5965_v24, %v5962_v56  ;;  %v10692_v38 = vunpack.c.l.b16 %v5757_v50  ;;  %v5397_v48 = vrot.slane %v5395_v46, 4 }
 0x4ad   : > { %6473 = vmatmul.bf16.vlgmr.msra.gmra.mxu2 %v6009_v42  ;;  %v5826_v56 = vrot.slane %v5824_v23, 5  ;;  %v5831_v24 = vrot.slane %v5829_v19, 4  ;;  %v5834_v62 = vrot.slane %v5832_v2, 5  ;;  %v5805_v23 = vpack.c.b16 %v5791_v21, %v10649_v39 }
 0x4ae   : > { %v5975_v32 = vsel %vm1063_vm0, %v5966_v25, %v5974_v63  ;;  %v5814_v45 = vpack.c.b16 %v10692_v38, %v5791_v21  ;;  %v5398_v20 = vor.u32 %v5397_v48, %v5394_v36 }
 0x4af   : > { %6375 = vmatmul.bf16.vlgmr.msrb.gmra.mxu0 %v5975_v32  ;;  %v5835_v25 = vor.u32 %v5834_v62, %v5831_v24  ;;  %v6011_v50 = vshrl.u32 %v5805_v23, 16  ;;  %v6014_v32 = vshll.u32 %v5805_v23, 16  ;;  %v5740_v24 = vld [vmem:[%s8189_s11 + $0x168] sm:$0xff]  ;;  %v5741_v62 = vld [vmem:[%s8189_s11 + $0x170] sm:$0xff] }
 0x4b0   : > { %v10677_v27 = vpop.f32.mrf.mxu1  ;;  %v5897_v42 = vrot.slane %v5814_v45, 5  ;;  %v5399_v36 = vsel %vm1063_vm0, %v10667_v22, %v5398_v20  ;;  %v5758_v37 = vpack.c.bf16 %v5740_v24, %v5740_v24  ;;  %v5759_v39 = vpack.c.bf16 %v5741_v62, %v5741_v62 }
 0x4b1   : > { %v6013_v7 = vrot.slane %v6011_v50, 3  ;;  %v5841_v22 = vshll.u32 %v5814_v45, 16 }
 0x4b2   : > { %v5898_v26 = vsel %vm584_vm1, %v11154_v16, %v5897_v42  ;;  %v5793_v20 = vunpack.c.l.b16 %v5758_v37 }
 0x4b3   : > { %5624 = vmatmul.bf16.gmra.mxu1 %v5372_v30  ;;  %v5823_v30 = vrot.slane %v5821_v59, 4  ;;  %v6029_v46 = vshrl.u32 %v5898_v26, 16  ;;  %v6032_v59 = vshll.u32 %v5898_v26, 16 }
 0x4b5   : > { %v5827_v29 = vor.u32 %v5826_v56, %v5823_v30  ;;  %v6031_v19 = vrot.slane %v6029_v46, 3  ;;  %v6034_v2 = vrot.slane %v6032_v59, 4  ;;  %v6016_v56 = vrot.slane %v6014_v32, 4 }
 0x4b7   : > { %v5836_v48 = vsel %vm437_vm2, %v5827_v29, %v5835_v25  ;;  %v6035_v30 = vor.u32 %v6034_v2, %v6031_v19  ;;  %v5977_v16 = vshrl.u32 %v5827_v29, 16  ;;  %v5980_v26 = vshll.u32 %v5827_v29, 16  ;;  %v10714_v2 = vpop.f32.mrf.mxu2 }
 0x4b8   : > { %v10694_v28 = vpop.f32.mrf.mxu1  ;;  %v5985_v21 = vshrl.u32 %v5836_v48, 16  ;;  %v5988_v46 = vshll.u32 %v5836_v48, 16  ;;  %v6017_v23 = vor.u32 %v6016_v56, %v6013_v7  ;;  %11156 = vst [vmem:[#allocation10_spill] sm:$0xff] %v10714_v2  ;;  %v5843_v56 = vrot.slane %v5841_v22, 5 }
 0x4b9   : > { %11152 = vst [vmem:[#allocation13_spill] sm:$0xff] %v10694_v28  ;;  %v6036_v59 = vsel %vm1063_vm0, %v6008_v49, %v6035_v30  ;;  %v10711_v28 = vunpack.c.l.b16 %v5759_v39  ;;  %v5979_v50 = vrot.slane %v5977_v16, 3  ;;  %v5982_v32 = vrot.slane %v5980_v26, 4 }
 0x4ba   : > { %v6018_v19 = vsel %vm1063_vm0, %v5974_v63, %v6017_v23  ;;  %v5990_v49 = vrot.slane %v5988_v46, 4 }
 0x4bb   : > { %v5815_v29 = vpack.c.b16 %v10711_v28, %v5793_v20  ;;  %v5983_v39 = vor.u32 %v5982_v32, %v5979_v50 }
 0x4bd   : > { %6478 = vmatmul.bf16.gmra.mxu2 %v6036_v59  ;;  %v5899_v24 = vrot.slane %v5815_v29, 5 }
 0x4bf   : > { %6380 = vmatmul.bf16.gmra.mxu0 %v6018_v19  ;;  %v5900_v37 = vsel %vm584_vm1, %v5897_v42, %v5899_v24  ;;  %v10724_v42 = vpop.f32.mrf.mxu2 }
 0x4c0   : > { %v10703_v12 = vpop.f32.mrf.mxu1  ;;  %v6056_v63 = vshrl.u32 %v5900_v37, 16  ;;  %v6059_v62 = vshll.u32 %v5900_v37, 16 }
 0x4c1   : > { %11155 = vst [vmem:[#allocation24_spill] sm:$0xff] %v10703_v12  ;;  %v5838_v12 = vshrl.u32 %v5814_v45, 16  ;;  %v5120_v45 = vadd.f32 %v10459_v43, %v10506_v14 }
 0x4c2   : > { %v6058_v16 = vrot.slane %v6056_v63, 3  ;;  %v6061_v26 = vrot.slane %v6059_v62, 4  ;;  %v5850_v63 = vshll.u32 %v5815_v29, 16 }
 0x4c3   : > { %5629 = vmatmul.bf16.gmra.mxu1 %v5399_v36  ;;  %v5987_v36 = vrot.slane %v5985_v21, 3  ;;  %v5840_v7 = vrot.slane %v5838_v12, 4  ;;  %v5806_v21 = vpack.c.b16 %v5793_v20, %v10692_v38  ;;  %v5169_v12 = vadd.f32 %v10540_v5, %v5120_v45  ;;  %v5743_v38 = vld [vmem:[%s8189_s11 + $0x180] sm:$0xff] }
 0x4c4   : > { %v6062_v46 = vor.u32 %v6061_v26, %v6058_v16  ;;  %v5761_v5 = vpack.c.bf16 %v5743_v38, %v5743_v38  ;;  %v5847_v45 = vshrl.u32 %v5815_v29, 16 }
 0x4c5   : > { %v5991_v59 = vor.u32 %v5990_v49, %v5987_v36  ;;  %v5844_v19 = vor.u32 %v5843_v56, %v5840_v7  ;;  %v6038_v22 = vshrl.u32 %v5806_v21, 16  ;;  %v6041_v2 = vshll.u32 %v5806_v21, 16  ;;  %v5742_v7 = vld [vmem:[%s8189_s11 + $0x178] sm:$0xff] }
 0x4c6   : > { %v6063_v32 = vsel %vm1063_vm0, %v6035_v30, %v6062_v46  ;;  %v5760_v20 = vpack.c.bf16 %v5742_v7, %v5742_v7  ;;  %v5122_v56 = vadd.f32 %v10470_v52, %v10519_v51  ;;  %v5849_v26 = vrot.slane %v5847_v45, 4 }
 0x4c7   : > { %v5992_v43 = vsel %vm1063_vm0, %v5983_v39, %v5991_v59  ;;  %v5845_v14 = vsel %vm437_vm2, %v5835_v25, %v5844_v19  ;;  %v6040_v36 = vrot.slane %v6038_v22, 3  ;;  %v6043_v49 = vrot.slane %v6041_v2, 4 }
 0x4c8   : > { %v10717_v48 = vpop.f32.mrf.mxu1  ;;  %v6020_v62 = vshrl.u32 %v5845_v14, 16  ;;  %v6023_v39 = vshll.u32 %v5845_v14, 16  ;;  %v5795_v25 = vunpack.c.l.b16 %v5760_v20  ;;  %v5171_v16 = vadd.f32 %v10559_v41, %v5122_v56 }
 0x4c9   : > { %11157 = vst [vmem:[#allocation25_spill] sm:$0xff] %v10717_v48  ;;  %v6044_v37 = vor.u32 %v6043_v49, %v6040_v36  ;;  %v5852_v21 = vrot.slane %v5850_v63, 5 }
 0x4ca   : > { %v6022_v52 = vrot.slane %v6020_v62, 3  ;;  %v6025_v51 = vrot.slane %v6023_v39, 4  ;;  %v5807_v20 = vpack.c.b16 %v5795_v25, %v10711_v28  ;;  %v5127_v62 = vadd.f32 %v10487_v40, %v10543_v60  ;;  %v5744_v28 = vld [vmem:[%s8189_s11 + $0x188] sm:$0xff] }
 0x4cb   : > { %v6045_v30 = vsel %vm1063_vm0, %v6017_v23, %v6044_v37  ;;  %v5125_v23 = vadd.f32 %v10480_v6, %v10524_v8  ;;  %v5762_v60 = vpack.c.bf16 %v5744_v28, %v5744_v28 }
 0x4cc   : > { %v6026_v49 = vor.u32 %v6025_v51, %v6022_v52  ;;  %v6065_v6 = vshrl.u32 %v5807_v20, 16  ;;  %v6068_v8 = vshll.u32 %v5807_v20, 16 }
 0x4cd   : > { %6483 = vmatmul.bf16.gmra.mxu2 %v6063_v32  ;;  %v5853_v32 = vor.u32 %v5852_v21, %v5849_v26 }
 0x4ce   : > { %v6027_v63 = vsel %vm1063_vm0, %v5991_v59, %v6026_v49  ;;  %v6067_v26 = vrot.slane %v6065_v6, 3  ;;  %v6070_v21 = vrot.slane %v6068_v8, 4  ;;  %v5130_v8 = vadd.f32 %v10489_v31, %v10561_v47 }
 0x4cf   : > { %6385 = vmatmul.bf16.gmra.mxu0 %v6045_v30  ;;  %v5854_v56 = vsel %vm437_vm2, %v5844_v19, %v5853_v32 }
 0x4d0   : > { %v5595_v48 = vpop.f32.mrf.mxu1  ;;  %v6071_v51 = vor.u32 %v6070_v21, %v6067_v26 }
 0x4d1   : > { %v10728_v50 = vadd.f32 %v5595_v48, %v5169_v12  ;;  %v5796_v48 = vunpack.c.l.b16 %v5761_v5  ;;  %v5174_v5 = vadd.f32 %v10579_v55, %v5125_v23  ;;  %v6047_v55 = vshrl.u32 %v5854_v56, 16 }
 0x4d2   : > { %v5176_v23 = vadd.f32 %v10595_v10, %v5127_v62 }
 0x4d3   : > { %6424 = vmatmul.bf16.vlgmr.msra.gmra.mxu1 %v5992_v43  ;;  %v10736_v2 = vpack.c.b16 %v5796_v48, %v5795_v25  ;;  %v10742_v43 = vpop.f32.mrf.mxu2  ;;  %v5745_v25 = vld [vmem:[%s8189_s11 + $0x190] sm:$0xff] }
 0x4d4   : > { %v5763_v52 = vpack.c.bf16 %v5745_v25, %v5745_v25 }
 0x4d5   : > { %v5901_v22 = vrot.slane %v10736_v2, 5  ;;  %v5856_v59 = vshrl.u32 %v10736_v2, 16  ;;  %v5859_v40 = vshll.u32 %v10736_v2, 16 }
 0x4d7   : > { %v5902_v14 = vsel %vm584_vm1, %v5899_v24, %v5901_v22  ;;  %v5861_v20 = vrot.slane %v5859_v40, 5  ;;  %v5179_v40 = vadd.f32 %v10609_v44, %v5130_v8 }
 0x4d8   : > { %v5597_v12 = vpop.f32.mrf.mxu1  ;;  %v6083_v36 = vshrl.u32 %v5902_v14, 16  ;;  %v6086_v41 = vshll.u32 %v5902_v14, 16  ;;  %v10767_v14 = vunpack.c.l.b16 %v5763_v52 }
 0x4d9   : > { %v10740_v29 = vadd.f32 %v5597_v12, %v5171_v16  ;;  %v6050_v16 = vshll.u32 %v5854_v56, 16  ;;  %v10763_v12 = vpop.f32.mrf.mxu3 }
 0x4da   : > { %v6085_v7 = vrot.slane %v6083_v36, 3  ;;  %v6088_v38 = vrot.slane %v6086_v41, 4  ;;  %v6049_v36 = vrot.slane %v6047_v55, 3  ;;  %v6072_v41 = vsel %vm1063_vm0, %v6044_v37, %v6071_v51 }
 0x4db   : > { %v10761_v19 = vpop.f32.mrf.mxu2 }
 0x4dc   : > { %v10750_v45 = vor.u32 %v6088_v38, %v6085_v7  ;;  %v6052_v7 = vrot.slane %v6050_v16, 4  ;;  %v5858_v38 = vrot.slane %v5856_v59, 4 }
 0x4de   : > { %v6090_v30 = vsel %vm1063_vm0, %v6062_v46, %v10750_v45  ;;  %v5797_v46 = vunpack.c.l.b16 %v5762_v60  ;;  %v10778_v10 = vor.u32 %v6052_v7, %v6049_v36  ;;  %v5862_v62 = vor.u32 %v5861_v20, %v5858_v38  ;;  %v5747_v36 = vld [vmem:[%s8189_s11 + $0x1a0] sm:$0xff] }
 0x4df   : > { %6488 = vmatmul.bf16.gmra.mxu2 %v6090_v30  ;;  %6390 = vmatmul.bf16.gmra.mxu0 %v6072_v41  ;;  %v5132_v41 = vadd.f32 %v10496_v13, %v10574_v0 }
 0x4e0   : > { %v5600_v24 = vpop.f32.mrf.mxu1  ;;  %v5808_v6 = vpack.c.b16 %v5797_v46, %v5796_v48  ;;  %v5863_v31 = vsel %vm437_vm2, %v5853_v32, %v5862_v62 }
 0x4e1   : > { %v10755_v39 = vadd.f32 %v5600_v24, %v5174_v5  ;;  %v5817_v5 = vpack.c.b16 %v10767_v14, %v5797_v46  ;;  %v10781_v16 = vpop.f32.mrf.mxu3  ;;  %v6074_v7 = vshrl.u32 %v5863_v31, 16  ;;  %v6077_v38 = vshll.u32 %v5863_v31, 16 }
 0x4e2   : > { %v6092_v25 = vshrl.u32 %v5808_v6, 16  ;;  %v6095_v55 = vshll.u32 %v5808_v6, 16  ;;  %v5765_v6 = vpack.c.bf16 %v5747_v36, %v5747_v36  ;;  %v5181_v13 = vadd.f32 %v10620_v61, %v5132_v41 }
 0x4e3   : > { %6429 = vmatmul.bf16.gmra.mxu1 %v6027_v63  ;;  %v5903_v24 = vrot.slane %v5817_v5, 5  ;;  %v10774_v63 = vpop.f32.mrf.mxu2  ;;  %v5865_v20 = vshrl.u32 %v5817_v5, 16  ;;  %v6076_v0 = vrot.slane %v6074_v7, 3 }
 0x4e4   : > { %v6094_v59 = vrot.slane %v6092_v25, 3  ;;  %v6097_v48 = vrot.slane %v6095_v55, 4 }
 0x4e5   : > { %v5904_v37 = vsel %vm584_vm1, %v5901_v22, %v5903_v24  ;;  %v6054_v22 = vsel %vm1063_vm0, %v6026_v49, %v10778_v10  ;;  %v5868_v49 = vshll.u32 %v5817_v5, 16  ;;  %v5867_v25 = vrot.slane %v5865_v20, 4 }
 0x4e6   : > { %v6110_v30 = vshrl.u32 %v5904_v37, 16  ;;  %v6113_v28 = vshll.u32 %v5904_v37, 16  ;;  %v10787_v52 = vor.u32 %v6097_v48, %v6094_v59 }
 0x4e7   : > { %v5870_v55 = vrot.slane %v5868_v49, 5 }
 0x4e8   : > { %v5602_v56 = vpop.f32.mrf.mxu1  ;;  %v6112_v26 = vrot.slane %v6110_v30, 3  ;;  %v6115_v21 = vrot.slane %v6113_v28, 4  ;;  %v6099_v8 = vsel %vm1063_vm0, %v6071_v51, %v10787_v52  ;;  %v10801_v30 = vunpack.c.l.b16 %v5765_v6 }
 0x4e9   : > { %v10772_v2 = vadd.f32 %v5602_v56, %v5176_v23  ;;  %v5746_v23 = vld [vmem:[%s8189_s11 + $0x198] sm:$0xff]  ;;  %v10804_v28 = vpop.f32.mrf.mxu3  ;;  %v5135_v51 = vadd.f32 %v10501_v3, %v10589_v9 }
 0x4ea   : > { %v6116_v60 = vor.u32 %v6115_v21, %v6112_v26  ;;  %v5764_v56 = vpack.c.bf16 %v5746_v23, %v5746_v23 }
 0x4eb   : > { %v10797_v32 = vpop.f32.mrf.mxu2 }
 0x4ec   : > { %v6117_v44 = vsel %vm1063_vm0, %v10750_v45, %v6116_v60  ;;  %v5799_v37 = vunpack.c.l.b16 %v5764_v56  ;;  %v6079_v45 = vrot.slane %v6077_v38, 4 }
 0x4ee   : > { %v10807_v5 = vpack.c.b16 %v10801_v30, %v5799_v37  ;;  %v5809_v61 = vpack.c.b16 %v5799_v37, %v10767_v14  ;;  %v10818_v31 = vor.u32 %v6079_v45, %v6076_v0  ;;  %v5184_v14 = vadd.f32 %v10644_v4, %v5135_v51  ;;  %v5749_v0 = vld [vmem:[%s8189_s11 + $0x1b0] sm:$0xff] }
 0x4ef   : > { %6493 = vmatmul.bf16.gmra.mxu2 %v6117_v44  ;;  %6395 = vmatmul.bf16.gmra.mxu0 %v6099_v8  ;;  %v5137_v8 = vadd.f32 %v10504_v18, %v10600_v53  ;;  %v5767_v51 = vpack.c.bf16 %v5749_v0, %v5749_v0 }
 0x4f0   : > { %v5605_v47 = vpop.f32.mrf.mxu1  ;;  %v5905_v59 = vrot.slane %v10807_v5, 5  ;;  %v6119_v41 = vshrl.u32 %v5809_v61, 16  ;;  %v6122_v7 = vshll.u32 %v5809_v61, 16 }
 0x4f1   : > { %v10789_v46 = vadd.f32 %v5605_v47, %v5179_v40  ;;  %v10820_v47 = vor.u32 %v5870_v55, %v5867_v25  ;;  %v10831_v6 = vpop.f32.mrf.mxu3  ;;  %v5874_v55 = vshrl.u32 %v10807_v5, 16  ;;  %v5802_v61 = vunpack.c.l.b16 %v5767_v51 }
 0x4f2   : > { %v6121_v38 = vrot.slane %v6119_v41, 3  ;;  %v6124_v44 = vrot.slane %v6122_v7, 4  ;;  %v5142_v51 = vadd.f32 %v10530_v1, %v10622_v33 }
 0x4f3   : > { %6434 = vmatmul.bf16.gmra.mxu1 %v6054_v22  ;;  %v10812_v48 = vpop.f32.mrf.mxu2  ;;  %v5906_v22 = vsel %vm584_vm1, %v5903_v24, %v5905_v59  ;;  %v6081_v24 = vsel %vm1063_vm0, %v10778_v10, %v10818_v31 }
 0x4f4   : > { %v6137_v23 = vshrl.u32 %v5906_v22, 16  ;;  %v6140_v36 = vshll.u32 %v5906_v22, 16  ;;  %v10829_v56 = vor.u32 %v6124_v44, %v6121_v38  ;;  %v5191_v33 = vadd.f32 %v10781_v16, %v5142_v51 }
 0x4f6   : > { %v6139_v3 = vrot.slane %v6137_v23, 3  ;;  %v6142_v9 = vrot.slane %v6140_v36, 4  ;;  %v6126_v18 = vsel %vm1063_vm0, %v10787_v52, %v10829_v56  ;;  %v5876_v36 = vrot.slane %v5874_v55, 4 }
 0x4f8   : > { %v5607_v26 = vpop.f32.mrf.mxu1  ;;  %v6143_v49 = vor.u32 %v6142_v9, %v6139_v3  ;;  %v5140_v9 = vadd.f32 %v10517_v34, %v10611_v58 }
 0x4f9   : > { %v5608_v21 = vadd.f32 %v5607_v26, %v5181_v13  ;;  %v5748_v13 = vld [vmem:[%s8189_s11 + $0x1a8] sm:$0xff]  ;;  %v5877_v26 = vshll.u32 %v10807_v5, 16  ;;  %v10854_v44 = vpop.f32.mrf.mxu3 }
 0x4fb   : > { %v10816_v40 = vadd.f32 %v10742_v43, %v5608_v21  ;;  %v5872_v43 = vsel %vm437_vm2, %v5862_v62, %v10820_v47  ;;  %v6144_v62 = vsel %vm1063_vm0, %v6116_v60, %v6143_v49  ;;  %v10838_v25 = vpop.f32.mrf.mxu2  ;;  %v5766_v21 = vpack.c.bf16 %v5748_v13, %v5748_v13 }
 0x4fc   : > { %v6101_v4 = vshrl.u32 %v5872_v43, 16  ;;  %v6104_v45 = vshll.u32 %v5872_v43, 16  ;;  %v5186_v60 = vadd.f32 %v10670_v35, %v5137_v8  ;;  %v5879_v41 = vrot.slane %v5877_v26, 5 }
 0x4fd   : > { %v5801_v53 = vunpack.c.l.b16 %v5766_v21  ;;  %v5750_v21 = vld [vmem:[%s8189_s11 + $0x1b8] sm:$0xff] }
 0x4fe   : > { %v6103_v22 = vrot.slane %v6101_v4, 3  ;;  %v6106_v23 = vrot.slane %v6104_v45, 4  ;;  %v10859_v43 = vor.u32 %v5879_v41, %v5876_v36 }
 0x4ff   : > { %6498 = vmatmul.bf16.gmra.mxu2 %v6144_v62  ;;  %6400 = vmatmul.bf16.gmra.mxu0 %v6126_v18  ;;  %v5810_v52 = vpack.c.b16 %v5801_v53, %v10801_v30  ;;  %v5189_v30 = vadd.f32 %v10763_v12, %v5140_v9 }
 0x500   : > { %v5610_v20 = vpop.f32.mrf.mxu1  ;;  %v5881_v62 = vsel %vm437_vm2, %v10820_v47, %v10859_v43 }
 0x501   : > { %v5611_v37 = vadd.f32 %v5610_v20, %v5184_v14  ;;  %v6107_v14 = vor.u32 %v6106_v23, %v6103_v22  ;;  %v6149_v13 = vshll.u32 %v5810_v52, 16  ;;  %v5768_v22 = vpack.c.bf16 %v5750_v21, %v5750_v21  ;;  %v10879_v23 = vpop.f32.mrf.mxu3 }
 0x503   : > { %6439 = vmatmul.bf16.gmra.mxu1 %v6081_v24  ;;  %v10842_v10 = vadd.f32 %v10761_v19, %v5611_v37  ;;  %v5819_v19 = vpack.c.b16 %v5802_v61, %v5801_v53  ;;  %v10851_v38 = vpop.f32.mrf.mxu2  ;;  %v6146_v37 = vshrl.u32 %v5810_v52, 16  ;;  %v6151_v4 = vrot.slane %v6149_v13, 4 }
 0x504   : > { %v5892_v1 = vunpack.c.l.b16 %v5768_v22 }
 0x505   : > { %v5907_v5 = vrot.slane %v5819_v19, 5  ;;  %v6148_v0 = vrot.slane %v6146_v37, 3  ;;  %v5883_v36 = vshrl.u32 %v5819_v19, 16  ;;  %v5886_v41 = vshll.u32 %v5819_v19, 16 }
 0x506   : > { %v5811_v37 = vpack.c.b16 %v5802_v61, %v5802_v61 }
 0x507   : > { %v5908_v20 = vsel %vm584_vm1, %v5905_v59, %v5907_v5  ;;  %v6152_v55 = vor.u32 %v6151_v4, %v6148_v0  ;;  %v5885_v52 = vrot.slane %v5883_v36, 4 }
 0x508   : > { %v5612_v7 = vpop.f32.mrf.mxu1  ;;  %v6164_v24 = vshrl.u32 %v5908_v20, 16  ;;  %v6167_v8 = vshll.u32 %v5908_v20, 16  ;;  %v5888_v20 = vrot.slane %v5886_v41, 5  ;;  %v6173_v0 = vshrl.u32 %v5811_v37, 16 }
 0x509   : > { %v5613_v3 = vadd.f32 %v5612_v7, %v5186_v60  ;;  %v6131_v60 = vshll.u32 %v5881_v62, 16  ;;  %v6153_v47 = vsel %vm1063_vm0, %v10829_v56, %v6152_v55  ;;  %v5145_v56 = vadd.f32 %v10552_v11, %v10635_v17  ;;  %v5203_v21 = vpop.f32.mrf.mxu3 }
 0x50a   : > { %v6166_v34 = vrot.slane %v6164_v24, 3  ;;  %v6169_v58 = vrot.slane %v6167_v8, 4  ;;  %v6176_v4 = vshll.u32 %v5811_v37, 16 }
 0x50b   : > { %v10857_v35 = vadd.f32 %v10774_v63, %v5613_v3  ;;  %v6108_v63 = vsel %vm1063_vm0, %v10818_v31, %v6107_v14  ;;  %v10872_v53 = vpop.f32.mrf.mxu2  ;;  %v6128_v31 = vshrl.u32 %v5881_v62, 16  ;;  %v6133_v7 = vrot.slane %v6131_v60, 4 }
 0x50c   : > { %v6170_v59 = vor.u32 %v6169_v58, %v6166_v34  ;;  %v5893_v3 = vpack.c.b16 %v5892_v1, %v5892_v1  ;;  %v6175_v62 = vrot.slane %v6173_v0, 3  ;;  %v5194_v61 = vadd.f32 %v10804_v28, %v5145_v56 }
 0x50d   : > { %v5147_v60 = vadd.f32 %v10570_v57, %v10659_v15  ;;  %v5150_v57 = vadd.f32 %v10587_v54, %v10677_v27 }
 0x50e   : > { %v6171_v18 = vsel %vm1063_vm0, %v6143_v49, %v6170_v59  ;;  %v6130_v49 = vrot.slane %v6128_v31, 3  ;;  %v5909_v24 = vrot.slane %v5893_v3, 5 }
 0x50f   : > { %6503 = vmatmul.bf16.gmra.mxu2 %v6171_v18  ;;  %6405 = vmatmul.bf16.gmra.mxu0 %v6153_v47  ;;  %v5196_v41 = vadd.f32 %v10831_v6, %v5147_v60  ;;  %v5199_v3 = vadd.f32 %v10854_v44, %v5150_v57 }
 0x510   : > { %v5615_v45 = vpop.f32.mrf.mxu1  ;;  %v6134_v19 = vor.u32 %v6133_v7, %v6130_v49  ;;  %v5910_v16 = vsel %vm584_vm1, %v5907_v5, %v5909_v24 }
 0x511   : > { %v5616_v26 = vadd.f32 %v5615_v45, %v5189_v30  ;;  %v6191_v34 = vshrl.u32 %v5910_v16, 16  ;;  %v6194_v58 = vshll.u32 %v5910_v16, 16  ;;  %v5889_v30 = vor.u32 %v5888_v20, %v5885_v52  ;;  %v11158_v52 = vld [vmem:[#allocation13_spill] sm:$0xff]  ;;  %v11159_v20 = vld [vmem:[#allocation19_spill] sm:$0xff] }
 0x512   : > { %v6135_v11 = vsel %vm1063_vm0, %v6107_v14, %v6134_v19  ;;  %v5152_v24 = vadd.f32 %v11159_v20, %v11158_v52 }
 0x513   : > { %6444 = vmatmul.bf16.gmra.mxu1 %v6108_v63  ;;  %v10875_v12 = vadd.f32 %v10797_v32, %v5616_v26  ;;  %v5676_v8 = vpop.f32.mrf.mxu2  ;;  %v6193_v45 = vrot.slane %v6191_v34, 3  ;;  %v6196_v63 = vrot.slane %v6194_v58, 4  ;;  %v6178_v26 = vrot.slane %v6176_v4, 4  ;;  %v11161_v4 = vld [vmem:[#allocation20_spill] sm:$0xff] }
 0x514   : > { %v5890_v5 = vsel %vm437_vm2, %v10859_v43, %v5889_v30  ;;  %v6182_v27 = vshrl.u32 %v5889_v30, 16  ;;  %v5201_v56 = vadd.f32 %v10879_v23, %v5152_v24  ;;  %v11162_v23 = vld [vmem:[#allocation25_spill] sm:$0xff] }
 0x515   : > { %v6197_v17 = vor.u32 %v6196_v63, %v6193_v45  ;;  %v6155_v28 = vshrl.u32 %v5890_v5, 16  ;;  %v6158_v36 = vshll.u32 %v5890_v5, 16 }
 0x516   : > { %v6184_v44 = vrot.slane %v6182_v27, 3 }
 0x517   : > { %v6198_v31 = vsel %vm1063_vm0, %v6170_v59, %v6197_v17  ;;  %v6157_v43 = vrot.slane %v6155_v28, 3  ;;  %v5205_v59 = vpop.f32.mrf.mxu3 }
 0x518   : > { %v5617_v32 = vpop.f32.mrf.mxu1 }
 0x519   : > { %v5618_v9 = vadd.f32 %v5617_v32, %v5191_v33  ;;  %v6160_v33 = vrot.slane %v6158_v36, 4 }
 0x51b   : > { %v10885_v13 = vadd.f32 %v10812_v48, %v5618_v9  ;;  %v6179_v48 = vor.u32 %v6178_v26, %v6175_v62  ;;  %v5679_v47 = vpop.f32.mrf.mxu2 }
 0x51d   : > { %v6180_v14 = vsel %vm1063_vm0, %v6152_v55, %v6179_v48  ;;  %v11163_v48 = vld [vmem:[#allocation21_spill] sm:$0xff] }
 0x51f   : > { %6508 = vmatmul.bf16.gmra.mxu2 %v6198_v31  ;;  %6410 = vmatmul.bf16.gmra.mxu0 %v6180_v14  ;;  %v5693_v9 = vpop.f32.mrf.mxu3 }
 0x520   : > { %v5620_v51 = vpop.f32.mrf.mxu1 }
 0x521   : > { %v5621_v18 = vadd.f32 %v5620_v51, %v5194_v61 }
 0x523   : > { %6449 = vmatmul.bf16.gmra.mxu1 %v6135_v11  ;;  %v10896_v22 = vadd.f32 %v10838_v25, %v5621_v18  ;;  %v6161_v25 = vor.u32 %v6160_v33, %v6157_v43  ;;  %v5681_v7 = vpop.f32.mrf.mxu2  ;;  %v5157_v18 = vadd.f32 %v11163_v48, %v11162_v23 }
 0x525   : > { %v6162_v55 = vsel %vm1063_vm0, %v6134_v19, %v6161_v25  ;;  %v11160_v19 = vld [vmem:[#allocation24_spill] sm:$0xff] }
 0x526   : > { %v5155_v45 = vadd.f32 %v11161_v4, %v11160_v19 }
 0x527   : > { %v5695_v61 = vpop.f32.mrf.mxu3 }
 0x528   : > { %v5622_v1 = vpop.f32.mrf.mxu1 }
 0x529   : > { %v5623_v49 = vadd.f32 %v5622_v1, %v5196_v41  ;;  %v11164_v41 = vld [vmem:[#allocation22_spill] sm:$0xff] }
 0x52a   : > { %v5645_v1 = vadd.f32 %v11164_v41, %v10728_v50 }
 0x52b   : > { %v10903_v15 = vadd.f32 %v10851_v38, %v5623_v49  ;;  %v6185_v38 = vshll.u32 %v5889_v30, 16 }
 0x52c   : > { %v6376_v54 = vpop.f32.mrf.mxu0 }
 0x52d   : > { %v6187_v58 = vrot.slane %v6185_v38, 4 }
 0x52f   : > { %v6188_v62 = vor.u32 %v6187_v58, %v6184_v44  ;;  %v5698_v60 = vpop.f32.mrf.mxu3 }
 0x530   : > { %v5625_v32 = vpop.f32.mrf.mxu1  ;;  %v6474_v16 = vpop.f32.mrf.mxu2 }
 0x531   : > { %v5626_v6 = vadd.f32 %v5625_v32, %v5199_v3  ;;  %v6189_v30 = vsel %vm1063_vm0, %v6161_v25, %v6188_v62 }
 0x533   : > { %6454 = vmatmul.bf16.gmra.mxu1 %v6162_v55  ;;  %v10910_v37 = vadd.f32 %v10872_v53, %v5626_v6  ;;  %v5204_v53 = vadd.f32 %v5203_v21, %v5155_v45  ;;  %v11165_v55 = vld [vmem:[#allocation23_spill] sm:$0xff]  ;;  %v10929_v6 = vld [vmem:[%s8148_s26] ss:$0 sm:$0xff] }
 0x534   : > { %v6378_v26 = vpop.f32.mrf.mxu0 }
 0x537   : > { %v5700_v49 = vpop.f32.mrf.mxu3 }
 0x538   : > { %v5627_v34 = vpop.f32.mrf.mxu1  ;;  %v6476_v51 = vpop.f32.mrf.mxu2 }
 0x539   : > { %v5628_v0 = vadd.f32 %v5627_v34, %v5201_v56  ;;  %v11166_v56 = vld [vmem:[#allocation14_spill] sm:$0xff] }
 0x53b   : > { %v10915_v63 = vadd.f32 %v5676_v8, %v5628_v0  ;;  %v5206_v8 = vadd.f32 %v5205_v59, %v5157_v18  ;;  %v5647_v59 = vadd.f32 %v11165_v55, %v10740_v29  ;;  %v5655_v18 = vadd.f32 %v10724_v42, %v10789_v46 }
 0x53c   : > { %v6381_v31 = vpop.f32.mrf.mxu0 }
 0x53d   : > { %v5696_v27 = vadd.f32 %v5695_v61, %v5647_v59 }
 0x53f   : > { %v5703_v24 = vpop.f32.mrf.mxu3 }
 0x540   : > { %v5630_v11 = vpop.f32.mrf.mxu1  ;;  %v6479_v36 = vpop.f32.mrf.mxu2 }
 0x541   : > { %v5631_v17 = vadd.f32 %v5630_v11, %v5204_v53 }
 0x543   : > { %6459 = vmatmul.bf16.gmra.mxu1 %v6189_v30  ;;  %v10920_v5 = vadd.f32 %v5679_v47, %v5631_v17  ;;  %v5694_v47 = vadd.f32 %v5693_v9, %v5645_v1 }
 0x544   : > { %v6383_v33 = vpop.f32.mrf.mxu0 }
 0x547   : > { %v5705_v4 = vpop.f32.mrf.mxu3 }
 0x548   : > { %v5632_v28 = vpop.f32.mrf.mxu1  ;;  %v6481_v25 = vpop.f32.mrf.mxu2  ;;  %v5706_v42 = vadd.f32 %v5705_v4, %v10816_v40 }
 0x549   : > { %v5633_v14 = vadd.f32 %v5632_v28, %v5206_v8  ;;  %v5704_v28 = vadd.f32 %v5703_v24, %v5655_v18 }
 0x54b   : > { %v10922_v21 = vadd.f32 %v5681_v7, %v5633_v14 }
 0x54c   : > { %v6386_v50 = vpop.f32.mrf.mxu0 }
 0x54f   : > { %v5708_v17 = vpop.f32.mrf.mxu3 }
 0x550   : > { %v6425_v43 = vpop.f32.mrf.mxu1 }
 0x551   : > { %v6426_v57 = vadd.f32 %v6425_v43, %v6376_v54  ;;  %v6484_v54 = vpop.f32.mrf.mxu2 }
 0x553   : > { %v6475_v3 = vadd.f32 %v6474_v16, %v6426_v57  ;;  %v5650_v16 = vadd.f32 %v11166_v56, %v10755_v39 }
 0x554   : > { %v6388_v19 = vpop.f32.mrf.mxu0 }
 0x555   : > { %v6514_v32 = vadd.f32 %v6475_v3, %v5694_v47  ;;  %v5699_v58 = vadd.f32 %v5698_v60, %v5650_v16 }
 0x557   : > { %v6530_v7 = vadd.f32 %v10929_v6, %v6514_v32  ;;  %v5710_v41 = vpop.f32.mrf.mxu3 }
 0x558   : > { %v6427_v52 = vpop.f32.mrf.mxu1 }
 0x559   : > { %6546 = vst [vmem:[%s9813_s17 + $0x120] sm:$0xff] %v6530_v7  ;;  %v6428_v20 = vadd.f32 %v6427_v52, %v6378_v26  ;;  %v6486_v62 = vpop.f32.mrf.mxu2  ;;  %v11167_v26 = vld [vmem:[#allocation10_spill] sm:$0xff]  ;;  %v5709_v7 = vadd.f32 %v5708_v17, %v10842_v10 }
 0x55a   : > { %v5652_v61 = vadd.f32 %v11167_v26, %v10772_v2 }
 0x55b   : > { %v6477_v38 = vadd.f32 %v6476_v51, %v6428_v20 }
 0x55c   : > { %v5701_v11 = vadd.f32 %v5700_v49, %v5652_v61  ;;  %v6391_v48 = vpop.f32.mrf.mxu0 }
 0x55d   : > { %v6515_v9 = vadd.f32 %v6477_v38, %v5696_v27  ;;  %v5711_v38 = vadd.f32 %v5710_v41, %v10857_v35 }
 0x55f   : > { %v6531_v34 = vadd.f32 %v10929_v6, %v6515_v9  ;;  %v5713_v32 = vpop.f32.mrf.mxu3 }
 0x560   : > { %v6430_v29 = vpop.f32.mrf.mxu1 }
 0x561   : > { %6547 = vst [vmem:[%s9813_s17 + $0x128] sm:$0xff] %v6531_v34  ;;  %v6431_v44 = vadd.f32 %v6430_v29, %v6381_v31 }
 0x562   : > { %v6489_v8 = vpop.f32.mrf.mxu2 }
 0x563   : > { %v6480_v0 = vadd.f32 %v6479_v36, %v6431_v44 }
 0x565   : > { %v6516_v45 = vadd.f32 %v6480_v0, %v5699_v58  ;;  %v5714_v58 = vadd.f32 %v5713_v32, %v10875_v12 }
 0x567   : > { %v6532_v53 = vadd.f32 %v10929_v6, %v6516_v45 }
 0x568   : > { %v6432_v51 = vpop.f32.mrf.mxu1 }
 0x569   : > { %6548 = vst [vmem:[%s9813_s17 + $0x130] sm:$0xff] %v6532_v53  ;;  %v6433_v39 = vadd.f32 %v6432_v51, %v6383_v33  ;;  %v6393_v33 = vpop.f32.mrf.mxu0 }
 0x56a   : > { %v6491_v57 = vpop.f32.mrf.mxu2 }
 0x56b   : > { %v6482_v30 = vadd.f32 %v6481_v25, %v6433_v39 }
 0x56d   : > { %v6517_v23 = vadd.f32 %v6482_v30, %v5701_v11 }
 0x56f   : > { %v6533_v31 = vadd.f32 %v10929_v6, %v6517_v23 }
 0x570   : > { %v6435_v60 = vpop.f32.mrf.mxu1 }
 0x571   : > { %6549 = vst [vmem:[%s9813_s17 + $0x138] sm:$0xff] %v6533_v31  ;;  %v6436_v2 = vadd.f32 %v6435_v60, %v6386_v50  ;;  %v6396_v59 = vpop.f32.mrf.mxu0 }
 0x572   : > { %v6494_v20 = vpop.f32.mrf.mxu2 }
 0x573   : > { %v6485_v36 = vadd.f32 %v6484_v54, %v6436_v2  ;;  %v5715_v54 = vpop.f32.mrf.mxu3 }
 0x574   : > { %v5716_v53 = vadd.f32 %v5715_v54, %v10885_v13 }
 0x575   : > { %v6518_v14 = vadd.f32 %v6485_v36, %v5704_v28 }
 0x577   : > { %v6534_v1 = vadd.f32 %v10929_v6, %v6518_v14 }
 0x578   : > { %v6437_v43 = vpop.f32.mrf.mxu1 }
 0x579   : > { %6550 = vst [vmem:[%s9813_s17 + $0x140] sm:$0xff] %v6534_v1  ;;  %v6438_v49 = vadd.f32 %v6437_v43, %v6388_v19  ;;  %v6398_v56 = vpop.f32.mrf.mxu0 }
 0x57a   : > { %v6496_v34 = vpop.f32.mrf.mxu2 }
 0x57b   : > { %v6487_v46 = vadd.f32 %v6486_v62, %v6438_v49  ;;  %v5718_v19 = vpop.f32.mrf.mxu3 }
 0x57c   : > { %v5719_v18 = vadd.f32 %v5718_v19, %v10896_v22 }
 0x57d   : > { %v6519_v25 = vadd.f32 %v6487_v46, %v5706_v42 }
 0x57f   : > { %v6535_v47 = vadd.f32 %v10929_v6, %v6519_v25 }
 0x580   : > { %v6440_v3 = vpop.f32.mrf.mxu1 }
 0x581   : > { %6551 = vst [vmem:[%s9813_s17 + $0x148] sm:$0xff] %v6535_v47  ;;  %v6441_v55 = vadd.f32 %v6440_v3, %v6391_v48  ;;  %v6401_v45 = vpop.f32.mrf.mxu0 }
 0x582   : > { %v6499_v26 = vpop.f32.mrf.mxu2 }
 0x583   : > { %v6490_v52 = vadd.f32 %v6489_v8, %v6441_v55  ;;  %v5720_v11 = vpop.f32.mrf.mxu3 }
 0x584   : > { %v5721_v14 = vadd.f32 %v5720_v11, %v10903_v15 }
 0x585   : > { %v6520_v50 = vadd.f32 %v6490_v52, %v5709_v7 }
 0x587   : > { %v6536_v24 = vadd.f32 %v10929_v6, %v6520_v50 }
 0x588   : > { %v6442_v27 = vpop.f32.mrf.mxu1 }
 0x589   : > { %6552 = vst [vmem:[%s9813_s17 + $0x150] sm:$0xff] %v6536_v24  ;;  %v6443_v40 = vadd.f32 %v6442_v27, %v6393_v33  ;;  %v6403_v12 = vpop.f32.mrf.mxu0 }
 0x58a   : > { %v6501_v48 = vpop.f32.mrf.mxu2 }
 0x58b   : > { %v6492_v9 = vadd.f32 %v6491_v57, %v6443_v40  ;;  %v5723_v13 = vpop.f32.mrf.mxu3 }
 0x58c   : > { %v5724_v57 = vadd.f32 %v5723_v13, %v10910_v37 }
 0x58d   : > { %v6521_v16 = vadd.f32 %v6492_v9, %v5711_v38 }
 0x58f   : > { %v6537_v29 = vadd.f32 %v10929_v6, %v6521_v16 }
 0x590   : > { %v6445_v10 = vpop.f32.mrf.mxu1 }
 0x591   : > { %6553 = vst [vmem:[%s9813_s17 + $0x158] sm:$0xff] %v6537_v29  ;;  %v6446_v44 = vadd.f32 %v6445_v10, %v6396_v59  ;;  %v6406_v36 = vpop.f32.mrf.mxu0 }
 0x592   : > { %v6504_v1 = vpop.f32.mrf.mxu2 }
 0x593   : > { %v6495_v0 = vadd.f32 %v6494_v20, %v6446_v44  ;;  %v5725_v42 = vpop.f32.mrf.mxu3 }
 0x594   : > { %v5726_v59 = vadd.f32 %v5725_v42, %v10915_v63 }
 0x595   : > { %v6522_v4 = vadd.f32 %v6495_v0, %v5714_v58 }
 0x597   : > { %v6538_v35 = vadd.f32 %v10929_v6, %v6522_v4 }
 0x598   : > { %v6447_v62 = vpop.f32.mrf.mxu1 }
 0x599   : > { %6554 = vst [vmem:[%s9813_s17 + $0x160] sm:$0xff] %v6538_v35  ;;  %v6448_v61 = vadd.f32 %v6447_v62, %v6398_v56  ;;  %v6408_v25 = vpop.f32.mrf.mxu0 }
 0x59a   : > { %v6506_v3 = vpop.f32.mrf.mxu2 }
 0x59b   : > { %v6497_v51 = vadd.f32 %v6496_v34, %v6448_v61  ;;  %v5728_v52 = vpop.f32.mrf.mxu3 }
 0x59c   : > { %v5729_v38 = vadd.f32 %v5728_v52, %v10920_v5 }
 0x59d   : > { %v6523_v39 = vadd.f32 %v6497_v51, %v5716_v53 }
 0x59f   : > { %v6539_v30 = vadd.f32 %v10929_v6, %v6523_v39 }
 0x5a0   : > { %v6450_v17 = vpop.f32.mrf.mxu1 }
 0x5a1   : > { %6555 = vst [vmem:[%s9813_s17 + $0x168] sm:$0xff] %v6539_v30  ;;  %v6451_v23 = vadd.f32 %v6450_v17, %v6401_v45  ;;  %v6411_v50 = vpop.f32.mrf.mxu0 }
 0x5a2   : > { %v6509_v24 = vpop.f32.mrf.mxu2 }
 0x5a3   : > { %v6500_v31 = vadd.f32 %v6499_v26, %v6451_v23  ;;  %v5730_v56 = vpop.f32.mrf.mxu3 }
 0x5a4   : > { %v5731_v44 = vadd.f32 %v5730_v56, %v10922_v21 }
 0x5a5   : > { %v6524_v60 = vadd.f32 %v6500_v31, %v5719_v18 }
 0x5a7   : > { %v6540_v8 = vadd.f32 %v10929_v6, %v6524_v60 }
 0x5a8   : > { %v6452_v2 = vpop.f32.mrf.mxu1 }
 0x5a9   : > { %6556 = vst [vmem:[%s9813_s17 + $0x170] sm:$0xff] %v6540_v8  ;;  %v6453_v28 = vadd.f32 %v6452_v2, %v6403_v12  ;;  %v6413_v63 = vpop.f32.mrf.mxu0 }
 0x5aa   : > { %v6511_v10 = vpop.f32.mrf.mxu2 }
 0x5ab   : > { %v6502_v41 = vadd.f32 %v6501_v48, %v6453_v28 }
 0x5ad   : > { %v6525_v43 = vadd.f32 %v6502_v41, %v5721_v14 }
 0x5af   : > { %v6541_v33 = vadd.f32 %v10929_v6, %v6525_v43 }
 0x5b0   : > { %v6455_v49 = vpop.f32.mrf.mxu1 }
 0x5b1   : > { %6557 = vst [vmem:[%s9813_s17 + $0x178] sm:$0xff] %v6541_v33  ;;  %v6456_v22 = vadd.f32 %v6455_v49, %v6406_v36 }
 0x5b3   : > { %v6505_v46 = vadd.f32 %v6504_v1, %v6456_v22 }
 0x5b5   : > { %v6526_v47 = vadd.f32 %v6505_v46, %v5724_v57 }
 0x5b7   : > { %v6542_v32 = vadd.f32 %v10929_v6, %v6526_v47 }
 0x5b8   : > { %v6457_v15 = vpop.f32.mrf.mxu1 }
 0x5b9   : > { %6558 = vst [vmem:[%s9813_s17 + $0x180] sm:$0xff] %v6542_v32  ;;  %v6458_v55 = vadd.f32 %v6457_v15, %v6408_v25 }
 0x5bb   : > { %v6507_v7 = vadd.f32 %v6506_v3, %v6458_v55 }
 0x5bd   : > { %v6527_v20 = vadd.f32 %v6507_v7, %v5726_v59 }
 0x5bf   : > { %v6543_v37 = vadd.f32 %v10929_v6, %v6527_v20 }
 0x5c0   : > { %v6460_v27 = vpop.f32.mrf.mxu1 }
 0x5c1   : > { %6559 = vst [vmem:[%s9813_s17 + $0x188] sm:$0xff] %v6543_v37  ;;  %v6461_v40 = vadd.f32 %v6460_v27, %v6411_v50 }
 0x5c3   : > { %v6510_v54 = vadd.f32 %v6509_v24, %v6461_v40 }
 0x5c5   : > { %v6528_v9 = vadd.f32 %v6510_v54, %v5729_v38 }
 0x5c7   : > { %v6544_v16 = vadd.f32 %v10929_v6, %v6528_v9 }
 0x5c8   : > { %v6462_v34 = vpop.f32.mrf.mxu1 }
 0x5c9   : > { %6560 = vst [vmem:[%s9813_s17 + $0x190] sm:$0xff] %v6544_v16  ;;  %v6463_v29 = vadd.f32 %v6462_v34, %v6413_v63 }
 0x5cb   : > { %v6512_v58 = vadd.f32 %v6511_v10, %v6463_v29 }
 0x5cd   : > { %v6529_v0 = vadd.f32 %v6512_v58, %v5731_v44 }
 0x5cf   : > { %v6545_v19 = vadd.f32 %v10929_v6, %v6529_v0 }
 0x5d1   : > { %6561 = vst [vmem:[%s9813_s17 + $0x198] sm:$0xff] %v6545_v19 }
 0x5d2 LB: >> { %s6669_s21 = smul.u32 24, %s8029_s22  ;;  %v8037_v5 = vmov 0.0   ;;  %s6567_s22 = sadd.s32 1, %s8029_s22   ;;  %s8029_s22 = sphi %s8027_s22, %s6567_s22  }
 0x5d3   : >> { %p6564_p5 = scmp.ge.s32.totalorder %s6567_s22, 16  }
 0x5d4   : >> { %s6670_s26 = scalar_lea.vmem %s9813_s17, %s6669_s21 [#allocation2]  ;;  %p7632_p6 = scmp.ne.s32.totalorder (%p6564_p5), %s8005_s15, 2 }
 0x5d5   : >> { %7631 = vst [vmem:[%s6670_s26 + $0x30] sm:$0xff] %v8037_v5  ;;  %6566 = sbr.rel (!%p6564_p5) target bundleno = 1490 (0x5d2), region = 128 }
 0x5da   : > { %6575 = sbr.rel (%p7632_p6) target bundleno = 1513 (0x5e9), region = 54  ;;  %s8031_s27 = smov (!%p7632_p6), 0  }
 0x5df LB: >> { %s7633_s4 = sshll.u32 %s8033_s27, 4  ;;  %s6672_s6 = smul.u32 24, %s8033_s27  ;;  %s8033_s27 = sphi %s8031_s27, %s6581_s27  }
 0x5e0   : >> { %s6588_s18 = scalar_lea.vmem %s8143_s10, %s7633_s4  ;;  %s6593_s29 = scalar_lea.vmem %s201_s8, %s7633_s4 [#allocation3] }
 0x5e1   : >> { %s6673_s23 = scalar_lea.vmem %s9813_s17, %s6672_s6 [#allocation2]  ;;  %v6589_v21 = vld [vmem:[%s6588_s18] sm:$0xff]  ;;  %v6590_v6 = vld [vmem:[%s6588_s18 + $0x8] sm:$0xff]  ;;  %s6581_s27 = sadd.s32 1, %s8033_s27  }
 0x5e2   : >> { %v7634_v4 = vld [vmem:[%s6673_s23 + $0x20] sm:$0xff]  ;;  %v7635_v45 = vld [vmem:[%s6673_s23 + $0x28] sm:$0xff]  ;;  %p6578_p7 = scmp.ge.s32.totalorder %s6581_s27, 16  }
 0x5e3   : >> { %v6591_v35 = vadd.f32 %v7634_v4, %v6589_v21  ;;  %v6592_v62 = vadd.f32 %v7635_v45, %v6590_v6 }
 0x5e4   : > { %6580 = sbr.rel (!%p6578_p7) target bundleno = 1503 (0x5df), region = 139 }
 0x5e5   : >> { %6594 = vst [vmem:[%s6593_s29] sm:$0xff] %v6591_v35 }
 0x5e6   : >> { %6595 = vst [vmem:[%s6593_s29 + $0x8] sm:$0xff] %v6592_v62 }
 0x5e9 PF: > { %s7786_s15 = sshll.u32 %s8009_s16, 8  ;;  %s6609_s11 = sshll.u32 %s201_s8, 4  ;;  %s6610_s11 = int_to_ptr.vmem [resolvable:$true] %s6609_s11 }
 0x5ea   : > { %s6608_s9 = scalar_lea.hbm %s11035_s3, %s7786_s15  ;;  %s11168_s22 = sand.u32 1, %s7997_s13  }
 0x5eb   : > { %s6611_s20 = sshll.u32 %s6608_s9, 4  ;;  %s6597_s21 = scalar_lea.sflag [#allocation4], %s11168_s22  ;;  %s6612_s20 = int_to_ptr.hbm [resolvable:$true] %s6611_s20 }
 0x5ec   : > { %s7929_s26 = sshra.s32 %s6612_s20, 4  ;;  %s7935_s17 = scalar_lea.hbm %s11035_s3, 512  ;;  %s7930_s26 = int_to_ptr.hbm [resolvable:$true] %s7929_s26 }
 0x5ed   : > { %s7931_s27 = scalar_lea.hbm %s7930_s26, 256  ;;  %p7936_p12 = scmp.lt.s32.totalorder %s7930_s26, %s11035_s3 }
 0x5ee   : > { %p7932_p8 = scmp.ne.s32.totalorder %s7930_s26, %s7931_s27  ;;  %p7937_p13 = scmp.lt.s32.totalorder %s7935_s17, %s7931_s27 }
 0x5f0   : > { %p7933_p10 = pnand %p7932_p8, %p8109_p3  ;;  %p7938_p0 = por %p7937_p13, %p7936_p12 }
 0x5f2   : > { %p7934_p11 = pneg %p7933_p10 }
 0x5f4   : > { %p7939_p1 = pnand %p7938_p0, %p7934_p11 }
 0x5f6   : > { %7942 = shalt.err (!%p7939_p1)
}
 0x5f7   : > { %s8038_s30 = smov 128   ;;  %s8039_s8 = smov 8  }
 0x5f8   : > { %7812 = dma.vmem_to_hbm [thread:$0]  (%p8109_p3), %s6610_s11, 4096, %s6612_s20, %s6597_s21, %s8038_s30, %s8038_s30, %s8039_s8  }
 0x5f9 PF: > { %p7818_p2 = scmp.ge.s32.totalorder %s8021_s19, 2  ;;  %s6626_s18 = sand.u32 1, %s7993_s12  }
 0x5fa   : > { %s6627_s23 = scalar_lea.sflag [#allocation4], %s6626_s18 }
 0x5fb   : > { %p7815_p4 = pnand %p7818_p2, %p8119_p9 }
 0x5fd   : > { %p7816_p5 = pneg %p7815_p4 }
 0x5ff   : > { %7988 = dma.done.wait (%p7816_p5), %s6627_s23, 4096  }
 0x600   : > { %7990 = vsyncadd (%p7816_p5), %s6627_s23, 4294963200  ;;  %s16_s19 = sadd.s32 1, %s8021_s19   ;;  %s11169_s15 = sld [smem:[#allocation6_spill]] }
 0x601   : > { %p13_p6 = scmp.ge.s32.totalorder %s16_s19, 8   ;;  %s11170_s16 = sld [smem:[#allocation7_spill]] }
 0x602   : > { %s11171_s17 = sld [smem:[#allocation8_spill]]  ;;  %s11173_s12 = smov %s7997_s13 }
 0x603   : > { %s11172_s18 = sld [smem:[#allocation9_spill]]  ;;  %s11174_s13 = smov %s8001_s14 }
 0x604   : > { %s11175_s14 = smov %s8127_s28  ;;  %15 = sbr.rel (!%p13_p6) target bundleno = 5 (0x5), region = 150 }
 0x609   :  { %6633 = vsyncpa [#allocation4], 1 }
 0x60a   :  { %6635 = vsyncpa [#allocation4 + $0x1], 1 }

</bundles_post_ra>
